<compile_context>
chip_gen: v7x
topology: tpu7x:2x2x1
jax: 0.10.0
libtpu: 0.0.40
codegen_flags: <defaults>
</compile_context>

<pallas_src>
import numpy as np
import jax
import jax.numpy as jnp
from jax import lax
from jax.experimental import pallas as pl
from jax.experimental.pallas import tpu as pltpu

DIM = 32                 # GIN hidden dim
NUM_GIN_LAYERS = 5
NUM_FEATURES_XD = 78     # input node features
MAX_NODES = 45           # to_dense_batch max_num_nodes
PROT_LEN = 8             # synthetic protein sequence length
PROT_EMB = 1280          # BERT embedding dim
GN_EPS = 1e-5            # GraphNorm eps


# ---------------------------------------------------------------------------
# Kernel 1: fused graph branch
#   5x [ relu(GINConv) + GraphNorm ]  ->  to_dense_batch  ->  fc_1 + ReLU
# ---------------------------------------------------------------------------
def _graph_branch_kernel(x_ref, adj_ref, s_ref, st_ref, icnt_ref, scat_ref,
                         w1_0_ref, w1_r_ref, b1_ref, w2_ref, b2_ref,
                         gnw_ref, gnb_ref, gnm_ref,
                         fc1_w_ref, fc1_b_ref, o_ref):
    h = x_ref[...]                                  # (N, 78) node features, f32
    # one-hot / adjacency matrices live bf16 in HBM (exact 0/1); upcast once.
    adj = adj_ref[...].astype(jnp.float32)          # (N, N)  == I + A (eps = 0)
    s = s_ref[...].astype(jnp.float32)              # (B, N)  one-hot graph assignment
    st = st_ref[...].astype(jnp.float32)            # (N, B)
    icnt = icnt_ref[...]                            # (B, 1)  1 / nodes_per_graph

    # Unrolled layer loop; intermediates stay in vregs/VMEM (no HBM bounce).
    for l in range(NUM_GIN_LAYERS):
        # GINConv aggregation: (I + A) @ h == (1+eps)*h + sum_j h_j
        agg = jnp.dot(adj, h, preferred_element_type=jnp.float32)
        w1 = w1_0_ref[...] if l == 0 else w1_r_ref[l - 1]
        z = jnp.dot(agg, w1, preferred_element_type=jnp.float32) + b1_ref[l]
        z = jnp.maximum(z, 0.0)                                   # MLP inner ReLU
        z = jnp.dot(z, w2_ref[l], preferred_element_type=jnp.float32) + b2_ref[l]
        z = jnp.maximum(z, 0.0)                                   # outer F.relu(conv(x))

        # GraphNorm, fused moments: one segment matmul gives E[z] and E[z^2].
        zc = jnp.concatenate([z, z * z], axis=-1)                           # (N, 64)
        mom_g = jnp.dot(s, zc, preferred_element_type=jnp.float32) * icnt   # (B, 64)
        mom_n = jnp.dot(st, mom_g, preferred_element_type=jnp.float32)      # (N, 64)
        mean_n = mom_n[:, :DIM]                                             # E[z]
        m2_n = mom_n[:, DIM:]                                               # E[z^2]
        c = gnm_ref[l]                                                      # mean_scale
        sub = z - c * mean_n
        var_n = m2_n - c * (2.0 - c) * (mean_n * mean_n)                    # E[(z-c*mean)^2]
        var_n = jnp.maximum(var_n, 0.0)                                     # guard cancellation
        h = gnw_ref[l] * sub * lax.rsqrt(var_n + GN_EPS) + gnb_ref[l]

    # to_dense_batch as a one-hot scatter matmul, fused with fc_1 + ReLU.
    scat = scat_ref[...].astype(jnp.float32)
    xd = jnp.dot(scat, h, preferred_element_type=jnp.float32)               # (B*45, 32)
    y = jnp.dot(xd, fc1_w_ref[...], preferred_element_type=jnp.float32) + fc1_b_ref[...]
    o_ref[...] = jnp.maximum(y, 0.0)                                        # (B*45, 128)


def graph_branch(x, adj_pi, s, st, inv_cnt, scatter, p):
    # TODO(synk): for large graphs, tile N with an "arbitrary" K-reduction grid
    # axis for the adjacency matmul and row-tile the scatter matmul; the dense
    # (N,N) adjacency exhausts v7x's 64 MiB VMEM near N~1.5-2k (128 MiB on
    # v5e/v6e). Also add a "parallel" grid axis so v7x's second TensorCore is
    # used; at the current toy sizes this kernel is launch-bound either way.
    n_rows = scatter.shape[0]
    fc1_w, fc1_b = p['fc_1']
    return pl.pallas_call(
        _graph_branch_kernel,
        out_shape=jax.ShapeDtypeStruct((n_rows, 128), jnp.float32),
        compiler_params=pltpu.CompilerParams(vmem_limit_bytes=32 * 1024 * 1024),
    )(x, adj_pi, s, st, inv_cnt, scatter,
      p['gin_w1_0'], p['gin_w1_r'], p['gin_b1'], p['gin_w2'], p['gin_b2'],
      p['gin_gnw'], p['gin_gnb'], p['gin_gnm'],
      fc1_w, fc1_b.reshape(1, -1))


# ---------------------------------------------------------------------------
# Kernel 2: protein branch + parallel co-attention + head MLP
#   (TB batch elements per grid step; gather via manual DMA on prefetched ids)
# ---------------------------------------------------------------------------
def _prot_coattn_head_kernel(tid_ref, x_ref, prot_hbm,
                             bw1_ref, bb1_ref, bw2_ref, bb2_ref,
                             wb_ref, wcT_ref, wpT_ref, whc_ref, whp_ref,
                             c1wc_ref, c1wp_ref, c1b_ref, c2w_ref, c2b_ref,
                             owT_ref, ob_ref,
                             out_ref, ac_ref, ap_ref,
                             prot_buf, sem):
    i = pl.program_id(0)
    tb, seq, emb = prot_buf.shape
    _, nmax, dmodel = x_ref.shape

    # --- Gather TB protein rows HBM -> VMEM (bf16), driven by target_id ------
    copies = []
    for j in range(tb):                              # static unrolled loop
        idx = tid_ref[i * tb + j]
        cp = pltpu.make_async_copy(prot_hbm.at[idx], prot_buf.at[j], sem.at[j])
        cp.start()
        copies.append(cp)
    for cp in copies:
        cp.wait()

    # --- Protein branch: bert_fc_1 + ReLU -> bert_fc_2 + ReLU (stacked rows) -
    t2d = prot_buf[...].reshape(tb * seq, emb)                        # bf16
    th = jnp.dot(t2d, bw1_ref[...], preferred_element_type=jnp.float32) + bb1_ref[...]
    th = jnp.maximum(th, 0.0)                                         # (tb*L, 512)
    tg2 = jnp.dot(th.astype(jnp.bfloat16), bw2_ref[...],
                  preferred_element_type=jnp.float32) + bb2_ref[...]
    tg2 = jnp.maximum(tg2, 0.0)                                       # (tb*L, 128)
    tg3 = tg2.reshape(tb, seq, dmodel)                                # target

    # --- Parallel co-attention (feature-last forms; x(torch) == xd^T) --------
    xd = x_ref[...]                                                   # (tb, Nmax, 128)
    xd2 = xd.reshape(tb * nmax, dmodel)

    # C = tanh(target @ W_b @ x);  stack target@W_b as one matmul
    tWb = jnp.dot(tg2, wb_ref[...], preferred_element_type=jnp.float32)
    tWb3 = tWb.reshape(tb, seq, dmodel)
    C = jnp.tanh(jnp.einsum('bld,bnd->bln', tWb3, xd,
                            preferred_element_type=jnp.float32))      # (tb, L, Nmax)
    Cn = jnp.tanh(jnp.einsum('bnd,bld->bnl', xd, tWb3,
                             preferred_element_type=jnp.float32))     # C^T, (tb, Nmax, L)

    # (W_c @ x)^T and (W_p @ t^T)^T as stacked row-major matmuls
    wcx = jnp.dot(xd2, wcT_ref[...],
                  preferred_element_type=jnp.float32).reshape(tb, nmax, 64)
    wpt = jnp.dot(tg2, wpT_ref[...],
                  preferred_element_type=jnp.float32).reshape(tb, seq, 64)

    # H_c^T = tanh((W_c x)^T + C^T (W_p t^T)^T);  H_p^T = tanh((W_p t^T)^T + C (W_c x)^T)
    hcT = jnp.tanh(wcx + jnp.einsum('bnl,blk->bnk', Cn, wpt,
                                    preferred_element_type=jnp.float32))   # (tb, Nmax, 64)
    hpT = jnp.tanh(wpt + jnp.einsum('bln,bnk->blk', C, wcx,
                                    preferred_element_type=jnp.float32))   # (tb, L, 64)

    # attention scores: w_h^T @ H  ==  lane-reduce of H^T * w_h
    whc = whc_ref[...].reshape(1, 1, 64)
    whp = whp_ref[...].reshape(1, 1, 64)
    sc = jnp.sum(hcT * whc, axis=-1)                                  # (tb, Nmax)
    sp = jnp.sum(hpT * whp, axis=-1)                                  # (tb, L)

    # exact softmax over the node / residue axis (lane axis)
    ec = jnp.exp(sc - jnp.max(sc, axis=-1, keepdims=True))
    a_c = ec / jnp.sum(ec, axis=-1, keepdims=True)
    ep = jnp.exp(sp - jnp.max(sp, axis=-1, keepdims=True))
    a_p = ep / jnp.sum(ep, axis=-1, keepdims=True)

    compound = jnp.einsum('bqn,bnd->bqd', a_c.reshape(tb, 1, nmax), xd,
                          preferred_element_type=jnp.float32).reshape(tb, dmodel)
    protein = jnp.einsum('bql,bld->bqd', a_p.reshape(tb, 1, seq), tg3,
                         preferred_element_type=jnp.float32).reshape(tb, dmodel)

    # --- Head MLP (stacked over the TB rows; concat as split-weight sum) -----
    hh = (jnp.dot(compound, c1wc_ref[...], preferred_element_type=jnp.float32)
          + jnp.dot(protein, c1wp_ref[...], preferred_element_type=jnp.float32)
          + c1b_ref[...])
    hh = jnp.maximum(hh, 0.0)                                         # (tb, 512)
    hh = jnp.dot(hh, c2w_ref[...], preferred_element_type=jnp.float32) + c2b_ref[...]
    hh = jnp.maximum(hh, 0.0)                                         # (tb, 128)

    out_ref[...] = jnp.sum(hh * owT_ref[...], axis=-1, keepdims=True) + ob_ref[...]
    ac_ref[...] = a_c.reshape(tb, 1, nmax)
    ap_ref[...] = a_p.reshape(tb, 1, seq)


def prot_coattn_head(x_dense, proteins, target_id, p, *, block_b=8):
    b, nmax, dmodel = x_dense.shape
    _, seq, emb = proteins.shape
    tb = max(1, min(block_b, b))
    b_pad = ((b + tb - 1) // tb) * tb
    if b_pad != b:
        x_dense = jnp.pad(x_dense, ((0, b_pad - b), (0, 0), (0, 0)))
        target_id = jnp.pad(target_id, (0, b_pad - b))

    c1w, c1b = p['cat_fc_1']
    c2w, c2b = p['cat_fc_2']
    ow, ob = p['out']
    w1, b1 = p['bert_fc_1']
    w2, b2 = p['bert_fc_2']

    const2 = lambda i, tid: (0, 0)
    # TODO(synk): weight operands could use pipeline_mode=pl.Buffered(1) to
    # save VMEM headroom on v7x; skipped (grid is tiny, default is fine).
    grid_spec = pltpu.PrefetchScalarGridSpec(
        num_scalar_prefetch=1, grid=(b_pad // tb,),
        in_specs=[
            pl.BlockSpec((tb, nmax, dmodel), lambda i, tid: (i, 0, 0)),  # x block
            pl.BlockSpec(memory_space=pl.ANY),                           # proteins (HBM)
            pl.BlockSpec((emb, 512), const2),                            # bert_fc_1 W (bf16)
            pl.BlockSpec((1, 512), const2),
            pl.BlockSpec((512, 128), const2),                            # bert_fc_2 W (bf16)
            pl.BlockSpec((1, 128), const2),
            pl.BlockSpec((128, 128), const2),                            # W_b
            pl.BlockSpec((128, 64), const2),                             # W_c^T
            pl.BlockSpec((128, 64), const2),                             # W_p^T
            pl.BlockSpec((1, 64), const2),                               # w_hc^T
            pl.BlockSpec((1, 64), const2),                               # w_hp^T
            pl.BlockSpec((128, 512), const2),                            # cat_fc_1 W (compound half)
            pl.BlockSpec((128, 512), const2),                            # cat_fc_1 W (protein half)
            pl.BlockSpec((1, 512), const2),
            pl.BlockSpec((512, 128), const2),                            # cat_fc_2 W
            pl.BlockSpec((1, 128), const2),
            pl.BlockSpec((1, 128), const2),                              # out W^T
            pl.BlockSpec((1, 1), const2),                                # out b
        ],
        out_specs=(
            pl.BlockSpec((tb, 1), lambda i, tid: (i, 0)),
            pl.BlockSpec((tb, 1, nmax), lambda i, tid: (i, 0, 0)),
            pl.BlockSpec((tb, 1, seq), lambda i, tid: (i, 0, 0)),
        ),
        scratch_shapes=[
            pltpu.VMEM((tb, seq, emb), jnp.bfloat16),   # gathered protein rows
            pltpu.SemaphoreType.DMA((tb,)),
        ],
    )
    out_shapes = (
        jax.ShapeDtypeStruct((b_pad, 1), jnp.float32),
        jax.ShapeDtypeStruct((b_pad, 1, nmax), jnp.float32),
        jax.ShapeDtypeStruct((b_pad, 1, seq), jnp.float32),
    )
    out, a_c, a_p = pl.pallas_call(
        _prot_coattn_head_kernel,
        out_shape=out_shapes,
        grid_spec=grid_spec,
        compiler_params=pltpu.CompilerParams(dimension_semantics=("parallel",)),
    )(target_id, x_dense, proteins,
      w1, b1.reshape(1, -1), w2, b2.reshape(1, -1),
      p['W_b'], p['W_c'].T, p['W_p'].T, p['w_hc'].T, p['w_hp'].T,
      c1w[:128], c1w[128:], c1b.reshape(1, -1),
      c2w, c2b.reshape(1, -1),
      ow.T, ob.reshape(1, 1))
    return out[:b], a_c[:b], a_p[:b]


# ---------------------------------------------------------------------------
# Parameter initialization (deterministic, synthetic)
# ---------------------------------------------------------------------------
def init_params(key):
    keys = iter(jax.random.split(key, 64))

    def lin(fin, fout):
        w = jax.random.normal(next(keys), (fin, fout), jnp.float32) / jnp.sqrt(float(fin))
        b = jax.random.normal(next(keys), (fout,), jnp.float32) * 0.01
        return w, b

    def xavier(shape):
        std = np.sqrt(2.0 / (shape[0] + shape[1]))
        return jax.random.normal(next(keys), shape, jnp.float32) * std

    params = {}
    # GIN stack, stacked along a leading layer axis for the fused kernel.
    w1s, b1s, w2s, b2s = [], [], [], []
    fin = NUM_FEATURES_XD
    for _ in range(NUM_GIN_LAYERS):
        w1, b1 = lin(fin, DIM)
        w2, b2 = lin(DIM, DIM)
        w1s.append(w1); b1s.append(b1); w2s.append(w2); b2s.append(b2)
        fin = DIM
    params['gin_w1_0'] = w1s[0]                                         # (78, 32)
    params['gin_w1_r'] = jnp.stack(w1s[1:])                             # (4, 32, 32)
    params['gin_b1'] = jnp.stack([b.reshape(1, -1) for b in b1s])       # (5, 1, 32)
    params['gin_w2'] = jnp.stack(w2s)                                   # (5, 32, 32)
    params['gin_b2'] = jnp.stack([b.reshape(1, -1) for b in b2s])       # (5, 1, 32)
    params['gin_gnw'] = jnp.ones((NUM_GIN_LAYERS, 1, DIM), jnp.float32)   # GraphNorm weight
    params['gin_gnb'] = jnp.zeros((NUM_GIN_LAYERS, 1, DIM), jnp.float32)  # GraphNorm bias
    params['gin_gnm'] = jnp.ones((NUM_GIN_LAYERS, 1, DIM), jnp.float32)   # mean_scale

    params['fc_1'] = lin(DIM, 128)
    # Large BERT projection weights stored bf16 (halves the only sizeable HBM
    # weight load); biases and all MXU accumulation stay f32.
    w, b = lin(PROT_EMB, 512)
    params['bert_fc_1'] = (w.astype(jnp.bfloat16), b)
    w, b = lin(512, 128)
    params['bert_fc_2'] = (w.astype(jnp.bfloat16), b)

    params['W_b'] = xavier((128, 128))
    params['W_c'] = xavier((64, 128))
    params['W_p'] = xavier((64, 128))
    params['w_hc'] = xavier((64, 1))
    params['w_hp'] = xavier((64, 1))
    params['cat_fc_1'] = lin(256, 512)
    params['cat_fc_2'] = lin(512, 128)
    params['out'] = lin(128, 1)
    # ln_after_GNN / layer_norm_1 / layer_norm_2 are declared but unused in the
    # reference forward(), so they are omitted here.
    return params


# ---------------------------------------------------------------------------
# Forward pass: 2 fused Pallas kernels + trivial JAX glue
# ---------------------------------------------------------------------------
def gin_bert_forward(params, x, adj_pi, s, st, inv_cnt, scatter, proteins, target_id):
    b = s.shape[0]

    # Graph branch: 5x(GINConv+ReLU+GraphNorm) + to_dense_batch + fc_1 + ReLU.
    x_flat = graph_branch(x, adj_pi, s, st, inv_cnt, scatter, params)   # (B*45, 128)
    x_dense = x_flat.reshape(b, MAX_NODES, 128)   # torch permutes to (B,128,45);
                                                  # the fused kernel consumes the
                                                  # un-permuted layout directly.

    # Protein branch + parallel co-attention + head MLP in one kernel,
    # TB batch elements per grid step.
    out, a_c, a_p = prot_coattn_head(x_dense, proteins, target_id, params)

    return out, [a_c], [a_p]


# ---------------------------------------------------------------------------
if __name__ == "__main__":
    key = jax.random.PRNGKey(0)
    kx, kp, kparam = jax.random.split(key, 3)

    # Synthetic batched graph: B=2 graphs with 6 and 7 nodes, chain-connected.
    nodes_per_graph = [6, 7]
    B = len(nodes_per_graph)
    N = sum(nodes_per_graph)
    batch_np = np.concatenate([np.full(n, i, np.int32) for i, n in enumerate(nodes_per_graph)])
    pos_np = np.concatenate([np.arange(n, dtype=np.int32) for n in nodes_per_graph])

    adj_np = np.zeros((N, N), np.float32)
    off = 0
    for n in nodes_per_graph:
        for i in range(n - 1):
            adj_np[off + i, off + i + 1] = 1.0
            adj_np[off + i + 1, off + i] = 1.0
        off += n
    adj_pi_np = adj_np + np.eye(N, dtype=np.float32)          # I + A  (GIN eps = 0)

    s_np = np.zeros((B, N), np.float32)                       # one-hot graph assignment
    s_np[batch_np, np.arange(N)] = 1.0
    inv_cnt_np = 1.0 / np.asarray(nodes_per_graph, np.float32).reshape(B, 1)

    # to_dense_batch scatter as a one-hot matrix: row b*45+pos <- node
    scatter_np = np.zeros((B * MAX_NODES, N), np.float32)
    scatter_np[batch_np * MAX_NODES + pos_np, np.arange(N)] = 1.0

    x = jax.random.normal(kx, (N, NUM_FEATURES_XD), jnp.float32)
    # synthetic "kiba_proteins.pt" table, stored bf16 in HBM: (num_proteins, L, 1280)
    proteins = (jax.random.normal(kp, (3, PROT_LEN, PROT_EMB), jnp.float32) * 0.1
                ).astype(jnp.bfloat16)
    target_id = jnp.array([0, 2], jnp.int32)

    params = init_params(kparam)

    # 0/1-valued matrices stored bf16 (exactly representable); f32 MXU accumulation.
    adj_pi = jnp.asarray(adj_pi_np, jnp.bfloat16)
    s_mat = jnp.asarray(s_np, jnp.bfloat16)
    st_mat = jnp.asarray(s_np.T, jnp.bfloat16)
    scatter = jnp.asarray(scatter_np, jnp.bfloat16)
    inv_cnt = jnp.asarray(inv_cnt_np, jnp.float32)

    fwd = jax.jit(gin_bert_forward)
    out, output_c, output_p = fwd(params, x, adj_pi, s_mat, st_mat,
                                  inv_cnt, scatter, proteins, target_id)

    jax.block_until_ready(out)
    jax.block_until_ready(output_c[0])
    jax.block_until_ready(output_p[0])

    assert out.shape == (B, 1)
    assert output_c[0].shape == (B, 1, MAX_NODES)
    assert output_p[0].shape == (B, 1, PROT_LEN)
    assert bool(jnp.all(jnp.isfinite(out)))
    print("KERNEL_OK")
</pallas_src>

<mosaic_0001>
module attributes {stable_mosaic.version = 11 : i64} {
  func.func @_graph_branch_kernel(%arg0: memref<13x78xf32, #tpu.memory_space<vmem>>, %arg1: memref<13x13xbf16, #tpu.memory_space<vmem>>, %arg2: memref<2x13xbf16, #tpu.memory_space<vmem>>, %arg3: memref<13x2xbf16, #tpu.memory_space<vmem>>, %arg4: memref<2x1xf32, #tpu.memory_space<vmem>>, %arg5: memref<90x13xbf16, #tpu.memory_space<vmem>>, %arg6: memref<78x32xf32, #tpu.memory_space<vmem>>, %arg7: memref<4x32x32xf32, #tpu.memory_space<vmem>>, %arg8: memref<5x1x32xf32, #tpu.memory_space<vmem>>, %arg9: memref<5x32x32xf32, #tpu.memory_space<vmem>>, %arg10: memref<5x1x32xf32, #tpu.memory_space<vmem>>, %arg11: memref<5x1x32xf32, #tpu.memory_space<vmem>>, %arg12: memref<5x1x32xf32, #tpu.memory_space<vmem>>, %arg13: memref<5x1x32xf32, #tpu.memory_space<vmem>>, %arg14: memref<32x128xf32, #tpu.memory_space<vmem>>, %arg15: memref<1x128xf32, #tpu.memory_space<vmem>>, %arg16: memref<90x128xf32, #tpu.memory_space<vmem>>) attributes {dimension_semantics = [], scalar_prefetch = 0 : i64, scratch_operands = 0 : i64, tpu.core_type = #tpu.core_type<tc>} {
    %c0 = arith.constant 0 : index
    %c0_0 = arith.constant 0 : index
    %0 = vector.load %arg0[%c0, %c0_0] : memref<13x78xf32, #tpu.memory_space<vmem>>, vector<13x78xf32>
    %c0_1 = arith.constant 0 : index
    %c0_2 = arith.constant 0 : index
    %1 = vector.load %arg1[%c0_1, %c0_2] : memref<13x13xbf16, #tpu.memory_space<vmem>>, vector<13x13xbf16>
    %2 = arith.extf %1 : vector<13x13xbf16> to vector<13x13xf32>
    %c0_3 = arith.constant 0 : index
    %c0_4 = arith.constant 0 : index
    %3 = vector.load %arg2[%c0_3, %c0_4] : memref<2x13xbf16, #tpu.memory_space<vmem>>, vector<2x13xbf16>
    %4 = arith.extf %3 : vector<2x13xbf16> to vector<2x13xf32>
    %c0_5 = arith.constant 0 : index
    %c0_6 = arith.constant 0 : index
    %5 = vector.load %arg3[%c0_5, %c0_6] : memref<13x2xbf16, #tpu.memory_space<vmem>>, vector<13x2xbf16>
    %6 = arith.extf %5 : vector<13x2xbf16> to vector<13x2xf32>
    %c0_7 = arith.constant 0 : index
    %c0_8 = arith.constant 0 : index
    %7 = vector.load %arg4[%c0_7, %c0_8] : memref<2x1xf32, #tpu.memory_space<vmem>>, vector<2x1xf32>
    %cst = arith.constant dense<0.000000e+00> : vector<13x78xf32>
    %8 = tpu.matmul %2, %0, %cst {dimension_numbers = #tpu.dot_dimension_numbers<[1], [0], [0], [1], [0, 0, 1, 1], [], []>} : vector<13x13xf32>, vector<13x78xf32>, vector<13x78xf32> -> vector<13x78xf32>
    %c0_9 = arith.constant 0 : index
    %c0_10 = arith.constant 0 : index
    %9 = vector.load %arg6[%c0_9, %c0_10] : memref<78x32xf32, #tpu.memory_space<vmem>>, vector<78x32xf32>
    %cst_11 = arith.constant dense<0.000000e+00> : vector<13x32xf32>
    %10 = tpu.matmul %8, %9, %cst_11 {dimension_numbers = #tpu.dot_dimension_numbers<[1], [0], [0], [1], [0, 0, 1, 1], [], []>} : vector<13x78xf32>, vector<78x32xf32>, vector<13x32xf32> -> vector<13x32xf32>
    %c0_12 = arith.constant 0 : index
    %c0_13 = arith.constant 0 : index
    %c0_14 = arith.constant 0 : index
    %11 = vector.load %arg8[%c0_12, %c0_13, %c0_14] : memref<5x1x32xf32, #tpu.memory_space<vmem>>, vector<1x1x32xf32>
    %12 = vector.shape_cast %11 : vector<1x1x32xf32> to vector<1x32xf32>
    %13 = vector.broadcast %12 : vector<1x32xf32> to vector<13x32xf32>
    %14 = arith.addf %10, %13 : vector<13x32xf32>
    %cst_15 = arith.constant 0.000000e+00 : f32
    %15 = vector.broadcast %cst_15 : f32 to vector<13x32xf32>
    %16 = arith.maximumf %14, %15 : vector<13x32xf32>
    %c0_16 = arith.constant 0 : index
    %c0_17 = arith.constant 0 : index
    %c0_18 = arith.constant 0 : index
    %17 = vector.load %arg9[%c0_16, %c0_17, %c0_18] : memref<5x32x32xf32, #tpu.memory_space<vmem>>, vector<1x32x32xf32>
    %18 = vector.shape_cast %17 : vector<1x32x32xf32> to vector<32x32xf32>
    %cst_19 = arith.constant dense<0.000000e+00> : vector<13x32xf32>
    %19 = tpu.matmul %16, %18, %cst_19 {dimension_numbers = #tpu.dot_dimension_numbers<[1], [0], [0], [1], [0, 0, 1, 1], [], []>} : vector<13x32xf32>, vector<32x32xf32>, vector<13x32xf32> -> vector<13x32xf32>
    %c0_20 = arith.constant 0 : index
    %c0_21 = arith.constant 0 : index
    %c0_22 = arith.constant 0 : index
    %20 = vector.load %arg10[%c0_20, %c0_21, %c0_22] : memref<5x1x32xf32, #tpu.memory_space<vmem>>, vector<1x1x32xf32>
    %21 = vector.shape_cast %20 : vector<1x1x32xf32> to vector<1x32xf32>
    %22 = vector.broadcast %21 : vector<1x32xf32> to vector<13x32xf32>
    %23 = arith.addf %19, %22 : vector<13x32xf32>
    %cst_23 = arith.constant 0.000000e+00 : f32
    %24 = vector.broadcast %cst_23 : f32 to vector<13x32xf32>
    %25 = arith.maximumf %23, %24 : vector<13x32xf32>
    %26 = arith.mulf %25, %25 : vector<13x32xf32>
    %27 = tpu.concatenate %25, %26 in 1 : vector<13x32xf32>, vector<13x32xf32> -> vector<13x64xf32>
    %cst_24 = arith.constant dense<0.000000e+00> : vector<2x64xf32>
    %28 = tpu.matmul %4, %27, %cst_24 {dimension_numbers = #tpu.dot_dimension_numbers<[1], [0], [0], [1], [0, 0, 1, 1], [], []>} : vector<2x13xf32>, vector<13x64xf32>, vector<2x64xf32> -> vector<2x64xf32>
    %29 = vector.broadcast %7 : vector<2x1xf32> to vector<2x64xf32>
    %30 = arith.mulf %28, %29 : vector<2x64xf32>
    %cst_25 = arith.constant dense<0.000000e+00> : vector<13x64xf32>
    %31 = tpu.matmul %6, %30, %cst_25 {dimension_numbers = #tpu.dot_dimension_numbers<[1], [0], [0], [1], [0, 0, 1, 1], [], []>} : vector<13x2xf32>, vector<2x64xf32>, vector<13x64xf32> -> vector<13x64xf32>
    %32 = vector.extract_strided_slice %31 {offsets = [0, 0], sizes = [13, 32], strides = [1, 1]} : vector<13x64xf32> to vector<13x32xf32>
    %33 = vector.extract_strided_slice %31 {offsets = [0, 32], sizes = [13, 32], strides = [1, 1]} : vector<13x64xf32> to vector<13x32xf32>
    %c0_26 = arith.constant 0 : index
    %c0_27 = arith.constant 0 : index
    %c0_28 = arith.constant 0 : index
    %34 = vector.load %arg13[%c0_26, %c0_27, %c0_28] : memref<5x1x32xf32, #tpu.memory_space<vmem>>, vector<1x1x32xf32>
    %35 = vector.shape_cast %34 : vector<1x1x32xf32> to vector<1x32xf32>
    %36 = vector.broadcast %35 : vector<1x32xf32> to vector<13x32xf32>
    %37 = arith.mulf %36, %32 : vector<13x32xf32>
    %38 = arith.subf %25, %37 : vector<13x32xf32>
    %cst_29 = arith.constant 2.000000e+00 : f32
    %39 = vector.broadcast %cst_29 : f32 to vector<1x32xf32>
    %40 = arith.subf %39, %35 : vector<1x32xf32>
    %41 = arith.mulf %35, %40 : vector<1x32xf32>
    %42 = arith.mulf %32, %32 : vector<13x32xf32>
    %43 = vector.broadcast %41 : vector<1x32xf32> to vector<13x32xf32>
    %44 = arith.mulf %43, %42 : vector<13x32xf32>
    %45 = arith.subf %33, %44 : vector<13x32xf32>
    %cst_30 = arith.constant 0.000000e+00 : f32
    %46 = vector.broadcast %cst_30 : f32 to vector<13x32xf32>
    %47 = arith.maximumf %45, %46 : vector<13x32xf32>
    %c0_31 = arith.constant 0 : index
    %c0_32 = arith.constant 0 : index
    %c0_33 = arith.constant 0 : index
    %48 = vector.load %arg11[%c0_31, %c0_32, %c0_33] : memref<5x1x32xf32, #tpu.memory_space<vmem>>, vector<1x1x32xf32>
    %49 = vector.shape_cast %48 : vector<1x1x32xf32> to vector<1x32xf32>
    %50 = vector.broadcast %49 : vector<1x32xf32> to vector<13x32xf32>
    %51 = arith.mulf %50, %38 : vector<13x32xf32>
    %cst_34 = arith.constant 9.99999974E-6 : f32
    %52 = vector.broadcast %cst_34 : f32 to vector<13x32xf32>
    %53 = arith.addf %47, %52 : vector<13x32xf32>
    %54 = math.rsqrt %53 : vector<13x32xf32>
    %55 = arith.mulf %51, %54 : vector<13x32xf32>
    %c0_35 = arith.constant 0 : index
    %c0_36 = arith.constant 0 : index
    %c0_37 = arith.constant 0 : index
    %56 = vector.load %arg12[%c0_35, %c0_36, %c0_37] : memref<5x1x32xf32, #tpu.memory_space<vmem>>, vector<1x1x32xf32>
    %57 = vector.shape_cast %56 : vector<1x1x32xf32> to vector<1x32xf32>
    %58 = vector.broadcast %57 : vector<1x32xf32> to vector<13x32xf32>
    %59 = arith.addf %55, %58 : vector<13x32xf32>
    %cst_38 = arith.constant dense<0.000000e+00> : vector<13x32xf32>
    %60 = tpu.matmul %2, %59, %cst_38 {dimension_numbers = #tpu.dot_dimension_numbers<[1], [0], [0], [1], [0, 0, 1, 1], [], []>} : vector<13x13xf32>, vector<13x32xf32>, vector<13x32xf32> -> vector<13x32xf32>
    %c0_39 = arith.constant 0 : index
    %c0_40 = arith.constant 0 : index
    %c0_41 = arith.constant 0 : index
    %61 = vector.load %arg7[%c0_39, %c0_40, %c0_41] : memref<4x32x32xf32, #tpu.memory_space<vmem>>, vector<1x32x32xf32>
    %62 = vector.shape_cast %61 : vector<1x32x32xf32> to vector<32x32xf32>
    %cst_42 = arith.constant dense<0.000000e+00> : vector<13x32xf32>
    %63 = tpu.matmul %60, %62, %cst_42 {dimension_numbers = #tpu.dot_dimension_numbers<[1], [0], [0], [1], [0, 0, 1, 1], [], []>} : vector<13x32xf32>, vector<32x32xf32>, vector<13x32xf32> -> vector<13x32xf32>
    %c1 = arith.constant 1 : index
    %c0_43 = arith.constant 0 : index
    %c0_44 = arith.constant 0 : index
    %64 = vector.load %arg8[%c1, %c0_43, %c0_44] : memref<5x1x32xf32, #tpu.memory_space<vmem>>, vector<1x1x32xf32>
    %65 = vector.shape_cast %64 : vector<1x1x32xf32> to vector<1x32xf32>
    %66 = vector.broadcast %65 : vector<1x32xf32> to vector<13x32xf32>
    %67 = arith.addf %63, %66 : vector<13x32xf32>
    %cst_45 = arith.constant 0.000000e+00 : f32
    %68 = vector.broadcast %cst_45 : f32 to vector<13x32xf32>
    %69 = arith.maximumf %67, %68 : vector<13x32xf32>
    %c1_46 = arith.constant 1 : index
    %c0_47 = arith.constant 0 : index
    %c0_48 = arith.constant 0 : index
    %70 = vector.load %arg9[%c1_46, %c0_47, %c0_48] : memref<5x32x32xf32, #tpu.memory_space<vmem>>, vector<1x32x32xf32>
    %71 = vector.shape_cast %70 : vector<1x32x32xf32> to vector<32x32xf32>
    %cst_49 = arith.constant dense<0.000000e+00> : vector<13x32xf32>
    %72 = tpu.matmul %69, %71, %cst_49 {dimension_numbers = #tpu.dot_dimension_numbers<[1], [0], [0], [1], [0, 0, 1, 1], [], []>} : vector<13x32xf32>, vector<32x32xf32>, vector<13x32xf32> -> vector<13x32xf32>
    %c1_50 = arith.constant 1 : index
    %c0_51 = arith.constant 0 : index
    %c0_52 = arith.constant 0 : index
    %73 = vector.load %arg10[%c1_50, %c0_51, %c0_52] : memref<5x1x32xf32, #tpu.memory_space<vmem>>, vector<1x1x32xf32>
    %74 = vector.shape_cast %73 : vector<1x1x32xf32> to vector<1x32xf32>
    %75 = vector.broadcast %74 : vector<1x32xf32> to vector<13x32xf32>
    %76 = arith.addf %72, %75 : vector<13x32xf32>
    %cst_53 = arith.constant 0.000000e+00 : f32
    %77 = vector.broadcast %cst_53 : f32 to vector<13x32xf32>
    %78 = arith.maximumf %76, %77 : vector<13x32xf32>
    %79 = arith.mulf %78, %78 : vector<13x32xf32>
    %80 = tpu.concatenate %78, %79 in 1 : vector<13x32xf32>, vector<13x32xf32> -> vector<13x64xf32>
    %cst_54 = arith.constant dense<0.000000e+00> : vector<2x64xf32>
    %81 = tpu.matmul %4, %80, %cst_54 {dimension_numbers = #tpu.dot_dimension_numbers<[1], [0], [0], [1], [0, 0, 1, 1], [], []>} : vector<2x13xf32>, vector<13x64xf32>, vector<2x64xf32> -> vector<2x64xf32>
    %82 = vector.broadcast %7 : vector<2x1xf32> to vector<2x64xf32>
    %83 = arith.mulf %81, %82 : vector<2x64xf32>
    %cst_55 = arith.constant dense<0.000000e+00> : vector<13x64xf32>
    %84 = tpu.matmul %6, %83, %cst_55 {dimension_numbers = #tpu.dot_dimension_numbers<[1], [0], [0], [1], [0, 0, 1, 1], [], []>} : vector<13x2xf32>, vector<2x64xf32>, vector<13x64xf32> -> vector<13x64xf32>
    %85 = vector.extract_strided_slice %84 {offsets = [0, 0], sizes = [13, 32], strides = [1, 1]} : vector<13x64xf32> to vector<13x32xf32>
    %86 = vector.extract_strided_slice %84 {offsets = [0, 32], sizes = [13, 32], strides = [1, 1]} : vector<13x64xf32> to vector<13x32xf32>
    %c1_56 = arith.constant 1 : index
    %c0_57 = arith.constant 0 : index
    %c0_58 = arith.constant 0 : index
    %87 = vector.load %arg13[%c1_56, %c0_57, %c0_58] : memref<5x1x32xf32, #tpu.memory_space<vmem>>, vector<1x1x32xf32>
    %88 = vector.shape_cast %87 : vector<1x1x32xf32> to vector<1x32xf32>
    %89 = vector.broadcast %88 : vector<1x32xf32> to vector<13x32xf32>
    %90 = arith.mulf %89, %85 : vector<13x32xf32>
    %91 = arith.subf %78, %90 : vector<13x32xf32>
    %cst_59 = arith.constant 2.000000e+00 : f32
    %92 = vector.broadcast %cst_59 : f32 to vector<1x32xf32>
    %93 = arith.subf %92, %88 : vector<1x32xf32>
    %94 = arith.mulf %88, %93 : vector<1x32xf32>
    %95 = arith.mulf %85, %85 : vector<13x32xf32>
    %96 = vector.broadcast %94 : vector<1x32xf32> to vector<13x32xf32>
    %97 = arith.mulf %96, %95 : vector<13x32xf32>
    %98 = arith.subf %86, %97 : vector<13x32xf32>
    %cst_60 = arith.constant 0.000000e+00 : f32
    %99 = vector.broadcast %cst_60 : f32 to vector<13x32xf32>
    %100 = arith.maximumf %98, %99 : vector<13x32xf32>
    %c1_61 = arith.constant 1 : index
    %c0_62 = arith.constant 0 : index
    %c0_63 = arith.constant 0 : index
    %101 = vector.load %arg11[%c1_61, %c0_62, %c0_63] : memref<5x1x32xf32, #tpu.memory_space<vmem>>, vector<1x1x32xf32>
    %102 = vector.shape_cast %101 : vector<1x1x32xf32> to vector<1x32xf32>
    %103 = vector.broadcast %102 : vector<1x32xf32> to vector<13x32xf32>
    %104 = arith.mulf %103, %91 : vector<13x32xf32>
    %cst_64 = arith.constant 9.99999974E-6 : f32
    %105 = vector.broadcast %cst_64 : f32 to vector<13x32xf32>
    %106 = arith.addf %100, %105 : vector<13x32xf32>
    %107 = math.rsqrt %106 : vector<13x32xf32>
    %108 = arith.mulf %104, %107 : vector<13x32xf32>
    %c1_65 = arith.constant 1 : index
    %c0_66 = arith.constant 0 : index
    %c0_67 = arith.constant 0 : index
    %109 = vector.load %arg12[%c1_65, %c0_66, %c0_67] : memref<5x1x32xf32, #tpu.memory_space<vmem>>, vector<1x1x32xf32>
    %110 = vector.shape_cast %109 : vector<1x1x32xf32> to vector<1x32xf32>
    %111 = vector.broadcast %110 : vector<1x32xf32> to vector<13x32xf32>
    %112 = arith.addf %108, %111 : vector<13x32xf32>
    %cst_68 = arith.constant dense<0.000000e+00> : vector<13x32xf32>
    %113 = tpu.matmul %2, %112, %cst_68 {dimension_numbers = #tpu.dot_dimension_numbers<[1], [0], [0], [1], [0, 0, 1, 1], [], []>} : vector<13x13xf32>, vector<13x32xf32>, vector<13x32xf32> -> vector<13x32xf32>
    %c1_69 = arith.constant 1 : index
    %c0_70 = arith.constant 0 : index
    %c0_71 = arith.constant 0 : index
    %114 = vector.load %arg7[%c1_69, %c0_70, %c0_71] : memref<4x32x32xf32, #tpu.memory_space<vmem>>, vector<1x32x32xf32>
    %115 = vector.shape_cast %114 : vector<1x32x32xf32> to vector<32x32xf32>
    %cst_72 = arith.constant dense<0.000000e+00> : vector<13x32xf32>
    %116 = tpu.matmul %113, %115, %cst_72 {dimension_numbers = #tpu.dot_dimension_numbers<[1], [0], [0], [1], [0, 0, 1, 1], [], []>} : vector<13x32xf32>, vector<32x32xf32>, vector<13x32xf32> -> vector<13x32xf32>
    %c2 = arith.constant 2 : index
    %c0_73 = arith.constant 0 : index
    %c0_74 = arith.constant 0 : index
    %117 = vector.load %arg8[%c2, %c0_73, %c0_74] : memref<5x1x32xf32, #tpu.memory_space<vmem>>, vector<1x1x32xf32>
    %118 = vector.shape_cast %117 : vector<1x1x32xf32> to vector<1x32xf32>
    %119 = vector.broadcast %118 : vector<1x32xf32> to vector<13x32xf32>
    %120 = arith.addf %116, %119 : vector<13x32xf32>
    %cst_75 = arith.constant 0.000000e+00 : f32
    %121 = vector.broadcast %cst_75 : f32 to vector<13x32xf32>
    %122 = arith.maximumf %120, %121 : vector<13x32xf32>
    %c2_76 = arith.constant 2 : index
    %c0_77 = arith.constant 0 : index
    %c0_78 = arith.constant 0 : index
    %123 = vector.load %arg9[%c2_76, %c0_77, %c0_78] : memref<5x32x32xf32, #tpu.memory_space<vmem>>, vector<1x32x32xf32>
    %124 = vector.shape_cast %123 : vector<1x32x32xf32> to vector<32x32xf32>
    %cst_79 = arith.constant dense<0.000000e+00> : vector<13x32xf32>
    %125 = tpu.matmul %122, %124, %cst_79 {dimension_numbers = #tpu.dot_dimension_numbers<[1], [0], [0], [1], [0, 0, 1, 1], [], []>} : vector<13x32xf32>, vector<32x32xf32>, vector<13x32xf32> -> vector<13x32xf32>
    %c2_80 = arith.constant 2 : index
    %c0_81 = arith.constant 0 : index
    %c0_82 = arith.constant 0 : index
    %126 = vector.load %arg10[%c2_80, %c0_81, %c0_82] : memref<5x1x32xf32, #tpu.memory_space<vmem>>, vector<1x1x32xf32>
    %127 = vector.shape_cast %126 : vector<1x1x32xf32> to vector<1x32xf32>
    %128 = vector.broadcast %127 : vector<1x32xf32> to vector<13x32xf32>
    %129 = arith.addf %125, %128 : vector<13x32xf32>
    %cst_83 = arith.constant 0.000000e+00 : f32
    %130 = vector.broadcast %cst_83 : f32 to vector<13x32xf32>
    %131 = arith.maximumf %129, %130 : vector<13x32xf32>
    %132 = arith.mulf %131, %131 : vector<13x32xf32>
    %133 = tpu.concatenate %131, %132 in 1 : vector<13x32xf32>, vector<13x32xf32> -> vector<13x64xf32>
    %cst_84 = arith.constant dense<0.000000e+00> : vector<2x64xf32>
    %134 = tpu.matmul %4, %133, %cst_84 {dimension_numbers = #tpu.dot_dimension_numbers<[1], [0], [0], [1], [0, 0, 1, 1], [], []>} : vector<2x13xf32>, vector<13x64xf32>, vector<2x64xf32> -> vector<2x64xf32>
    %135 = vector.broadcast %7 : vector<2x1xf32> to vector<2x64xf32>
    %136 = arith.mulf %134, %135 : vector<2x64xf32>
    %cst_85 = arith.constant dense<0.000000e+00> : vector<13x64xf32>
    %137 = tpu.matmul %6, %136, %cst_85 {dimension_numbers = #tpu.dot_dimension_numbers<[1], [0], [0], [1], [0, 0, 1, 1], [], []>} : vector<13x2xf32>, vector<2x64xf32>, vector<13x64xf32> -> vector<13x64xf32>
    %138 = vector.extract_strided_slice %137 {offsets = [0, 0], sizes = [13, 32], strides = [1, 1]} : vector<13x64xf32> to vector<13x32xf32>
    %139 = vector.extract_strided_slice %137 {offsets = [0, 32], sizes = [13, 32], strides = [1, 1]} : vector<13x64xf32> to vector<13x32xf32>
    %c2_86 = arith.constant 2 : index
    %c0_87 = arith.constant 0 : index
    %c0_88 = arith.constant 0 : index
    %140 = vector.load %arg13[%c2_86, %c0_87, %c0_88] : memref<5x1x32xf32, #tpu.memory_space<vmem>>, vector<1x1x32xf32>
    %141 = vector.shape_cast %140 : vector<1x1x32xf32> to vector<1x32xf32>
    %142 = vector.broadcast %141 : vector<1x32xf32> to vector<13x32xf32>
    %143 = arith.mulf %142, %138 : vector<13x32xf32>
    %144 = arith.subf %131, %143 : vector<13x32xf32>
    %cst_89 = arith.constant 2.000000e+00 : f32
    %145 = vector.broadcast %cst_89 : f32 to vector<1x32xf32>
    %146 = arith.subf %145, %141 : vector<1x32xf32>
    %147 = arith.mulf %141, %146 : vector<1x32xf32>
    %148 = arith.mulf %138, %138 : vector<13x32xf32>
    %149 = vector.broadcast %147 : vector<1x32xf32> to vector<13x32xf32>
    %150 = arith.mulf %149, %148 : vector<13x32xf32>
    %151 = arith.subf %139, %150 : vector<13x32xf32>
    %cst_90 = arith.constant 0.000000e+00 : f32
    %152 = vector.broadcast %cst_90 : f32 to vector<13x32xf32>
    %153 = arith.maximumf %151, %152 : vector<13x32xf32>
    %c2_91 = arith.constant 2 : index
    %c0_92 = arith.constant 0 : index
    %c0_93 = arith.constant 0 : index
    %154 = vector.load %arg11[%c2_91, %c0_92, %c0_93] : memref<5x1x32xf32, #tpu.memory_space<vmem>>, vector<1x1x32xf32>
    %155 = vector.shape_cast %154 : vector<1x1x32xf32> to vector<1x32xf32>
    %156 = vector.broadcast %155 : vector<1x32xf32> to vector<13x32xf32>
    %157 = arith.mulf %156, %144 : vector<13x32xf32>
    %cst_94 = arith.constant 9.99999974E-6 : f32
    %158 = vector.broadcast %cst_94 : f32 to vector<13x32xf32>
    %159 = arith.addf %153, %158 : vector<13x32xf32>
    %160 = math.rsqrt %159 : vector<13x32xf32>
    %161 = arith.mulf %157, %160 : vector<13x32xf32>
    %c2_95 = arith.constant 2 : index
    %c0_96 = arith.constant 0 : index
    %c0_97 = arith.constant 0 : index
    %162 = vector.load %arg12[%c2_95, %c0_96, %c0_97] : memref<5x1x32xf32, #tpu.memory_space<vmem>>, vector<1x1x32xf32>
    %163 = vector.shape_cast %162 : vector<1x1x32xf32> to vector<1x32xf32>
    %164 = vector.broadcast %163 : vector<1x32xf32> to vector<13x32xf32>
    %165 = arith.addf %161, %164 : vector<13x32xf32>
    %cst_98 = arith.constant dense<0.000000e+00> : vector<13x32xf32>
    %166 = tpu.matmul %2, %165, %cst_98 {dimension_numbers = #tpu.dot_dimension_numbers<[1], [0], [0], [1], [0, 0, 1, 1], [], []>} : vector<13x13xf32>, vector<13x32xf32>, vector<13x32xf32> -> vector<13x32xf32>
    %c2_99 = arith.constant 2 : index
    %c0_100 = arith.constant 0 : index
    %c0_101 = arith.constant 0 : index
    %167 = vector.load %arg7[%c2_99, %c0_100, %c0_101] : memref<4x32x32xf32, #tpu.memory_space<vmem>>, vector<1x32x32xf32>
    %168 = vector.shape_cast %167 : vector<1x32x32xf32> to vector<32x32xf32>
    %cst_102 = arith.constant dense<0.000000e+00> : vector<13x32xf32>
    %169 = tpu.matmul %166, %168, %cst_102 {dimension_numbers = #tpu.dot_dimension_numbers<[1], [0], [0], [1], [0, 0, 1, 1], [], []>} : vector<13x32xf32>, vector<32x32xf32>, vector<13x32xf32> -> vector<13x32xf32>
    %c3 = arith.constant 3 : index
    %c0_103 = arith.constant 0 : index
    %c0_104 = arith.constant 0 : index
    %170 = vector.load %arg8[%c3, %c0_103, %c0_104] : memref<5x1x32xf32, #tpu.memory_space<vmem>>, vector<1x1x32xf32>
    %171 = vector.shape_cast %170 : vector<1x1x32xf32> to vector<1x32xf32>
    %172 = vector.broadcast %171 : vector<1x32xf32> to vector<13x32xf32>
    %173 = arith.addf %169, %172 : vector<13x32xf32>
    %cst_105 = arith.constant 0.000000e+00 : f32
    %174 = vector.broadcast %cst_105 : f32 to vector<13x32xf32>
    %175 = arith.maximumf %173, %174 : vector<13x32xf32>
    %c3_106 = arith.constant 3 : index
    %c0_107 = arith.constant 0 : index
    %c0_108 = arith.constant 0 : index
    %176 = vector.load %arg9[%c3_106, %c0_107, %c0_108] : memref<5x32x32xf32, #tpu.memory_space<vmem>>, vector<1x32x32xf32>
    %177 = vector.shape_cast %176 : vector<1x32x32xf32> to vector<32x32xf32>
    %cst_109 = arith.constant dense<0.000000e+00> : vector<13x32xf32>
    %178 = tpu.matmul %175, %177, %cst_109 {dimension_numbers = #tpu.dot_dimension_numbers<[1], [0], [0], [1], [0, 0, 1, 1], [], []>} : vector<13x32xf32>, vector<32x32xf32>, vector<13x32xf32> -> vector<13x32xf32>
    %c3_110 = arith.constant 3 : index
    %c0_111 = arith.constant 0 : index
    %c0_112 = arith.constant 0 : index
    %179 = vector.load %arg10[%c3_110, %c0_111, %c0_112] : memref<5x1x32xf32, #tpu.memory_space<vmem>>, vector<1x1x32xf32>
    %180 = vector.shape_cast %179 : vector<1x1x32xf32> to vector<1x32xf32>
    %181 = vector.broadcast %180 : vector<1x32xf32> to vector<13x32xf32>
    %182 = arith.addf %178, %181 : vector<13x32xf32>
    %cst_113 = arith.constant 0.000000e+00 : f32
    %183 = vector.broadcast %cst_113 : f32 to vector<13x32xf32>
    %184 = arith.maximumf %182, %183 : vector<13x32xf32>
    %185 = arith.mulf %184, %184 : vector<13x32xf32>
    %186 = tpu.concatenate %184, %185 in 1 : vector<13x32xf32>, vector<13x32xf32> -> vector<13x64xf32>
    %cst_114 = arith.constant dense<0.000000e+00> : vector<2x64xf32>
    %187 = tpu.matmul %4, %186, %cst_114 {dimension_numbers = #tpu.dot_dimension_numbers<[1], [0], [0], [1], [0, 0, 1, 1], [], []>} : vector<2x13xf32>, vector<13x64xf32>, vector<2x64xf32> -> vector<2x64xf32>
    %188 = vector.broadcast %7 : vector<2x1xf32> to vector<2x64xf32>
    %189 = arith.mulf %187, %188 : vector<2x64xf32>
    %cst_115 = arith.constant dense<0.000000e+00> : vector<13x64xf32>
    %190 = tpu.matmul %6, %189, %cst_115 {dimension_numbers = #tpu.dot_dimension_numbers<[1], [0], [0], [1], [0, 0, 1, 1], [], []>} : vector<13x2xf32>, vector<2x64xf32>, vector<13x64xf32> -> vector<13x64xf32>
    %191 = vector.extract_strided_slice %190 {offsets = [0, 0], sizes = [13, 32], strides = [1, 1]} : vector<13x64xf32> to vector<13x32xf32>
    %192 = vector.extract_strided_slice %190 {offsets = [0, 32], sizes = [13, 32], strides = [1, 1]} : vector<13x64xf32> to vector<13x32xf32>
    %c3_116 = arith.constant 3 : index
    %c0_117 = arith.constant 0 : index
    %c0_118 = arith.constant 0 : index
    %193 = vector.load %arg13[%c3_116, %c0_117, %c0_118] : memref<5x1x32xf32, #tpu.memory_space<vmem>>, vector<1x1x32xf32>
    %194 = vector.shape_cast %193 : vector<1x1x32xf32> to vector<1x32xf32>
    %195 = vector.broadcast %194 : vector<1x32xf32> to vector<13x32xf32>
    %196 = arith.mulf %195, %191 : vector<13x32xf32>
    %197 = arith.subf %184, %196 : vector<13x32xf32>
    %cst_119 = arith.constant 2.000000e+00 : f32
    %198 = vector.broadcast %cst_119 : f32 to vector<1x32xf32>
    %199 = arith.subf %198, %194 : vector<1x32xf32>
    %200 = arith.mulf %194, %199 : vector<1x32xf32>
    %201 = arith.mulf %191, %191 : vector<13x32xf32>
    %202 = vector.broadcast %200 : vector<1x32xf32> to vector<13x32xf32>
    %203 = arith.mulf %202, %201 : vector<13x32xf32>
    %204 = arith.subf %192, %203 : vector<13x32xf32>
    %cst_120 = arith.constant 0.000000e+00 : f32
    %205 = vector.broadcast %cst_120 : f32 to vector<13x32xf32>
    %206 = arith.maximumf %204, %205 : vector<13x32xf32>
    %c3_121 = arith.constant 3 : index
    %c0_122 = arith.constant 0 : index
    %c0_123 = arith.constant 0 : index
    %207 = vector.load %arg11[%c3_121, %c0_122, %c0_123] : memref<5x1x32xf32, #tpu.memory_space<vmem>>, vector<1x1x32xf32>
    %208 = vector.shape_cast %207 : vector<1x1x32xf32> to vector<1x32xf32>
    %209 = vector.broadcast %208 : vector<1x32xf32> to vector<13x32xf32>
    %210 = arith.mulf %209, %197 : vector<13x32xf32>
    %cst_124 = arith.constant 9.99999974E-6 : f32
    %211 = vector.broadcast %cst_124 : f32 to vector<13x32xf32>
    %212 = arith.addf %206, %211 : vector<13x32xf32>
    %213 = math.rsqrt %212 : vector<13x32xf32>
    %214 = arith.mulf %210, %213 : vector<13x32xf32>
    %c3_125 = arith.constant 3 : index
    %c0_126 = arith.constant 0 : index
    %c0_127 = arith.constant 0 : index
    %215 = vector.load %arg12[%c3_125, %c0_126, %c0_127] : memref<5x1x32xf32, #tpu.memory_space<vmem>>, vector<1x1x32xf32>
    %216 = vector.shape_cast %215 : vector<1x1x32xf32> to vector<1x32xf32>
    %217 = vector.broadcast %216 : vector<1x32xf32> to vector<13x32xf32>
    %218 = arith.addf %214, %217 : vector<13x32xf32>
    %cst_128 = arith.constant dense<0.000000e+00> : vector<13x32xf32>
    %219 = tpu.matmul %2, %218, %cst_128 {dimension_numbers = #tpu.dot_dimension_numbers<[1], [0], [0], [1], [0, 0, 1, 1], [], []>} : vector<13x13xf32>, vector<13x32xf32>, vector<13x32xf32> -> vector<13x32xf32>
    %c3_129 = arith.constant 3 : index
    %c0_130 = arith.constant 0 : index
    %c0_131 = arith.constant 0 : index
    %220 = vector.load %arg7[%c3_129, %c0_130, %c0_131] : memref<4x32x32xf32, #tpu.memory_space<vmem>>, vector<1x32x32xf32>
    %221 = vector.shape_cast %220 : vector<1x32x32xf32> to vector<32x32xf32>
    %cst_132 = arith.constant dense<0.000000e+00> : vector<13x32xf32>
    %222 = tpu.matmul %219, %221, %cst_132 {dimension_numbers = #tpu.dot_dimension_numbers<[1], [0], [0], [1], [0, 0, 1, 1], [], []>} : vector<13x32xf32>, vector<32x32xf32>, vector<13x32xf32> -> vector<13x32xf32>
    %c4 = arith.constant 4 : index
    %c0_133 = arith.constant 0 : index
    %c0_134 = arith.constant 0 : index
    %223 = vector.load %arg8[%c4, %c0_133, %c0_134] : memref<5x1x32xf32, #tpu.memory_space<vmem>>, vector<1x1x32xf32>
    %224 = vector.shape_cast %223 : vector<1x1x32xf32> to vector<1x32xf32>
    %225 = vector.broadcast %224 : vector<1x32xf32> to vector<13x32xf32>
    %226 = arith.addf %222, %225 : vector<13x32xf32>
    %cst_135 = arith.constant 0.000000e+00 : f32
    %227 = vector.broadcast %cst_135 : f32 to vector<13x32xf32>
    %228 = arith.maximumf %226, %227 : vector<13x32xf32>
    %c4_136 = arith.constant 4 : index
    %c0_137 = arith.constant 0 : index
    %c0_138 = arith.constant 0 : index
    %229 = vector.load %arg9[%c4_136, %c0_137, %c0_138] : memref<5x32x32xf32, #tpu.memory_space<vmem>>, vector<1x32x32xf32>
    %230 = vector.shape_cast %229 : vector<1x32x32xf32> to vector<32x32xf32>
    %cst_139 = arith.constant dense<0.000000e+00> : vector<13x32xf32>
    %231 = tpu.matmul %228, %230, %cst_139 {dimension_numbers = #tpu.dot_dimension_numbers<[1], [0], [0], [1], [0, 0, 1, 1], [], []>} : vector<13x32xf32>, vector<32x32xf32>, vector<13x32xf32> -> vector<13x32xf32>
    %c4_140 = arith.constant 4 : index
    %c0_141 = arith.constant 0 : index
    %c0_142 = arith.constant 0 : index
    %232 = vector.load %arg10[%c4_140, %c0_141, %c0_142] : memref<5x1x32xf32, #tpu.memory_space<vmem>>, vector<1x1x32xf32>
    %233 = vector.shape_cast %232 : vector<1x1x32xf32> to vector<1x32xf32>
    %234 = vector.broadcast %233 : vector<1x32xf32> to vector<13x32xf32>
    %235 = arith.addf %231, %234 : vector<13x32xf32>
    %cst_143 = arith.constant 0.000000e+00 : f32
    %236 = vector.broadcast %cst_143 : f32 to vector<13x32xf32>
    %237 = arith.maximumf %235, %236 : vector<13x32xf32>
    %238 = arith.mulf %237, %237 : vector<13x32xf32>
    %239 = tpu.concatenate %237, %238 in 1 : vector<13x32xf32>, vector<13x32xf32> -> vector<13x64xf32>
    %cst_144 = arith.constant dense<0.000000e+00> : vector<2x64xf32>
    %240 = tpu.matmul %4, %239, %cst_144 {dimension_numbers = #tpu.dot_dimension_numbers<[1], [0], [0], [1], [0, 0, 1, 1], [], []>} : vector<2x13xf32>, vector<13x64xf32>, vector<2x64xf32> -> vector<2x64xf32>
    %241 = vector.broadcast %7 : vector<2x1xf32> to vector<2x64xf32>
    %242 = arith.mulf %240, %241 : vector<2x64xf32>
    %cst_145 = arith.constant dense<0.000000e+00> : vector<13x64xf32>
    %243 = tpu.matmul %6, %242, %cst_145 {dimension_numbers = #tpu.dot_dimension_numbers<[1], [0], [0], [1], [0, 0, 1, 1], [], []>} : vector<13x2xf32>, vector<2x64xf32>, vector<13x64xf32> -> vector<13x64xf32>
    %244 = vector.extract_strided_slice %243 {offsets = [0, 0], sizes = [13, 32], strides = [1, 1]} : vector<13x64xf32> to vector<13x32xf32>
    %245 = vector.extract_strided_slice %243 {offsets = [0, 32], sizes = [13, 32], strides = [1, 1]} : vector<13x64xf32> to vector<13x32xf32>
    %c4_146 = arith.constant 4 : index
    %c0_147 = arith.constant 0 : index
    %c0_148 = arith.constant 0 : index
    %246 = vector.load %arg13[%c4_146, %c0_147, %c0_148] : memref<5x1x32xf32, #tpu.memory_space<vmem>>, vector<1x1x32xf32>
    %247 = vector.shape_cast %246 : vector<1x1x32xf32> to vector<1x32xf32>
    %248 = vector.broadcast %247 : vector<1x32xf32> to vector<13x32xf32>
    %249 = arith.mulf %248, %244 : vector<13x32xf32>
    %250 = arith.subf %237, %249 : vector<13x32xf32>
    %cst_149 = arith.constant 2.000000e+00 : f32
    %251 = vector.broadcast %cst_149 : f32 to vector<1x32xf32>
    %252 = arith.subf %251, %247 : vector<1x32xf32>
    %253 = arith.mulf %247, %252 : vector<1x32xf32>
    %254 = arith.mulf %244, %244 : vector<13x32xf32>
    %255 = vector.broadcast %253 : vector<1x32xf32> to vector<13x32xf32>
    %256 = arith.mulf %255, %254 : vector<13x32xf32>
    %257 = arith.subf %245, %256 : vector<13x32xf32>
    %cst_150 = arith.constant 0.000000e+00 : f32
    %258 = vector.broadcast %cst_150 : f32 to vector<13x32xf32>
    %259 = arith.maximumf %257, %258 : vector<13x32xf32>
    %c4_151 = arith.constant 4 : index
    %c0_152 = arith.constant 0 : index
    %c0_153 = arith.constant 0 : index
    %260 = vector.load %arg11[%c4_151, %c0_152, %c0_153] : memref<5x1x32xf32, #tpu.memory_space<vmem>>, vector<1x1x32xf32>
    %261 = vector.shape_cast %260 : vector<1x1x32xf32> to vector<1x32xf32>
    %262 = vector.broadcast %261 : vector<1x32xf32> to vector<13x32xf32>
    %263 = arith.mulf %262, %250 : vector<13x32xf32>
    %cst_154 = arith.constant 9.99999974E-6 : f32
    %264 = vector.broadcast %cst_154 : f32 to vector<13x32xf32>
    %265 = arith.addf %259, %264 : vector<13x32xf32>
    %266 = math.rsqrt %265 : vector<13x32xf32>
    %267 = arith.mulf %263, %266 : vector<13x32xf32>
    %c4_155 = arith.constant 4 : index
    %c0_156 = arith.constant 0 : index
    %c0_157 = arith.constant 0 : index
    %268 = vector.load %arg12[%c4_155, %c0_156, %c0_157] : memref<5x1x32xf32, #tpu.memory_space<vmem>>, vector<1x1x32xf32>
    %269 = vector.shape_cast %268 : vector<1x1x32xf32> to vector<1x32xf32>
    %270 = vector.broadcast %269 : vector<1x32xf32> to vector<13x32xf32>
    %271 = arith.addf %267, %270 : vector<13x32xf32>
    %c0_158 = arith.constant 0 : index
    %c0_159 = arith.constant 0 : index
    %272 = vector.load %arg5[%c0_158, %c0_159] : memref<90x13xbf16, #tpu.memory_space<vmem>>, vector<90x13xbf16>
    %273 = arith.extf %272 : vector<90x13xbf16> to vector<90x13xf32>
    %cst_160 = arith.constant dense<0.000000e+00> : vector<90x32xf32>
    %274 = tpu.matmul %273, %271, %cst_160 {dimension_numbers = #tpu.dot_dimension_numbers<[1], [0], [0], [1], [0, 0, 1, 1], [], []>} : vector<90x13xf32>, vector<13x32xf32>, vector<90x32xf32> -> vector<90x32xf32>
    %c0_161 = arith.constant 0 : index
    %c0_162 = arith.constant 0 : index
    %275 = vector.load %arg14[%c0_161, %c0_162] : memref<32x128xf32, #tpu.memory_space<vmem>>, vector<32x128xf32>
    %cst_163 = arith.constant dense<0.000000e+00> : vector<90x128xf32>
    %276 = tpu.matmul %274, %275, %cst_163 {dimension_numbers = #tpu.dot_dimension_numbers<[1], [0], [0], [1], [0, 0, 1, 1], [], []>} : vector<90x32xf32>, vector<32x128xf32>, vector<90x128xf32> -> vector<90x128xf32>
    %c0_164 = arith.constant 0 : index
    %c0_165 = arith.constant 0 : index
    %277 = vector.load %arg15[%c0_164, %c0_165] : memref<1x128xf32, #tpu.memory_space<vmem>>, vector<1x128xf32>
    %278 = vector.broadcast %277 : vector<1x128xf32> to vector<90x128xf32>
    %279 = arith.addf %276, %278 : vector<90x128xf32>
    %cst_166 = arith.constant 0.000000e+00 : f32
    %280 = vector.broadcast %cst_166 : f32 to vector<90x128xf32>
    %281 = arith.maximumf %279, %280 : vector<90x128xf32>
    %c0_167 = arith.constant 0 : index
    %c0_168 = arith.constant 0 : index
    %282 = vector.load %arg16[%c0_167, %c0_168] : memref<90x128xf32, #tpu.memory_space<vmem>>, vector<90x128xf32>
    tpu.vector_store %arg16[%c0_167, %c0_168], %281 {strides = array<i32>} : memref<90x128xf32, #tpu.memory_space<vmem>>, vector<90x128xf32>,
    return
  }
}

module attributes {stable_mosaic.version = 11 : i64} {
  func.func @_prot_coattn_head_kernel(%arg0: i32, %arg1: memref<2xi32, #tpu.memory_space<smem>>, %arg2: memref<2x45x128xf32, #tpu.memory_space<vmem>>, %arg3: memref<3x8x1280xbf16, #tpu.memory_space<any>>, %arg4: memref<1280x512xbf16, #tpu.memory_space<vmem>>, %arg5: memref<1x512xf32, #tpu.memory_space<vmem>>, %arg6: memref<512x128xbf16, #tpu.memory_space<vmem>>, %arg7: memref<1x128xf32, #tpu.memory_space<vmem>>, %arg8: memref<128x128xf32, #tpu.memory_space<vmem>>, %arg9: memref<128x64xf32, #tpu.memory_space<vmem>>, %arg10: memref<128x64xf32, #tpu.memory_space<vmem>>, %arg11: memref<1x64xf32, #tpu.memory_space<vmem>>, %arg12: memref<1x64xf32, #tpu.memory_space<vmem>>, %arg13: memref<128x512xf32, #tpu.memory_space<vmem>>, %arg14: memref<128x512xf32, #tpu.memory_space<vmem>>, %arg15: memref<1x512xf32, #tpu.memory_space<vmem>>, %arg16: memref<512x128xf32, #tpu.memory_space<vmem>>, %arg17: memref<1x128xf32, #tpu.memory_space<vmem>>, %arg18: memref<1x128xf32, #tpu.memory_space<vmem>>, %arg19: memref<1x1xf32, #tpu.memory_space<vmem>>, %arg20: memref<2x1xf32, #tpu.memory_space<vmem>>, %arg21: memref<2x1x45xf32, #tpu.memory_space<vmem>>, %arg22: memref<2x1x8xf32, #tpu.memory_space<vmem>>, %arg23: memref<2x8x1280xbf16, #tpu.memory_space<vmem>>, %arg24: memref<2x!tpu.dma_semaphore, #tpu.memory_space<semaphore_mem>>) attributes {dimension_semantics = [#tpu.dimension_semantics<parallel>], iteration_bounds = array<i64: 1>, scalar_prefetch = 1 : i64, scratch_operands = 2 : i64, tpu.core_type = #tpu.core_type<tc>, window_params = [{transform_indices = @transform_0, window_bounds = array<i64: 2, 45, 128>}, {}, {pipeline_mode = #tpu.pipeline_mode<synchronous>, transform_indices = @transform_2, window_bounds = array<i64: 1280, 512>}, {pipeline_mode = #tpu.pipeline_mode<synchronous>, transform_indices = @transform_3, window_bounds = array<i64: 1, 512>}, {pipeline_mode = #tpu.pipeline_mode<synchronous>, transform_indices = @transform_4, window_bounds = array<i64: 512, 128>}, {pipeline_mode = #tpu.pipeline_mode<synchronous>, transform_indices = @transform_5, window_bounds = array<i64: 1, 128>}, {pipeline_mode = #tpu.pipeline_mode<synchronous>, transform_indices = @transform_6, window_bounds = array<i64: 128, 128>}, {pipeline_mode = #tpu.pipeline_mode<synchronous>, transform_indices = @transform_7, window_bounds = array<i64: 128, 64>}, {pipeline_mode = #tpu.pipeline_mode<synchronous>, transform_indices = @transform_8, window_bounds = array<i64: 128, 64>}, {pipeline_mode = #tpu.pipeline_mode<synchronous>, transform_indices = @transform_9, window_bounds = array<i64: 1, 64>}, {pipeline_mode = #tpu.pipeline_mode<synchronous>, transform_indices = @transform_10, window_bounds = array<i64: 1, 64>}, {pipeline_mode = #tpu.pipeline_mode<synchronous>, transform_indices = @transform_11, window_bounds = array<i64: 128, 512>}, {pipeline_mode = #tpu.pipeline_mode<synchronous>, transform_indices = @transform_12, window_bounds = array<i64: 128, 512>}, {pipeline_mode = #tpu.pipeline_mode<synchronous>, transform_indices = @transform_13, window_bounds = array<i64: 1, 512>}, {pipeline_mode = #tpu.pipeline_mode<synchronous>, transform_indices = @transform_14, window_bounds = array<i64: 512, 128>}, {pipeline_mode = #tpu.pipeline_mode<synchronous>, transform_indices = @transform_15, window_bounds = array<i64: 1, 128>}, {pipeline_mode = #tpu.pipeline_mode<synchronous>, transform_indices = @transform_16, window_bounds = array<i64: 1, 128>}, {pipeline_mode = #tpu.pipeline_mode<synchronous>, transform_indices = @transform_17, window_bounds = array<i64: 1, 1>}, {transform_indices = @transform_18, window_bounds = array<i64: 2, 1>}, {transform_indices = @transform_19, window_bounds = array<i64: 2, 1, 45>}, {transform_indices = @transform_20, window_bounds = array<i64: 2, 1, 8>}]} {
    %c2_i32 = arith.constant 2 : i32
    %0 = arith.muli %arg0, %c2_i32 : i32
    %c0_i32 = arith.constant 0 : i32
    %1 = arith.addi %0, %c0_i32 : i32
    %2 = arith.index_cast %1 : i32 to index
    %3 = memref.load %arg1[%2] : memref<2xi32, #tpu.memory_space<smem>>
    %c0_i32_0 = arith.constant 0 : i32
    %c0_i32_1 = arith.constant 0 : i32
    %c0_i32_2 = arith.constant 0 : i32
    %c0_i32_3 = arith.constant 0 : i32
    %4 = tpu.memref_slice %arg3[%3, %c0_i32_2, %c0_i32_3] : memref<3x8x1280xbf16, #tpu.memory_space<any>> -> memref<1x8x1280xbf16, #tpu.memory_space<any>>
    %5 = tpu.memref_squeeze %4 : memref<1x8x1280xbf16, #tpu.memory_space<any>> -> memref<8x1280xbf16, #tpu.memory_space<any>>
    %c0_i32_4 = arith.constant 0 : i32
    %c0_i32_5 = arith.constant 0 : i32
    %6 = tpu.memref_slice %arg23[%c0_i32_0, %c0_i32_4, %c0_i32_5] : memref<2x8x1280xbf16, #tpu.memory_space<vmem>> -> memref<1x8x1280xbf16, #tpu.memory_space<vmem>>
    %7 = tpu.memref_squeeze %6 : memref<1x8x1280xbf16, #tpu.memory_space<vmem>> -> memref<8x1280xbf16, #tpu.memory_space<vmem>>
    %8 = tpu.memref_slice %arg24[%c0_i32_1] : memref<2x!tpu.dma_semaphore, #tpu.memory_space<semaphore_mem>> -> memref<1x!tpu.dma_semaphore, #tpu.memory_space<semaphore_mem>>
    %9 = tpu.memref_squeeze %8 : memref<1x!tpu.dma_semaphore, #tpu.memory_space<semaphore_mem>> -> memref<!tpu.dma_semaphore, #tpu.memory_space<semaphore_mem>>
    tpu.enqueue_dma source(%5 : memref<8x1280xbf16, #tpu.memory_space<any>>) target(%7 : memref<8x1280xbf16, #tpu.memory_space<vmem>>) target_semaphore(%9 : memref<!tpu.dma_semaphore, #tpu.memory_space<semaphore_mem>>)
    %c2_i32_6 = arith.constant 2 : i32
    %10 = arith.muli %arg0, %c2_i32_6 : i32
    %c1_i32 = arith.constant 1 : i32
    %11 = arith.addi %10, %c1_i32 : i32
    %12 = arith.index_cast %11 : i32 to index
    %13 = memref.load %arg1[%12] : memref<2xi32, #tpu.memory_space<smem>>
    %c1_i32_7 = arith.constant 1 : i32
    %c1_i32_8 = arith.constant 1 : i32
    %c0_i32_9 = arith.constant 0 : i32
    %c0_i32_10 = arith.constant 0 : i32
    %14 = tpu.memref_slice %arg3[%13, %c0_i32_9, %c0_i32_10] : memref<3x8x1280xbf16, #tpu.memory_space<any>> -> memref<1x8x1280xbf16, #tpu.memory_space<any>>
    %15 = tpu.memref_squeeze %14 : memref<1x8x1280xbf16, #tpu.memory_space<any>> -> memref<8x1280xbf16, #tpu.memory_space<any>>
    %c0_i32_11 = arith.constant 0 : i32
    %c0_i32_12 = arith.constant 0 : i32
    %16 = tpu.memref_slice %arg23[%c1_i32_7, %c0_i32_11, %c0_i32_12] : memref<2x8x1280xbf16, #tpu.memory_space<vmem>> -> memref<1x8x1280xbf16, #tpu.memory_space<vmem>>
    %17 = tpu.memref_squeeze %16 : memref<1x8x1280xbf16, #tpu.memory_space<vmem>> -> memref<8x1280xbf16, #tpu.memory_space<vmem>>
    %18 = tpu.memref_slice %arg24[%c1_i32_8] : memref<2x!tpu.dma_semaphore, #tpu.memory_space<semaphore_mem>> -> memref<1x!tpu.dma_semaphore, #tpu.memory_space<semaphore_mem>>
    %19 = tpu.memref_squeeze %18 : memref<1x!tpu.dma_semaphore, #tpu.memory_space<semaphore_mem>> -> memref<!tpu.dma_semaphore, #tpu.memory_space<semaphore_mem>>
    tpu.enqueue_dma source(%15 : memref<8x1280xbf16, #tpu.memory_space<any>>) target(%17 : memref<8x1280xbf16, #tpu.memory_space<vmem>>) target_semaphore(%19 : memref<!tpu.dma_semaphore, #tpu.memory_space<semaphore_mem>>)
    %c0_i32_13 = arith.constant 0 : i32
    %c0_i32_14 = arith.constant 0 : i32
    %c0_i32_15 = arith.constant 0 : i32
    %c0_i32_16 = arith.constant 0 : i32
    %20 = tpu.memref_slice %arg3[%3, %c0_i32_15, %c0_i32_16] : memref<3x8x1280xbf16, #tpu.memory_space<any>> -> memref<1x8x1280xbf16, #tpu.memory_space<any>>
    %21 = tpu.memref_squeeze %20 : memref<1x8x1280xbf16, #tpu.memory_space<any>> -> memref<8x1280xbf16, #tpu.memory_space<any>>
    %c0_i32_17 = arith.constant 0 : i32
    %c0_i32_18 = arith.constant 0 : i32
    %22 = tpu.memref_slice %arg23[%c0_i32_13, %c0_i32_17, %c0_i32_18] : memref<2x8x1280xbf16, #tpu.memory_space<vmem>> -> memref<1x8x1280xbf16, #tpu.memory_space<vmem>>
    %23 = tpu.memref_squeeze %22 : memref<1x8x1280xbf16, #tpu.memory_space<vmem>> -> memref<8x1280xbf16, #tpu.memory_space<vmem>>
    %24 = tpu.memref_slice %arg24[%c0_i32_14] : memref<2x!tpu.dma_semaphore, #tpu.memory_space<semaphore_mem>> -> memref<1x!tpu.dma_semaphore, #tpu.memory_space<semaphore_mem>>
    %25 = tpu.memref_squeeze %24 : memref<1x!tpu.dma_semaphore, #tpu.memory_space<semaphore_mem>> -> memref<!tpu.dma_semaphore, #tpu.memory_space<semaphore_mem>>
    tpu.wait_dma2 semaphore(%25 : memref<!tpu.dma_semaphore, #tpu.memory_space<semaphore_mem>>) src(%21 : memref<8x1280xbf16, #tpu.memory_space<any>>) dst(%23 : memref<8x1280xbf16, #tpu.memory_space<vmem>>)
    %c1_i32_19 = arith.constant 1 : i32
    %c1_i32_20 = arith.constant 1 : i32
    %c0_i32_21 = arith.constant 0 : i32
    %c0_i32_22 = arith.constant 0 : i32
    %26 = tpu.memref_slice %arg3[%13, %c0_i32_21, %c0_i32_22] : memref<3x8x1280xbf16, #tpu.memory_space<any>> -> memref<1x8x1280xbf16, #tpu.memory_space<any>>
    %27 = tpu.memref_squeeze %26 : memref<1x8x1280xbf16, #tpu.memory_space<any>> -> memref<8x1280xbf16, #tpu.memory_space<any>>
    %c0_i32_23 = arith.constant 0 : i32
    %c0_i32_24 = arith.constant 0 : i32
    %28 = tpu.memref_slice %arg23[%c1_i32_19, %c0_i32_23, %c0_i32_24] : memref<2x8x1280xbf16, #tpu.memory_space<vmem>> -> memref<1x8x1280xbf16, #tpu.memory_space<vmem>>
    %29 = tpu.memref_squeeze %28 : memref<1x8x1280xbf16, #tpu.memory_space<vmem>> -> memref<8x1280xbf16, #tpu.memory_space<vmem>>
    %30 = tpu.memref_slice %arg24[%c1_i32_20] : memref<2x!tpu.dma_semaphore, #tpu.memory_space<semaphore_mem>> -> memref<1x!tpu.dma_semaphore, #tpu.memory_space<semaphore_mem>>
    %31 = tpu.memref_squeeze %30 : memref<1x!tpu.dma_semaphore, #tpu.memory_space<semaphore_mem>> -> memref<!tpu.dma_semaphore, #tpu.memory_space<semaphore_mem>>
    tpu.wait_dma2 semaphore(%31 : memref<!tpu.dma_semaphore, #tpu.memory_space<semaphore_mem>>) src(%27 : memref<8x1280xbf16, #tpu.memory_space<any>>) dst(%29 : memref<8x1280xbf16, #tpu.memory_space<vmem>>)
    %c0 = arith.constant 0 : index
    %c0_25 = arith.constant 0 : index
    %c0_26 = arith.constant 0 : index
    %32 = vector.load %arg23[%c0, %c0_25, %c0_26] : memref<2x8x1280xbf16, #tpu.memory_space<vmem>>, vector<2x8x1280xbf16>
    %33 = vector.shape_cast %32 : vector<2x8x1280xbf16> to vector<16x1280xbf16>
    %c0_27 = arith.constant 0 : index
    %c0_28 = arith.constant 0 : index
    %34 = vector.load %arg4[%c0_27, %c0_28] : memref<1280x512xbf16, #tpu.memory_space<vmem>>, vector<1280x512xbf16>
    %cst = arith.constant dense<0.000000e+00> : vector<16x512xf32>
    %35 = tpu.matmul %33, %34, %cst {dimension_numbers = #tpu.dot_dimension_numbers<[1], [0], [0], [1], [0, 0, 1, 1], [], []>} : vector<16x1280xbf16>, vector<1280x512xbf16>, vector<16x512xf32> -> vector<16x512xf32>
    %c0_29 = arith.constant 0 : index
    %c0_30 = arith.constant 0 : index
    %36 = vector.load %arg5[%c0_29, %c0_30] : memref<1x512xf32, #tpu.memory_space<vmem>>, vector<1x512xf32>
    %37 = vector.broadcast %36 : vector<1x512xf32> to vector<16x512xf32>
    %38 = arith.addf %35, %37 : vector<16x512xf32>
    %cst_31 = arith.constant 0.000000e+00 : f32
    %39 = vector.broadcast %cst_31 : f32 to vector<16x512xf32>
    %40 = arith.maximumf %38, %39 : vector<16x512xf32>
    %41 = arith.truncf %40 : vector<16x512xf32> to vector<16x512xbf16>
    %c0_32 = arith.constant 0 : index
    %c0_33 = arith.constant 0 : index
    %42 = vector.load %arg6[%c0_32, %c0_33] : memref<512x128xbf16, #tpu.memory_space<vmem>>, vector<512x128xbf16>
    %cst_34 = arith.constant dense<0.000000e+00> : vector<16x128xf32>
    %43 = tpu.matmul %41, %42, %cst_34 {dimension_numbers = #tpu.dot_dimension_numbers<[1], [0], [0], [1], [0, 0, 1, 1], [], []>} : vector<16x512xbf16>, vector<512x128xbf16>, vector<16x128xf32> -> vector<16x128xf32>
    %c0_35 = arith.constant 0 : index
    %c0_36 = arith.constant 0 : index
    %44 = vector.load %arg7[%c0_35, %c0_36] : memref<1x128xf32, #tpu.memory_space<vmem>>, vector<1x128xf32>
    %45 = vector.broadcast %44 : vector<1x128xf32> to vector<16x128xf32>
    %46 = arith.addf %43, %45 : vector<16x128xf32>
    %cst_37 = arith.constant 0.000000e+00 : f32
    %47 = vector.broadcast %cst_37 : f32 to vector<16x128xf32>
    %48 = arith.maximumf %46, %47 : vector<16x128xf32>
    %49 = vector.shape_cast %48 : vector<16x128xf32> to vector<2x8x128xf32>
    %c0_38 = arith.constant 0 : index
    %c0_39 = arith.constant 0 : index
    %c0_40 = arith.constant 0 : index
    %50 = vector.load %arg2[%c0_38, %c0_39, %c0_40] : memref<2x45x128xf32, #tpu.memory_space<vmem>>, vector<2x45x128xf32>
    %51 = vector.shape_cast %50 : vector<2x45x128xf32> to vector<90x128xf32>
    %c0_41 = arith.constant 0 : index
    %c0_42 = arith.constant 0 : index
    %52 = vector.load %arg8[%c0_41, %c0_42] : memref<128x128xf32, #tpu.memory_space<vmem>>, vector<128x128xf32>
    %cst_43 = arith.constant dense<0.000000e+00> : vector<16x128xf32>
    %53 = tpu.matmul %48, %52, %cst_43 {dimension_numbers = #tpu.dot_dimension_numbers<[1], [0], [0], [1], [0, 0, 1, 1], [], []>} : vector<16x128xf32>, vector<128x128xf32>, vector<16x128xf32> -> vector<16x128xf32>
    %54 = vector.shape_cast %53 : vector<16x128xf32> to vector<2x8x128xf32>
    "tpu.trace_start"() <{level = 10 : i32, message = "bld,bnd->bln"}> : () -> ()
    %cst_44 = arith.constant dense<0.000000e+00> : vector<2x8x45xf32>
    %55 = tpu.matmul %54, %50, %cst_44 {dimension_numbers = #tpu.dot_dimension_numbers<[2], [2], [1], [1], [0, 0, 0, 1, 1, 1], [0], [0]>} : vector<2x8x128xf32>, vector<2x45x128xf32>, vector<2x8x45xf32> -> vector<2x8x45xf32>
    "tpu.trace_stop"() : () -> ()
    %56 = math.tanh %55 : vector<2x8x45xf32>
    "tpu.trace_start"() <{level = 10 : i32, message = "bnd,bld->bnl"}> : () -> ()
    %cst_45 = arith.constant dense<0.000000e+00> : vector<2x45x8xf32>
    %57 = tpu.matmul %50, %54, %cst_45 {dimension_numbers = #tpu.dot_dimension_numbers<[2], [2], [1], [1], [0, 0, 0, 1, 1, 1], [0], [0]>} : vector<2x45x128xf32>, vector<2x8x128xf32>, vector<2x45x8xf32> -> vector<2x45x8xf32>
    "tpu.trace_stop"() : () -> ()
    %58 = math.tanh %57 : vector<2x45x8xf32>
    %c0_46 = arith.constant 0 : index
    %c0_47 = arith.constant 0 : index
    %59 = vector.load %arg9[%c0_46, %c0_47] : memref<128x64xf32, #tpu.memory_space<vmem>>, vector<128x64xf32>
    %cst_48 = arith.constant dense<0.000000e+00> : vector<90x64xf32>
    %60 = tpu.matmul %51, %59, %cst_48 {dimension_numbers = #tpu.dot_dimension_numbers<[1], [0], [0], [1], [0, 0, 1, 1], [], []>} : vector<90x128xf32>, vector<128x64xf32>, vector<90x64xf32> -> vector<90x64xf32>
    %61 = vector.shape_cast %60 : vector<90x64xf32> to vector<2x45x64xf32>
    %c0_49 = arith.constant 0 : index
    %c0_50 = arith.constant 0 : index
    %62 = vector.load %arg10[%c0_49, %c0_50] : memref<128x64xf32, #tpu.memory_space<vmem>>, vector<128x64xf32>
    %cst_51 = arith.constant dense<0.000000e+00> : vector<16x64xf32>
    %63 = tpu.matmul %48, %62, %cst_51 {dimension_numbers = #tpu.dot_dimension_numbers<[1], [0], [0], [1], [0, 0, 1, 1], [], []>} : vector<16x128xf32>, vector<128x64xf32>, vector<16x64xf32> -> vector<16x64xf32>
    %64 = vector.shape_cast %63 : vector<16x64xf32> to vector<2x8x64xf32>
    "tpu.trace_start"() <{level = 10 : i32, message = "bnl,blk->bnk"}> : () -> ()
    %cst_52 = arith.constant dense<0.000000e+00> : vector<2x45x64xf32>
    %65 = tpu.matmul %58, %64, %cst_52 {dimension_numbers = #tpu.dot_dimension_numbers<[2], [1], [1], [2], [0, 0, 0, 1, 1, 2], [0], [0]>} : vector<2x45x8xf32>, vector<2x8x64xf32>, vector<2x45x64xf32> -> vector<2x45x64xf32>
    "tpu.trace_stop"() : () -> ()
    %66 = arith.addf %61, %65 : vector<2x45x64xf32>
    %67 = math.tanh %66 : vector<2x45x64xf32>
    "tpu.trace_start"() <{level = 10 : i32, message = "bln,bnk->blk"}> : () -> ()
    %cst_53 = arith.constant dense<0.000000e+00> : vector<2x8x64xf32>
    %68 = tpu.matmul %56, %61, %cst_53 {dimension_numbers = #tpu.dot_dimension_numbers<[2], [1], [1], [2], [0, 0, 0, 1, 1, 2], [0], [0]>} : vector<2x8x45xf32>, vector<2x45x64xf32>, vector<2x8x64xf32> -> vector<2x8x64xf32>
    "tpu.trace_stop"() : () -> ()
    %69 = arith.addf %64, %68 : vector<2x8x64xf32>
    %70 = math.tanh %69 : vector<2x8x64xf32>
    %c0_54 = arith.constant 0 : index
    %c0_55 = arith.constant 0 : index
    %71 = vector.load %arg11[%c0_54, %c0_55] : memref<1x64xf32, #tpu.memory_space<vmem>>, vector<1x64xf32>
    %72 = vector.shape_cast %71 : vector<1x64xf32> to vector<1x1x64xf32>
    %c0_56 = arith.constant 0 : index
    %c0_57 = arith.constant 0 : index
    %73 = vector.load %arg12[%c0_56, %c0_57] : memref<1x64xf32, #tpu.memory_space<vmem>>, vector<1x64xf32>
    %74 = vector.shape_cast %73 : vector<1x64xf32> to vector<1x1x64xf32>
    %75 = vector.broadcast %72 : vector<1x1x64xf32> to vector<2x45x64xf32>
    %76 = arith.mulf %67, %75 : vector<2x45x64xf32>
    %cst_58 = arith.constant dense<0.000000e+00> : vector<2x45xf32>
    %77 = vector.multi_reduction <add>, %76, %cst_58 [2] : vector<2x45x64xf32> to vector<2x45xf32>
    %78 = vector.broadcast %74 : vector<1x1x64xf32> to vector<2x8x64xf32>
    %79 = arith.mulf %70, %78 : vector<2x8x64xf32>
    %cst_59 = arith.constant dense<0.000000e+00> : vector<2x8xf32>
    %80 = vector.multi_reduction <add>, %79, %cst_59 [2] : vector<2x8x64xf32> to vector<2x8xf32>
    %cst_60 = arith.constant dense<0xFF800000> : vector<2xf32>
    %81 = vector.multi_reduction <maximumf>, %77, %cst_60 [1] : vector<2x45xf32> to vector<2xf32>
    %82 = vector.shape_cast %81 : vector<2xf32> to vector<2x1xf32>
    %83 = vector.broadcast %82 : vector<2x1xf32> to vector<2x45xf32>
    %84 = arith.subf %77, %83 : vector<2x45xf32>
    %85 = math.exp %84 : vector<2x45xf32>
    %cst_61 = arith.constant dense<0.000000e+00> : vector<2xf32>
    %86 = vector.multi_reduction <add>, %85, %cst_61 [1] : vector<2x45xf32> to vector<2xf32>
    %87 = vector.shape_cast %86 : vector<2xf32> to vector<2x1xf32>
    %88 = vector.broadcast %87 : vector<2x1xf32> to vector<2x45xf32>
    %89 = arith.divf %85, %88 : vector<2x45xf32>
    %cst_62 = arith.constant dense<0xFF800000> : vector<2xf32>
    %90 = vector.multi_reduction <maximumf>, %80, %cst_62 [1] : vector<2x8xf32> to vector<2xf32>
    %91 = vector.shape_cast %90 : vector<2xf32> to vector<2x1xf32>
    %92 = vector.broadcast %91 : vector<2x1xf32> to vector<2x8xf32>
    %93 = arith.subf %80, %92 : vector<2x8xf32>
    %94 = math.exp %93 : vector<2x8xf32>
    %cst_63 = arith.constant dense<0.000000e+00> : vector<2xf32>
    %95 = vector.multi_reduction <add>, %94, %cst_63 [1] : vector<2x8xf32> to vector<2xf32>
    %96 = vector.shape_cast %95 : vector<2xf32> to vector<2x1xf32>
    %97 = vector.broadcast %96 : vector<2x1xf32> to vector<2x8xf32>
    %98 = arith.divf %94, %97 : vector<2x8xf32>
    %99 = vector.shape_cast %89 : vector<2x45xf32> to vector<2x1x45xf32>
    "tpu.trace_start"() <{level = 10 : i32, message = "bqn,bnd->bqd"}> : () -> ()
    %cst_64 = arith.constant dense<0.000000e+00> : vector<2x1x128xf32>
    %100 = tpu.matmul %99, %50, %cst_64 {dimension_numbers = #tpu.dot_dimension_numbers<[2], [1], [1], [2], [0, 0, 0, 1, 1, 2], [0], [0]>} : vector<2x1x45xf32>, vector<2x45x128xf32>, vector<2x1x128xf32> -> vector<2x1x128xf32>
    "tpu.trace_stop"() : () -> ()
    %101 = vector.shape_cast %100 : vector<2x1x128xf32> to vector<2x128xf32>
    %102 = vector.shape_cast %98 : vector<2x8xf32> to vector<2x1x8xf32>
    "tpu.trace_start"() <{level = 10 : i32, message = "bql,bld->bqd"}> : () -> ()
    %cst_65 = arith.constant dense<0.000000e+00> : vector<2x1x128xf32>
    %103 = tpu.matmul %102, %49, %cst_65 {dimension_numbers = #tpu.dot_dimension_numbers<[2], [1], [1], [2], [0, 0, 0, 1, 1, 2], [0], [0]>} : vector<2x1x8xf32>, vector<2x8x128xf32>, vector<2x1x128xf32> -> vector<2x1x128xf32>
    "tpu.trace_stop"() : () -> ()
    %104 = vector.shape_cast %103 : vector<2x1x128xf32> to vector<2x128xf32>
    %c0_66 = arith.constant 0 : index
    %c0_67 = arith.constant 0 : index
    %105 = vector.load %arg13[%c0_66, %c0_67] : memref<128x512xf32, #tpu.memory_space<vmem>>, vector<128x512xf32>
    %cst_68 = arith.constant dense<0.000000e+00> : vector<2x512xf32>
    %106 = tpu.matmul %101, %105, %cst_68 {dimension_numbers = #tpu.dot_dimension_numbers<[1], [0], [0], [1], [0, 0, 1, 1], [], []>} : vector<2x128xf32>, vector<128x512xf32>, vector<2x512xf32> -> vector<2x512xf32>
    %c0_69 = arith.constant 0 : index
    %c0_70 = arith.constant 0 : index
    %107 = vector.load %arg14[%c0_69, %c0_70] : memref<128x512xf32, #tpu.memory_space<vmem>>, vector<128x512xf32>
    %cst_71 = arith.constant dense<0.000000e+00> : vector<2x512xf32>
    %108 = tpu.matmul %104, %107, %cst_71 {dimension_numbers = #tpu.dot_dimension_numbers<[1], [0], [0], [1], [0, 0, 1, 1], [], []>} : vector<2x128xf32>, vector<128x512xf32>, vector<2x512xf32> -> vector<2x512xf32>
    %109 = arith.addf %106, %108 : vector<2x512xf32>
    %c0_72 = arith.constant 0 : index
    %c0_73 = arith.constant 0 : index
    %110 = vector.load %arg15[%c0_72, %c0_73] : memref<1x512xf32, #tpu.memory_space<vmem>>, vector<1x512xf32>
    %111 = vector.broadcast %110 : vector<1x512xf32> to vector<2x512xf32>
    %112 = arith.addf %109, %111 : vector<2x512xf32>
    %cst_74 = arith.constant 0.000000e+00 : f32
    %113 = vector.broadcast %cst_74 : f32 to vector<2x512xf32>
    %114 = arith.maximumf %112, %113 : vector<2x512xf32>
    %c0_75 = arith.constant 0 : index
    %c0_76 = arith.constant 0 : index
    %115 = vector.load %arg16[%c0_75, %c0_76] : memref<512x128xf32, #tpu.memory_space<vmem>>, vector<512x128xf32>
    %cst_77 = arith.constant dense<0.000000e+00> : vector<2x128xf32>
    %116 = tpu.matmul %114, %115, %cst_77 {dimension_numbers = #tpu.dot_dimension_numbers<[1], [0], [0], [1], [0, 0, 1, 1], [], []>} : vector<2x512xf32>, vector<512x128xf32>, vector<2x128xf32> -> vector<2x128xf32>
    %c0_78 = arith.constant 0 : index
    %c0_79 = arith.constant 0 : index
    %117 = vector.load %arg17[%c0_78, %c0_79] : memref<1x128xf32, #tpu.memory_space<vmem>>, vector<1x128xf32>
    %118 = vector.broadcast %117 : vector<1x128xf32> to vector<2x128xf32>
    %119 = arith.addf %116, %118 : vector<2x128xf32>
    %cst_80 = arith.constant 0.000000e+00 : f32
    %120 = vector.broadcast %cst_80 : f32 to vector<2x128xf32>
    %121 = arith.maximumf %119, %120 : vector<2x128xf32>
    %c0_81 = arith.constant 0 : index
    %c0_82 = arith.constant 0 : index
    %122 = vector.load %arg18[%c0_81, %c0_82] : memref<1x128xf32, #tpu.memory_space<vmem>>, vector<1x128xf32>
    %123 = vector.broadcast %122 : vector<1x128xf32> to vector<2x128xf32>
    %124 = arith.mulf %121, %123 : vector<2x128xf32>
    %cst_83 = arith.constant dense<0.000000e+00> : vector<2xf32>
    %125 = vector.multi_reduction <add>, %124, %cst_83 [1] : vector<2x128xf32> to vector<2xf32>
    %126 = vector.shape_cast %125 : vector<2xf32> to vector<2x1xf32>
    %c0_84 = arith.constant 0 : index
    %c0_85 = arith.constant 0 : index
    %127 = vector.load %arg19[%c0_84, %c0_85] : memref<1x1xf32, #tpu.memory_space<vmem>>, vector<1x1xf32>
    %128 = vector.broadcast %127 : vector<1x1xf32> to vector<2x1xf32>
    %129 = arith.addf %126, %128 : vector<2x1xf32>
    %c0_86 = arith.constant 0 : index
    %c0_87 = arith.constant 0 : index
    %130 = vector.load %arg20[%c0_86, %c0_87] : memref<2x1xf32, #tpu.memory_space<vmem>>, vector<2x1xf32>
    tpu.vector_store %arg20[%c0_86, %c0_87], %129 {strides = array<i32>} : memref<2x1xf32, #tpu.memory_space<vmem>>, vector<2x1xf32>,
    %131 = vector.shape_cast %89 : vector<2x45xf32> to vector<2x1x45xf32>
    %c0_88 = arith.constant 0 : index
    %c0_89 = arith.constant 0 : index
    %c0_90 = arith.constant 0 : index
    %132 = vector.load %arg21[%c0_88, %c0_89, %c0_90] : memref<2x1x45xf32, #tpu.memory_space<vmem>>, vector<2x1x45xf32>
    tpu.vector_store %arg21[%c0_88, %c0_89, %c0_90], %131 {strides = array<i32>} : memref<2x1x45xf32, #tpu.memory_space<vmem>>, vector<2x1x45xf32>,
    %133 = vector.shape_cast %98 : vector<2x8xf32> to vector<2x1x8xf32>
    %c0_91 = arith.constant 0 : index
    %c0_92 = arith.constant 0 : index
    %c0_93 = arith.constant 0 : index
    %134 = vector.load %arg22[%c0_91, %c0_92, %c0_93] : memref<2x1x8xf32, #tpu.memory_space<vmem>>, vector<2x1x8xf32>
    tpu.vector_store %arg22[%c0_91, %c0_92, %c0_93], %133 {strides = array<i32>} : memref<2x1x8xf32, #tpu.memory_space<vmem>>, vector<2x1x8xf32>,
    return
  }
  func.func @transform_0(%arg0: i32, %arg1: memref<2xi32, #tpu.memory_space<smem>>) -> (i32, i32, i32) {
    %c0_i32 = arith.constant 0 : i32
    %c0_i32_0 = arith.constant 0 : i32
    %c0_i32_1 = arith.constant 0 : i32
    return %arg0, %c0_i32, %c0_i32_0 : i32, i32, i32
  }
  func.func @transform_2(%arg0: i32, %arg1: memref<2xi32, #tpu.memory_space<smem>>) -> (i32, i32) {
    %c0_i32 = arith.constant 0 : i32
    %c0_i32_0 = arith.constant 0 : i32
    %c0_i32_1 = arith.constant 0 : i32
    return %c0_i32, %c0_i32_0 : i32, i32
  }
  func.func @transform_3(%arg0: i32, %arg1: memref<2xi32, #tpu.memory_space<smem>>) -> (i32, i32) {
    %c0_i32 = arith.constant 0 : i32
    %c0_i32_0 = arith.constant 0 : i32
    %c0_i32_1 = arith.constant 0 : i32
    return %c0_i32, %c0_i32_0 : i32, i32
  }
  func.func @transform_4(%arg0: i32, %arg1: memref<2xi32, #tpu.memory_space<smem>>) -> (i32, i32) {
    %c0_i32 = arith.constant 0 : i32
    %c0_i32_0 = arith.constant 0 : i32
    %c0_i32_1 = arith.constant 0 : i32
    return %c0_i32, %c0_i32_0 : i32, i32
  }
  func.func @transform_5(%arg0: i32, %arg1: memref<2xi32, #tpu.memory_space<smem>>) -> (i32, i32) {
    %c0_i32 = arith.constant 0 : i32
    %c0_i32_0 = arith.constant 0 : i32
    %c0_i32_1 = arith.constant 0 : i32
    return %c0_i32, %c0_i32_0 : i32, i32
  }
  func.func @transform_6(%arg0: i32, %arg1: memref<2xi32, #tpu.memory_space<smem>>) -> (i32, i32) {
    %c0_i32 = arith.constant 0 : i32
    %c0_i32_0 = arith.constant 0 : i32
    %c0_i32_1 = arith.constant 0 : i32
    return %c0_i32, %c0_i32_0 : i32, i32
  }
  func.func @transform_7(%arg0: i32, %arg1: memref<2xi32, #tpu.memory_space<smem>>) -> (i32, i32) {
    %c0_i32 = arith.constant 0 : i32
    %c0_i32_0 = arith.constant 0 : i32
    %c0_i32_1 = arith.constant 0 : i32
    return %c0_i32, %c0_i32_0 : i32, i32
  }
  func.func @transform_8(%arg0: i32, %arg1: memref<2xi32, #tpu.memory_space<smem>>) -> (i32, i32) {
    %c0_i32 = arith.constant 0 : i32
    %c0_i32_0 = arith.constant 0 : i32
    %c0_i32_1 = arith.constant 0 : i32
    return %c0_i32, %c0_i32_0 : i32, i32
  }
  func.func @transform_9(%arg0: i32, %arg1: memref<2xi32, #tpu.memory_space<smem>>) -> (i32, i32) {
    %c0_i32 = arith.constant 0 : i32
    %c0_i32_0 = arith.constant 0 : i32
    %c0_i32_1 = arith.constant 0 : i32
    return %c0_i32, %c0_i32_0 : i32, i32
  }
  func.func @transform_10(%arg0: i32, %arg1: memref<2xi32, #tpu.memory_space<smem>>) -> (i32, i32) {
    %c0_i32 = arith.constant 0 : i32
    %c0_i32_0 = arith.constant 0 : i32
    %c0_i32_1 = arith.constant 0 : i32
    return %c0_i32, %c0_i32_0 : i32, i32
  }
  func.func @transform_11(%arg0: i32, %arg1: memref<2xi32, #tpu.memory_space<smem>>) -> (i32, i32) {
    %c0_i32 = arith.constant 0 : i32
    %c0_i32_0 = arith.constant 0 : i32
    %c0_i32_1 = arith.constant 0 : i32
    return %c0_i32, %c0_i32_0 : i32, i32
  }
  func.func @transform_12(%arg0: i32, %arg1: memref<2xi32, #tpu.memory_space<smem>>) -> (i32, i32) {
    %c0_i32 = arith.constant 0 : i32
    %c0_i32_0 = arith.constant 0 : i32
    %c0_i32_1 = arith.constant 0 : i32
    return %c0_i32, %c0_i32_0 : i32, i32
  }
  func.func @transform_13(%arg0: i32, %arg1: memref<2xi32, #tpu.memory_space<smem>>) -> (i32, i32) {
    %c0_i32 = arith.constant 0 : i32
    %c0_i32_0 = arith.constant 0 : i32
    %c0_i32_1 = arith.constant 0 : i32
    return %c0_i32, %c0_i32_0 : i32, i32
  }
  func.func @transform_14(%arg0: i32, %arg1: memref<2xi32, #tpu.memory_space<smem>>) -> (i32, i32) {
    %c0_i32 = arith.constant 0 : i32
    %c0_i32_0 = arith.constant 0 : i32
    %c0_i32_1 = arith.constant 0 : i32
    return %c0_i32, %c0_i32_0 : i32, i32
  }
  func.func @transform_15(%arg0: i32, %arg1: memref<2xi32, #tpu.memory_space<smem>>) -> (i32, i32) {
    %c0_i32 = arith.constant 0 : i32
    %c0_i32_0 = arith.constant 0 : i32
    %c0_i32_1 = arith.constant 0 : i32
    return %c0_i32, %c0_i32_0 : i32, i32
  }
  func.func @transform_16(%arg0: i32, %arg1: memref<2xi32, #tpu.memory_space<smem>>) -> (i32, i32) {
    %c0_i32 = arith.constant 0 : i32
    %c0_i32_0 = arith.constant 0 : i32
    %c0_i32_1 = arith.constant 0 : i32
    return %c0_i32, %c0_i32_0 : i32, i32
  }
  func.func @transform_17(%arg0: i32, %arg1: memref<2xi32, #tpu.memory_space<smem>>) -> (i32, i32) {
    %c0_i32 = arith.constant 0 : i32
    %c0_i32_0 = arith.constant 0 : i32
    %c0_i32_1 = arith.constant 0 : i32
    return %c0_i32, %c0_i32_0 : i32, i32
  }
  func.func @transform_18(%arg0: i32, %arg1: memref<2xi32, #tpu.memory_space<smem>>) -> (i32, i32) {
    %c0_i32 = arith.constant 0 : i32
    %c0_i32_0 = arith.constant 0 : i32
    return %arg0, %c0_i32 : i32, i32
  }
  func.func @transform_19(%arg0: i32, %arg1: memref<2xi32, #tpu.memory_space<smem>>) -> (i32, i32, i32) {
    %c0_i32 = arith.constant 0 : i32
    %c0_i32_0 = arith.constant 0 : i32
    %c0_i32_1 = arith.constant 0 : i32
    return %arg0, %c0_i32, %c0_i32_0 : i32, i32, i32
  }
  func.func @transform_20(%arg0: i32, %arg1: memref<2xi32, #tpu.memory_space<smem>>) -> (i32, i32, i32) {
    %c0_i32 = arith.constant 0 : i32
    %c0_i32_0 = arith.constant 0 : i32
    %c0_i32_1 = arith.constant 0 : i32
    return %arg0, %c0_i32, %c0_i32_0 : i32, i32, i32
  }
}

</mosaic_0001>

<bundles_post_ra>
// kernel: gin_bert_forward.2
= control target key start
LH: loop header
LB: loop body
LE: loop exit
PB: predicated region body
PF: predicated region fallthrough
CT: control target
= control target key end

     0   :  { %s4875_s0 = inlined_call_operand.hbm [shape: f32[13,78], index: 0, kind: input, shape index: {}]   ;;  %s4876_s1 = inlined_call_operand.hbm [shape: bf16[13,13], index: 1, kind: input, shape index: {}]   ;;  %s4877_s2 = inlined_call_operand.hbm [shape: bf16[2,13], index: 2, kind: input, shape index: {}]   ;;  %s4878_s3 = inlined_call_operand.vmem [shape: bf16[13,2], index: 3, kind: input, shape index: {}]   ;;  %s4879_s4 = inlined_call_operand.vmem [shape: f32[2,1], index: 4, kind: input, shape index: {}]   ;;  %s4880_s5 = inlined_call_operand.vmem [shape: bf16[90,13], index: 5, kind: input, shape index: {}]   ;;  %s4881_s6 = inlined_call_operand.vmem [shape: f32[78,32], index: 6, kind: input, shape index: {}]   ;;  %s4882_s7 = inlined_call_operand.hbm [shape: f32[4,32,32], index: 7, kind: input, shape index: {}]   ;;  %s4883_s8 = inlined_call_operand.hbm [shape: f32[5,1,32], index: 8, kind: input, shape index: {}]   ;;  %s4884_s9 = inlined_call_operand.hbm [shape: f32[5,32,32], index: 9, kind: input, shape index: {}]   ;;  %s4885_s10 = inlined_call_operand.hbm [shape: f32[5,1,32], index: 10, kind: input, shape index: {}]   ;;  %s4886_s11 = inlined_call_operand.hbm [shape: f32[5,1,32], index: 11, kind: input, shape index: {}]   ;;  %s4887_s12 = inlined_call_operand.hbm [shape: f32[5,1,32], index: 12, kind: input, shape index: {}]   ;;  %s4888_s13 = inlined_call_operand.hbm [shape: f32[5,1,32], index: 13, kind: input, shape index: {}]   ;;  %s4889_s14 = inlined_call_operand.hbm [shape: f32[32,128], index: 14, kind: input, shape index: {}]   ;;  %s4890_s15 = inlined_call_operand.hbm [shape: f32[1,128], index: 15, kind: input, shape index: {}]   ;;  %s4891_s16 = inlined_call_operand.vmem [shape: f32[90,128], index: 16, kind: output, shape index: {}]  }
   0x1   :  { %4894 = sst [smem:[#allocation28_spill]] %s4875_s0 }
   0x2   :  { %4895 = sst [smem:[#allocation29_spill]] %s4891_s16 }
   0x3   :  { %21 = vsyncpa [#allocation3], 0 }
   0x4   :  { %22 = vsyncpa [#allocation5], 0 }
   0x5   :  { %23 = vsyncpa [#allocation8], 0 }
   0x6   :  { %24 = vsyncpa [#allocation11], 0 }
   0x7   :  { %25 = vsyncpa [#allocation14], 0 }
   0x8   :  { %26 = vsyncpa [#allocation17], 0 }
   0x9   :  { %27 = vsyncpa [#allocation20], 0  ;;  %s4217_s21 = smov [#allocation4]   ;;  %s3939_s25 = scalar_lea.hbm %s4876_s1, 128 }
   0xa   :  { %s45_s22 = sshll.u32 %s4217_s21, 4  ;;  %p3940_p0 = scmp.ne.s32.totalorder %s4876_s1, %s3939_s25  ;;  %s46_s22 = int_to_ptr.vmem [resolvable:$true] %s45_s22 }
   0xb   :  { %p3943_p1 = scmp.lt.u32.totalorder %s3939_s25, %s4876_s1 }
   0xd   :  { %p3945_p2 = pnand %p3943_p1, %p3940_p0 }
   0xf   :  { %3948 = shalt.err (!%p3945_p2)
}
  0x10   :  { %s3949_s30 = scalar_lea.vmem %s46_s22, 128  ;;  %p3954_p4 = scmp.lt.s32.totalorder %s46_s22, %s46_s22 }
  0x11   :  { %p3950_p3 = scmp.ne.s32.totalorder %s46_s22, %s3949_s30  ;;  %p3955_p5 = scmp.lt.s32.totalorder %s3949_s30, %s3949_s30 }
  0x13   :  { %p3956_p6 = por %p3955_p5, %p3954_p4 }
  0x15   :  { %p3957_p7 = pnand %p3956_p6, %p3950_p3 }
  0x17   :  { %3960 = shalt.err (!%p3957_p7)
}
  0x18   :  { %s4218_s0 = smov 64   ;;  %s4219_s17 = smov 4  }
  0x19   :  { %51 = dma.hbm_to_vmem [thread:$0]  %s4876_s1, 128, %s46_s22, [#allocation5], %s4218_s0, %s4218_s0, %s4219_s17  }
  0x1a   :  { %s4220_s20 = smov [#allocation7]   ;;  %s4221_s23 = smov [#allocation10]  }
  0x1b   :  { %s75_s21 = sshll.u32 %s4220_s20, 4  ;;  %s99_s24 = sshll.u32 %s4221_s23, 4  ;;  %s76_s21 = int_to_ptr.vmem [resolvable:$true] %s75_s21  ;;  %s100_s24 = int_to_ptr.vmem [resolvable:$true] %s99_s24 }
  0x1c   :  { %s3961_s27 = scalar_lea.hbm %s4882_s7, 2048 }
  0x1d   :  { %p3962_p8 = scmp.ne.s32.totalorder %s4882_s7, %s3961_s27  ;;  %p3965_p9 = scmp.lt.u32.totalorder %s3961_s27, %s4882_s7 }
  0x1f   :  { %p3967_p10 = pnand %p3965_p9, %p3962_p8 }
  0x21   :  { %3970 = shalt.err (!%p3967_p10)
}
  0x22   :  { %s3971_s1 = scalar_lea.vmem %s76_s21, 2048  ;;  %p3976_p12 = scmp.lt.s32.totalorder %s76_s21, %s76_s21 }
  0x23   :  { %p3972_p11 = scmp.ne.s32.totalorder %s76_s21, %s3971_s1  ;;  %p3977_p13 = scmp.lt.s32.totalorder %s3971_s1, %s3971_s1 }
  0x25   :  { %p3978_p0 = por %p3977_p13, %p3976_p12 }
  0x27   :  { %p3979_p1 = pnand %p3978_p0, %p3972_p11 }
  0x29   :  { %3982 = shalt.err (!%p3979_p1)
}
  0x2a   :  { %s4222_s22 = smov 128   ;;  %s4223_s0 = smov 8  }
  0x2b   :  { %81 = dma.hbm_to_vmem [thread:$0]  %s4882_s7, 2048, %s76_s21, [#allocation8], %s4222_s22, %s4222_s22, %s4223_s0  }
  0x2c   :  { %s3983_s20 = scalar_lea.hbm %s4884_s9, 2560 }
  0x2d   :  { %p3984_p2 = scmp.ne.s32.totalorder %s4884_s9, %s3983_s20  ;;  %p3987_p3 = scmp.lt.u32.totalorder %s3983_s20, %s4884_s9 }
  0x2f   :  { %p3989_p4 = pnand %p3987_p3, %p3984_p2 }
  0x31   :  { %3992 = shalt.err (!%p3989_p4)
}
  0x32   :  { %s3993_s28 = scalar_lea.vmem %s100_s24, 2560  ;;  %p3998_p6 = scmp.lt.s32.totalorder %s100_s24, %s100_s24 }
  0x33   :  { %p3994_p5 = scmp.ne.s32.totalorder %s100_s24, %s3993_s28  ;;  %p3999_p7 = scmp.lt.s32.totalorder %s3993_s28, %s3993_s28 }
  0x35   :  { %p4000_p8 = por %p3999_p7, %p3998_p6 }
  0x37   :  { %p4001_p9 = pnand %p4000_p8, %p3994_p5 }
  0x39   :  { %4004 = shalt.err (!%p4001_p9)
}
  0x3a   :  { %105 = dma.hbm_to_vmem [thread:$0]  %s4884_s9, 2560, %s100_s24, [#allocation11], %s4222_s22, %s4222_s22, %s4223_s0  }
  0x3b   :  { %s4224_s29 = smov [#allocation13]   ;;  %s4225_s1 = smov [#allocation16]  }
  0x3c   :  { %s123_s30 = sshll.u32 %s4224_s29, 4  ;;  %s147_s17 = sshll.u32 %s4225_s1, 4  ;;  %s124_s30 = int_to_ptr.vmem [resolvable:$true] %s123_s30  ;;  %s148_s17 = int_to_ptr.vmem [resolvable:$true] %s147_s17 }
  0x3d   :  { %s4005_s19 = scalar_lea.hbm %s4886_s11, 80 }
  0x3e   :  { %p4006_p10 = scmp.ne.s32.totalorder %s4886_s11, %s4005_s19  ;;  %p4009_p11 = scmp.lt.u32.totalorder %s4005_s19, %s4886_s11 }
  0x40   :  { %p4011_p12 = pnand %p4009_p11, %p4006_p10 }
  0x42   :  { %4014 = shalt.err (!%p4011_p12)
}
  0x43   :  { %s4015_s9 = scalar_lea.vmem %s124_s30, 80  ;;  %s4019_s24 = scalar_lea.vmem %s124_s30, 96 }
  0x44   :  { %p4016_p13 = scmp.ne.s32.totalorder %s124_s30, %s4015_s9  ;;  %p4020_p0 = scmp.lt.s32.totalorder %s124_s30, %s124_s30 }
  0x45   :  { %p4021_p1 = scmp.lt.s32.totalorder %s4019_s24, %s4015_s9 }
  0x47   :  { %p4022_p2 = por %p4021_p1, %p4020_p0 }
  0x49   :  { %p4023_p3 = pnand %p4022_p2, %p4016_p13 }
  0x4b   :  { %4026 = shalt.err (!%p4023_p3)
}
  0x4c   :  { %s4226_s27 = smov 16   ;;  %s4227_s28 = smov 1  }
  0x4d   :  { %129 = dma.hbm_to_vmem [thread:$0]  %s4886_s11, 80, %s124_s30, [#allocation14], %s4226_s27, %s4226_s27, %s4227_s28  }
  0x4e   :  { %s4027_s18 = scalar_lea.hbm %s4888_s13, 80 }
  0x4f   :  { %p4028_p4 = scmp.ne.s32.totalorder %s4888_s13, %s4027_s18  ;;  %p4031_p5 = scmp.lt.u32.totalorder %s4027_s18, %s4888_s13 }
  0x51   :  { %p4033_p6 = pnand %p4031_p5, %p4028_p4 }
  0x53   :  { %4036 = shalt.err (!%p4033_p6)
}
  0x54   :  { %s4037_s25 = scalar_lea.vmem %s148_s17, 80  ;;  %s4041_s26 = scalar_lea.vmem %s148_s17, 96 }
  0x55   :  { %p4038_p7 = scmp.ne.s32.totalorder %s148_s17, %s4037_s25  ;;  %p4042_p8 = scmp.lt.s32.totalorder %s148_s17, %s148_s17 }
  0x56   :  { %p4043_p9 = scmp.lt.s32.totalorder %s4041_s26, %s4037_s25 }
  0x58   :  { %p4044_p10 = por %p4043_p9, %p4042_p8 }
  0x5a   :  { %p4045_p11 = pnand %p4044_p10, %p4038_p7 }
  0x5c   :  { %4048 = shalt.err (!%p4045_p11)
}
  0x5d   :  { %153 = dma.hbm_to_vmem [thread:$0]  %s4888_s13, 80, %s148_s17, [#allocation17], %s4226_s27, %s4226_s27, %s4227_s28  }
  0x5e   :  { %s4228_s9 = smov [#allocation2]   ;;  %s4229_s7 = smov [#allocation6]  }
  0x5f   :  { %s33_s24 = sshll.u32 %s4228_s9, 4  ;;  %s58_s21 = sshll.u32 %s4229_s7, 4  ;;  %s34_s24 = int_to_ptr.vmem [resolvable:$true] %s33_s24  ;;  %s59_s21 = int_to_ptr.vmem [resolvable:$true] %s58_s21 }
  0x60   :  { %s4896_s18 = sld [smem:[#allocation28_spill]] }
  0x66   :  { %s4049_s16 = scalar_lea.hbm %s4896_s18, 256 }
  0x67   :  { %p4050_p12 = scmp.ne.s32.totalorder %s4896_s18, %s4049_s16  ;;  %p4053_p13 = scmp.lt.u32.totalorder %s4049_s16, %s4896_s18 }
  0x69   :  { %p4055_p0 = pnand %p4053_p13, %p4050_p12 }
  0x6b   :  { %4058 = shalt.err (!%p4055_p0)
}
  0x6c   :  { %s4059_s13 = scalar_lea.vmem %s34_s24, 256  ;;  %p4064_p2 = scmp.lt.s32.totalorder %s34_s24, %s34_s24 }
  0x6d   :  { %p4060_p1 = scmp.ne.s32.totalorder %s34_s24, %s4059_s13  ;;  %p4065_p3 = scmp.lt.s32.totalorder %s4059_s13, %s4059_s13 }
  0x6f   :  { %p4066_p4 = por %p4065_p3, %p4064_p2 }
  0x71   :  { %p4067_p5 = pnand %p4066_p4, %p4060_p1 }
  0x73   :  { %4070 = shalt.err (!%p4067_p5)
}
  0x74   :  { %39 = dma.hbm_to_vmem [thread:$0]  %s4896_s18, 256, %s34_s24, [#allocation3], %s4222_s22, %s4222_s22, %s4223_s0  }
  0x75   :  { %s4071_s9 = scalar_lea.hbm %s4877_s2, 16 }
  0x76   :  { %p4072_p6 = scmp.ne.s32.totalorder %s4877_s2, %s4071_s9  ;;  %p4075_p7 = scmp.lt.u32.totalorder %s4071_s9, %s4877_s2 }
  0x78   :  { %p4077_p8 = pnand %p4075_p7, %p4072_p6 }
  0x7a   :  { %4080 = shalt.err (!%p4077_p8)
}
  0x7b   :  { %s4081_s19 = scalar_lea.vmem %s59_s21, 16  ;;  %s4085_s20 = scalar_lea.vmem %s59_s21, 32 }
  0x7c   :  { %p4082_p9 = scmp.ne.s32.totalorder %s59_s21, %s4081_s19  ;;  %p4086_p10 = scmp.lt.s32.totalorder %s59_s21, %s59_s21 }
  0x7d   :  { %p4087_p11 = scmp.lt.s32.totalorder %s4085_s20, %s4081_s19 }
  0x7f   :  { %p4088_p12 = por %p4087_p11, %p4086_p10 }
  0x81   :  { %p4089_p13 = pnand %p4088_p12, %p4082_p9 }
  0x83   :  { %4092 = shalt.err (!%p4089_p13)
}
  0x84   :  { %61 = dma.hbm_to_vmem [thread:$0]  %s4877_s2, 16, %s59_s21, [#allocation5]  }
  0x85   :  { %s4230_s23 = smov [#allocation9]   ;;  %s4231_s13 = smov [#allocation12]  }
  0x86   :  { %s87_s25 = sshll.u32 %s4230_s23, 4  ;;  %s111_s17 = sshll.u32 %s4231_s13, 4  ;;  %s88_s25 = int_to_ptr.vmem [resolvable:$true] %s87_s25  ;;  %s112_s17 = int_to_ptr.vmem [resolvable:$true] %s111_s17 }
  0x87   :  { %s4093_s30 = scalar_lea.hbm %s4883_s8, 80 }
  0x88   :  { %p4094_p0 = scmp.ne.s32.totalorder %s4883_s8, %s4093_s30  ;;  %p4097_p1 = scmp.lt.u32.totalorder %s4093_s30, %s4883_s8 }
  0x8a   :  { %p4099_p2 = pnand %p4097_p1, %p4094_p0 }
  0x8c   :  { %4102 = shalt.err (!%p4099_p2)
}
  0x8d   :  { %s4103_s2 = scalar_lea.vmem %s88_s25, 80  ;;  %s4107_s21 = scalar_lea.vmem %s88_s25, 96 }
  0x8e   :  { %p4104_p3 = scmp.ne.s32.totalorder %s88_s25, %s4103_s2  ;;  %p4108_p4 = scmp.lt.s32.totalorder %s88_s25, %s88_s25 }
  0x8f   :  { %p4109_p5 = scmp.lt.s32.totalorder %s4107_s21, %s4103_s2 }
  0x91   :  { %p4110_p6 = por %p4109_p5, %p4108_p4 }
  0x93   :  { %p4111_p7 = pnand %p4110_p6, %p4104_p3 }
  0x95   :  { %4114 = shalt.err (!%p4111_p7)
}
  0x96   :  { %93 = dma.hbm_to_vmem [thread:$0]  %s4883_s8, 80, %s88_s25, [#allocation8], %s4226_s27, %s4226_s27, %s4227_s28  }
  0x97   :  { %s4115_s18 = scalar_lea.hbm %s4885_s10, 80 }
  0x98   :  { %p4116_p8 = scmp.ne.s32.totalorder %s4885_s10, %s4115_s18  ;;  %p4119_p9 = scmp.lt.u32.totalorder %s4115_s18, %s4885_s10 }
  0x9a   :  { %p4121_p10 = pnand %p4119_p9, %p4116_p8 }
  0x9c   :  { %4124 = shalt.err (!%p4121_p10)
}
  0x9d   :  { %s4125_s30 = scalar_lea.vmem %s112_s17, 80  ;;  %s4129_s9 = scalar_lea.vmem %s112_s17, 96 }
  0x9e   :  { %p4126_p11 = scmp.ne.s32.totalorder %s112_s17, %s4125_s30  ;;  %p4130_p12 = scmp.lt.s32.totalorder %s112_s17, %s112_s17 }
  0x9f   :  { %p4131_p13 = scmp.lt.s32.totalorder %s4129_s9, %s4125_s30 }
  0xa1   :  { %p4132_p0 = por %p4131_p13, %p4130_p12 }
  0xa3   :  { %p4133_p1 = pnand %p4132_p0, %p4126_p11 }
  0xa5   :  { %4136 = shalt.err (!%p4133_p1)
}
  0xa6   :  { %117 = dma.hbm_to_vmem [thread:$0]  %s4885_s10, 80, %s112_s17, [#allocation11], %s4226_s27, %s4226_s27, %s4227_s28  }
  0xa7   :  { %s4232_s7 = smov [#allocation15]   ;;  %s4233_s1 = smov [#allocation18]  }
  0xa8   :  { %s135_s29 = sshll.u32 %s4232_s7, 4  ;;  %s159_s2 = sshll.u32 %s4233_s1, 4  ;;  %s136_s29 = int_to_ptr.vmem [resolvable:$true] %s135_s29  ;;  %s160_s2 = int_to_ptr.vmem [resolvable:$true] %s159_s2 }
  0xa9   :  { %s4137_s19 = scalar_lea.hbm %s4887_s12, 80 }
  0xaa   :  { %p4138_p2 = scmp.ne.s32.totalorder %s4887_s12, %s4137_s19  ;;  %p4141_p3 = scmp.lt.u32.totalorder %s4137_s19, %s4887_s12 }
  0xac   :  { %p4143_p4 = pnand %p4141_p3, %p4138_p2 }
  0xae   :  { %4146 = shalt.err (!%p4143_p4)
}
  0xaf   :  { %s4147_s10 = scalar_lea.vmem %s136_s29, 80  ;;  %s4151_s17 = scalar_lea.vmem %s136_s29, 96 }
  0xb0   :  { %p4148_p5 = scmp.ne.s32.totalorder %s136_s29, %s4147_s10  ;;  %p4152_p6 = scmp.lt.s32.totalorder %s136_s29, %s136_s29 }
  0xb1   :  { %p4153_p7 = scmp.lt.s32.totalorder %s4151_s17, %s4147_s10 }
  0xb3   :  { %p4154_p8 = por %p4153_p7, %p4152_p6 }
  0xb5   :  { %p4155_p9 = pnand %p4154_p8, %p4148_p5 }
  0xb7   :  { %4158 = shalt.err (!%p4155_p9)
}
  0xb8   :  { %141 = dma.hbm_to_vmem [thread:$0]  %s4887_s12, 80, %s136_s29, [#allocation14], %s4226_s27, %s4226_s27, %s4227_s28  }
  0xb9   :  { %s4159_s9 = scalar_lea.hbm %s4889_s14, 512 }
  0xba   :  { %p4160_p10 = scmp.ne.s32.totalorder %s4889_s14, %s4159_s9  ;;  %p4163_p11 = scmp.lt.u32.totalorder %s4159_s9, %s4889_s14 }
  0xbc   :  { %p4165_p12 = pnand %p4163_p11, %p4160_p10 }
  0xbe   :  { %4168 = shalt.err (!%p4165_p12)
}
  0xbf   :  { %s4169_s21 = scalar_lea.vmem %s160_s2, 512  ;;  %p4174_p0 = scmp.lt.s32.totalorder %s160_s2, %s160_s2 }
  0xc0   :  { %p4170_p13 = scmp.ne.s32.totalorder %s160_s2, %s4169_s21  ;;  %p4175_p1 = scmp.lt.s32.totalorder %s4169_s21, %s4169_s21 }
  0xc2   :  { %p4176_p2 = por %p4175_p1, %p4174_p0 }
  0xc4   :  { %p4177_p3 = pnand %p4176_p2, %p4170_p13 }
  0xc6   :  { %4180 = shalt.err (!%p4177_p3)
}
  0xc7   :  { %165 = dma.hbm_to_vmem [thread:$0]  %s4889_s14, 512, %s160_s2, [#allocation17], %s4222_s22, %s4222_s22, %s4223_s0  }
  0xc8   :  { %s4234_s28 = smov [#allocation19]   ;;  %s4181_s20 = scalar_lea.hbm %s4890_s15, 16 }
  0xc9   :  { %s172_s29 = sshll.u32 %s4234_s28, 4  ;;  %p4182_p4 = scmp.ne.s32.totalorder %s4890_s15, %s4181_s20  ;;  %s173_s29 = int_to_ptr.vmem [resolvable:$true] %s172_s29 }
  0xca   :  { %p4185_p5 = scmp.lt.u32.totalorder %s4181_s20, %s4890_s15 }
  0xcc   :  { %p4187_p6 = pnand %p4185_p5, %p4182_p4 }
  0xce   :  { %4190 = shalt.err (!%p4187_p6)
}
  0xcf   :  { %s4191_s17 = scalar_lea.vmem %s173_s29, 16  ;;  %s4195_s14 = scalar_lea.vmem %s173_s29, 32 }
  0xd0   :  { %p4192_p7 = scmp.ne.s32.totalorder %s173_s29, %s4191_s17  ;;  %p4196_p8 = scmp.lt.s32.totalorder %s173_s29, %s173_s29 }
  0xd1   :  { %p4197_p9 = scmp.lt.s32.totalorder %s4195_s14, %s4191_s17 }
  0xd3   :  { %p4198_p10 = por %p4197_p9, %p4196_p8 }
  0xd5   :  { %p4199_p11 = pnand %p4198_p10, %p4192_p7 }
  0xd7   :  { %4202 = shalt.err (!%p4199_p11)
}
  0xd8   :  { %175 = dma.hbm_to_vmem [thread:$0]  %s4890_s15, 16, %s173_s29, [#allocation20]  }
  0xd9   :  { %4203 = dma.done.wait [#allocation3], 256  }
  0xda   :  { %4204 = vsyncadd [#allocation3], 4294967040 }
  0xdb   :  { %4205 = dma.done.wait [#allocation5], 144  }
  0xdc   :  { %4206 = vsyncadd [#allocation5], 4294967152 }
  0xdd   :  { %4207 = dma.done.wait [#allocation8], 2128  }
  0xde   :  { %4208 = vsyncadd [#allocation8], 4294965168 }
  0xdf   :  { %4209 = dma.done.wait [#allocation11], 2640  }
  0xe0   :  { %4210 = vsyncadd [#allocation11], 4294964656 }
  0xe1   :  { %4211 = dma.done.wait [#allocation14], 160  }
  0xe2   :  { %4212 = vsyncadd [#allocation14], 4294967136 }
  0xe3   :  { %4213 = dma.done.wait [#allocation17], 592  }
  0xe4   :  { %4214 = vsyncadd [#allocation17], 4294966704 }
  0xe5   :  { %4215 = dma.done.wait [#allocation20], 16  }
  0xe6   :  { %4216 = vsyncadd [#allocation20], 4294967280  ;;  %vm232_vm0 = vcmask 1044480   ;;  %vm4235_vm1 = vmmov 1   ;;  %v212_v1 = vld [vmem:[#allocation2] sm:$0xff]  ;;  %vm225_vm3 = vcmask 105472  }
  0xe7   :  { %vm4499_vm2 = vmpackc.low %vm232_vm0, %vm4235_vm1  ;;  %v213_v2 = vld [vmem:[#allocation2 + $0x8] sm:$0x1f]  ;;  %v214_v3 = vld [vmem:[#allocation4] sm:$0xf]  ;;  %vm335_vm4 = vcmask 1045504   ;;  %vm328_vm6 = vcmask 637952  }
  0xe8   :  { %v3710_v4 = vpack.c.bf16 %v213_v2, %v212_v1  ;;  %v4503_v5 = vunpack.c.l.bf16 %v214_v3  ;;  %v215_v6 = vld [vmem:[#allocation4 + $0x4] sm:$0x7]  ;;  %v311_v7 = vld [vmem:[%s4881_s6] sm:$0xff]  ;;  %v312_v8 = vld [vmem:[%s4881_s6 + $0x8] sm:$0xff]  ;;  %vm427_vm7 = vcmask 261120   ;;  %v4236_v42 = vmov 0.0|0.0  }
  0xe9   :  { %v3716_v9 = vpack.c.bf16 %v312_v8, %v311_v7  ;;  %v313_v10 = vld [vmem:[%s4881_s6 + $0x10] sm:$0xff]  ;;  %v314_v11 = vld [vmem:[%s4881_s6 + $0x18] sm:$0xff]  ;;  %v4521_v12 = vunpack.c.l.bf16 %v215_v6  ;;  %v315_v14 = vld [vmem:[%s4881_s6 + $0x20] sm:$0xff]  ;;  %vm4237_vm8 = vmmov 0   ;;  %v4238_v45 = vmov 0.0   ;;  %s4899_s27 = sld [smem:[#allocation29_spill]] }
  0xea   :  { %3712 = vmatprep.subr.msk.bf16.mxu0 %vm4499_vm2, %v3710_v4  ;;  %3449 = vmatprep.mubr.msk.f32.mxu0 %vm225_vm3, %v4503_v5  ;;  %v3720_v13 = vpack.c.bf16 %v314_v11, %v313_v10  ;;  %v316_v15 = vld [vmem:[%s4881_s6 + $0x28] sm:$0xff]  ;;  %v317_v17 = vld [vmem:[%s4881_s6 + $0x30] sm:$0xff]  ;;  %v318_v18 = vld [vmem:[%s4881_s6 + $0x38] sm:$0xff]  ;;  %v4239_v49 = vmov 0   ;;  %vm605_vm9 = vcmask 15360   ;;  %vm612_vm10 = vcmask 1041408  }
  0xeb   :  { %3715 = vmatpush3.bf16.msk.msra.mxu0 %vm4499_vm2, %v3710_v4  ;;  %3717 = vmatprep.subr.bf16.mxu1 %v3716_v9  ;;  %v3724_v16 = vpack.c.bf16 %v316_v15, %v315_v14  ;;  %v3728_v19 = vpack.c.bf16 %v318_v18, %v317_v17  ;;  %v319_v20 = vld [vmem:[%s4881_s6 + $0x40] sm:$0xff]  ;;  %v320_v21 = vld [vmem:[%s4881_s6 + $0x48] sm:$0x3f]  ;;  %vm3733_vm5 = vmpackc.low %vm335_vm4, %vm4235_vm1  ;;  %s4240_s6 = smov 32   ;;  %v693_v6 = vlaneseq }
  0xec   :  { %3719 = vmatpush3.bf16.msra.mxu1 %v3716_v9  ;;  %v3732_v22 = vpack.c.bf16 %v320_v21, %v319_v20  ;;  %v416_v23 = vld [vmem:[#allocation10] sm:$0xff]  ;;  %v417_v24 = vld [vmem:[#allocation10 + $0x8] sm:$0xff]  ;;  %v418_v28 = vld [vmem:[#allocation10 + $0x10] sm:$0xff]  ;;  %3898 = vset.pattern.permute.xlu0 %v4239_v49 }
  0xed   :  { %3721 = vmatprep.subr.bf16.mxu1 %v3720_v13  ;;  %v3738_v25 = vpack.c.bf16 %v417_v24, %v416_v23  ;;  %v419_v29 = vld [vmem:[#allocation10 + $0x18] sm:$0xff]  ;;  %v3175_v38 = vld [vmem:[#allocation12] ss:$0 sm:$0xff]  ;;  %v221_v63 = vld [vmem:[%s4878_s3 + $0x4] sm:$0x7]  ;;  %v694_v8 = vshrl.u32 %v693_v6, 7 }
  0xee   :  { %3450 = vmatmul.mubr.msk.f32.vlgmr.msra.gmra.mrb[0].mxu0 %vm225_vm3, %v4521_v12  ;;  %v3742_v30 = vpack.c.bf16 %v419_v29, %v418_v28  ;;  %v3171_v31 = vld [vmem:[#allocation9] ss:$0 sm:$0xff]  ;;  %v224_v51 = vld [vmem:[%s4879_s4] sm:$0x3]  ;;  %v218_v55 = vld [vmem:[#allocation6] sm:$0x1]  ;;  %v4586_v4 = vunpack.c.l.bf16 %v221_v63 }
  0xef   :  { %3739 = vmatprep.subr.bf16.mxu0 %v3738_v25  ;;  %v4567_v59 = vunpack.c.l.bf16 %v218_v55  ;;  %v220_v60 = vld [vmem:[%s4878_s3] sm:$0xf]  ;;  %v691_v7 = vld [vmem:[#allocation16] sm:$0x1]  ;;  %v4594_v10 = vsub.s32 0, %v694_v8  ;;  %s4241_s3 = smov 96  }
  0xf0   :  { %3723 = vmatpush3.bf16.msra.mxu1 %v3720_v13  ;;  %3741 = vmatpush3.bf16.msra.mxu0 %v3738_v25  ;;  %v4576_v61 = vunpack.c.l.bf16 %v220_v60  ;;  %v702_v9 = vsub.f32 2.0, %v691_v7  ;;  %v934_v60 = vld [vmem:[#allocation10 + $0x30] sm:$0xff]  ;;  %v935_v63 = vld [vmem:[#allocation10 + $0x38] sm:$0xff] }
  0xf1   :  { %3725 = vmatprep.subr.bf16.mxu1 %v3724_v16  ;;  %3743 = vmatprep.subr.bf16.mxu0 %v3742_v30  ;;  %v696_v13 = vrot.slane %v691_v7, %v4594_v10 }
  0xf2   :  { %v703_v11 = vmul.f32 %v702_v9, %v691_v7 }
  0xf4   :  { %3727 = vmatpush3.bf16.msra.mxu1 %v3724_v16  ;;  %3745 = vmatpush3.bf16.msra.mxu0 %v3742_v30  ;;  %v710_v15 = vrot.slane %v703_v11, %v4594_v10 }
  0xf5   :  { %3729 = vmatprep.subr.bf16.mxu1 %v3728_v19  ;;  %3746 = vmatprep.subr.bf16.mxu0 %v4236_v42 }
  0xf8   :  { %3731 = vmatpush3.bf16.msra.mxu1 %v3728_v19 }
  0xf9   :  { %3734 = vmatprep.subr.msk.bf16.mxu1 %vm3733_vm5, %v3732_v22 }
  0xfc   :  { %3737 = vmatpush3.bf16.msk.msra.mxu1 %vm3733_vm5, %v3732_v22 }
 0x1c1   :  { %v3451_v26 = vpop.f32.mrb[0].mxu0 }
 0x1c2   :  { %v302_v27 = vpop.f32.mrb[1].mxu0 }
 0x1c3   :  { %3472 = vmatprep.mubr.msk.f32.mxu1 %vm328_vm6, %v302_v27 }
 0x1c4   :  { %3473 = vmatmul.mubr.msk.f32.vlgmr.msra.gmra.mrb[0].mxu1 %vm328_vm6, %v3451_v26 }
 0x297   :  { %v3474_v32 = vpop.f32.mrb[0].mxu1 }
 0x298   :  { %v411_v33 = vadd.f32 %v3474_v32, %v3171_v31  ;;  %v405_v34 = vpop.f32.mrb[1].mxu1  ;;  %v836_v32 = vld [vmem:[#allocation7] sm:$0xff] }
 0x299   :  { %v406_v35 = vadd.f32 %v3171_v31, %v405_v34  ;;  %v838_v34 = vld [vmem:[#allocation7 + $0x10] sm:$0xff] }
 0x29a   :  { %v415_v37 = vmax.f32 %v411_v33, 0.0  ;;  %v837_v33 = vld [vmem:[#allocation7 + $0x8] sm:$0xff] }
 0x29b   :  { %v414_v36 = vmax.f32 %v406_v35, 0.0  ;;  %v3756_v35 = vpack.c.bf16 %v837_v33, %v836_v32  ;;  %v1192_v32 = vld [vmem:[#allocation16 + $0x1] sm:$0x1] }
 0x29c   :  { %v1203_v33 = vsub.f32 2.0, %v1192_v32 }
 0x29d   :  { %3483 = vmatprep.mubr.msk.f32.mxu0 %vm427_vm7, %v414_v36  ;;  %v839_v36 = vld [vmem:[#allocation7 + $0x18] sm:$0xff]  ;;  %3757 = vmatprep.subr.bf16.mxu1 %v3756_v35 }
 0x29e   :  { %3484 = vmatmul.mubr.msk.f32.vlgmr.msra.gmra.mrb[2].mxu0 %vm427_vm7, %v415_v37  ;;  %3759 = vmatpush3.bf16.msra.mxu1 %v3756_v35  ;;  %v1197_v35 = vrot.slane %v1192_v32, %v4594_v10 }
 0x29f   :  { %3490 = vmatprep.mubr.msk.f32.mxu0 %vm4237_vm8, %v4238_v45 }
 0x371   :  { %v3485_v39 = vpop.f32.mrb[2].mxu0 }
 0x372   :  { %v506_v40 = vadd.f32 %v3485_v39, %v3175_v38  ;;  %v500_v41 = vpop.f32.mrb[3].mxu0 }
 0x373   :  { %v501_v43 = vadd.f32 %v3175_v38, %v500_v41  ;;  %v3760_v38 = vpack.c.bf16 %v839_v36, %v838_v34  ;;  %v1204_v34 = vmul.f32 %v1203_v33, %v1192_v32 }
 0x374   :  { %v4549_v44 = vmax.f32 %v506_v40, 0.0  ;;  %v3183_v40 = vld [vmem:[#allocation13] ss:$0 sm:$0xff] }
 0x375   :  { %v4553_v46 = vmax.f32 %v501_v43, 0.0  ;;  %3761 = vmatprep.subr.bf16.mxu1 %v3760_v38  ;;  %v1211_v36 = vrot.slane %v1204_v34, %v4594_v10 }
 0x376   :  { %v512_v47 = vmul.f32 %v4549_v44, %v4549_v44  ;;  %3763 = vmatpush3.bf16.msra.mxu1 %v3760_v38 }
 0x377   :  { %v511_v48 = vmul.f32 %v4553_v46, %v4553_v46  ;;  %3772 = vmatprep.subr.bf16.mxu1 %v4236_v42 }
 0x379   :  { %v3893_v50 = vpack.i.bf16 %v512_v47, %v511_v48 }
 0x37b   :  { %3894 = vrot.lane.b32.xlu0 %v3893_v50, %s4240_s6  ;;  %v3184_v50 = vld [vmem:[#allocation15] ss:$0 sm:$0xff] }
 0x37f   :  { %601 = vperm.xlu0 %3898, %v224_v51  }
 0x3ed   :  { %v3895_v52 = vpop.permute.xlu0 %3894 }
 0x3ee   :  { %v3897_v53 = vunpack.i.h.bf16 %v3895_v52  ;;  %v3896_v54 = vunpack.i.l.bf16 %v3895_v52 }
 0x3f0   :  { %v522_v56 = vsel %vm427_vm7, %v4549_v44, %v3897_v53  ;;  %v521_v57 = vsel %vm427_vm7, %v4553_v46, %v3896_v54 }
 0x3f1   :  { %v3747_v58 = vpack.c.bf16 %v522_v56, %v521_v57 }
 0x3f3   :  { %3749 = vmatpush3.bf16.msk.msra.mxu0 %vm4499_vm2, %v3747_v58 }
 0x3f6   :  { %3491 = vmatmul.mubr.msk.f32.vlgmr.msra.gmra.mrb[4].mxu0 %vm225_vm3, %v4567_v59 }
 0x3f7   :  { %3495 = vmatprep.mubr.msk.f32.mxu0 %vm605_vm9, %v4576_v61 }
 0x3fe   :  { %v4580_v62 = vpop.permute.xlu0 %601 }
 0x4c9   :  { %v595_v1 = vpop.f32.mrb[4].mxu0 }
 0x4ca   :  { %v604_v2 = vmul.f32 %v4580_v62, %v595_v1  ;;  %v3492_v3 = vpop.f32.mrb[5].mxu0  ;;  %v3768_v1 = vpack.c.bf16 %v935_v63, %v934_v60  ;;  %v1343_v63 = vld [vmem:[#allocation7 + $0x38] sm:$0xff] }
 0x4cc   :  { %3493 = vmatprep.subr.msk.mxu0 %vm612_vm10, %v604_v2 }
 0x4cd   :  { %3494 = vmatpush3.msk.msra.mxu0 %vm612_vm10, %v604_v2  ;;  %v3188_v2 = vld [vmem:[#allocation9 + $0x1] ss:$0 sm:$0xff] }
 0x4ce   :  { %3496 = vmatmul.mubr.msk.f32.vlgmr.msra.gmra.mrb[6].mxu0 %vm605_vm9, %v4586_v4 }
 0x4cf   :  { %3502 = vmatprep.mubr.msk.f32.mxu0 %vm225_vm3, %v4503_v5 }
 0x5a1   :  { %v3497_v14 = vpop.f32.mrb[6].mxu0 }
 0x5a2   :  { %v699_v16 = vmul.f32 %v3497_v14, %v696_v13  ;;  %v682_v17 = vpop.f32.mrb[7].mxu0  ;;  %v705_v20 = vmul.f32 %v3497_v14, %v3497_v14 }
 0x5a3   :  { %v698_v18 = vmul.f32 %v696_v13, %v682_v17  ;;  %v704_v19 = vmul.f32 %v682_v17, %v682_v17  ;;  %v3191_v13 = vld [vmem:[#allocation12 + $0x1] ss:$0 sm:$0xff] }
 0x5a4   :  { %v713_v22 = vmul.f32 %v710_v15, %v705_v20  ;;  %v701_v41 = vsub.f32 %v4549_v44, %v699_v16  ;;  %v932_v44 = vld [vmem:[#allocation10 + $0x20] sm:$0xff] }
 0x5a5   :  { %v712_v21 = vmul.f32 %v710_v15, %v704_v19  ;;  %v700_v39 = vsub.f32 %v4553_v46, %v698_v18  ;;  %v933_v46 = vld [vmem:[#allocation10 + $0x28] sm:$0xff] }
 0x5a6   :  { %v734_v49 = vmul.f32 %v3183_v40, %v701_v41  ;;  %v3764_v56 = vpack.c.bf16 %v933_v46, %v932_v44  ;;  %v1340_v46 = vld [vmem:[#allocation7 + $0x20] sm:$0xff] }
 0x5a7   :  { %716 = vrot.lane.b32.xlu1 %v712_v21, %s4240_s6  ;;  %v733_v47 = vmul.f32 %v3183_v40, %v700_v39 }
 0x5ab   :  { %718 = vrot.lane.b32.xlu1 %v713_v22, %s4240_s6 }
 0x619   :  { %v717_v23 = vpop.permute.xlu1 %716 }
 0x61a   :  { %v722_v24 = vsub.f32 %v682_v17, %v717_v23 }
 0x61c   :  { %v724_v25 = vmax.f32 %v722_v24, 0.0 }
 0x61d   :  { %v719_v26 = vpop.permute.xlu1 %718 }
 0x61e   :  { %v735_v27 = vadd.f32 1e-05, %v724_v25  ;;  %v723_v28 = vsub.f32 %v3497_v14, %v719_v26 }
 0x620   :  { %3919 = vrsqrt.f32 %v735_v27  ;;  %v725_v29 = vmax.f32 %v723_v28, 0.0 }
 0x622   :  { %v736_v30 = vadd.f32 1e-05, %v725_v29 }
 0x624   :  { %3921 = vrsqrt.f32 %v736_v30 }
 0x62a   :  { %v3920_v31 = vpop.eup %3919 }
 0x62b   :  { %741 = vrot.lane.b32.xlu1 %v3920_v31, %s4241_s3 }
 0x62e   :  { %v3922_v37 = vpop.eup %3921 }
 0x62f   :  { %743 = vrot.lane.b32.xlu0 %v3922_v37, %s4241_s3 }
 0x69d   :  { %v742_v43 = vpop.permute.xlu1 %741 }
 0x69e   :  { %v747_v48 = vmul.f32 %v742_v43, %v733_v47 }
 0x6a0   :  { %v756_v53 = vadd.f32 %v3184_v50, %v747_v48 }
 0x6a1   :  { %v744_v51 = vpop.permute.xlu0 %743 }
 0x6a2   :  { %v748_v52 = vmul.f32 %v744_v51, %v734_v49 }
 0x6a4   :  { %v757_v54 = vadd.f32 %v3184_v50, %v748_v52 }
 0x6a6   :  { %v3750_v55 = vpack.c.bf16 %v757_v54, %v756_v53 }
 0x6a8   :  { %3752 = vmatprep.subr.msk.bf16.mxu0 %vm4499_vm2, %v3750_v55 }
 0x6a9   :  { %3755 = vmatpush3.bf16.msk.msra.mxu0 %vm4499_vm2, %v3750_v55 }
 0x6aa   :  { %3765 = vmatprep.subr.bf16.mxu0 %v3764_v56 }
 0x6ac   :  { %3503 = vmatmul.mubr.msk.f32.vlgmr.msra.gmra.mrb[8].mxu0 %vm225_vm3, %v4521_v12 }
 0x6ad   :  { %3767 = vmatpush3.bf16.msra.mxu0 %v3764_v56  ;;  %v1341_v56 = vld [vmem:[#allocation7 + $0x28] sm:$0xff] }
 0x6ae   :  { %3769 = vmatprep.subr.bf16.mxu0 %v3768_v1  ;;  %v3782_v60 = vpack.c.bf16 %v1341_v56, %v1340_v46  ;;  %v1696_v56 = vld [vmem:[#allocation16 + $0x2] sm:$0x1] }
 0x6b1   :  { %3771 = vmatpush3.bf16.msra.mxu0 %v3768_v1 }
 0x77f   :  { %v3504_v57 = vpop.f32.mrb[8].mxu0 }
 0x780   :  { %v827_v58 = vpop.f32.mrb[9].mxu0 }
 0x781   :  { %3513 = vmatprep.mubr.msk.f32.mxu1 %vm427_vm7, %v827_v58 }
 0x782   :  { %3514 = vmatmul.mubr.msk.f32.vlgmr.msra.gmra.mrb[2].mxu1 %vm427_vm7, %v3504_v57  ;;  %v1342_v57 = vld [vmem:[#allocation7 + $0x30] sm:$0xff] }
 0x783   :  { %3531 = vmatprep.mubr.msk.f32.mxu1 %vm4237_vm8, %v4238_v45 }
 0x855   :  { %v3515_v3 = vpop.f32.mrb[2].mxu1 }
 0x856   :  { %v926_v6 = vadd.f32 %v3515_v3, %v3188_v2  ;;  %v920_v7 = vpop.f32.mrb[3].mxu1 }
 0x857   :  { %v921_v8 = vadd.f32 %v3188_v2, %v920_v7  ;;  %v3786_v2 = vpack.c.bf16 %v1343_v63, %v1342_v57  ;;  %v1707_v57 = vsub.f32 2.0, %v1696_v56 }
 0x858   :  { %v930_v11 = vmax.f32 %v926_v6, 0.0  ;;  %v3199_v6 = vld [vmem:[#allocation13 + $0x1] ss:$0 sm:$0xff] }
 0x859   :  { %v929_v9 = vmax.f32 %v921_v8, 0.0 }
 0x85b   :  { %3524 = vmatprep.mubr.msk.f32.mxu0 %vm427_vm7, %v929_v9  ;;  %v3200_v9 = vld [vmem:[#allocation15 + $0x1] ss:$0 sm:$0xff] }
 0x85c   :  { %3525 = vmatmul.mubr.msk.f32.vlgmr.msra.gmra.mrb[10].mxu0 %vm427_vm7, %v930_v11 }
 0x85d   :  { %3536 = vmatprep.mubr.msk.f32.mxu0 %vm605_vm9, %v4576_v61 }
 0x92f   :  { %v3526_v14 = vpop.f32.mrb[10].mxu0 }
 0x930   :  { %v1022_v15 = vadd.f32 %v3526_v14, %v3191_v13  ;;  %v1016_v16 = vpop.f32.mrb[11].mxu0 }
 0x931   :  { %v1017_v17 = vadd.f32 %v3191_v13, %v1016_v16 }
 0x932   :  { %v4619_v18 = vmax.f32 %v1022_v15, 0.0 }
 0x933   :  { %v4621_v19 = vmax.f32 %v1017_v17, 0.0 }
 0x934   :  { %v1028_v20 = vmul.f32 %v4619_v18, %v4619_v18 }
 0x935   :  { %v1027_v21 = vmul.f32 %v4621_v19, %v4621_v19 }
 0x937   :  { %v3899_v22 = vpack.i.bf16 %v1028_v20, %v1027_v21 }
 0x939   :  { %3900 = vrot.lane.b32.xlu1 %v3899_v22, %s4240_s6 }
 0x9ab   :  { %v3901_v23 = vpop.permute.xlu1 %3900 }
 0x9ac   :  { %v3903_v24 = vunpack.i.h.bf16 %v3901_v23  ;;  %v3902_v25 = vunpack.i.l.bf16 %v3901_v23 }
 0x9ae   :  { %v1038_v26 = vsel %vm427_vm7, %v4619_v18, %v3903_v24  ;;  %v1037_v27 = vsel %vm427_vm7, %v4621_v19, %v3902_v25  ;;  %v1438_v25 = vld [vmem:[#allocation10 + $0x50] sm:$0xff] }
 0x9af   :  { %v3773_v28 = vpack.c.bf16 %v1038_v26, %v1037_v27  ;;  %v1439_v26 = vld [vmem:[#allocation10 + $0x58] sm:$0xff] }
 0x9b0   :  { %v3794_v27 = vpack.c.bf16 %v1439_v26, %v1438_v25  ;;  %v1847_v26 = vld [vmem:[#allocation7 + $0x58] sm:$0xff] }
 0x9b1   :  { %3775 = vmatpush3.bf16.msk.msra.mxu1 %vm4499_vm2, %v3773_v28  ;;  %v3204_v28 = vld [vmem:[#allocation9 + $0x2] ss:$0 sm:$0xff] }
 0x9b4   :  { %3532 = vmatmul.mubr.msk.f32.vlgmr.msra.gmra.mrb[4].mxu1 %vm225_vm3, %v4567_v59 }
 0x9b5   :  { %3543 = vmatprep.mubr.msk.f32.mxu1 %vm225_vm3, %v4503_v5 }
 0xa87   :  { %v1108_v29 = vpop.f32.mrb[4].mxu1 }
 0xa88   :  { %v1112_v30 = vmul.f32 %v1108_v29, %v4580_v62  ;;  %v3533_v31 = vpop.f32.mrb[5].mxu1 }
 0xa8a   :  { %3534 = vmatprep.subr.msk.mxu0 %vm612_vm10, %v1112_v30 }
 0xa8b   :  { %3535 = vmatpush3.msk.msra.mxu0 %vm612_vm10, %v1112_v30 }
 0xa8c   :  { %3537 = vmatmul.mubr.msk.f32.vlgmr.msra.gmra.mrb[12].mxu0 %vm605_vm9, %v4586_v4  ;;  %3783 = vmatprep.subr.bf16.mxu0 %v3782_v60 }
 0xa8d   :  { %3785 = vmatpush3.bf16.msra.mxu0 %v3782_v60  ;;  %v1701_v60 = vrot.slane %v1696_v56, %v4594_v10 }
 0xa8e   :  { %3787 = vmatprep.subr.bf16.mxu0 %v3786_v2 }
 0xa91   :  { %3789 = vmatpush3.bf16.msra.mxu0 %v3786_v2 }
 0xa92   :  { %3798 = vmatprep.subr.bf16.mxu0 %v4236_v42 }
 0xb5f   :  { %v3538_v37 = vpop.f32.mrb[12].mxu0 }
 0xb60   :  { %v1200_v38 = vmul.f32 %v3538_v37, %v1197_v35  ;;  %v1206_v39 = vmul.f32 %v3538_v37, %v3538_v37  ;;  %v1182_v40 = vpop.f32.mrb[13].mxu0 }
 0xb61   :  { %v1199_v41 = vmul.f32 %v1197_v35, %v1182_v40  ;;  %v1205_v43 = vmul.f32 %v1182_v40, %v1182_v40  ;;  %v3207_v35 = vld [vmem:[#allocation12 + $0x2] ss:$0 sm:$0xff] }
 0xb62   :  { %v1214_v47 = vmul.f32 %v1211_v36, %v1206_v39  ;;  %v1202_v3 = vsub.f32 %v4619_v18, %v1200_v38  ;;  %v1436_v18 = vld [vmem:[#allocation10 + $0x40] sm:$0xff] }
 0xb63   :  { %v1213_v48 = vmul.f32 %v1211_v36, %v1205_v43  ;;  %v1201_v7 = vsub.f32 %v4621_v19, %v1199_v41  ;;  %v1437_v19 = vld [vmem:[#allocation10 + $0x48] sm:$0xff] }
 0xb64   :  { %1219 = vrot.lane.b32.xlu1 %v1214_v47, %s4240_s6  ;;  %v1236_v8 = vmul.f32 %v3199_v6, %v1202_v3  ;;  %v3790_v22 = vpack.c.bf16 %v1437_v19, %v1436_v18  ;;  %v1844_v19 = vld [vmem:[#allocation7 + $0x40] sm:$0xff] }
 0xb65   :  { %1217 = vrot.lane.b32.xlu0 %v1213_v48, %s4240_s6  ;;  %v1235_v13 = vmul.f32 %v3199_v6, %v1201_v7 }
 0xbd6   :  { %v1220_v49 = vpop.permute.xlu1 %1219 }
 0xbd7   :  { %v1224_v50 = vsub.f32 %v3538_v37, %v1220_v49  ;;  %v1218_v51 = vpop.permute.xlu0 %1217 }
 0xbd8   :  { %v1223_v52 = vsub.f32 %v1182_v40, %v1218_v51 }
 0xbd9   :  { %v1226_v53 = vmax.f32 %v1224_v50, 0.0 }
 0xbda   :  { %v1225_v54 = vmax.f32 %v1223_v52, 0.0 }
 0xbdb   :  { %v1238_v55 = vadd.f32 1e-05, %v1226_v53 }
 0xbdc   :  { %v1237_v44 = vadd.f32 1e-05, %v1225_v54 }
 0xbdd   :  { %3923 = vrsqrt.f32 %v1238_v55 }
 0xbde   :  { %3925 = vrsqrt.f32 %v1237_v44 }
 0xbe7   :  { %v3924_v58 = vpop.eup %3923 }
 0xbe8   :  { %v3926_v1 = vpop.eup %3925  ;;  %1245 = vrot.lane.b32.xlu1 %v3924_v58, %s4241_s3  ;;  %v1708_v58 = vmul.f32 %v1707_v57, %v1696_v56 }
 0xbe9   :  { %1243 = vrot.lane.b32.xlu0 %v3926_v1, %s4241_s3 }
 0xbea   :  { %v1715_v63 = vrot.slane %v1708_v58, %v4594_v10 }
 0xc5a   :  { %v1246_v11 = vpop.permute.xlu1 %1245 }
 0xc5b   :  { %v1250_v14 = vmul.f32 %v1246_v11, %v1236_v8  ;;  %v1244_v15 = vpop.permute.xlu0 %1243 }
 0xc5c   :  { %v1249_v16 = vmul.f32 %v1244_v15, %v1235_v13 }
 0xc5d   :  { %v1260_v17 = vadd.f32 %v3200_v9, %v1250_v14 }
 0xc5e   :  { %v1259_v20 = vadd.f32 %v3200_v9, %v1249_v16 }
 0xc60   :  { %v3776_v21 = vpack.c.bf16 %v1260_v17, %v1259_v20 }
 0xc62   :  { %3778 = vmatprep.subr.msk.bf16.mxu1 %vm4499_vm2, %v3776_v21 }
 0xc63   :  { %3781 = vmatpush3.bf16.msk.msra.mxu1 %vm4499_vm2, %v3776_v21 }
 0xc64   :  { %3791 = vmatprep.subr.bf16.mxu1 %v3790_v22 }
 0xc66   :  { %3544 = vmatmul.mubr.msk.f32.vlgmr.msra.gmra.mrb[6].mxu1 %vm225_vm3, %v4521_v12 }
 0xc67   :  { %3793 = vmatpush3.bf16.msra.mxu1 %v3790_v22  ;;  %v1845_v22 = vld [vmem:[#allocation7 + $0x48] sm:$0xff] }
 0xc68   :  { %3795 = vmatprep.subr.bf16.mxu1 %v3794_v27  ;;  %v3808_v25 = vpack.c.bf16 %v1845_v22, %v1844_v19  ;;  %v2200_v22 = vld [vmem:[#allocation16 + $0x3] sm:$0x1] }
 0xc6b   :  { %3797 = vmatpush3.bf16.msra.mxu1 %v3794_v27 }
 0xd39   :  { %v3545_v23 = vpop.f32.mrb[6].mxu1 }
 0xd3a   :  { %v1330_v24 = vpop.f32.mrb[7].mxu1 }
 0xd3b   :  { %3554 = vmatprep.mubr.msk.f32.mxu0 %vm427_vm7, %v1330_v24 }
 0xd3c   :  { %3555 = vmatmul.mubr.msk.f32.vlgmr.msra.gmra.mrb[14].mxu0 %vm427_vm7, %v3545_v23  ;;  %v1846_v23 = vld [vmem:[#allocation7 + $0x50] sm:$0xff] }
 0xd3d   :  { %3572 = vmatprep.mubr.msk.f32.mxu0 %vm4237_vm8, %v4238_v45 }
 0xe0f   :  { %v3556_v29 = vpop.f32.mrb[14].mxu0 }
 0xe10   :  { %v1430_v30 = vadd.f32 %v3556_v29, %v3204_v28  ;;  %v1424_v31 = vpop.f32.mrb[15].mxu0 }
 0xe11   :  { %v1425_v32 = vadd.f32 %v3204_v28, %v1424_v31  ;;  %v3812_v28 = vpack.c.bf16 %v1847_v26, %v1846_v23  ;;  %v2211_v23 = vsub.f32 2.0, %v2200_v22 }
 0xe12   :  { %v1434_v34 = vmax.f32 %v1430_v30, 0.0  ;;  %v3215_v30 = vld [vmem:[#allocation13 + $0x2] ss:$0 sm:$0xff] }
 0xe13   :  { %v1433_v33 = vmax.f32 %v1425_v32, 0.0 }
 0xe15   :  { %3565 = vmatprep.mubr.msk.f32.mxu1 %vm427_vm7, %v1433_v33  ;;  %v3216_v33 = vld [vmem:[#allocation15 + $0x2] ss:$0 sm:$0xff] }
 0xe16   :  { %3566 = vmatmul.mubr.msk.f32.vlgmr.msra.gmra.mrb[8].mxu1 %vm427_vm7, %v1434_v34 }
 0xe17   :  { %3577 = vmatprep.mubr.msk.f32.mxu1 %vm605_vm9, %v4576_v61 }
 0xee9   :  { %v3567_v36 = vpop.f32.mrb[8].mxu1 }
 0xeea   :  { %v1526_v37 = vadd.f32 %v3567_v36, %v3207_v35  ;;  %v1520_v38 = vpop.f32.mrb[9].mxu1 }
 0xeeb   :  { %v1521_v39 = vadd.f32 %v3207_v35, %v1520_v38 }
 0xeec   :  { %v4666_v40 = vmax.f32 %v1526_v37, 0.0 }
 0xeed   :  { %v4668_v41 = vmax.f32 %v1521_v39, 0.0 }
 0xeee   :  { %v1532_v43 = vmul.f32 %v4666_v40, %v4666_v40 }
 0xeef   :  { %v1531_v47 = vmul.f32 %v4668_v41, %v4668_v41 }
 0xef1   :  { %v3904_v48 = vpack.i.bf16 %v1532_v43, %v1531_v47 }
 0xef3   :  { %3905 = vrot.lane.b32.xlu0 %v3904_v48, %s4240_s6 }
 0xf65   :  { %v3906_v49 = vpop.permute.xlu0 %3905 }
 0xf66   :  { %v3908_v50 = vunpack.i.h.bf16 %v3906_v49  ;;  %v3907_v51 = vunpack.i.l.bf16 %v3906_v49 }
 0xf68   :  { %v1542_v52 = vsel %vm427_vm7, %v4666_v40, %v3908_v50  ;;  %v1541_v53 = vsel %vm427_vm7, %v4668_v41, %v3907_v51  ;;  %v1942_v51 = vld [vmem:[#allocation10 + $0x70] sm:$0xff] }
 0xf69   :  { %v3799_v54 = vpack.c.bf16 %v1542_v52, %v1541_v53  ;;  %v1943_v52 = vld [vmem:[#allocation10 + $0x78] sm:$0xff] }
 0xf6a   :  { %v3820_v53 = vpack.c.bf16 %v1943_v52, %v1942_v51  ;;  %v2351_v51 = vld [vmem:[#allocation7 + $0x78] sm:$0xff] }
 0xf6b   :  { %3801 = vmatpush3.bf16.msk.msra.mxu0 %vm4499_vm2, %v3799_v54  ;;  %v3220_v54 = vld [vmem:[#allocation9 + $0x3] ss:$0 sm:$0xff] }
 0xf6e   :  { %3573 = vmatmul.mubr.msk.f32.vlgmr.msra.gmra.mrb[16].mxu0 %vm225_vm3, %v4567_v59 }
 0xf6f   :  { %3584 = vmatprep.mubr.msk.f32.mxu0 %vm225_vm3, %v4503_v5 }
0x1041   :  { %v1612_v55 = vpop.f32.mrb[16].mxu0 }
0x1042   :  { %v1616_v44 = vmul.f32 %v1612_v55, %v4580_v62  ;;  %v3574_v46 = vpop.f32.mrb[17].mxu0 }
0x1044   :  { %3575 = vmatprep.subr.msk.mxu1 %vm612_vm10, %v1616_v44 }
0x1045   :  { %3576 = vmatpush3.msk.msra.mxu1 %vm612_vm10, %v1616_v44 }
0x1046   :  { %3578 = vmatmul.mubr.msk.f32.vlgmr.msra.gmra.mrb[10].mxu1 %vm605_vm9, %v4586_v4  ;;  %3809 = vmatprep.subr.bf16.mxu1 %v3808_v25 }
0x1047   :  { %3811 = vmatpush3.bf16.msra.mxu1 %v3808_v25  ;;  %v2205_v25 = vrot.slane %v2200_v22, %v4594_v10 }
0x1048   :  { %3813 = vmatprep.subr.bf16.mxu1 %v3812_v28 }
0x104b   :  { %3815 = vmatpush3.bf16.msra.mxu1 %v3812_v28 }
0x104c   :  { %3824 = vmatprep.subr.bf16.mxu1 %v4236_v42 }
0x1119   :  { %v3579_v1 = vpop.f32.mrb[10].mxu1 }
0x111a   :  { %v1704_v2 = vmul.f32 %v3579_v1, %v1701_v60  ;;  %v1710_v3 = vmul.f32 %v3579_v1, %v3579_v1  ;;  %v1686_v6 = vpop.f32.mrb[11].mxu1 }
0x111b   :  { %v1703_v7 = vmul.f32 %v1701_v60, %v1686_v6  ;;  %v1709_v8 = vmul.f32 %v1686_v6, %v1686_v6  ;;  %v3223_v60 = vld [vmem:[#allocation12 + $0x3] ss:$0 sm:$0xff] }
0x111c   :  { %v1718_v9 = vmul.f32 %v1715_v63, %v1710_v3  ;;  %v1706_v29 = vsub.f32 %v4666_v40, %v1704_v2  ;;  %v1940_v40 = vld [vmem:[#allocation10 + $0x60] sm:$0xff] }
0x111d   :  { %v1717_v11 = vmul.f32 %v1715_v63, %v1709_v8  ;;  %v1705_v31 = vsub.f32 %v4668_v41, %v1703_v7  ;;  %v1941_v41 = vld [vmem:[#allocation10 + $0x68] sm:$0xff] }
0x111e   :  { %1723 = vrot.lane.b32.xlu0 %v1718_v9, %s4240_s6  ;;  %v1740_v32 = vmul.f32 %v3215_v30, %v1706_v29  ;;  %v3816_v48 = vpack.c.bf16 %v1941_v41, %v1940_v40  ;;  %v2348_v40 = vld [vmem:[#allocation7 + $0x60] sm:$0xff]  ;;  %v2349_v41 = vld [vmem:[#allocation7 + $0x68] sm:$0xff] }
0x111f   :  { %1721 = vrot.lane.b32.xlu1 %v1717_v11, %s4240_s6  ;;  %v1739_v35 = vmul.f32 %v3215_v30, %v1705_v31 }
0x1190   :  { %v1724_v13 = vpop.permute.xlu0 %1723 }
0x1191   :  { %v1728_v14 = vsub.f32 %v3579_v1, %v1724_v13  ;;  %v1722_v15 = vpop.permute.xlu1 %1721 }
0x1192   :  { %v1727_v16 = vsub.f32 %v1686_v6, %v1722_v15 }
0x1193   :  { %v1730_v17 = vmax.f32 %v1728_v14, 0.0 }
0x1194   :  { %v1729_v20 = vmax.f32 %v1727_v16, 0.0 }
0x1195   :  { %v1742_v21 = vadd.f32 1e-05, %v1730_v17 }
0x1196   :  { %v1741_v18 = vadd.f32 1e-05, %v1729_v20 }
0x1197   :  { %3927 = vrsqrt.f32 %v1742_v21 }
0x1198   :  { %3929 = vrsqrt.f32 %v1741_v18 }
0x11a1   :  { %v3928_v24 = vpop.eup %3927 }
0x11a2   :  { %v3930_v27 = vpop.eup %3929  ;;  %1749 = vrot.lane.b32.xlu0 %v3928_v24, %s4241_s3  ;;  %v2212_v24 = vmul.f32 %v2211_v23, %v2200_v22 }
0x11a3   :  { %1747 = vrot.lane.b32.xlu1 %v3930_v27, %s4241_s3 }
0x11a4   :  { %v2219_v26 = vrot.slane %v2212_v24, %v4594_v10 }
0x1214   :  { %v1750_v34 = vpop.permute.xlu0 %1749 }
0x1215   :  { %v1754_v36 = vmul.f32 %v1750_v34, %v1740_v32  ;;  %v1748_v37 = vpop.permute.xlu1 %1747 }
0x1216   :  { %v1753_v38 = vmul.f32 %v1748_v37, %v1739_v35 }
0x1217   :  { %v1764_v39 = vadd.f32 %v3216_v33, %v1754_v36 }
0x1218   :  { %v1763_v43 = vadd.f32 %v3216_v33, %v1753_v38 }
0x121a   :  { %v3802_v47 = vpack.c.bf16 %v1764_v39, %v1763_v43 }
0x121c   :  { %3804 = vmatprep.subr.msk.bf16.mxu0 %vm4499_vm2, %v3802_v47 }
0x121d   :  { %3807 = vmatpush3.bf16.msk.msra.mxu0 %vm4499_vm2, %v3802_v47 }
0x121e   :  { %3817 = vmatprep.subr.bf16.mxu0 %v3816_v48 }
0x1220   :  { %3585 = vmatmul.mubr.msk.f32.vlgmr.msra.gmra.mrb[18].mxu0 %vm225_vm3, %v4521_v12 }
0x1221   :  { %3819 = vmatpush3.bf16.msra.mxu0 %v3816_v48  ;;  %v2350_v48 = vld [vmem:[#allocation7 + $0x70] sm:$0xff] }
0x1222   :  { %3821 = vmatprep.subr.bf16.mxu0 %v3820_v53 }
0x1225   :  { %3823 = vmatpush3.bf16.msra.mxu0 %v3820_v53  ;;  %v3838_v53 = vpack.c.bf16 %v2351_v51, %v2350_v48 }
0x12f3   :  { %v3586_v49 = vpop.f32.mrb[18].mxu0 }
0x12f4   :  { %v1834_v50 = vpop.f32.mrb[19].mxu0 }
0x12f5   :  { %3595 = vmatprep.mubr.msk.f32.mxu1 %vm427_vm7, %v1834_v50  ;;  %v3834_v50 = vpack.c.bf16 %v2349_v41, %v2348_v40 }
0x12f6   :  { %3596 = vmatmul.mubr.msk.f32.vlgmr.msra.gmra.mrb[12].mxu1 %vm427_vm7, %v3586_v49 }
0x12f7   :  { %3613 = vmatprep.mubr.msk.f32.mxu1 %vm4237_vm8, %v4238_v45 }
0x13c9   :  { %v3597_v55 = vpop.f32.mrb[12].mxu1 }
0x13ca   :  { %v1934_v44 = vadd.f32 %v3597_v55, %v3220_v54  ;;  %v1928_v46 = vpop.f32.mrb[13].mxu1  ;;  %v3231_v55 = vld [vmem:[#allocation13 + $0x3] ss:$0 sm:$0xff] }
0x13cb   :  { %v1929_v56 = vadd.f32 %v3220_v54, %v1928_v46 }
0x13cc   :  { %v1938_v58 = vmax.f32 %v1934_v44, 0.0 }
0x13cd   :  { %v1937_v57 = vmax.f32 %v1929_v56, 0.0  ;;  %v3232_v56 = vld [vmem:[#allocation15 + $0x3] ss:$0 sm:$0xff] }
0x13cf   :  { %3606 = vmatprep.mubr.msk.f32.mxu0 %vm427_vm7, %v1937_v57 }
0x13d0   :  { %3607 = vmatmul.mubr.msk.f32.vlgmr.msra.gmra.mrb[20].mxu0 %vm427_vm7, %v1938_v58 }
0x13d1   :  { %3618 = vmatprep.mubr.msk.f32.mxu0 %vm605_vm9, %v4576_v61 }
0x14a3   :  { %v3608_v63 = vpop.f32.mrb[20].mxu0 }
0x14a4   :  { %v2030_v1 = vadd.f32 %v3608_v63, %v3223_v60  ;;  %v2024_v2 = vpop.f32.mrb[21].mxu0 }
0x14a5   :  { %v2025_v3 = vadd.f32 %v3223_v60, %v2024_v2 }
0x14a6   :  { %v4713_v6 = vmax.f32 %v2030_v1, 0.0 }
0x14a7   :  { %v4715_v7 = vmax.f32 %v2025_v3, 0.0 }
0x14a8   :  { %v2036_v8 = vmul.f32 %v4713_v6, %v4713_v6 }
0x14a9   :  { %v2035_v9 = vmul.f32 %v4715_v7, %v4715_v7 }
0x14ab   :  { %v3909_v11 = vpack.i.bf16 %v2036_v8, %v2035_v9 }
0x14ad   :  { %3910 = vrot.lane.b32.xlu1 %v3909_v11, %s4240_s6 }
0x151f   :  { %v3911_v13 = vpop.permute.xlu1 %3910 }
0x1520   :  { %v3913_v14 = vunpack.i.h.bf16 %v3911_v13  ;;  %v3912_v15 = vunpack.i.l.bf16 %v3911_v13  ;;  %v2446_v13 = vld [vmem:[#allocation10 + $0x90] sm:$0xff] }
0x1522   :  { %v2046_v16 = vsel %vm427_vm7, %v4713_v6, %v3913_v14  ;;  %v2045_v17 = vsel %vm427_vm7, %v4715_v7, %v3912_v15  ;;  %v2447_v14 = vld [vmem:[#allocation10 + $0x98] sm:$0xff] }
0x1523   :  { %v3825_v20 = vpack.c.bf16 %v2046_v16, %v2045_v17  ;;  %v3846_v15 = vpack.c.bf16 %v2447_v14, %v2446_v13  ;;  %v3248_v14 = vld [vmem:[#allocation15 + $0x4] ss:$0 sm:$0xff] }
0x1525   :  { %3827 = vmatpush3.bf16.msk.msra.mxu1 %vm4499_vm2, %v3825_v20 }
0x1528   :  { %3614 = vmatmul.mubr.msk.f32.vlgmr.msra.gmra.mrb[14].mxu1 %vm225_vm3, %v4567_v59 }
0x1529   :  { %3625 = vmatprep.mubr.msk.f32.mxu1 %vm225_vm3, %v4503_v5 }
0x15fb   :  { %v2116_v21 = vpop.f32.mrb[14].mxu1 }
0x15fc   :  { %v2120_v18 = vmul.f32 %v2116_v21, %v4580_v62  ;;  %v3615_v19 = vpop.f32.mrb[15].mxu1 }
0x15fe   :  { %3616 = vmatprep.subr.msk.mxu0 %vm612_vm10, %v2120_v18 }
0x15ff   :  { %3617 = vmatpush3.msk.msra.mxu0 %vm612_vm10, %v2120_v18 }
0x1600   :  { %3619 = vmatmul.mubr.msk.f32.vlgmr.msra.gmra.mrb[22].mxu0 %vm605_vm9, %v4586_v4  ;;  %3835 = vmatprep.subr.bf16.mxu0 %v3834_v50 }
0x1601   :  { %3837 = vmatpush3.bf16.msra.mxu0 %v3834_v50 }
0x1602   :  { %3839 = vmatprep.subr.bf16.mxu0 %v3838_v53 }
0x1605   :  { %3841 = vmatpush3.bf16.msra.mxu0 %v3838_v53 }
0x1606   :  { %3850 = vmatprep.subr.bf16.mxu0 %v4236_v42  ;;  %v2444_v42 = vld [vmem:[#allocation10 + $0x80] sm:$0xff] }
0x16d3   :  { %v3620_v27 = vpop.f32.mrb[22].mxu0 }
0x16d4   :  { %v2208_v5 = vmul.f32 %v3620_v27, %v2205_v25  ;;  %v2214_v28 = vmul.f32 %v3620_v27, %v3620_v27  ;;  %v2190_v29 = vpop.f32.mrb[23].mxu0 }
0x16d5   :  { %v2207_v30 = vmul.f32 %v2205_v25, %v2190_v29  ;;  %v2213_v31 = vmul.f32 %v2190_v29, %v2190_v29 }
0x16d6   :  { %v2222_v32 = vmul.f32 %v2219_v26, %v2214_v28  ;;  %v2210_v54 = vsub.f32 %v4713_v6, %v2208_v5  ;;  %v2445_v6 = vld [vmem:[#allocation10 + $0x88] sm:$0xff] }
0x16d7   :  { %v2221_v33 = vmul.f32 %v2219_v26, %v2213_v31  ;;  %v2209_v44 = vsub.f32 %v4715_v7, %v2207_v30  ;;  %v3842_v7 = vpack.c.bf16 %v2445_v6, %v2444_v42  ;;  %v2964_v42 = vld [vmem:[#allocation18 + $0x18] sm:$0xff] }
0x16d8   :  { %2227 = vrot.lane.b32.xlu1 %v2222_v32, %s4240_s6  ;;  %v2244_v46 = vmul.f32 %v3231_v55, %v2210_v54 }
0x16d9   :  { %2225 = vrot.lane.b32.xlu0 %v2221_v33, %s4240_s6  ;;  %v2243_v58 = vmul.f32 %v3231_v55, %v2209_v44 }
0x174a   :  { %v2228_v34 = vpop.permute.xlu1 %2227 }
0x174b   :  { %v2232_v35 = vsub.f32 %v3620_v27, %v2228_v34  ;;  %v2226_v36 = vpop.permute.xlu0 %2225 }
0x174c   :  { %v2231_v37 = vsub.f32 %v2190_v29, %v2226_v36 }
0x174d   :  { %v2234_v38 = vmax.f32 %v2232_v35, 0.0 }
0x174e   :  { %v2233_v39 = vmax.f32 %v2231_v37, 0.0 }
0x174f   :  { %v2246_v43 = vadd.f32 1e-05, %v2234_v38  ;;  %v2704_v38 = vld [vmem:[#allocation16 + $0x4] sm:$0x1] }
0x1750   :  { %v2245_v47 = vadd.f32 1e-05, %v2233_v39  ;;  %v2715_v39 = vsub.f32 2.0, %v2704_v38 }
0x1751   :  { %3931 = vrsqrt.f32 %v2246_v43 }
0x1752   :  { %3933 = vrsqrt.f32 %v2245_v47  ;;  %v2716_v43 = vmul.f32 %v2715_v39, %v2704_v38  ;;  %v2709_v47 = vrot.slane %v2704_v38, %v4594_v10 }
0x1754   :  { %v2723_v40 = vrot.slane %v2716_v43, %v4594_v10 }
0x175b   :  { %v3932_v49 = vpop.eup %3931 }
0x175c   :  { %v3934_v52 = vpop.eup %3933  ;;  %2253 = vrot.lane.b32.xlu1 %v3932_v49, %s4241_s3 }
0x175d   :  { %2251 = vrot.lane.b32.xlu0 %v3934_v52, %s4241_s3 }
0x17ce   :  { %v2254_v57 = vpop.permute.xlu1 %2253 }
0x17cf   :  { %v2258_v60 = vmul.f32 %v2254_v57, %v2244_v46  ;;  %v2252_v63 = vpop.permute.xlu0 %2251  ;;  %v3276_v57 = vld [vmem:[%s4880_s5] sm:$0xff]  }
0x17d0   :  { %v2257_v1 = vmul.f32 %v2252_v63, %v2243_v58  ;;  %v3277_v58 = vunpack.c.l.bf16 %v3276_v57 }
0x17d1   :  { %v2268_v2 = vadd.f32 %v3232_v56, %v2258_v60 }
0x17d2   :  { %v2267_v3 = vadd.f32 %v3232_v56, %v2257_v1  ;;  %v2961_v1 = vld [vmem:[#allocation18] sm:$0xff] }
0x17d4   :  { %v3828_v8 = vpack.c.bf16 %v2268_v2, %v2267_v3  ;;  %v2962_v2 = vld [vmem:[#allocation18 + $0x8] sm:$0xff]  ;;  %v2963_v3 = vld [vmem:[#allocation18 + $0x10] sm:$0xff] }
0x17d5   :  { %v3864_v6 = vpack.c.bf16 %v2964_v42, %v2963_v3 }
0x17d6   :  { %3830 = vmatprep.subr.msk.bf16.mxu1 %vm4499_vm2, %v3828_v8 }
0x17d7   :  { %3833 = vmatpush3.bf16.msk.msra.mxu1 %vm4499_vm2, %v3828_v8  ;;  %v3860_v8 = vpack.c.bf16 %v2962_v2, %v2961_v1 }
0x17d8   :  { %3843 = vmatprep.subr.bf16.mxu1 %v3842_v7 }
0x17da   :  { %3626 = vmatmul.mubr.msk.f32.vlgmr.msra.gmra.mrb[16].mxu1 %vm225_vm3, %v4521_v12  ;;  %v3236_v12 = vld [vmem:[#allocation9 + $0x4] ss:$0 sm:$0xff] }
0x17db   :  { %3845 = vmatpush3.bf16.msra.mxu1 %v3842_v7 }
0x17dc   :  { %3847 = vmatprep.subr.bf16.mxu1 %v3846_v15 }
0x17df   :  { %3849 = vmatpush3.bf16.msra.mxu1 %v3846_v15 }
0x18ad   :  { %v3627_v9 = vpop.f32.mrb[16].mxu1 }
0x18ae   :  { %v2338_v11 = vpop.f32.mrb[17].mxu1 }
0x18af   :  { %3636 = vmatprep.mubr.msk.f32.mxu0 %vm427_vm7, %v2338_v11 }
0x18b0   :  { %3637 = vmatmul.mubr.msk.f32.vlgmr.msra.gmra.mrb[24].mxu0 %vm427_vm7, %v3627_v9  ;;  %v3247_v9 = vld [vmem:[#allocation13 + $0x4] ss:$0 sm:$0xff] }
0x18b1   :  { %3654 = vmatprep.mubr.msk.f32.mxu0 %vm4237_vm8, %v4238_v45  ;;  %v3239_v45 = vld [vmem:[#allocation12 + $0x4] ss:$0 sm:$0xff] }
0x1983   :  { %v3638_v16 = vpop.f32.mrb[24].mxu0 }
0x1984   :  { %v2438_v17 = vadd.f32 %v3638_v16, %v3236_v12  ;;  %v2432_v20 = vpop.f32.mrb[25].mxu0 }
0x1985   :  { %v2433_v21 = vadd.f32 %v3236_v12, %v2432_v20 }
0x1986   :  { %v2442_v19 = vmax.f32 %v2438_v17, 0.0 }
0x1987   :  { %v2441_v18 = vmax.f32 %v2433_v21, 0.0 }
0x1989   :  { %3647 = vmatprep.mubr.msk.f32.mxu1 %vm427_vm7, %v2441_v18 }
0x198a   :  { %3648 = vmatmul.mubr.msk.f32.vlgmr.msra.gmra.mrb[18].mxu1 %vm427_vm7, %v2442_v19 }
0x198b   :  { %3659 = vmatprep.mubr.msk.f32.mxu1 %vm605_vm9, %v4576_v61 }
0x1a5d   :  { %v3649_v22 = vpop.f32.mrb[18].mxu1 }
0x1a5e   :  { %v2534_v23 = vadd.f32 %v3649_v22, %v3239_v45  ;;  %v2528_v24 = vpop.f32.mrb[19].mxu1  ;;  %v3278_v22 = vunpack.c.h.bf16 %v3276_v57 }
0x1a5f   :  { %v2529_v25 = vadd.f32 %v3239_v45, %v2528_v24  ;;  %v3295_v45 = vld [vmem:[%s4880_s5 + $0x8] sm:$0xff]   ;;  %v3296_v24 = vld [vmem:[%s4880_s5 + $0x10] sm:$0xff]  }
0x1a60   :  { %v4760_v26 = vmax.f32 %v2534_v23, 0.0  ;;  %v3281_v23 = vunpack.c.l.bf16 %v3295_v45 }
0x1a61   :  { %v4762_v27 = vmax.f32 %v2529_v25, 0.0  ;;  %v3282_v25 = vunpack.c.h.bf16 %v3295_v45 }
0x1a62   :  { %v2540_v5 = vmul.f32 %v4760_v26, %v4760_v26 }
0x1a63   :  { %v2539_v28 = vmul.f32 %v4762_v27, %v4762_v27 }
0x1a65   :  { %v3914_v29 = vpack.i.bf16 %v2540_v5, %v2539_v28  ;;  %v3286_v5 = vunpack.c.h.bf16 %v3296_v24  ;;  %v3298_v28 = vld [vmem:[%s4880_s5 + $0x20] sm:$0xff]  }
0x1a67   :  { %3915 = vrot.lane.b32.xlu0 %v3914_v29, %s4240_s6 }
0x1ad9   :  { %v3916_v30 = vpop.permute.xlu0 %3915 }
0x1ada   :  { %v3918_v61 = vunpack.i.h.bf16 %v3916_v30  ;;  %v3917_v31 = vunpack.i.l.bf16 %v3916_v30  ;;  %v3293_v30 = vunpack.c.l.bf16 %v3298_v28 }
0x1adc   :  { %v2550_v32 = vsel %vm427_vm7, %v4760_v26, %v3918_v61  ;;  %v2549_v33 = vsel %vm427_vm7, %v4762_v27, %v3917_v31  ;;  %v2783_v61 = vld [vmem:[%s4880_s5 + $0x28] sm:$0xf]  ;;  %v3294_v31 = vunpack.c.h.bf16 %v3298_v28 }
0x1add   :  { %v3851_v34 = vpack.c.bf16 %v2550_v32, %v2549_v33  ;;  %v2795_v32 = vunpack.c.l.bf16 %v2783_v61  ;;  %v2784_v33 = vld [vmem:[%s4880_s5 + $0x2c] sm:$0x1] }
0x1adf   :  { %3853 = vmatpush3.bf16.msk.msra.mxu0 %vm4499_vm2, %v3851_v34  ;;  %v2796_v34 = vunpack.c.l.bf16 %v2784_v33 }
0x1ae2   :  { %3655 = vmatmul.mubr.msk.f32.vlgmr.msra.gmra.mrb[26].mxu0 %vm225_vm3, %v4567_v59 }
0x1ae3   :  { %3666 = vmatprep.mubr.msk.f32.mxu0 %vm225_vm3, %v3277_v58 }
0x1bb5   :  { %v2620_v35 = vpop.f32.mrb[26].mxu0 }
0x1bb6   :  { %v2624_v36 = vmul.f32 %v2620_v35, %v4580_v62  ;;  %v3656_v37 = vpop.f32.mrb[27].mxu0 }
0x1bb8   :  { %3657 = vmatprep.subr.msk.mxu1 %vm612_vm10, %v2624_v36 }
0x1bb9   :  { %3658 = vmatpush3.msk.msra.mxu1 %vm612_vm10, %v2624_v36 }
0x1bba   :  { %3660 = vmatmul.mubr.msk.f32.vlgmr.msra.gmra.mrb[20].mxu1 %vm605_vm9, %v4586_v4  ;;  %3861 = vmatprep.subr.bf16.mxu1 %v3860_v8 }
0x1bbb   :  { %3863 = vmatpush3.bf16.msra.mxu1 %v3860_v8 }
0x1bbc   :  { %3865 = vmatprep.subr.bf16.mxu1 %v3864_v6 }
0x1bbf   :  { %3867 = vmatpush3.bf16.msra.mxu1 %v3864_v6 }
0x1c8d   :  { %v3661_v41 = vpop.f32.mrb[20].mxu1 }
0x1c8e   :  { %v2712_v59 = vmul.f32 %v3661_v41, %v2709_v47  ;;  %v2718_v48 = vmul.f32 %v3661_v41, %v3661_v41  ;;  %v2694_v49 = vpop.f32.mrb[21].mxu1 }
0x1c8f   :  { %v2711_v62 = vmul.f32 %v2709_v47, %v2694_v49  ;;  %v2717_v50 = vmul.f32 %v2694_v49, %v2694_v49 }
0x1c90   :  { %v2726_v51 = vmul.f32 %v2723_v40, %v2718_v48  ;;  %v2714_v7 = vsub.f32 %v4760_v26, %v2712_v59  ;;  %v3285_v26 = vunpack.c.l.bf16 %v3296_v24 }
0x1c91   :  { %v2725_v52 = vmul.f32 %v2723_v40, %v2717_v50  ;;  %v2713_v11 = vsub.f32 %v4762_v27, %v2711_v62  ;;  %v3297_v27 = vld [vmem:[%s4880_s5 + $0x18] sm:$0xff]  }
0x1c92   :  { %2731 = vrot.lane.b32.xlu0 %v2726_v51, %s4240_s6  ;;  %v2748_v13 = vmul.f32 %v3247_v9, %v2714_v7  ;;  %v3289_v0 = vunpack.c.l.bf16 %v3297_v27  ;;  %v3290_v29 = vunpack.c.h.bf16 %v3297_v27  ;;  %v3262_v62 = vld [vmem:[#allocation19] ss:$0 sm:$0xff] }
0x1c93   :  { %2729 = vrot.lane.b32.xlu1 %v2725_v52, %s4240_s6  ;;  %v2747_v12 = vmul.f32 %v3247_v9, %v2713_v11 }
0x1d04   :  { %v2732_v4 = vpop.permute.xlu0 %2731 }
0x1d05   :  { %v2736_v53 = vsub.f32 %v3661_v41, %v2732_v4  ;;  %v2730_v54 = vpop.permute.xlu1 %2729 }
0x1d06   :  { %v2735_v55 = vsub.f32 %v2694_v49, %v2730_v54 }
0x1d07   :  { %v2738_v44 = vmax.f32 %v2736_v53, 0.0 }
0x1d08   :  { %v2737_v46 = vmax.f32 %v2735_v55, 0.0 }
0x1d09   :  { %v2750_v56 = vadd.f32 1e-05, %v2738_v44 }
0x1d0a   :  { %v2749_v10 = vadd.f32 1e-05, %v2737_v46 }
0x1d0b   :  { %3935 = vrsqrt.f32 %v2750_v56 }
0x1d0c   :  { %3937 = vrsqrt.f32 %v2749_v10 }
0x1d15   :  { %v3936_v60 = vpop.eup %3935 }
0x1d16   :  { %v3938_v63 = vpop.eup %3937  ;;  %2757 = vrot.lane.b32.xlu0 %v3936_v60, %s4241_s3 }
0x1d17   :  { %2755 = vrot.lane.b32.xlu1 %v3938_v63, %s4241_s3 }
0x1d88   :  { %v2758_v15 = vpop.permute.xlu0 %2757 }
0x1d89   :  { %v2762_v16 = vmul.f32 %v2758_v15, %v2748_v13  ;;  %v2756_v17 = vpop.permute.xlu1 %2755 }
0x1d8a   :  { %v2761_v20 = vmul.f32 %v2756_v17, %v2747_v12 }
0x1d8b   :  { %v2772_v21 = vadd.f32 %v3248_v14, %v2762_v16 }
0x1d8c   :  { %v2771_v18 = vadd.f32 %v3248_v14, %v2761_v20 }
0x1d8e   :  { %v3854_v19 = vpack.c.bf16 %v2772_v21, %v2771_v18 }
0x1d90   :  { %3856 = vmatprep.subr.msk.bf16.mxu0 %vm4499_vm2, %v3854_v19 }
0x1d91   :  { %3859 = vmatpush3.bf16.msk.msra.mxu0 %vm4499_vm2, %v3854_v19 }
0x1d94   :  { %3667 = vmatmul.mubr.msk.f32.vlgmr.msra.gmra.mrb[28].mxu0 %vm225_vm3, %v3278_v22 }
0x1d95   :  { %3669 = vmatprep.mubr.msk.f32.mxu0 %vm225_vm3, %v3281_v23 }
0x1d98   :  { %3670 = vmatmul.mubr.msk.f32.gmra.mrb[30].mxu0 %vm225_vm3, %v3282_v25 }
0x1d99   :  { %3672 = vmatprep.mubr.msk.f32.mxu0 %vm225_vm3, %v3285_v26 }
0x1d9c   :  { %3673 = vmatmul.mubr.msk.f32.gmra.mrb[32].mxu0 %vm225_vm3, %v3286_v5 }
0x1d9d   :  { %3675 = vmatprep.mubr.msk.f32.mxu0 %vm225_vm3, %v3289_v0 }
0x1da0   :  { %3676 = vmatmul.mubr.msk.f32.gmra.mrb[34].mxu0 %vm225_vm3, %v3290_v29 }
0x1da1   :  { %3678 = vmatprep.mubr.msk.f32.mxu0 %vm225_vm3, %v3293_v30 }
0x1da4   :  { %3679 = vmatmul.mubr.msk.f32.gmra.mrb[36].mxu0 %vm225_vm3, %v3294_v31 }
0x1da5   :  { %3681 = vmatprep.mubr.msk.f32.mxu0 %vm225_vm3, %v2795_v32 }
0x1da8   :  { %3682 = vmatmul.mubr.msk.f32.gmra.mrb[38].mxu0 %vm225_vm3, %v2796_v34 }
0x1e67   :  { %v3668_v35 = vpop.f32.mrb[28].mxu0 }
0x1e68   :  { %v2902_v36 = vpop.f32.mrb[29].mxu0 }
0x1e69   :  { %3692 = vmatprep.mubr.msk.f32.mxu1 %vm427_vm7, %v2902_v36 }
0x1e6a   :  { %3693 = vmatmul.mubr.msk.f32.vlgmr.msra.gmra.mrb[22].mxu1 %vm427_vm7, %v3668_v35 }
0x1e6b   :  { %v3671_v37 = vpop.f32.mrb[30].mxu0 }
0x1e6c   :  { %v2912_v38 = vpop.f32.mrb[31].mxu0 }
0x1e6d   :  { %3695 = vmatprep.mubr.msk.f32.mxu1 %vm427_vm7, %v2912_v38 }
0x1e6e   :  { %3696 = vmatmul.mubr.msk.f32.gmra.mrb[24].mxu1 %vm427_vm7, %v3671_v37 }
0x1e6f   :  { %v3674_v39 = vpop.f32.mrb[32].mxu0 }
0x1e70   :  { %v2922_v43 = vpop.f32.mrb[33].mxu0 }
0x1e71   :  { %3698 = vmatprep.mubr.msk.f32.mxu1 %vm427_vm7, %v2922_v43 }
0x1e72   :  { %3699 = vmatmul.mubr.msk.f32.gmra.mrb[26].mxu1 %vm427_vm7, %v3674_v39 }
0x1e73   :  { %v3677_v47 = vpop.f32.mrb[34].mxu0 }
0x1e74   :  { %v2932_v40 = vpop.f32.mrb[35].mxu0 }
0x1e75   :  { %3701 = vmatprep.mubr.msk.f32.mxu1 %vm427_vm7, %v2932_v40 }
0x1e76   :  { %3702 = vmatmul.mubr.msk.f32.gmra.mrb[28].mxu1 %vm427_vm7, %v3677_v47 }
0x1e77   :  { %v3680_v41 = vpop.f32.mrb[36].mxu0 }
0x1e78   :  { %v2942_v59 = vpop.f32.mrb[37].mxu0 }
0x1e79   :  { %3704 = vmatprep.mubr.msk.f32.mxu1 %vm427_vm7, %v2942_v59 }
0x1e7a   :  { %3705 = vmatmul.mubr.msk.f32.gmra.mrb[30].mxu1 %vm427_vm7, %v3680_v41 }
0x1e7b   :  { %v3683_v48 = vpop.f32.mrb[38].mxu0 }
0x1e7c   :  { %v2952_v49 = vpop.f32.mrb[39].mxu0 }
0x1e7d   :  { %3707 = vmatprep.mubr.msk.f32.mxu1 %vm427_vm7, %v2952_v49 }
0x1e7e   :  { %3708 = vmatmul.mubr.msk.f32.gmra.mrb[32].mxu1 %vm427_vm7, %v3683_v48 }
0x1f3d   :  { %v3694_v50 = vpop.f32.mrb[22].mxu1 }
0x1f3e   :  { %v3080_v51 = vadd.f32 %v3694_v50, %v3262_v62  ;;  %v3074_v52 = vpop.f32.mrb[23].mxu1 }
0x1f3f   :  { %v3075_v4 = vadd.f32 %v3262_v62, %v3074_v52 }
0x1f40   :  { %v3134_v53 = vmax.f32 %v3080_v51, 0.0 }
0x1f41   :  { %v3133_v54 = vmax.f32 %v3075_v4, 0.0  ;;  %v3697_v55 = vpop.f32.mrb[24].mxu1 }
0x1f42   :  { %3146 = vst [vmem:[%s4899_s27 + $0x8] sm:$0xff] %v3134_v53  ;;  %v3090_v44 = vadd.f32 %v3697_v55, %v3262_v62  ;;  %v3084_v46 = vpop.f32.mrb[25].mxu1 }
0x1f43   :  { %3145 = vst [vmem:[%s4899_s27] sm:$0xff] %v3133_v54  ;;  %v3085_v56 = vadd.f32 %v3262_v62, %v3084_v46 }
0x1f44   :  { %v3136_v10 = vmax.f32 %v3090_v44, 0.0 }
0x1f45   :  { %v3135_v57 = vmax.f32 %v3085_v56, 0.0  ;;  %v3700_v58 = vpop.f32.mrb[26].mxu1 }
0x1f46   :  { %3148 = vst [vmem:[%s4899_s27 + $0x18] sm:$0xff] %v3136_v10  ;;  %v3100_v60 = vadd.f32 %v3700_v58, %v3262_v62  ;;  %v3094_v63 = vpop.f32.mrb[27].mxu1 }
0x1f47   :  { %3147 = vst [vmem:[%s4899_s27 + $0x10] sm:$0xff] %v3135_v57  ;;  %v3095_v1 = vadd.f32 %v3262_v62, %v3094_v63 }
0x1f48   :  { %v3138_v2 = vmax.f32 %v3100_v60, 0.0 }
0x1f49   :  { %v3137_v3 = vmax.f32 %v3095_v1, 0.0  ;;  %v3703_v8 = vpop.f32.mrb[28].mxu1 }
0x1f4a   :  { %3150 = vst [vmem:[%s4899_s27 + $0x28] sm:$0xff] %v3138_v2  ;;  %v3110_v42 = vadd.f32 %v3703_v8, %v3262_v62  ;;  %v3104_v6 = vpop.f32.mrb[29].mxu1 }
0x1f4b   :  { %3149 = vst [vmem:[%s4899_s27 + $0x20] sm:$0xff] %v3137_v3  ;;  %v3105_v7 = vadd.f32 %v3262_v62, %v3104_v6 }
0x1f4c   :  { %v3140_v9 = vmax.f32 %v3110_v42, 0.0 }
0x1f4d   :  { %v3139_v11 = vmax.f32 %v3105_v7, 0.0  ;;  %v3706_v13 = vpop.f32.mrb[30].mxu1 }
0x1f4e   :  { %3152 = vst [vmem:[%s4899_s27 + $0x38] sm:$0xff] %v3140_v9  ;;  %v3120_v14 = vadd.f32 %v3706_v13, %v3262_v62  ;;  %v3114_v15 = vpop.f32.mrb[31].mxu1 }
0x1f4f   :  { %3151 = vst [vmem:[%s4899_s27 + $0x30] sm:$0xff] %v3139_v11  ;;  %v3115_v12 = vadd.f32 %v3262_v62, %v3114_v15 }
0x1f50   :  { %v3142_v16 = vmax.f32 %v3120_v14, 0.0 }
0x1f51   :  { %v3141_v17 = vmax.f32 %v3115_v12, 0.0  ;;  %v3709_v20 = vpop.f32.mrb[32].mxu1 }
0x1f52   :  { %3154 = vst [vmem:[%s4899_s27 + $0x48] sm:$0xff] %v3142_v16  ;;  %v3130_v21 = vadd.f32 %v3709_v20, %v3262_v62  ;;  %v3124_v18 = vpop.f32.mrb[33].mxu1 }
0x1f53   :  { %3153 = vst [vmem:[%s4899_s27 + $0x40] sm:$0xff] %v3141_v17  ;;  %v3125_v19 = vadd.f32 %v3262_v62, %v3124_v18 }
0x1f54   :  { %v3144_v45 = vmax.f32 %v3130_v21, 0.0 }
0x1f55   :  { %v3143_v22 = vmax.f32 %v3125_v19, 0.0 }
0x1f56   :  { %3156 = vst [vmem:[%s4899_s27 + $0x58] sm:$0x3] %v3144_v45 }
0x1f57   :  { %3155 = vst [vmem:[%s4899_s27 + $0x50] sm:$0xff] %v3143_v22 }
0x1f58   :  { %3161 = vsyncpa [#allocation3], 1 }
0x1f59   :  { %3162 = vsyncpa [#allocation5], 1 }
0x1f5a   :  { %3163 = vsyncpa [#allocation8], 1 }
0x1f5b   :  { %3164 = vsyncpa [#allocation11], 1 }
0x1f5c   :  { %3165 = vsyncpa [#allocation14], 1 }
0x1f5d   :  { %3166 = vsyncpa [#allocation17], 1 }
0x1f5e   :  { %3167 = vsyncpa [#allocation20], 1 }

// kernel: gin_bert_forward.3
= control target key start
LH: loop header
LB: loop body
LE: loop exit
PB: predicated region body
PF: predicated region fallthrough
CT: control target
= control target key end

     0   :  { %s16481_s0 = inlined_call_operand.vmem [shape: s32[2], index: 0, kind: input, shape index: {}]   ;;  %s16482_s1 = inlined_call_operand.vmem [shape: f32[2,45,128], index: 1, kind: input, shape index: {}]   ;;  %s16483_s2 = inlined_call_operand.vmem [shape: bf16[3,8,1280], index: 2, kind: input, shape index: {}]   ;;  %s16484_s3 = inlined_call_operand.vmem [shape: bf16[1280,512], index: 3, kind: input, shape index: {}]   ;;  %s16485_s4 = inlined_call_operand.hbm [shape: f32[1,512], index: 4, kind: input, shape index: {}]   ;;  %s16486_s5 = inlined_call_operand.vmem [shape: bf16[512,128], index: 5, kind: input, shape index: {}]   ;;  %s16487_s6 = inlined_call_operand.hbm [shape: f32[1,128], index: 6, kind: input, shape index: {}]   ;;  %s16488_s7 = inlined_call_operand.vmem [shape: f32[128,128], index: 7, kind: input, shape index: {}]   ;;  %s16489_s8 = inlined_call_operand.vmem [shape: f32[128,64], index: 8, kind: input, shape index: {}]   ;;  %s16490_s9 = inlined_call_operand.vmem [shape: f32[128,64], index: 9, kind: input, shape index: {}]   ;;  %s16491_s10 = inlined_call_operand.hbm [shape: f32[1,64], index: 10, kind: input, shape index: {}]   ;;  %s16492_s11 = inlined_call_operand.hbm [shape: f32[1,64], index: 11, kind: input, shape index: {}]   ;;  %s16493_s12 = inlined_call_operand.vmem [shape: f32[128,512], index: 12, kind: input, shape index: {}]   ;;  %s16494_s13 = inlined_call_operand.vmem [shape: f32[128,512], index: 13, kind: input, shape index: {}]   ;;  %s16495_s14 = inlined_call_operand.hbm [shape: f32[1,512], index: 14, kind: input, shape index: {}]   ;;  %s16496_s15 = inlined_call_operand.vmem [shape: f32[512,128], index: 15, kind: input, shape index: {}]   ;;  %s16497_s16 = inlined_call_operand.hbm [shape: f32[1,128], index: 16, kind: input, shape index: {}]   ;;  %s16498_s17 = inlined_call_operand.hbm [shape: f32[1,128], index: 17, kind: input, shape index: {}]   ;;  %s16499_s19 = inlined_call_operand.vmem [shape: f32[2,1], index: 19, kind: output, shape index: {0}]   ;;  %s16500_s20 = inlined_call_operand.hbm [shape: f32[2,1,45], index: 20, kind: output, shape index: {1}]   ;;  %s16501_s21 = inlined_call_operand.hbm [shape: f32[2,1,8], index: 21, kind: output, shape index: {2}]   ;;  %s16502_s18 = inlined_call_operand.<no memory space> [shape: f32[1,1], index: 18, kind: input, shape index: {}]  }
   0x1   :  { %16610 = sst [smem:[#allocation102_spill]] %s16481_s0  ;;  %v31_v0 = vstv %s16502_s18 }
   0x2   :  { %16611 = sst [smem:[#allocation103_spill]] %s16482_s1  ;;  %s16617_s26 = sld [smem:[#allocation102_spill]]  ;;  %32 = vst [vmem:[#allocation6] sm:$0x1] %v31_v0 }
   0x3   :  { %16612 = sst [smem:[#allocation104_spill]] %s16483_s2 }
   0x4   :  { %16613 = sst [smem:[#allocation105_spill]] %s16484_s3 }
   0x5   :  { %16614 = sst [smem:[#allocation106_spill]] %s16485_s4 }
   0x6   :  { %16615 = sst [smem:[#allocation107_spill]] %s16486_s5 }
   0x7   :  { %16616 = sst [smem:[#allocation108_spill]] %s16496_s15 }
   0x8   :  { %s27_s15 = sshll.u32 %s16617_s26, 4  ;;  %s28_s15 = int_to_ptr.vmem [resolvable:$true] %s27_s15 }
   0x9   :  { %s11878_s28 = scalar_lea.vmem %s28_s15, 16  ;;  %p11883_p1 = scmp.lt.s32.totalorder %s28_s15, %s28_s15 }
   0xa   :  { %p11879_p0 = scmp.ne.s32.totalorder %s28_s15, %s11878_s28  ;;  %p11884_p2 = scmp.lt.s32.totalorder %s11878_s28, %s11878_s28 }
   0xc   :  { %p11885_p3 = por %p11884_p2, %p11883_p1 }
   0xe   :  { %p11886_p4 = pnand %p11885_p3, %p11879_p0 }
  0x10   :  { %11889 = shalt.err (!%p11886_p4)  }
  0x11   :  { %s12106_s29 = smov [#allocation5]  }
  0x12   :  { %30 = dma.vmem_to_smem %s28_s15, 16, %s12106_s29, [#allocation4] }
  0x13   :  { %12088 = dma.done.wait [#allocation4], 16 }
  0x14   :  { %12089 = vsyncadd [#allocation4], 4294967280 }
  0x15   :  { %34 = sfence }
  0x16   :  { %35 = vsyncpa [#allocation8], 0 }
  0x17   :  { %36 = vsyncpa [#allocation11], 0 }
  0x18   :  { %37 = vsyncpa [#allocation14], 0 }
  0x19   :  { %38 = vsyncpa [#allocation17], 0 }
  0x1a   :  { %39 = vsyncpa [#allocation9], 0 }
  0x1b   :  { %40 = vsyncpa [#allocation21], 0  ;;  %s12107_s18 = smov [#allocation10]   ;;  %s12108_s4 = smov [#allocation13]  }
  0x1c   :  { %s63_s0 = sshll.u32 %s12107_s18, 4  ;;  %s89_s30 = sshll.u32 %s12108_s4, 4  ;;  %s64_s0 = int_to_ptr.vmem [resolvable:$true] %s63_s0  ;;  %s90_s30 = int_to_ptr.vmem [resolvable:$true] %s89_s30 }
  0x1d   :  { %s11890_s23 = scalar_lea.hbm %s16487_s6, 16 }
  0x1e   :  { %p11891_p5 = scmp.ne.s32.totalorder %s16487_s6, %s11890_s23  ;;  %p11894_p6 = scmp.lt.u32.totalorder %s11890_s23, %s16487_s6 }
  0x20   :  { %p11896_p7 = pnand %p11894_p6, %p11891_p5 }
  0x22   :  { %11899 = shalt.err (!%p11896_p7)
}
  0x23   :  { %s11900_s25 = scalar_lea.vmem %s64_s0, 16  ;;  %s11904_s26 = scalar_lea.vmem %s64_s0, 32 }
  0x24   :  { %p11901_p8 = scmp.ne.s32.totalorder %s64_s0, %s11900_s25  ;;  %p11905_p9 = scmp.lt.s32.totalorder %s64_s0, %s64_s0 }
  0x25   :  { %p11906_p10 = scmp.lt.s32.totalorder %s11904_s26, %s11900_s25 }
  0x27   :  { %p11907_p11 = por %p11906_p10, %p11905_p9 }
  0x29   :  { %p11908_p12 = pnand %p11907_p11, %p11901_p8 }
  0x2b   :  { %11911 = shalt.err (!%p11908_p12)
}
  0x2c   :  { %66 = dma.hbm_to_vmem [thread:$0]  %s16487_s6, 16, %s64_s0, [#allocation11]  }
  0x2d   :  { %s11912_s18 = scalar_lea.hbm %s16492_s11, 16 }
  0x2e   :  { %p11913_p13 = scmp.ne.s32.totalorder %s16492_s11, %s11912_s18  ;;  %p11916_p0 = scmp.lt.u32.totalorder %s11912_s18, %s16492_s11 }
  0x30   :  { %p11918_p1 = pnand %p11916_p0, %p11913_p13 }
  0x32   :  { %11921 = shalt.err (!%p11918_p1)
}
  0x33   :  { %s11922_s15 = scalar_lea.vmem %s90_s30, 16  ;;  %s11926_s1 = scalar_lea.vmem %s90_s30, 32 }
  0x34   :  { %p11923_p2 = scmp.ne.s32.totalorder %s90_s30, %s11922_s15  ;;  %p11927_p3 = scmp.lt.s32.totalorder %s90_s30, %s90_s30 }
  0x35   :  { %p11928_p4 = scmp.lt.s32.totalorder %s11926_s1, %s11922_s15 }
  0x37   :  { %p11929_p5 = por %p11928_p4, %p11927_p3 }
  0x39   :  { %p11930_p6 = pnand %p11929_p5, %p11923_p2 }
  0x3b   :  { %11933 = shalt.err (!%p11930_p6)
}
  0x3c   :  { %92 = dma.hbm_to_vmem [thread:$0]  %s16492_s11, 16, %s90_s30, [#allocation14]  }
  0x3d   :  { %s12109_s24 = smov [#allocation16]   ;;  %s12110_s25 = smov [#allocation7]  }
  0x3e   :  { %s115_s2 = sshll.u32 %s12109_s24, 4  ;;  %s51_s26 = sshll.u32 %s12110_s25, 4  ;;  %s116_s2 = int_to_ptr.vmem [resolvable:$true] %s115_s2  ;;  %s52_s26 = int_to_ptr.vmem [resolvable:$true] %s51_s26 }
  0x3f   :  { %s11934_s28 = scalar_lea.hbm %s16497_s16, 16 }
  0x40   :  { %p11935_p7 = scmp.ne.s32.totalorder %s16497_s16, %s11934_s28  ;;  %p11938_p8 = scmp.lt.u32.totalorder %s11934_s28, %s16497_s16 }
  0x42   :  { %p11940_p9 = pnand %p11938_p8, %p11935_p7 }
  0x44   :  { %11943 = shalt.err (!%p11940_p9)
}
  0x45   :  { %s11944_s11 = scalar_lea.vmem %s116_s2, 16  ;;  %s11948_s30 = scalar_lea.vmem %s116_s2, 32 }
  0x46   :  { %p11945_p10 = scmp.ne.s32.totalorder %s116_s2, %s11944_s11  ;;  %p11949_p11 = scmp.lt.s32.totalorder %s116_s2, %s116_s2 }
  0x47   :  { %p11950_p12 = scmp.lt.s32.totalorder %s11948_s30, %s11944_s11 }
  0x49   :  { %p11951_p13 = por %p11950_p12, %p11949_p11 }
  0x4b   :  { %p11952_p0 = pnand %p11951_p13, %p11945_p10 }
  0x4d   :  { %11955 = shalt.err (!%p11952_p0)
}
  0x4e   :  { %118 = dma.hbm_to_vmem [thread:$0]  %s16497_s16, 16, %s116_s2, [#allocation17]  }
  0x4f   :  { %s16618_s6 = sld [smem:[#allocation106_spill]] }
  0x55   :  { %s11956_s0 = scalar_lea.hbm %s16618_s6, 64 }
  0x56   :  { %p11957_p1 = scmp.ne.s32.totalorder %s16618_s6, %s11956_s0  ;;  %p11960_p2 = scmp.lt.u32.totalorder %s11956_s0, %s16618_s6 }
  0x58   :  { %p11962_p3 = pnand %p11960_p2, %p11957_p1 }
  0x5a   :  { %11965 = shalt.err (!%p11962_p3)
}
  0x5b   :  { %s11966_s28 = scalar_lea.vmem %s52_s26, 64  ;;  %p11971_p5 = scmp.lt.s32.totalorder %s52_s26, %s52_s26 }
  0x5c   :  { %p11967_p4 = scmp.ne.s32.totalorder %s52_s26, %s11966_s28  ;;  %p11972_p6 = scmp.lt.s32.totalorder %s11966_s28, %s11966_s28 }
  0x5e   :  { %p11973_p7 = por %p11972_p6, %p11971_p5 }
  0x60   :  { %p11974_p8 = pnand %p11973_p7, %p11967_p4 }
  0x62   :  { %11977 = shalt.err (!%p11974_p8)
}
  0x63   :  { %54 = dma.hbm_to_vmem [thread:$0]  %s16618_s6, 64, %s52_s26, [#allocation8]  }
  0x64   :  { %s12111_s29 = smov [#allocation12]   ;;  %s12112_s4 = smov [#allocation15]  }
  0x65   :  { %s79_s18 = sshll.u32 %s12111_s29, 4  ;;  %s103_s5 = sshll.u32 %s12112_s4, 4  ;;  %s80_s18 = int_to_ptr.vmem [resolvable:$true] %s79_s18  ;;  %s104_s5 = int_to_ptr.vmem [resolvable:$true] %s103_s5 }
  0x66   :  { %s11978_s22 = scalar_lea.hbm %s16491_s10, 16 }
  0x67   :  { %p11979_p9 = scmp.ne.s32.totalorder %s16491_s10, %s11978_s22  ;;  %p11982_p10 = scmp.lt.u32.totalorder %s11978_s22, %s16491_s10 }
  0x69   :  { %p11984_p11 = pnand %p11982_p10, %p11979_p9 }
  0x6b   :  { %11987 = shalt.err (!%p11984_p11)
}
  0x6c   :  { %s11988_s26 = scalar_lea.vmem %s80_s18, 16  ;;  %s11992_s6 = scalar_lea.vmem %s80_s18, 32 }
  0x6d   :  { %p11989_p12 = scmp.ne.s32.totalorder %s80_s18, %s11988_s26  ;;  %p11993_p13 = scmp.lt.s32.totalorder %s80_s18, %s80_s18 }
  0x6e   :  { %p11994_p0 = scmp.lt.s32.totalorder %s11992_s6, %s11988_s26 }
  0x70   :  { %p11995_p1 = por %p11994_p0, %p11993_p13 }
  0x72   :  { %p11996_p2 = pnand %p11995_p1, %p11989_p12 }
  0x74   :  { %11999 = shalt.err (!%p11996_p2)
}
  0x75   :  { %82 = dma.hbm_to_vmem [thread:$0]  %s16491_s10, 16, %s80_s18, [#allocation11]  }
  0x76   :  { %s12000_s28 = scalar_lea.hbm %s16495_s14, 64 }
  0x77   :  { %p12001_p3 = scmp.ne.s32.totalorder %s16495_s14, %s12000_s28  ;;  %p12004_p4 = scmp.lt.u32.totalorder %s12000_s28, %s16495_s14 }
  0x79   :  { %p12006_p5 = pnand %p12004_p4, %p12001_p3 }
  0x7b   :  { %12009 = shalt.err (!%p12006_p5)
}
  0x7c   :  { %s12010_s11 = scalar_lea.vmem %s104_s5, 64  ;;  %p12015_p7 = scmp.lt.s32.totalorder %s104_s5, %s104_s5 }
  0x7d   :  { %p12011_p6 = scmp.ne.s32.totalorder %s104_s5, %s12010_s11  ;;  %p12016_p8 = scmp.lt.s32.totalorder %s12010_s11, %s12010_s11 }
  0x7f   :  { %p12017_p9 = por %p12016_p8, %p12015_p7 }
  0x81   :  { %p12018_p10 = pnand %p12017_p9, %p12011_p6 }
  0x83   :  { %12021 = shalt.err (!%p12018_p10)
}
  0x84   :  { %106 = dma.hbm_to_vmem [thread:$0]  %s16495_s14, 64, %s104_s5, [#allocation14]  }
  0x85   :  { %s12113_s30 = smov [#allocation18]   ;;  %s12022_s1 = scalar_lea.hbm %s16498_s17, 16 }
  0x86   :  { %s125_s22 = sshll.u32 %s12113_s30, 4  ;;  %p12023_p11 = scmp.ne.s32.totalorder %s16498_s17, %s12022_s1  ;;  %s126_s22 = int_to_ptr.vmem [resolvable:$true] %s125_s22 }
  0x87   :  { %p12026_p12 = scmp.lt.u32.totalorder %s12022_s1, %s16498_s17 }
  0x89   :  { %p12028_p13 = pnand %p12026_p12, %p12023_p11 }
  0x8b   :  { %12031 = shalt.err (!%p12028_p13)
}
  0x8c   :  { %s12032_s25 = scalar_lea.vmem %s126_s22, 16  ;;  %s12036_s14 = scalar_lea.vmem %s126_s22, 32 }
  0x8d   :  { %p12033_p0 = scmp.ne.s32.totalorder %s126_s22, %s12032_s25  ;;  %p12037_p1 = scmp.lt.s32.totalorder %s126_s22, %s126_s22 }
  0x8e   :  { %p12038_p2 = scmp.lt.s32.totalorder %s12036_s14, %s12032_s25 }
  0x90   :  { %p12039_p3 = por %p12038_p2, %p12037_p1 }
  0x92   :  { %p12040_p4 = pnand %p12039_p3, %p12033_p0 }
  0x94   :  { %12043 = shalt.err (!%p12040_p4)
}
  0x95   :  { %128 = dma.hbm_to_vmem [thread:$0]  %s16498_s17, 16, %s126_s22, [#allocation17]  }
  0x96   :  { %12090 = dma.done.wait [#allocation8], 64  }
  0x97   :  { %12091 = vsyncadd [#allocation8], 4294967232 }
  0x98   :  { %12092 = dma.done.wait [#allocation11], 32  }
  0x99   :  { %12093 = vsyncadd [#allocation11], 4294967264 }
  0x9a   :  { %12094 = dma.done.wait [#allocation14], 80  }
  0x9b   :  { %12095 = vsyncadd [#allocation14], 4294967216 }
  0x9c   :  { %12096 = dma.done.wait [#allocation17], 32  }
  0x9d   :  { %12097 = vsyncadd [#allocation17], 4294967264  ;;  %s154_s3 = sld [smem:[#allocation5]]  ;;  %s16619_s29 = sld [smem:[#allocation104_spill]] }
  0xa3   :  { %s10178_s28 = smul.u32 40, %s154_s3 }
  0xa5   :  { %s157_s4 = scalar_lea.vmem %s16619_s29, %s10178_s28 }
  0xa6   :  { %v12327_v1 = vld [vmem:[%s157_s4] sm:$0xff]  ;;  %v12329_v2 = vld [vmem:[%s157_s4 + $0x8] sm:$0xff]  ;;  %v12331_v3 = vld [vmem:[%s157_s4 + $0x10] sm:$0xff] }
  0xa7   :  { %v12333_v4 = vld [vmem:[%s157_s4 + $0x18] sm:$0xff]  ;;  %v12335_v5 = vld [vmem:[%s157_s4 + $0x20] sm:$0xff] }
  0xa8   :  { %207 = vsyncadd [#allocation3], 640  ;;  %s9762_s17 = sld [smem:[#allocation5 + $0x1]] }
  0xae   :  { %s10179_s11 = smul.u32 40, %s9762_s17 }
  0xb0   :  { %s212_s30 = scalar_lea.vmem %s16619_s29, %s10179_s11 }
  0xb1   :  { %v12340_v6 = vld [vmem:[%s212_s30] sm:$0xff]  ;;  %v12342_v7 = vld [vmem:[%s212_s30 + $0x8] sm:$0xff]  ;;  %v12344_v8 = vld [vmem:[%s212_s30 + $0x10] sm:$0xff] }
  0xb2   :  { %v12346_v9 = vld [vmem:[%s212_s30 + $0x18] sm:$0xff]  ;;  %v12348_v10 = vld [vmem:[%s212_s30 + $0x20] sm:$0xff] }
  0xb3   :  { %264 = vsyncadd [#allocation3 + $0x1], 640 }
  0xb4   :  { %12098 = dma.done.wait [#allocation3], 640 }
  0xb5   :  { %12099 = vsyncadd [#allocation3], 4294966656 }
  0xb6   :  { %12100 = dma.done.wait [#allocation3 + $0x1], 640 }
  0xb7   :  { %12101 = vsyncadd [#allocation3 + $0x1], 4294966656  ;;  %v9765_v11 = vcombine.high %v12327_v1, %v12340_v6  ;;  %s16620_s15 = sld [smem:[#allocation105_spill]]  ;;  %s16621_s26 = sld [smem:[#allocation107_spill]]  ;;  %vm12115_vm0 = vmmov 0   ;;  %vm5550_vm1 = vcmask 64512  }
  0xb8   :  { %s16625_s27 = sld [smem:[#allocation103_spill]]  ;;  %vm6920_vm2 = vcmask 1044480   ;;  %vm12118_vm3 = vmmov 1   ;;  %vm6916_vm5 = vcmask 367616   ;;  %vm8185_vm6 = vcmask 523264   ;;  %s16904_s17 = sld [smem:[#allocation108_spill]] }
  0xb9   :  { %2305 = vmatprep.mubr.bf16.mxu0 %v9765_v11  ;;  %2520 = vmatprep.mubr.bf16.mxu1 %v9765_v11  ;;  %vm14738_vm4 = vmpackc.low %vm6920_vm2, %vm12118_vm3  ;;  %vm8201_vm7 = vcmask 520192   ;;  %vm8260_vm8 = vcmask 130112   ;;  %vm8267_vm9 = vcmask 195712   ;;  %vm8274_vm10 = vcmask 261312  }
  0xba   :  { %vm8281_vm11 = vcmask 326912   ;;  %vm8288_vm12 = vcmask 392512   ;;  %vm8319_vm13 = vcmask 1041409   ;;  %vm8322_vm14 = vcmask 361472  }
  0xbb   :  { %vm8521_vm15 = vcmask 58368   ;;  %vm9680_vm2 = vcmask 360448   ;;  %vm9685_vm3 = vcmask 57344  }
  0xbd   :  { %v11106_v12 = vld [vmem:[%s16620_s15 + $0x4] ss:$16 sps:$4 sm:$0xff]   ;;  %v11108_v13 = vld [vmem:[%s16620_s15 + $0xc] ss:$16 sps:$4 sm:$0xff]   ;;  %v11110_v14 = vld [vmem:[%s16620_s15] ss:$16 sps:$4 sm:$0xff]  }
  0xbe   :  { %2273 = vmatprep.subr.bf16.mxu0 %v11106_v12  ;;  %v11111_v15 = vld [vmem:[%s16620_s15 + $0x8] ss:$16 sps:$4 sm:$0xff]   ;;  %2488 = vmatprep.subr.bf16.mxu1 %v11108_v13  ;;  %v11112_v16 = vld [vmem:[%s16620_s15 + $0x24] ss:$16 sps:$4 sm:$0xff]   ;;  %v11114_v17 = vld [vmem:[%s16620_s15 + $0x2c] ss:$16 sps:$4 sm:$0xff]  }
  0xbf   :  { %2274 = vmatpush1.bf16.msra.mxu0 %v11110_v14  ;;  %2489 = vmatpush1.bf16.msra.mxu1 %v11111_v15  ;;  %v11116_v18 = vld [vmem:[%s16620_s15 + $0x20] ss:$16 sps:$4 sm:$0xff]   ;;  %v11117_v19 = vld [vmem:[%s16620_s15 + $0x28] ss:$16 sps:$4 sm:$0xff]   ;;  %v11118_v20 = vld [vmem:[%s16620_s15 + $0x44] ss:$16 sps:$4 sm:$0xff]  }
  0xc0   :  { %2275 = vmatprep.subr.bf16.mxu0 %v11112_v16  ;;  %2490 = vmatprep.subr.bf16.mxu1 %v11114_v17  ;;  %v11120_v21 = vld [vmem:[%s16620_s15 + $0x4c] ss:$16 sps:$4 sm:$0xff]   ;;  %v11122_v22 = vld [vmem:[%s16620_s15 + $0x40] ss:$16 sps:$4 sm:$0xff]   ;;  %v11123_v23 = vld [vmem:[%s16620_s15 + $0x48] ss:$16 sps:$4 sm:$0xff]  }
  0xc1   :  { %v11124_v24 = vld [vmem:[%s16620_s15 + $0x64] ss:$16 sps:$4 sm:$0xff]   ;;  %v11126_v25 = vld [vmem:[%s16620_s15 + $0x6c] ss:$16 sps:$4 sm:$0xff]   ;;  %v11128_v26 = vld [vmem:[%s16620_s15 + $0x60] ss:$16 sps:$4 sm:$0xff]  }
  0xc2   :  { %v11129_v27 = vld [vmem:[%s16620_s15 + $0x68] ss:$16 sps:$4 sm:$0xff]   ;;  %v11130_v28 = vld [vmem:[%s16620_s15 + $0x84] ss:$16 sps:$4 sm:$0xff]   ;;  %v11132_v29 = vld [vmem:[%s16620_s15 + $0x8c] ss:$16 sps:$4 sm:$0xff]  }
  0xc3   :  { %2276 = vmatpush1.bf16.msra.mxu0 %v11116_v18  ;;  %2491 = vmatpush1.bf16.msra.mxu1 %v11117_v19  ;;  %v11134_v30 = vld [vmem:[%s16620_s15 + $0x80] ss:$16 sps:$4 sm:$0xff]   ;;  %v11135_v31 = vld [vmem:[%s16620_s15 + $0x88] ss:$16 sps:$4 sm:$0xff]   ;;  %v11136_v32 = vld [vmem:[%s16620_s15 + $0xa4] ss:$16 sps:$4 sm:$0xff]  }
  0xc4   :  { %2277 = vmatprep.subr.bf16.mxu0 %v11118_v20  ;;  %2492 = vmatprep.subr.bf16.mxu1 %v11120_v21  ;;  %v11138_v33 = vld [vmem:[%s16620_s15 + $0xac] ss:$16 sps:$4 sm:$0xff]   ;;  %v11140_v34 = vld [vmem:[%s16620_s15 + $0xa0] ss:$16 sps:$4 sm:$0xff]   ;;  %v11141_v35 = vld [vmem:[%s16620_s15 + $0xa8] ss:$16 sps:$4 sm:$0xff]  }
  0xc5   :  { %v11142_v36 = vld [vmem:[%s16620_s15 + $0xc4] ss:$16 sps:$4 sm:$0xff]   ;;  %v11144_v37 = vld [vmem:[%s16620_s15 + $0xcc] ss:$16 sps:$4 sm:$0xff]   ;;  %v11146_v38 = vld [vmem:[%s16620_s15 + $0xc0] ss:$16 sps:$4 sm:$0xff]  }
  0xc6   :  { %v11147_v39 = vld [vmem:[%s16620_s15 + $0xc8] ss:$16 sps:$4 sm:$0xff]   ;;  %v11148_v40 = vld [vmem:[%s16620_s15 + $0xe4] ss:$16 sps:$4 sm:$0xff]   ;;  %v11150_v41 = vld [vmem:[%s16620_s15 + $0xec] ss:$16 sps:$4 sm:$0xff]  }
  0xc7   :  { %2278 = vmatpush1.bf16.msra.mxu0 %v11122_v22  ;;  %2493 = vmatpush1.bf16.msra.mxu1 %v11123_v23  ;;  %v11152_v42 = vld [vmem:[%s16620_s15 + $0xe0] ss:$16 sps:$4 sm:$0xff]   ;;  %v11153_v43 = vld [vmem:[%s16620_s15 + $0xe8] ss:$16 sps:$4 sm:$0xff]   ;;  %v11154_v44 = vld [vmem:[%s16620_s15 + $0x104] ss:$16 sps:$4 sm:$0xff]  }
  0xc8   :  { %2279 = vmatprep.subr.bf16.mxu0 %v11124_v24  ;;  %2494 = vmatprep.subr.bf16.mxu1 %v11126_v25  ;;  %v11156_v45 = vld [vmem:[%s16620_s15 + $0x10c] ss:$16 sps:$4 sm:$0xff]   ;;  %v11158_v46 = vld [vmem:[%s16620_s15 + $0x100] ss:$16 sps:$4 sm:$0xff]   ;;  %v11159_v47 = vld [vmem:[%s16620_s15 + $0x108] ss:$16 sps:$4 sm:$0xff]  }
  0xc9   :  { %v11160_v48 = vld [vmem:[%s16620_s15 + $0x124] ss:$16 sps:$4 sm:$0xff]   ;;  %v11162_v49 = vld [vmem:[%s16620_s15 + $0x12c] ss:$16 sps:$4 sm:$0xff]   ;;  %v11164_v50 = vld [vmem:[%s16620_s15 + $0x120] ss:$16 sps:$4 sm:$0xff]  }
  0xca   :  { %v11165_v51 = vld [vmem:[%s16620_s15 + $0x128] ss:$16 sps:$4 sm:$0xff]   ;;  %v11166_v52 = vld [vmem:[%s16620_s15 + $0x144] ss:$16 sps:$4 sm:$0xff]   ;;  %v11168_v53 = vld [vmem:[%s16620_s15 + $0x14c] ss:$16 sps:$4 sm:$0xff]  }
  0xcb   :  { %2280 = vmatpush1.bf16.msra.mxu0 %v11128_v26  ;;  %2495 = vmatpush1.bf16.msra.mxu1 %v11129_v27  ;;  %v11170_v54 = vld [vmem:[%s16620_s15 + $0x140] ss:$16 sps:$4 sm:$0xff]   ;;  %v11171_v55 = vld [vmem:[%s16620_s15 + $0x148] ss:$16 sps:$4 sm:$0xff]   ;;  %v11172_v56 = vld [vmem:[%s16620_s15 + $0x164] ss:$16 sps:$4 sm:$0xff]   ;;  %v9764_v26 = vcombine.low %v12327_v1, %v12340_v6 }
  0xcc   :  { %2281 = vmatprep.subr.bf16.mxu0 %v11130_v28  ;;  %2496 = vmatprep.subr.bf16.mxu1 %v11132_v29  ;;  %v11174_v57 = vld [vmem:[%s16620_s15 + $0x16c] ss:$16 sps:$4 sm:$0xff]   ;;  %v11176_v58 = vld [vmem:[%s16620_s15 + $0x160] ss:$16 sps:$4 sm:$0xff]   ;;  %v11177_v59 = vld [vmem:[%s16620_s15 + $0x168] ss:$16 sps:$4 sm:$0xff]   ;;  %v9767_v29 = vcombine.high %v12329_v2, %v12342_v7 }
  0xcd   :  { %v11178_v60 = vld [vmem:[%s16620_s15 + $0x184] ss:$16 sps:$4 sm:$0xff]   ;;  %v11180_v61 = vld [vmem:[%s16620_s15 + $0x18c] ss:$16 sps:$4 sm:$0xff]   ;;  %v11182_v62 = vld [vmem:[%s16620_s15 + $0x180] ss:$16 sps:$4 sm:$0xff]  }
  0xce   :  { %v11183_v63 = vld [vmem:[%s16620_s15 + $0x188] ss:$16 sps:$4 sm:$0xff]   ;;  %v11184_v0 = vld [vmem:[%s16620_s15 + $0x1a4] ss:$16 sps:$4 sm:$0xff]   ;;  %v11186_v11 = vld [vmem:[%s16620_s15 + $0x1ac] ss:$16 sps:$4 sm:$0xff]  }
  0xcf   :  { %2282 = vmatpush1.bf16.msra.mxu0 %v11134_v30  ;;  %2497 = vmatpush1.bf16.msra.mxu1 %v11135_v31  ;;  %v11188_v12 = vld [vmem:[%s16620_s15 + $0x1a0] ss:$16 sps:$4 sm:$0xff]   ;;  %v11189_v13 = vld [vmem:[%s16620_s15 + $0x1a8] ss:$16 sps:$4 sm:$0xff]   ;;  %v11190_v14 = vld [vmem:[%s16620_s15 + $0x1c4] ss:$16 sps:$4 sm:$0xff]  }
  0xd0   :  { %2283 = vmatprep.subr.bf16.mxu0 %v11136_v32  ;;  %2498 = vmatprep.subr.bf16.mxu1 %v11138_v33  ;;  %v11192_v15 = vld [vmem:[%s16620_s15 + $0x1cc] ss:$16 sps:$4 sm:$0xff]   ;;  %v11194_v16 = vld [vmem:[%s16620_s15 + $0x1c0] ss:$16 sps:$4 sm:$0xff]   ;;  %v11195_v17 = vld [vmem:[%s16620_s15 + $0x1c8] ss:$16 sps:$4 sm:$0xff]  }
  0xd1   :  { %v11196_v18 = vld [vmem:[%s16620_s15 + $0x1e4] ss:$16 sps:$4 sm:$0xff]   ;;  %v11198_v19 = vld [vmem:[%s16620_s15 + $0x1ec] ss:$16 sps:$4 sm:$0xff]   ;;  %v11200_v20 = vld [vmem:[%s16620_s15 + $0x1e0] ss:$16 sps:$4 sm:$0xff]  }
  0xd2   :  { %v11201_v21 = vld [vmem:[%s16620_s15 + $0x1e8] ss:$16 sps:$4 sm:$0xff]   ;;  %v11204_v22 = vld [vmem:[%s16620_s15 + $0x204] ss:$16 sps:$4 sm:$0xff]   ;;  %v11207_v23 = vld [vmem:[%s16620_s15 + $0x20c] ss:$16 sps:$4 sm:$0xff]  }
  0xd3   :  { %2284 = vmatpush1.bf16.msra.mxu0 %v11140_v34  ;;  %2499 = vmatpush1.bf16.msra.mxu1 %v11141_v35  ;;  %v11202_v24 = vld [vmem:[%s16620_s15 + $0x200] ss:$16 sps:$4 sm:$0xff]   ;;  %v11205_v25 = vld [vmem:[%s16620_s15 + $0x208] ss:$16 sps:$4 sm:$0xff]   ;;  %v11210_v27 = vld [vmem:[%s16620_s15 + $0x224] ss:$16 sps:$4 sm:$0xff]  }
  0xd4   :  { %2285 = vmatprep.subr.bf16.mxu0 %v11142_v36  ;;  %2500 = vmatprep.subr.bf16.mxu1 %v11144_v37  ;;  %v11213_v28 = vld [vmem:[%s16620_s15 + $0x22c] ss:$16 sps:$4 sm:$0xff]   ;;  %v11208_v1 = vld [vmem:[%s16620_s15 + $0x220] ss:$16 sps:$4 sm:$0xff]   ;;  %v11211_v6 = vld [vmem:[%s16620_s15 + $0x228] ss:$16 sps:$4 sm:$0xff]  }
  0xd5   :  { %v11216_v30 = vld [vmem:[%s16620_s15 + $0x244] ss:$16 sps:$4 sm:$0xff]   ;;  %v11219_v31 = vld [vmem:[%s16620_s15 + $0x24c] ss:$16 sps:$4 sm:$0xff]   ;;  %v11214_v32 = vld [vmem:[%s16620_s15 + $0x240] ss:$16 sps:$4 sm:$0xff]  }
  0xd6   :  { %v11217_v33 = vld [vmem:[%s16620_s15 + $0x248] ss:$16 sps:$4 sm:$0xff]   ;;  %v11222_v34 = vld [vmem:[%s16620_s15 + $0x264] ss:$16 sps:$4 sm:$0xff]   ;;  %v11225_v35 = vld [vmem:[%s16620_s15 + $0x26c] ss:$16 sps:$4 sm:$0xff]  }
  0xd7   :  { %2286 = vmatpush1.bf16.msra.mxu0 %v11146_v38  ;;  %2501 = vmatpush1.bf16.msra.mxu1 %v11147_v39  ;;  %v11220_v36 = vld [vmem:[%s16620_s15 + $0x260] ss:$16 sps:$4 sm:$0xff]   ;;  %v11223_v37 = vld [vmem:[%s16620_s15 + $0x268] ss:$16 sps:$4 sm:$0xff]   ;;  %v11228_v38 = vld [vmem:[%s16620_s15 + $0x284] ss:$16 sps:$4 sm:$0xff]  }
  0xd8   :  { %2287 = vmatprep.subr.bf16.mxu0 %v11148_v40  ;;  %2502 = vmatprep.subr.bf16.mxu1 %v11150_v41  ;;  %v11231_v39 = vld [vmem:[%s16620_s15 + $0x28c] ss:$16 sps:$4 sm:$0xff]   ;;  %v11226_v40 = vld [vmem:[%s16620_s15 + $0x280] ss:$16 sps:$4 sm:$0xff]   ;;  %v11229_v41 = vld [vmem:[%s16620_s15 + $0x288] ss:$16 sps:$4 sm:$0xff]  }
  0xdb   :  { %2288 = vmatpush1.bf16.msra.mxu0 %v11152_v42  ;;  %2503 = vmatpush1.bf16.msra.mxu1 %v11153_v43  ;;  %v11234_v42 = vld [vmem:[%s16620_s15 + $0x2a4] ss:$16 sps:$4 sm:$0xff]   ;;  %v11237_v43 = vld [vmem:[%s16620_s15 + $0x2ac] ss:$16 sps:$4 sm:$0xff]  }
  0xdc   :  { %2289 = vmatprep.subr.bf16.mxu0 %v11154_v44  ;;  %2504 = vmatprep.subr.bf16.mxu1 %v11156_v45  ;;  %v11232_v44 = vld [vmem:[%s16620_s15 + $0x2a0] ss:$16 sps:$4 sm:$0xff]   ;;  %v11235_v45 = vld [vmem:[%s16620_s15 + $0x2a8] ss:$16 sps:$4 sm:$0xff]  }
  0xdf   :  { %2290 = vmatpush1.bf16.msra.mxu0 %v11158_v46  ;;  %2505 = vmatpush1.bf16.msra.mxu1 %v11159_v47  ;;  %v11240_v46 = vld [vmem:[%s16620_s15 + $0x2c4] ss:$16 sps:$4 sm:$0xff]   ;;  %v11243_v47 = vld [vmem:[%s16620_s15 + $0x2cc] ss:$16 sps:$4 sm:$0xff]  }
  0xe0   :  { %2291 = vmatprep.subr.bf16.mxu0 %v11160_v48  ;;  %2506 = vmatprep.subr.bf16.mxu1 %v11162_v49  ;;  %v11238_v48 = vld [vmem:[%s16620_s15 + $0x2c0] ss:$16 sps:$4 sm:$0xff]   ;;  %v11241_v49 = vld [vmem:[%s16620_s15 + $0x2c8] ss:$16 sps:$4 sm:$0xff]  }
  0xe3   :  { %2292 = vmatpush1.bf16.msra.mxu0 %v11164_v50  ;;  %2507 = vmatpush1.bf16.msra.mxu1 %v11165_v51  ;;  %v11246_v50 = vld [vmem:[%s16620_s15 + $0x2e4] ss:$16 sps:$4 sm:$0xff]   ;;  %v11249_v51 = vld [vmem:[%s16620_s15 + $0x2ec] ss:$16 sps:$4 sm:$0xff]  }
  0xe4   :  { %2293 = vmatprep.subr.bf16.mxu0 %v11166_v52  ;;  %2508 = vmatprep.subr.bf16.mxu1 %v11168_v53  ;;  %v11244_v52 = vld [vmem:[%s16620_s15 + $0x2e0] ss:$16 sps:$4 sm:$0xff]   ;;  %v11247_v53 = vld [vmem:[%s16620_s15 + $0x2e8] ss:$16 sps:$4 sm:$0xff]  }
  0xe7   :  { %2294 = vmatpush1.bf16.msra.mxu0 %v11170_v54  ;;  %2509 = vmatpush1.bf16.msra.mxu1 %v11171_v55  ;;  %v11252_v54 = vld [vmem:[%s16620_s15 + $0x304] ss:$16 sps:$4 sm:$0xff]   ;;  %v11255_v55 = vld [vmem:[%s16620_s15 + $0x30c] ss:$16 sps:$4 sm:$0xff]  }
  0xe8   :  { %2295 = vmatprep.subr.bf16.mxu0 %v11172_v56  ;;  %2510 = vmatprep.subr.bf16.mxu1 %v11174_v57  ;;  %v11250_v56 = vld [vmem:[%s16620_s15 + $0x300] ss:$16 sps:$4 sm:$0xff]   ;;  %v11253_v57 = vld [vmem:[%s16620_s15 + $0x308] ss:$16 sps:$4 sm:$0xff]  }
  0xeb   :  { %2296 = vmatpush1.bf16.msra.mxu0 %v11176_v58  ;;  %2511 = vmatpush1.bf16.msra.mxu1 %v11177_v59  ;;  %v11258_v58 = vld [vmem:[%s16620_s15 + $0x324] ss:$16 sps:$4 sm:$0xff]   ;;  %v11261_v59 = vld [vmem:[%s16620_s15 + $0x32c] ss:$16 sps:$4 sm:$0xff]  }
  0xec   :  { %2297 = vmatprep.subr.bf16.mxu0 %v11178_v60  ;;  %2512 = vmatprep.subr.bf16.mxu1 %v11180_v61  ;;  %v11256_v60 = vld [vmem:[%s16620_s15 + $0x320] ss:$16 sps:$4 sm:$0xff]   ;;  %v11259_v61 = vld [vmem:[%s16620_s15 + $0x328] ss:$16 sps:$4 sm:$0xff]  }
  0xef   :  { %2298 = vmatpush1.bf16.msra.mxu0 %v11182_v62  ;;  %2513 = vmatpush1.bf16.msra.mxu1 %v11183_v63  ;;  %v11264_v62 = vld [vmem:[%s16620_s15 + $0x344] ss:$16 sps:$4 sm:$0xff]   ;;  %v11267_v63 = vld [vmem:[%s16620_s15 + $0x34c] ss:$16 sps:$4 sm:$0xff]  }
  0xf0   :  { %2299 = vmatprep.subr.bf16.mxu0 %v11184_v0  ;;  %2514 = vmatprep.subr.bf16.mxu1 %v11186_v11  ;;  %v11262_v0 = vld [vmem:[%s16620_s15 + $0x340] ss:$16 sps:$4 sm:$0xff]   ;;  %v11265_v11 = vld [vmem:[%s16620_s15 + $0x348] ss:$16 sps:$4 sm:$0xff]  }
  0xf3   :  { %2300 = vmatpush1.bf16.msra.mxu0 %v11188_v12  ;;  %2515 = vmatpush1.bf16.msra.mxu1 %v11189_v13  ;;  %v11270_v12 = vld [vmem:[%s16620_s15 + $0x364] ss:$16 sps:$4 sm:$0xff]   ;;  %v11273_v13 = vld [vmem:[%s16620_s15 + $0x36c] ss:$16 sps:$4 sm:$0xff]  }
  0xf4   :  { %2301 = vmatprep.subr.bf16.mxu0 %v11190_v14  ;;  %2516 = vmatprep.subr.bf16.mxu1 %v11192_v15  ;;  %v11268_v14 = vld [vmem:[%s16620_s15 + $0x360] ss:$16 sps:$4 sm:$0xff]   ;;  %v11271_v15 = vld [vmem:[%s16620_s15 + $0x368] ss:$16 sps:$4 sm:$0xff]  }
  0xf7   :  { %2302 = vmatpush1.bf16.msra.mxu0 %v11194_v16  ;;  %2517 = vmatpush1.bf16.msra.mxu1 %v11195_v17  ;;  %v11276_v16 = vld [vmem:[%s16620_s15 + $0x384] ss:$16 sps:$4 sm:$0xff]   ;;  %v11279_v17 = vld [vmem:[%s16620_s15 + $0x38c] ss:$16 sps:$4 sm:$0xff]  }
  0xf8   :  { %2303 = vmatprep.subr.bf16.mxu0 %v11196_v18  ;;  %2518 = vmatprep.subr.bf16.mxu1 %v11198_v19  ;;  %v11274_v18 = vld [vmem:[%s16620_s15 + $0x380] ss:$16 sps:$4 sm:$0xff]   ;;  %v11277_v19 = vld [vmem:[%s16620_s15 + $0x388] ss:$16 sps:$4 sm:$0xff]  }
  0xfb   :  { %2304 = vmatpush1.bf16.msra.mxu0 %v11200_v20  ;;  %2519 = vmatpush1.bf16.msra.mxu1 %v11201_v21  ;;  %v11282_v20 = vld [vmem:[%s16620_s15 + $0x3a4] ss:$16 sps:$4 sm:$0xff]   ;;  %v11285_v21 = vld [vmem:[%s16620_s15 + $0x3ac] ss:$16 sps:$4 sm:$0xff]  }
  0xfc   :  { %2316 = vmatprep.subr.bf16.mxu0 %v11204_v22  ;;  %2531 = vmatprep.subr.bf16.mxu1 %v11207_v23  ;;  %v11280_v22 = vld [vmem:[%s16620_s15 + $0x3a0] ss:$16 sps:$4 sm:$0xff]   ;;  %v11283_v23 = vld [vmem:[%s16620_s15 + $0x3a8] ss:$16 sps:$4 sm:$0xff]  }
  0xfe   :  { %2306 = vmatmul.mubr.bf16.vlgmr.msra.gmra.mrb[0].mxu0 %v9764_v26  ;;  %2521 = vmatmul.mubr.bf16.vlgmr.msra.gmra.mrb[0].mxu1 %v9764_v26  ;;  %v11286_v26 = vld [vmem:[%s16620_s15 + $0x3c0] ss:$16 sps:$4 sm:$0xff]  }
  0xff   :  { %2317 = vmatpush1.bf16.msra.mxu0 %v11202_v24  ;;  %2532 = vmatpush1.bf16.msra.mxu1 %v11205_v25  ;;  %v11288_v24 = vld [vmem:[%s16620_s15 + $0x3c4] ss:$16 sps:$4 sm:$0xff]   ;;  %v11291_v25 = vld [vmem:[%s16620_s15 + $0x3cc] ss:$16 sps:$4 sm:$0xff]  }
 0x100   :  { %2318 = vmatprep.subr.bf16.mxu0 %v11210_v27  ;;  %2533 = vmatprep.subr.bf16.mxu1 %v11213_v28  ;;  %v11289_v27 = vld [vmem:[%s16620_s15 + $0x3c8] ss:$16 sps:$4 sm:$0xff]   ;;  %v11294_v28 = vld [vmem:[%s16620_s15 + $0x3e4] ss:$16 sps:$4 sm:$0xff]  }
 0x101   :  { %2348 = vmatprep.mubr.bf16.mxu0 %v9767_v29  ;;  %2563 = vmatprep.mubr.bf16.mxu1 %v9767_v29  ;;  %v11297_v29 = vld [vmem:[%s16620_s15 + $0x3ec] ss:$16 sps:$4 sm:$0xff]  }
 0x103   :  { %2319 = vmatpush1.bf16.msra.mxu0 %v11208_v1  ;;  %2534 = vmatpush1.bf16.msra.mxu1 %v11211_v6  ;;  %v11292_v1 = vld [vmem:[%s16620_s15 + $0x3e0] ss:$16 sps:$4 sm:$0xff]   ;;  %v11295_v6 = vld [vmem:[%s16620_s15 + $0x3e8] ss:$16 sps:$4 sm:$0xff]  }
 0x104   :  { %2320 = vmatprep.subr.bf16.mxu0 %v11216_v30  ;;  %2535 = vmatprep.subr.bf16.mxu1 %v11219_v31  ;;  %v11300_v30 = vld [vmem:[%s16620_s15 + $0x404] ss:$16 sps:$4 sm:$0xff]   ;;  %v11303_v31 = vld [vmem:[%s16620_s15 + $0x40c] ss:$16 sps:$4 sm:$0xff]  }
 0x107   :  { %2321 = vmatpush1.bf16.msra.mxu0 %v11214_v32  ;;  %2536 = vmatpush1.bf16.msra.mxu1 %v11217_v33  ;;  %v11298_v32 = vld [vmem:[%s16620_s15 + $0x400] ss:$16 sps:$4 sm:$0xff]   ;;  %v11301_v33 = vld [vmem:[%s16620_s15 + $0x408] ss:$16 sps:$4 sm:$0xff]  }
 0x108   :  { %2322 = vmatprep.subr.bf16.mxu0 %v11222_v34  ;;  %2537 = vmatprep.subr.bf16.mxu1 %v11225_v35  ;;  %v9766_v34 = vcombine.low %v12329_v2, %v12342_v7  ;;  %v11306_v35 = vld [vmem:[%s16620_s15 + $0x424] ss:$16 sps:$4 sm:$0xff]   ;;  %v11304_v2 = vld [vmem:[%s16620_s15 + $0x420] ss:$16 sps:$4 sm:$0xff]   ;;  %v11307_v7 = vld [vmem:[%s16620_s15 + $0x428] ss:$16 sps:$4 sm:$0xff]  }
 0x10b   :  { %2323 = vmatpush1.bf16.msra.mxu0 %v11220_v36  ;;  %2538 = vmatpush1.bf16.msra.mxu1 %v11223_v37  ;;  %v11309_v36 = vld [vmem:[%s16620_s15 + $0x42c] ss:$16 sps:$4 sm:$0xff]   ;;  %v9769_v37 = vcombine.high %v12331_v3, %v12344_v8 }
 0x10c   :  { %2324 = vmatprep.subr.bf16.mxu0 %v11228_v38  ;;  %2539 = vmatprep.subr.bf16.mxu1 %v11231_v39  ;;  %v11312_v38 = vld [vmem:[%s16620_s15 + $0x444] ss:$16 sps:$4 sm:$0xff]   ;;  %v11315_v39 = vld [vmem:[%s16620_s15 + $0x44c] ss:$16 sps:$4 sm:$0xff]  }
 0x10f   :  { %2325 = vmatpush1.bf16.msra.mxu0 %v11226_v40  ;;  %2540 = vmatpush1.bf16.msra.mxu1 %v11229_v41  ;;  %v11310_v40 = vld [vmem:[%s16620_s15 + $0x440] ss:$16 sps:$4 sm:$0xff]   ;;  %v11313_v41 = vld [vmem:[%s16620_s15 + $0x448] ss:$16 sps:$4 sm:$0xff]  }
 0x110   :  { %2326 = vmatprep.subr.bf16.mxu0 %v11234_v42  ;;  %2541 = vmatprep.subr.bf16.mxu1 %v11237_v43  ;;  %v11318_v42 = vld [vmem:[%s16620_s15 + $0x464] ss:$16 sps:$4 sm:$0xff]   ;;  %v11321_v43 = vld [vmem:[%s16620_s15 + $0x46c] ss:$16 sps:$4 sm:$0xff]  }
 0x113   :  { %2327 = vmatpush1.bf16.msra.mxu0 %v11232_v44  ;;  %2542 = vmatpush1.bf16.msra.mxu1 %v11235_v45  ;;  %v11316_v44 = vld [vmem:[%s16620_s15 + $0x460] ss:$16 sps:$4 sm:$0xff]   ;;  %v11319_v45 = vld [vmem:[%s16620_s15 + $0x468] ss:$16 sps:$4 sm:$0xff]  }
 0x114   :  { %2328 = vmatprep.subr.bf16.mxu0 %v11240_v46  ;;  %2543 = vmatprep.subr.bf16.mxu1 %v11243_v47  ;;  %v11324_v46 = vld [vmem:[%s16620_s15 + $0x484] ss:$16 sps:$4 sm:$0xff]   ;;  %v11327_v47 = vld [vmem:[%s16620_s15 + $0x48c] ss:$16 sps:$4 sm:$0xff]  }
 0x117   :  { %2329 = vmatpush1.bf16.msra.mxu0 %v11238_v48  ;;  %2544 = vmatpush1.bf16.msra.mxu1 %v11241_v49  ;;  %v11322_v48 = vld [vmem:[%s16620_s15 + $0x480] ss:$16 sps:$4 sm:$0xff]   ;;  %v11325_v49 = vld [vmem:[%s16620_s15 + $0x488] ss:$16 sps:$4 sm:$0xff]  }
 0x118   :  { %2330 = vmatprep.subr.bf16.mxu0 %v11246_v50  ;;  %2545 = vmatprep.subr.bf16.mxu1 %v11249_v51  ;;  %v11330_v50 = vld [vmem:[%s16620_s15 + $0x4a4] ss:$16 sps:$4 sm:$0xff]   ;;  %v11333_v51 = vld [vmem:[%s16620_s15 + $0x4ac] ss:$16 sps:$4 sm:$0xff]  }
 0x11b   :  { %2331 = vmatpush1.bf16.msra.mxu0 %v11244_v52  ;;  %2546 = vmatpush1.bf16.msra.mxu1 %v11247_v53  ;;  %v11328_v52 = vld [vmem:[%s16620_s15 + $0x4a0] ss:$16 sps:$4 sm:$0xff]   ;;  %v11331_v53 = vld [vmem:[%s16620_s15 + $0x4a8] ss:$16 sps:$4 sm:$0xff]  }
 0x11c   :  { %2332 = vmatprep.subr.bf16.mxu0 %v11252_v54  ;;  %2547 = vmatprep.subr.bf16.mxu1 %v11255_v55  ;;  %v11336_v54 = vld [vmem:[%s16620_s15 + $0x4c4] ss:$16 sps:$4 sm:$0xff]   ;;  %v11339_v55 = vld [vmem:[%s16620_s15 + $0x4cc] ss:$16 sps:$4 sm:$0xff]  }
 0x11f   :  { %2333 = vmatpush1.bf16.msra.mxu0 %v11250_v56  ;;  %2548 = vmatpush1.bf16.msra.mxu1 %v11253_v57  ;;  %v11334_v56 = vld [vmem:[%s16620_s15 + $0x4c0] ss:$16 sps:$4 sm:$0xff]   ;;  %v11337_v57 = vld [vmem:[%s16620_s15 + $0x4c8] ss:$16 sps:$4 sm:$0xff]  }
 0x120   :  { %2334 = vmatprep.subr.bf16.mxu0 %v11258_v58  ;;  %2549 = vmatprep.subr.bf16.mxu1 %v11261_v59  ;;  %v11342_v58 = vld [vmem:[%s16620_s15 + $0x4e4] ss:$16 sps:$4 sm:$0xff]   ;;  %v11345_v59 = vld [vmem:[%s16620_s15 + $0x4ec] ss:$16 sps:$4 sm:$0xff]  }
 0x123   :  { %2335 = vmatpush1.bf16.msra.mxu0 %v11256_v60  ;;  %2550 = vmatpush1.bf16.msra.mxu1 %v11259_v61  ;;  %v11340_v60 = vld [vmem:[%s16620_s15 + $0x4e0] ss:$16 sps:$4 sm:$0xff]   ;;  %v11343_v61 = vld [vmem:[%s16620_s15 + $0x4e8] ss:$16 sps:$4 sm:$0xff]  }
 0x124   :  { %2336 = vmatprep.subr.bf16.mxu0 %v11264_v62  ;;  %2551 = vmatprep.subr.bf16.mxu1 %v11267_v63  ;;  %v11348_v62 = vld [vmem:[%s16620_s15 + $0x504] ss:$16 sps:$4 sm:$0xff]   ;;  %v11351_v63 = vld [vmem:[%s16620_s15 + $0x50c] ss:$16 sps:$4 sm:$0xff]  }
 0x127   :  { %2337 = vmatpush1.bf16.msra.mxu0 %v11262_v0  ;;  %2552 = vmatpush1.bf16.msra.mxu1 %v11265_v11  ;;  %v11346_v0 = vld [vmem:[%s16620_s15 + $0x500] ss:$16 sps:$4 sm:$0xff]   ;;  %v11349_v11 = vld [vmem:[%s16620_s15 + $0x508] ss:$16 sps:$4 sm:$0xff]  }
 0x128   :  { %2338 = vmatprep.subr.bf16.mxu0 %v11270_v12  ;;  %2553 = vmatprep.subr.bf16.mxu1 %v11273_v13  ;;  %v11354_v12 = vld [vmem:[%s16620_s15 + $0x524] ss:$16 sps:$4 sm:$0xff]   ;;  %v11357_v13 = vld [vmem:[%s16620_s15 + $0x52c] ss:$16 sps:$4 sm:$0xff]  }
 0x12b   :  { %2339 = vmatpush1.bf16.msra.mxu0 %v11268_v14  ;;  %2554 = vmatpush1.bf16.msra.mxu1 %v11271_v15  ;;  %v11352_v14 = vld [vmem:[%s16620_s15 + $0x520] ss:$16 sps:$4 sm:$0xff]   ;;  %v11355_v15 = vld [vmem:[%s16620_s15 + $0x528] ss:$16 sps:$4 sm:$0xff]  }
 0x12c   :  { %2340 = vmatprep.subr.bf16.mxu0 %v11276_v16  ;;  %2555 = vmatprep.subr.bf16.mxu1 %v11279_v17  ;;  %v11360_v16 = vld [vmem:[%s16620_s15 + $0x544] ss:$16 sps:$4 sm:$0xff]   ;;  %v11363_v17 = vld [vmem:[%s16620_s15 + $0x54c] ss:$16 sps:$4 sm:$0xff]  }
 0x12f   :  { %2341 = vmatpush1.bf16.msra.mxu0 %v11274_v18  ;;  %2556 = vmatpush1.bf16.msra.mxu1 %v11277_v19  ;;  %v11358_v18 = vld [vmem:[%s16620_s15 + $0x540] ss:$16 sps:$4 sm:$0xff]   ;;  %v11361_v19 = vld [vmem:[%s16620_s15 + $0x548] ss:$16 sps:$4 sm:$0xff]  }
 0x130   :  { %2342 = vmatprep.subr.bf16.mxu0 %v11282_v20  ;;  %2557 = vmatprep.subr.bf16.mxu1 %v11285_v21  ;;  %v11366_v20 = vld [vmem:[%s16620_s15 + $0x564] ss:$16 sps:$4 sm:$0xff]   ;;  %v11369_v21 = vld [vmem:[%s16620_s15 + $0x56c] ss:$16 sps:$4 sm:$0xff]  }
 0x133   :  { %2343 = vmatpush1.bf16.msra.mxu0 %v11280_v22  ;;  %2558 = vmatpush1.bf16.msra.mxu1 %v11283_v23  ;;  %v11364_v22 = vld [vmem:[%s16620_s15 + $0x560] ss:$16 sps:$4 sm:$0xff]   ;;  %v11367_v23 = vld [vmem:[%s16620_s15 + $0x568] ss:$16 sps:$4 sm:$0xff]  }
 0x134   :  { %2344 = vmatprep.subr.bf16.mxu0 %v11288_v24  ;;  %2559 = vmatprep.subr.bf16.mxu1 %v11291_v25  ;;  %v11372_v24 = vld [vmem:[%s16620_s15 + $0x584] ss:$16 sps:$4 sm:$0xff]   ;;  %v11375_v25 = vld [vmem:[%s16620_s15 + $0x58c] ss:$16 sps:$4 sm:$0xff]  }
 0x137   :  { %2345 = vmatpush1.bf16.msra.mxu0 %v11286_v26  ;;  %2560 = vmatpush1.bf16.msra.mxu1 %v11289_v27  ;;  %v11370_v26 = vld [vmem:[%s16620_s15 + $0x580] ss:$16 sps:$4 sm:$0xff]   ;;  %v11373_v27 = vld [vmem:[%s16620_s15 + $0x588] ss:$16 sps:$4 sm:$0xff]  }
 0x138   :  { %2346 = vmatprep.subr.bf16.mxu0 %v11294_v28  ;;  %2561 = vmatprep.subr.bf16.mxu1 %v11297_v29  ;;  %v11378_v28 = vld [vmem:[%s16620_s15 + $0x5a4] ss:$16 sps:$4 sm:$0xff]   ;;  %v11381_v29 = vld [vmem:[%s16620_s15 + $0x5ac] ss:$16 sps:$4 sm:$0xff]  }
 0x13b   :  { %2347 = vmatpush1.bf16.msra.mxu0 %v11292_v1  ;;  %2562 = vmatpush1.bf16.msra.mxu1 %v11295_v6  ;;  %v11376_v1 = vld [vmem:[%s16620_s15 + $0x5a0] ss:$16 sps:$4 sm:$0xff]   ;;  %v11379_v6 = vld [vmem:[%s16620_s15 + $0x5a8] ss:$16 sps:$4 sm:$0xff]  }
 0x13c   :  { %2359 = vmatprep.subr.bf16.mxu0 %v11300_v30  ;;  %2574 = vmatprep.subr.bf16.mxu1 %v11303_v31  ;;  %v11384_v30 = vld [vmem:[%s16620_s15 + $0x5c4] ss:$16 sps:$4 sm:$0xff]   ;;  %v11387_v31 = vld [vmem:[%s16620_s15 + $0x5cc] ss:$16 sps:$4 sm:$0xff]  }
 0x13e   :  { %2349 = vmatmul.mubr.bf16.vlgmr.msra.gmra.mrb[0].mxu0 %v9766_v34  ;;  %2564 = vmatmul.mubr.bf16.vlgmr.msra.gmra.mrb[0].mxu1 %v9766_v34  ;;  %v11390_v34 = vld [vmem:[%s16620_s15 + $0x5e4] ss:$16 sps:$4 sm:$0xff]  }
 0x13f   :  { %2360 = vmatpush1.bf16.msra.mxu0 %v11298_v32  ;;  %2575 = vmatpush1.bf16.msra.mxu1 %v11301_v33  ;;  %v11382_v32 = vld [vmem:[%s16620_s15 + $0x5c0] ss:$16 sps:$4 sm:$0xff]   ;;  %v11385_v33 = vld [vmem:[%s16620_s15 + $0x5c8] ss:$16 sps:$4 sm:$0xff]  }
 0x140   :  { %2361 = vmatprep.subr.bf16.mxu0 %v11306_v35  ;;  %2576 = vmatprep.subr.bf16.mxu1 %v11309_v36  ;;  %v11393_v35 = vld [vmem:[%s16620_s15 + $0x5ec] ss:$16 sps:$4 sm:$0xff]   ;;  %v11388_v36 = vld [vmem:[%s16620_s15 + $0x5e0] ss:$16 sps:$4 sm:$0xff]  }
 0x141   :  { %2391 = vmatprep.mubr.bf16.mxu0 %v9769_v37  ;;  %2606 = vmatprep.mubr.bf16.mxu1 %v9769_v37  ;;  %v11391_v37 = vld [vmem:[%s16620_s15 + $0x5e8] ss:$16 sps:$4 sm:$0xff]  }
 0x143   :  { %2362 = vmatpush1.bf16.msra.mxu0 %v11304_v2  ;;  %2577 = vmatpush1.bf16.msra.mxu1 %v11307_v7  ;;  %v11396_v2 = vld [vmem:[%s16620_s15 + $0x604] ss:$16 sps:$4 sm:$0xff]   ;;  %v11399_v7 = vld [vmem:[%s16620_s15 + $0x60c] ss:$16 sps:$4 sm:$0xff]  }
 0x144   :  { %2363 = vmatprep.subr.bf16.mxu0 %v11312_v38  ;;  %2578 = vmatprep.subr.bf16.mxu1 %v11315_v39  ;;  %v11394_v38 = vld [vmem:[%s16620_s15 + $0x600] ss:$16 sps:$4 sm:$0xff]   ;;  %v11397_v39 = vld [vmem:[%s16620_s15 + $0x608] ss:$16 sps:$4 sm:$0xff]  }
 0x147   :  { %2364 = vmatpush1.bf16.msra.mxu0 %v11310_v40  ;;  %2579 = vmatpush1.bf16.msra.mxu1 %v11313_v41  ;;  %v9768_v40 = vcombine.low %v12331_v3, %v12344_v8  ;;  %v11402_v41 = vld [vmem:[%s16620_s15 + $0x624] ss:$16 sps:$4 sm:$0xff]   ;;  %v11400_v3 = vld [vmem:[%s16620_s15 + $0x620] ss:$16 sps:$4 sm:$0xff]   ;;  %v11403_v8 = vld [vmem:[%s16620_s15 + $0x628] ss:$16 sps:$4 sm:$0xff]  }
 0x148   :  { %2365 = vmatprep.subr.bf16.mxu0 %v11318_v42  ;;  %2580 = vmatprep.subr.bf16.mxu1 %v11321_v43  ;;  %v11405_v42 = vld [vmem:[%s16620_s15 + $0x62c] ss:$16 sps:$4 sm:$0xff]   ;;  %v9771_v43 = vcombine.high %v12333_v4, %v12346_v9 }
 0x14b   :  { %2366 = vmatpush1.bf16.msra.mxu0 %v11316_v44  ;;  %2581 = vmatpush1.bf16.msra.mxu1 %v11319_v45  ;;  %v11408_v44 = vld [vmem:[%s16620_s15 + $0x644] ss:$16 sps:$4 sm:$0xff]   ;;  %v11411_v45 = vld [vmem:[%s16620_s15 + $0x64c] ss:$16 sps:$4 sm:$0xff]  }
 0x14c   :  { %2367 = vmatprep.subr.bf16.mxu0 %v11324_v46  ;;  %2582 = vmatprep.subr.bf16.mxu1 %v11327_v47  ;;  %v11406_v46 = vld [vmem:[%s16620_s15 + $0x640] ss:$16 sps:$4 sm:$0xff]   ;;  %v11409_v47 = vld [vmem:[%s16620_s15 + $0x648] ss:$16 sps:$4 sm:$0xff]  }
 0x14f   :  { %2368 = vmatpush1.bf16.msra.mxu0 %v11322_v48  ;;  %2583 = vmatpush1.bf16.msra.mxu1 %v11325_v49  ;;  %v11414_v48 = vld [vmem:[%s16620_s15 + $0x664] ss:$16 sps:$4 sm:$0xff]   ;;  %v11417_v49 = vld [vmem:[%s16620_s15 + $0x66c] ss:$16 sps:$4 sm:$0xff]  }
 0x150   :  { %2369 = vmatprep.subr.bf16.mxu0 %v11330_v50  ;;  %2584 = vmatprep.subr.bf16.mxu1 %v11333_v51  ;;  %v11412_v50 = vld [vmem:[%s16620_s15 + $0x660] ss:$16 sps:$4 sm:$0xff]   ;;  %v11415_v51 = vld [vmem:[%s16620_s15 + $0x668] ss:$16 sps:$4 sm:$0xff]  }
 0x153   :  { %2370 = vmatpush1.bf16.msra.mxu0 %v11328_v52  ;;  %2585 = vmatpush1.bf16.msra.mxu1 %v11331_v53  ;;  %v11420_v52 = vld [vmem:[%s16620_s15 + $0x684] ss:$16 sps:$4 sm:$0xff]   ;;  %v11423_v53 = vld [vmem:[%s16620_s15 + $0x68c] ss:$16 sps:$4 sm:$0xff]  }
 0x154   :  { %2371 = vmatprep.subr.bf16.mxu0 %v11336_v54  ;;  %2586 = vmatprep.subr.bf16.mxu1 %v11339_v55  ;;  %v11418_v54 = vld [vmem:[%s16620_s15 + $0x680] ss:$16 sps:$4 sm:$0xff]   ;;  %v11421_v55 = vld [vmem:[%s16620_s15 + $0x688] ss:$16 sps:$4 sm:$0xff]  }
 0x157   :  { %2372 = vmatpush1.bf16.msra.mxu0 %v11334_v56  ;;  %2587 = vmatpush1.bf16.msra.mxu1 %v11337_v57  ;;  %v11426_v56 = vld [vmem:[%s16620_s15 + $0x6a4] ss:$16 sps:$4 sm:$0xff]   ;;  %v11429_v57 = vld [vmem:[%s16620_s15 + $0x6ac] ss:$16 sps:$4 sm:$0xff]  }
 0x158   :  { %2373 = vmatprep.subr.bf16.mxu0 %v11342_v58  ;;  %2588 = vmatprep.subr.bf16.mxu1 %v11345_v59  ;;  %v11424_v58 = vld [vmem:[%s16620_s15 + $0x6a0] ss:$16 sps:$4 sm:$0xff]   ;;  %v11427_v59 = vld [vmem:[%s16620_s15 + $0x6a8] ss:$16 sps:$4 sm:$0xff]  }
 0x15b   :  { %2374 = vmatpush1.bf16.msra.mxu0 %v11340_v60  ;;  %2589 = vmatpush1.bf16.msra.mxu1 %v11343_v61  ;;  %v11432_v60 = vld [vmem:[%s16620_s15 + $0x6c4] ss:$16 sps:$4 sm:$0xff]   ;;  %v11435_v61 = vld [vmem:[%s16620_s15 + $0x6cc] ss:$16 sps:$4 sm:$0xff]  }
 0x15c   :  { %2375 = vmatprep.subr.bf16.mxu0 %v11348_v62  ;;  %2590 = vmatprep.subr.bf16.mxu1 %v11351_v63  ;;  %v11430_v62 = vld [vmem:[%s16620_s15 + $0x6c0] ss:$16 sps:$4 sm:$0xff]   ;;  %v11433_v63 = vld [vmem:[%s16620_s15 + $0x6c8] ss:$16 sps:$4 sm:$0xff]  }
 0x15f   :  { %2376 = vmatpush1.bf16.msra.mxu0 %v11346_v0  ;;  %2591 = vmatpush1.bf16.msra.mxu1 %v11349_v11  ;;  %v11438_v0 = vld [vmem:[%s16620_s15 + $0x6e4] ss:$16 sps:$4 sm:$0xff]   ;;  %v11441_v11 = vld [vmem:[%s16620_s15 + $0x6ec] ss:$16 sps:$4 sm:$0xff]  }
 0x160   :  { %2377 = vmatprep.subr.bf16.mxu0 %v11354_v12  ;;  %2592 = vmatprep.subr.bf16.mxu1 %v11357_v13  ;;  %v11436_v12 = vld [vmem:[%s16620_s15 + $0x6e0] ss:$16 sps:$4 sm:$0xff]   ;;  %v11439_v13 = vld [vmem:[%s16620_s15 + $0x6e8] ss:$16 sps:$4 sm:$0xff]  }
 0x163   :  { %2378 = vmatpush1.bf16.msra.mxu0 %v11352_v14  ;;  %2593 = vmatpush1.bf16.msra.mxu1 %v11355_v15  ;;  %v11444_v14 = vld [vmem:[%s16620_s15 + $0x704] ss:$16 sps:$4 sm:$0xff]   ;;  %v11447_v15 = vld [vmem:[%s16620_s15 + $0x70c] ss:$16 sps:$4 sm:$0xff]  }
 0x164   :  { %2379 = vmatprep.subr.bf16.mxu0 %v11360_v16  ;;  %2594 = vmatprep.subr.bf16.mxu1 %v11363_v17  ;;  %v11442_v16 = vld [vmem:[%s16620_s15 + $0x700] ss:$16 sps:$4 sm:$0xff]   ;;  %v11445_v17 = vld [vmem:[%s16620_s15 + $0x708] ss:$16 sps:$4 sm:$0xff]  }
 0x167   :  { %2380 = vmatpush1.bf16.msra.mxu0 %v11358_v18  ;;  %2595 = vmatpush1.bf16.msra.mxu1 %v11361_v19  ;;  %v11450_v18 = vld [vmem:[%s16620_s15 + $0x724] ss:$16 sps:$4 sm:$0xff]   ;;  %v11453_v19 = vld [vmem:[%s16620_s15 + $0x72c] ss:$16 sps:$4 sm:$0xff]  }
 0x168   :  { %2381 = vmatprep.subr.bf16.mxu0 %v11366_v20  ;;  %2596 = vmatprep.subr.bf16.mxu1 %v11369_v21  ;;  %v11448_v20 = vld [vmem:[%s16620_s15 + $0x720] ss:$16 sps:$4 sm:$0xff]   ;;  %v11451_v21 = vld [vmem:[%s16620_s15 + $0x728] ss:$16 sps:$4 sm:$0xff]  }
 0x16b   :  { %2382 = vmatpush1.bf16.msra.mxu0 %v11364_v22  ;;  %2597 = vmatpush1.bf16.msra.mxu1 %v11367_v23  ;;  %v11456_v22 = vld [vmem:[%s16620_s15 + $0x744] ss:$16 sps:$4 sm:$0xff]   ;;  %v11459_v23 = vld [vmem:[%s16620_s15 + $0x74c] ss:$16 sps:$4 sm:$0xff]  }
 0x16c   :  { %2383 = vmatprep.subr.bf16.mxu0 %v11372_v24  ;;  %2598 = vmatprep.subr.bf16.mxu1 %v11375_v25  ;;  %v11454_v24 = vld [vmem:[%s16620_s15 + $0x740] ss:$16 sps:$4 sm:$0xff]   ;;  %v11457_v25 = vld [vmem:[%s16620_s15 + $0x748] ss:$16 sps:$4 sm:$0xff]  }
 0x16f   :  { %2384 = vmatpush1.bf16.msra.mxu0 %v11370_v26  ;;  %2599 = vmatpush1.bf16.msra.mxu1 %v11373_v27  ;;  %v11462_v26 = vld [vmem:[%s16620_s15 + $0x764] ss:$16 sps:$4 sm:$0xff]   ;;  %v11465_v27 = vld [vmem:[%s16620_s15 + $0x76c] ss:$16 sps:$4 sm:$0xff]  }
 0x170   :  { %2385 = vmatprep.subr.bf16.mxu0 %v11378_v28  ;;  %2600 = vmatprep.subr.bf16.mxu1 %v11381_v29  ;;  %v11460_v28 = vld [vmem:[%s16620_s15 + $0x760] ss:$16 sps:$4 sm:$0xff]   ;;  %v11463_v29 = vld [vmem:[%s16620_s15 + $0x768] ss:$16 sps:$4 sm:$0xff]  }
 0x173   :  { %2386 = vmatpush1.bf16.msra.mxu0 %v11376_v1  ;;  %2601 = vmatpush1.bf16.msra.mxu1 %v11379_v6  ;;  %v11468_v1 = vld [vmem:[%s16620_s15 + $0x784] ss:$16 sps:$4 sm:$0xff]   ;;  %v11471_v6 = vld [vmem:[%s16620_s15 + $0x78c] ss:$16 sps:$4 sm:$0xff]  }
 0x174   :  { %2387 = vmatprep.subr.bf16.mxu0 %v11384_v30  ;;  %2602 = vmatprep.subr.bf16.mxu1 %v11387_v31  ;;  %v11466_v30 = vld [vmem:[%s16620_s15 + $0x780] ss:$16 sps:$4 sm:$0xff]   ;;  %v11469_v31 = vld [vmem:[%s16620_s15 + $0x788] ss:$16 sps:$4 sm:$0xff]  }
 0x177   :  { %2388 = vmatpush1.bf16.msra.mxu0 %v11382_v32  ;;  %2603 = vmatpush1.bf16.msra.mxu1 %v11385_v33  ;;  %v11474_v32 = vld [vmem:[%s16620_s15 + $0x7a4] ss:$16 sps:$4 sm:$0xff]   ;;  %v11477_v33 = vld [vmem:[%s16620_s15 + $0x7ac] ss:$16 sps:$4 sm:$0xff]  }
 0x178   :  { %2389 = vmatprep.subr.bf16.mxu0 %v11390_v34  ;;  %2604 = vmatprep.subr.bf16.mxu1 %v11393_v35  ;;  %v11472_v34 = vld [vmem:[%s16620_s15 + $0x7a0] ss:$16 sps:$4 sm:$0xff]   ;;  %v11475_v35 = vld [vmem:[%s16620_s15 + $0x7a8] ss:$16 sps:$4 sm:$0xff]  }
 0x17b   :  { %2390 = vmatpush1.bf16.msra.mxu0 %v11388_v36  ;;  %2605 = vmatpush1.bf16.msra.mxu1 %v11391_v37  ;;  %v11480_v36 = vld [vmem:[%s16620_s15 + $0x7c4] ss:$16 sps:$4 sm:$0xff]   ;;  %v11483_v37 = vld [vmem:[%s16620_s15 + $0x7cc] ss:$16 sps:$4 sm:$0xff]  }
 0x17c   :  { %2402 = vmatprep.subr.bf16.mxu0 %v11396_v2  ;;  %2617 = vmatprep.subr.bf16.mxu1 %v11399_v7  ;;  %v11478_v2 = vld [vmem:[%s16620_s15 + $0x7c0] ss:$16 sps:$4 sm:$0xff]   ;;  %v11481_v7 = vld [vmem:[%s16620_s15 + $0x7c8] ss:$16 sps:$4 sm:$0xff]  }
 0x17e   :  { %2392 = vmatmul.mubr.bf16.vlgmr.msra.gmra.mrb[0].mxu0 %v9768_v40  ;;  %2607 = vmatmul.mubr.bf16.vlgmr.msra.gmra.mrb[0].mxu1 %v9768_v40  ;;  %v11484_v40 = vld [vmem:[%s16620_s15 + $0x7e0] ss:$16 sps:$4 sm:$0xff]  }
 0x17f   :  { %2403 = vmatpush1.bf16.msra.mxu0 %v11394_v38  ;;  %2618 = vmatpush1.bf16.msra.mxu1 %v11397_v39  ;;  %v11486_v38 = vld [vmem:[%s16620_s15 + $0x7e4] ss:$16 sps:$4 sm:$0xff]   ;;  %v11489_v39 = vld [vmem:[%s16620_s15 + $0x7ec] ss:$16 sps:$4 sm:$0xff]  }
 0x180   :  { %2404 = vmatprep.subr.bf16.mxu0 %v11402_v41  ;;  %2619 = vmatprep.subr.bf16.mxu1 %v11405_v42  ;;  %v11487_v41 = vld [vmem:[%s16620_s15 + $0x7e8] ss:$16 sps:$4 sm:$0xff]   ;;  %v11492_v42 = vld [vmem:[%s16620_s15 + $0x804] ss:$16 sps:$4 sm:$0xff]  }
 0x181   :  { %2434 = vmatprep.mubr.bf16.mxu0 %v9771_v43  ;;  %2649 = vmatprep.mubr.bf16.mxu1 %v9771_v43  ;;  %v11495_v43 = vld [vmem:[%s16620_s15 + $0x80c] ss:$16 sps:$4 sm:$0xff]  }
 0x183   :  { %2405 = vmatpush1.bf16.msra.mxu0 %v11400_v3  ;;  %2620 = vmatpush1.bf16.msra.mxu1 %v11403_v8  ;;  %v9770_v3 = vcombine.low %v12333_v4, %v12346_v9  ;;  %v11490_v8 = vld [vmem:[%s16620_s15 + $0x800] ss:$16 sps:$4 sm:$0xff]   ;;  %v11501_v4 = vld [vmem:[%s16620_s15 + $0x82c] ss:$16 sps:$4 sm:$0xff]   ;;  %v9773_v9 = vcombine.high %v12335_v5, %v12348_v10 }
 0x184   :  { %2406 = vmatprep.subr.bf16.mxu0 %v11408_v44  ;;  %2621 = vmatprep.subr.bf16.mxu1 %v11411_v45  ;;  %v11493_v44 = vld [vmem:[%s16620_s15 + $0x808] ss:$16 sps:$4 sm:$0xff]   ;;  %v11498_v45 = vld [vmem:[%s16620_s15 + $0x824] ss:$16 sps:$4 sm:$0xff]  }
 0x187   :  { %2407 = vmatpush1.bf16.msra.mxu0 %v11406_v46  ;;  %2622 = vmatpush1.bf16.msra.mxu1 %v11409_v47  ;;  %v11496_v46 = vld [vmem:[%s16620_s15 + $0x820] ss:$16 sps:$4 sm:$0xff]   ;;  %v11499_v47 = vld [vmem:[%s16620_s15 + $0x828] ss:$16 sps:$4 sm:$0xff]  }
 0x188   :  { %2408 = vmatprep.subr.bf16.mxu0 %v11414_v48  ;;  %2623 = vmatprep.subr.bf16.mxu1 %v11417_v49  ;;  %v11504_v48 = vld [vmem:[%s16620_s15 + $0x844] ss:$16 sps:$4 sm:$0xff]   ;;  %v11507_v49 = vld [vmem:[%s16620_s15 + $0x84c] ss:$16 sps:$4 sm:$0xff]  }
 0x18b   :  { %2409 = vmatpush1.bf16.msra.mxu0 %v11412_v50  ;;  %2624 = vmatpush1.bf16.msra.mxu1 %v11415_v51  ;;  %v11502_v50 = vld [vmem:[%s16620_s15 + $0x840] ss:$16 sps:$4 sm:$0xff]   ;;  %v11505_v51 = vld [vmem:[%s16620_s15 + $0x848] ss:$16 sps:$4 sm:$0xff]  }
 0x18c   :  { %2410 = vmatprep.subr.bf16.mxu0 %v11420_v52  ;;  %2625 = vmatprep.subr.bf16.mxu1 %v11423_v53  ;;  %v11510_v52 = vld [vmem:[%s16620_s15 + $0x864] ss:$16 sps:$4 sm:$0xff]   ;;  %v11513_v53 = vld [vmem:[%s16620_s15 + $0x86c] ss:$16 sps:$4 sm:$0xff]  }
 0x18f   :  { %2411 = vmatpush1.bf16.msra.mxu0 %v11418_v54  ;;  %2626 = vmatpush1.bf16.msra.mxu1 %v11421_v55  ;;  %v11508_v54 = vld [vmem:[%s16620_s15 + $0x860] ss:$16 sps:$4 sm:$0xff]   ;;  %v11511_v55 = vld [vmem:[%s16620_s15 + $0x868] ss:$16 sps:$4 sm:$0xff]  }
 0x190   :  { %2412 = vmatprep.subr.bf16.mxu0 %v11426_v56  ;;  %2627 = vmatprep.subr.bf16.mxu1 %v11429_v57  ;;  %v11516_v56 = vld [vmem:[%s16620_s15 + $0x884] ss:$16 sps:$4 sm:$0xff]   ;;  %v11519_v57 = vld [vmem:[%s16620_s15 + $0x88c] ss:$16 sps:$4 sm:$0xff]  }
 0x193   :  { %2413 = vmatpush1.bf16.msra.mxu0 %v11424_v58  ;;  %2628 = vmatpush1.bf16.msra.mxu1 %v11427_v59  ;;  %v11514_v58 = vld [vmem:[%s16620_s15 + $0x880] ss:$16 sps:$4 sm:$0xff]   ;;  %v11517_v59 = vld [vmem:[%s16620_s15 + $0x888] ss:$16 sps:$4 sm:$0xff]  }
 0x194   :  { %2414 = vmatprep.subr.bf16.mxu0 %v11432_v60  ;;  %2629 = vmatprep.subr.bf16.mxu1 %v11435_v61  ;;  %v11522_v60 = vld [vmem:[%s16620_s15 + $0x8a4] ss:$16 sps:$4 sm:$0xff]   ;;  %v11525_v61 = vld [vmem:[%s16620_s15 + $0x8ac] ss:$16 sps:$4 sm:$0xff]  }
 0x197   :  { %2415 = vmatpush1.bf16.msra.mxu0 %v11430_v62  ;;  %2630 = vmatpush1.bf16.msra.mxu1 %v11433_v63  ;;  %v11520_v62 = vld [vmem:[%s16620_s15 + $0x8a0] ss:$16 sps:$4 sm:$0xff]   ;;  %v11523_v63 = vld [vmem:[%s16620_s15 + $0x8a8] ss:$16 sps:$4 sm:$0xff]  }
 0x198   :  { %2416 = vmatprep.subr.bf16.mxu0 %v11438_v0  ;;  %2631 = vmatprep.subr.bf16.mxu1 %v11441_v11  ;;  %v11528_v0 = vld [vmem:[%s16620_s15 + $0x8c4] ss:$16 sps:$4 sm:$0xff]   ;;  %v11531_v11 = vld [vmem:[%s16620_s15 + $0x8cc] ss:$16 sps:$4 sm:$0xff]  }
 0x19b   :  { %2417 = vmatpush1.bf16.msra.mxu0 %v11436_v12  ;;  %2632 = vmatpush1.bf16.msra.mxu1 %v11439_v13  ;;  %v11526_v12 = vld [vmem:[%s16620_s15 + $0x8c0] ss:$16 sps:$4 sm:$0xff]   ;;  %v11529_v13 = vld [vmem:[%s16620_s15 + $0x8c8] ss:$16 sps:$4 sm:$0xff]  }
 0x19c   :  { %2418 = vmatprep.subr.bf16.mxu0 %v11444_v14  ;;  %2633 = vmatprep.subr.bf16.mxu1 %v11447_v15  ;;  %v11534_v14 = vld [vmem:[%s16620_s15 + $0x8e4] ss:$16 sps:$4 sm:$0xff]   ;;  %v11537_v15 = vld [vmem:[%s16620_s15 + $0x8ec] ss:$16 sps:$4 sm:$0xff]  }
 0x19f   :  { %2419 = vmatpush1.bf16.msra.mxu0 %v11442_v16  ;;  %2634 = vmatpush1.bf16.msra.mxu1 %v11445_v17  ;;  %v11532_v16 = vld [vmem:[%s16620_s15 + $0x8e0] ss:$16 sps:$4 sm:$0xff]   ;;  %v11535_v17 = vld [vmem:[%s16620_s15 + $0x8e8] ss:$16 sps:$4 sm:$0xff]  }
 0x1a0   :  { %2420 = vmatprep.subr.bf16.mxu0 %v11450_v18  ;;  %2635 = vmatprep.subr.bf16.mxu1 %v11453_v19  ;;  %v11540_v18 = vld [vmem:[%s16620_s15 + $0x904] ss:$16 sps:$4 sm:$0xff]   ;;  %v11543_v19 = vld [vmem:[%s16620_s15 + $0x90c] ss:$16 sps:$4 sm:$0xff]  }
 0x1a3   :  { %2421 = vmatpush1.bf16.msra.mxu0 %v11448_v20  ;;  %2636 = vmatpush1.bf16.msra.mxu1 %v11451_v21  ;;  %v11538_v20 = vld [vmem:[%s16620_s15 + $0x900] ss:$16 sps:$4 sm:$0xff]   ;;  %v11541_v21 = vld [vmem:[%s16620_s15 + $0x908] ss:$16 sps:$4 sm:$0xff]  }
 0x1a4   :  { %2422 = vmatprep.subr.bf16.mxu0 %v11456_v22  ;;  %2637 = vmatprep.subr.bf16.mxu1 %v11459_v23  ;;  %v11546_v22 = vld [vmem:[%s16620_s15 + $0x924] ss:$16 sps:$4 sm:$0xff]   ;;  %v11549_v23 = vld [vmem:[%s16620_s15 + $0x92c] ss:$16 sps:$4 sm:$0xff]  }
 0x1a7   :  { %2423 = vmatpush1.bf16.msra.mxu0 %v11454_v24  ;;  %2638 = vmatpush1.bf16.msra.mxu1 %v11457_v25  ;;  %v11544_v24 = vld [vmem:[%s16620_s15 + $0x920] ss:$16 sps:$4 sm:$0xff]   ;;  %v11547_v25 = vld [vmem:[%s16620_s15 + $0x928] ss:$16 sps:$4 sm:$0xff]  }
 0x1a8   :  { %2424 = vmatprep.subr.bf16.mxu0 %v11462_v26  ;;  %2639 = vmatprep.subr.bf16.mxu1 %v11465_v27  ;;  %v11552_v26 = vld [vmem:[%s16620_s15 + $0x944] ss:$16 sps:$4 sm:$0xff]   ;;  %v11555_v27 = vld [vmem:[%s16620_s15 + $0x94c] ss:$16 sps:$4 sm:$0xff]  }
 0x1ab   :  { %2425 = vmatpush1.bf16.msra.mxu0 %v11460_v28  ;;  %2640 = vmatpush1.bf16.msra.mxu1 %v11463_v29  ;;  %v11550_v28 = vld [vmem:[%s16620_s15 + $0x940] ss:$16 sps:$4 sm:$0xff]   ;;  %v11553_v29 = vld [vmem:[%s16620_s15 + $0x948] ss:$16 sps:$4 sm:$0xff]  }
 0x1ac   :  { %2426 = vmatprep.subr.bf16.mxu0 %v11468_v1  ;;  %2641 = vmatprep.subr.bf16.mxu1 %v11471_v6  ;;  %v11558_v1 = vld [vmem:[%s16620_s15 + $0x964] ss:$16 sps:$4 sm:$0xff]   ;;  %v11561_v6 = vld [vmem:[%s16620_s15 + $0x96c] ss:$16 sps:$4 sm:$0xff]  }
 0x1af   :  { %2427 = vmatpush1.bf16.msra.mxu0 %v11466_v30  ;;  %2642 = vmatpush1.bf16.msra.mxu1 %v11469_v31  ;;  %v11556_v30 = vld [vmem:[%s16620_s15 + $0x960] ss:$16 sps:$4 sm:$0xff]   ;;  %v11559_v31 = vld [vmem:[%s16620_s15 + $0x968] ss:$16 sps:$4 sm:$0xff]  }
 0x1b0   :  { %2428 = vmatprep.subr.bf16.mxu0 %v11474_v32  ;;  %2643 = vmatprep.subr.bf16.mxu1 %v11477_v33  ;;  %v11564_v32 = vld [vmem:[%s16620_s15 + $0x984] ss:$16 sps:$4 sm:$0xff]   ;;  %v11567_v33 = vld [vmem:[%s16620_s15 + $0x98c] ss:$16 sps:$4 sm:$0xff]  }
 0x1b3   :  { %2429 = vmatpush1.bf16.msra.mxu0 %v11472_v34  ;;  %2644 = vmatpush1.bf16.msra.mxu1 %v11475_v35  ;;  %v11562_v34 = vld [vmem:[%s16620_s15 + $0x980] ss:$16 sps:$4 sm:$0xff]   ;;  %v11565_v35 = vld [vmem:[%s16620_s15 + $0x988] ss:$16 sps:$4 sm:$0xff]  }
 0x1b4   :  { %2430 = vmatprep.subr.bf16.mxu0 %v11480_v36  ;;  %2645 = vmatprep.subr.bf16.mxu1 %v11483_v37  ;;  %v11570_v36 = vld [vmem:[%s16620_s15 + $0x9a4] ss:$16 sps:$4 sm:$0xff]   ;;  %v11573_v37 = vld [vmem:[%s16620_s15 + $0x9ac] ss:$16 sps:$4 sm:$0xff]  }
 0x1b7   :  { %2431 = vmatpush1.bf16.msra.mxu0 %v11478_v2  ;;  %2646 = vmatpush1.bf16.msra.mxu1 %v11481_v7  ;;  %v11568_v2 = vld [vmem:[%s16620_s15 + $0x9a0] ss:$16 sps:$4 sm:$0xff]   ;;  %v11571_v7 = vld [vmem:[%s16620_s15 + $0x9a8] ss:$16 sps:$4 sm:$0xff]  }
 0x1b8   :  { %2432 = vmatprep.subr.bf16.mxu0 %v11486_v38  ;;  %2647 = vmatprep.subr.bf16.mxu1 %v11489_v39  ;;  %v11576_v38 = vld [vmem:[%s16620_s15 + $0x9c4] ss:$16 sps:$4 sm:$0xff]   ;;  %v11579_v39 = vld [vmem:[%s16620_s15 + $0x9cc] ss:$16 sps:$4 sm:$0xff]  }
 0x1bb   :  { %2433 = vmatpush1.bf16.msra.mxu0 %v11484_v40  ;;  %2648 = vmatpush1.bf16.msra.mxu1 %v11487_v41  ;;  %v11574_v40 = vld [vmem:[%s16620_s15 + $0x9c0] ss:$16 sps:$4 sm:$0xff]   ;;  %v11577_v41 = vld [vmem:[%s16620_s15 + $0x9c8] ss:$16 sps:$4 sm:$0xff]  }
 0x1bc   :  { %2445 = vmatprep.subr.bf16.mxu0 %v11492_v42  ;;  %2660 = vmatprep.subr.bf16.mxu1 %v11495_v43  ;;  %v11582_v42 = vld [vmem:[%s16620_s15 + $0x9e4] ss:$16 sps:$4 sm:$0xff]   ;;  %v11585_v43 = vld [vmem:[%s16620_s15 + $0x9ec] ss:$16 sps:$4 sm:$0xff]  }
 0x1be   :  { %2435 = vmatmul.mubr.bf16.vlgmr.msra.gmra.mrb[0].mxu0 %v9770_v3  ;;  %2650 = vmatmul.mubr.bf16.vlgmr.msra.gmra.mrb[0].mxu1 %v9770_v3  ;;  %v11580_v3 = vld [vmem:[%s16620_s15 + $0x9e0] ss:$16 sps:$4 sm:$0xff]  }
 0x1bf   :  { %2446 = vmatpush1.bf16.msra.mxu0 %v11490_v8  ;;  %2661 = vmatpush1.bf16.msra.mxu1 %v11493_v44  ;;  %v11583_v8 = vld [vmem:[%s16620_s15 + $0x9e8] ss:$16 sps:$4 sm:$0xff]   ;;  %v11586_v44 = vld [vmem:[%s16621_s26 + $0x40] sm:$0xff]  }
 0x1c0   :  { %2447 = vmatprep.subr.bf16.mxu0 %v11498_v45  ;;  %2662 = vmatprep.subr.bf16.mxu1 %v11501_v4  ;;  %v11587_v45 = vld [vmem:[%s16621_s26 + $0xc0] sm:$0xff]   ;;  %v9772_v4 = vcombine.low %v12335_v5, %v12348_v10  ;;  %v11591_v5 = vld [vmem:[%s16621_s26 + $0xc8] sm:$0xff]  }
 0x1c1   :  { %2477 = vmatprep.mubr.bf16.mxu0 %v9773_v9  ;;  %2692 = vmatprep.mubr.bf16.mxu1 %v9773_v9  ;;  %v11588_v9 = vld [vmem:[%s16621_s26] sm:$0xff]   ;;  %v11592_v10 = vld [vmem:[%s16621_s26 + $0x8] sm:$0xff]  }
 0x1c3   :  { %2448 = vmatpush1.bf16.msra.mxu0 %v11496_v46  ;;  %2663 = vmatpush1.bf16.msra.mxu1 %v11499_v47  ;;  %v11589_v46 = vld [vmem:[%s16621_s26 + $0x80] sm:$0xff]   ;;  %v11590_v47 = vld [vmem:[%s16621_s26 + $0x48] sm:$0xff]  }
 0x1c4   :  { %2449 = vmatprep.subr.bf16.mxu0 %v11504_v48  ;;  %2664 = vmatprep.subr.bf16.mxu1 %v11507_v49  ;;  %v11593_v48 = vld [vmem:[%s16621_s26 + $0x88] sm:$0xff]   ;;  %v11594_v49 = vld [vmem:[%s16621_s26 + $0x50] sm:$0xff]  }
 0x1c7   :  { %2450 = vmatpush1.bf16.msra.mxu0 %v11502_v50  ;;  %2665 = vmatpush1.bf16.msra.mxu1 %v11505_v51  ;;  %v11595_v50 = vld [vmem:[%s16621_s26 + $0xd0] sm:$0xff]  }
 0x1c8   :  { %2451 = vmatprep.subr.bf16.mxu0 %v11510_v52  ;;  %2666 = vmatprep.subr.bf16.mxu1 %v11513_v53  ;;  %v11596_v51 = vld [vmem:[%s16621_s26 + $0x10] sm:$0xff]   ;;  %v11598_v53 = vld [vmem:[%s16621_s26 + $0x58] sm:$0xff]  }
 0x1c9   :  { %v11597_v52 = vld [vmem:[%s16621_s26 + $0x90] sm:$0xff]  }
 0x1cb   :  { %2452 = vmatpush1.bf16.msra.mxu0 %v11508_v54  ;;  %2667 = vmatpush1.bf16.msra.mxu1 %v11511_v55  ;;  %v11599_v54 = vld [vmem:[%s16621_s26 + $0xd8] sm:$0xff]  }
 0x1cc   :  { %2453 = vmatprep.subr.bf16.mxu0 %v11516_v56  ;;  %2668 = vmatprep.subr.bf16.mxu1 %v11519_v57  ;;  %v11600_v55 = vld [vmem:[%s16621_s26 + $0x18] sm:$0xff]   ;;  %v11602_v57 = vld [vmem:[%s16621_s26 + $0x60] sm:$0xff]  }
 0x1cd   :  { %v11601_v56 = vld [vmem:[%s16621_s26 + $0x98] sm:$0xff]  }
 0x1cf   :  { %2454 = vmatpush1.bf16.msra.mxu0 %v11514_v58  ;;  %2669 = vmatpush1.bf16.msra.mxu1 %v11517_v59  ;;  %v11603_v58 = vld [vmem:[%s16621_s26 + $0xe0] sm:$0xff]  }
 0x1d0   :  { %2455 = vmatprep.subr.bf16.mxu0 %v11522_v60  ;;  %2670 = vmatprep.subr.bf16.mxu1 %v11525_v61  ;;  %v11604_v59 = vld [vmem:[%s16621_s26 + $0x20] sm:$0xff]   ;;  %v11606_v61 = vld [vmem:[%s16621_s26 + $0x68] sm:$0xff]  }
 0x1d1   :  { %v11605_v60 = vld [vmem:[%s16621_s26 + $0xa0] sm:$0xff]  }
 0x1d3   :  { %2456 = vmatpush1.bf16.msra.mxu0 %v11520_v62  ;;  %2671 = vmatpush1.bf16.msra.mxu1 %v11523_v63  ;;  %v11607_v62 = vld [vmem:[%s16621_s26 + $0xe8] sm:$0xff]  }
 0x1d4   :  { %2457 = vmatprep.subr.bf16.mxu0 %v11528_v0  ;;  %2672 = vmatprep.subr.bf16.mxu1 %v11531_v11  ;;  %v11608_v63 = vld [vmem:[%s16621_s26 + $0x28] sm:$0xff]   ;;  %v11610_v11 = vld [vmem:[%s16621_s26 + $0x70] sm:$0xff]  }
 0x1d5   :  { %v11609_v0 = vld [vmem:[%s16621_s26 + $0xa8] sm:$0xff]  }
 0x1d7   :  { %2458 = vmatpush1.bf16.msra.mxu0 %v11526_v12  ;;  %2673 = vmatpush1.bf16.msra.mxu1 %v11529_v13  ;;  %v11611_v12 = vld [vmem:[%s16621_s26 + $0xf0] sm:$0xff]  }
 0x1d8   :  { %2459 = vmatprep.subr.bf16.mxu0 %v11534_v14  ;;  %2674 = vmatprep.subr.bf16.mxu1 %v11537_v15  ;;  %v11612_v13 = vld [vmem:[%s16621_s26 + $0x30] sm:$0xff]   ;;  %v11614_v15 = vld [vmem:[%s16621_s26 + $0x78] sm:$0xff]  }
 0x1d9   :  { %v11613_v14 = vld [vmem:[%s16621_s26 + $0xb0] sm:$0xff]  }
 0x1db   :  { %2460 = vmatpush1.bf16.msra.mxu0 %v11532_v16  ;;  %2675 = vmatpush1.bf16.msra.mxu1 %v11535_v17  ;;  %v11615_v16 = vld [vmem:[%s16621_s26 + $0xf8] sm:$0xff]  }
 0x1dc   :  { %2461 = vmatprep.subr.bf16.mxu0 %v11540_v18  ;;  %2676 = vmatprep.subr.bf16.mxu1 %v11543_v19  ;;  %v11616_v17 = vld [vmem:[%s16621_s26 + $0x38] sm:$0xff]   ;;  %v3654_v19 = vld [vmem:[%s16488_s7] sm:$0xff] }
 0x1dd   :  { %v11617_v18 = vld [vmem:[%s16621_s26 + $0xb8] sm:$0xff]  }
 0x1df   :  { %2462 = vmatpush1.bf16.msra.mxu0 %v11538_v20  ;;  %2677 = vmatpush1.bf16.msra.mxu1 %v11541_v21  ;;  %v3655_v20 = vld [vmem:[%s16488_s7 + $0x8] sm:$0xff] }
 0x1e0   :  { %2463 = vmatprep.subr.bf16.mxu0 %v11546_v22  ;;  %2678 = vmatprep.subr.bf16.mxu1 %v11549_v23  ;;  %v10696_v21 = vpack.c.bf16 %v3655_v20, %v3654_v19  ;;  %v16511_v22 = vlaneseq  ;;  %v13497_v19 = vld [vmem:[%s16625_s27 + $0x8] sm:$0xff]  ;;  %v16514_v20 = vmov 0.0|0.0  }
 0x1e2   :  { %v13433_v23 = vshrl.u32 %v16511_v22, 7 }
 0x1e3   :  { %2464 = vmatpush1.bf16.msra.mxu0 %v11544_v24  ;;  %2679 = vmatpush1.bf16.msra.mxu1 %v11547_v25 }
 0x1e4   :  { %2465 = vmatprep.subr.bf16.mxu0 %v11552_v26  ;;  %2680 = vmatprep.subr.bf16.mxu1 %v11555_v27  ;;  %16622 = vst [vmem:[#allocation33_spill] sm:$0xff] %v13433_v23  ;;  %v13436_v24 = vsub.s32 0, %v13433_v23  ;;  %v16510_v25 = vsub.s32 2, %v13433_v23  ;;  %v601_v26 = vld [vmem:[#allocation7] sm:$0xf]  ;;  %v13440_v27 = vsub.s32 1, %v13433_v23 }
 0x1e6   :  { %16623 = vst [vmem:[#allocation34_spill] sm:$0xff] %v13436_v24  ;;  %16624 = vst [vmem:[#allocation35_spill] sm:$0xff] %v13440_v27 }
 0x1e7   :  { %2466 = vmatpush1.bf16.msra.mxu0 %v11550_v28  ;;  %2681 = vmatpush1.bf16.msra.mxu1 %v11553_v29  ;;  %v16509_v28 = vsub.s32 3, %v13433_v23  ;;  %v606_v29 = vrot.slane %v601_v26, %v13436_v24 }
 0x1e8   :  { %2467 = vmatprep.subr.bf16.mxu0 %v11558_v1  ;;  %2682 = vmatprep.subr.bf16.mxu1 %v11561_v6  ;;  %v614_v1 = vrot.slane %v601_v26, %v16510_v25  ;;  %v610_v6 = vrot.slane %v601_v26, %v13440_v27 }
 0x1eb   :  { %2468 = vmatpush1.bf16.msra.mxu0 %v11556_v30  ;;  %2683 = vmatpush1.bf16.msra.mxu1 %v11559_v31  ;;  %v618_v30 = vrot.slane %v601_v26, %v16509_v28  ;;  %v13508_v26 = vld [vmem:[%s16625_s27 + $0x10] sm:$0xff]  ;;  %v4096_v28 = vld [vmem:[%s16489_s8 + $0x38] sm:$0xff] }
 0x1ec   :  { %2469 = vmatprep.subr.bf16.mxu0 %v11564_v32  ;;  %2684 = vmatprep.subr.bf16.mxu1 %v11567_v33 }
 0x1ef   :  { %2470 = vmatpush1.bf16.msra.mxu0 %v11562_v34  ;;  %2685 = vmatpush1.bf16.msra.mxu1 %v11565_v35 }
 0x1f0   :  { %2471 = vmatprep.subr.bf16.mxu0 %v11570_v36  ;;  %2686 = vmatprep.subr.bf16.mxu1 %v11573_v37 }
 0x1f3   :  { %2472 = vmatpush1.bf16.msra.mxu0 %v11568_v2  ;;  %2687 = vmatpush1.bf16.msra.mxu1 %v11571_v7 }
 0x1f4   :  { %2473 = vmatprep.subr.bf16.mxu0 %v11576_v38  ;;  %2688 = vmatprep.subr.bf16.mxu1 %v11579_v39 }
 0x1f7   :  { %2474 = vmatpush1.bf16.msra.mxu0 %v11574_v40  ;;  %2689 = vmatpush1.bf16.msra.mxu1 %v11577_v41 }
 0x1f8   :  { %2475 = vmatprep.subr.bf16.mxu0 %v11582_v42  ;;  %2690 = vmatprep.subr.bf16.mxu1 %v11585_v43 }
 0x1fb   :  { %2476 = vmatpush1.bf16.msra.mxu0 %v11580_v3  ;;  %2691 = vmatpush1.bf16.msra.mxu1 %v11583_v8 }
 0x1fc   :  { %10180 = vmatprep.subr.bf16.mxu0 %v11586_v44  ;;  %10202 = vmatprep.subr.bf16.mxu1 %v11587_v45 }
 0x1fe   :  { %2478 = vmatmul.mubr.bf16.vlgmr.msra.gmra.mrb[0].mxu0 %v9772_v4  ;;  %2693 = vmatmul.mubr.bf16.vlgmr.msra.gmra.mrb[0].mxu1 %v9772_v4 }
 0x1ff   :  { %10181 = vmatpush3.bf16.msra.mxu0 %v11588_v9  ;;  %10203 = vmatpush3.bf16.msra.mxu1 %v11589_v46 }
 0x200   :  { %10182 = vmatprep.subr.bf16.mxu0 %v11590_v47  ;;  %10204 = vmatprep.subr.bf16.mxu1 %v11591_v5 }
 0x203   :  { %10183 = vmatpush3.bf16.msra.mxu0 %v11592_v10  ;;  %10205 = vmatpush3.bf16.msra.mxu1 %v11593_v48  ;;  %v3656_v10 = vld [vmem:[%s16488_s7 + $0x10] sm:$0xff]  ;;  %v3657_v48 = vld [vmem:[%s16488_s7 + $0x18] sm:$0xff] }
 0x204   :  { %10184 = vmatprep.subr.bf16.mxu0 %v11594_v49  ;;  %10206 = vmatprep.subr.bf16.mxu1 %v11595_v50 }
 0x207   :  { %10185 = vmatpush3.bf16.msra.mxu0 %v11596_v51  ;;  %10207 = vmatpush3.bf16.msra.mxu1 %v11597_v52 }
 0x208   :  { %10186 = vmatprep.subr.bf16.mxu0 %v11598_v53  ;;  %10208 = vmatprep.subr.bf16.mxu1 %v11599_v54  ;;  %v10700_v53 = vpack.c.bf16 %v3657_v48, %v3656_v10  ;;  %v3658_v54 = vld [vmem:[%s16488_s7 + $0x20] sm:$0xff] }
 0x20b   :  { %10187 = vmatpush3.bf16.msra.mxu0 %v11600_v55  ;;  %10209 = vmatpush3.bf16.msra.mxu1 %v11601_v56  ;;  %v3659_v55 = vld [vmem:[%s16488_s7 + $0x28] sm:$0xff] }
 0x20c   :  { %10188 = vmatprep.subr.bf16.mxu0 %v11602_v57  ;;  %10210 = vmatprep.subr.bf16.mxu1 %v11603_v58  ;;  %v10704_v56 = vpack.c.bf16 %v3659_v55, %v3658_v54  ;;  %v3660_v57 = vld [vmem:[%s16488_s7 + $0x30] sm:$0xff]  ;;  %v3661_v58 = vld [vmem:[%s16488_s7 + $0x38] sm:$0xff] }
 0x20f   :  { %10189 = vmatpush3.bf16.msra.mxu0 %v11604_v59  ;;  %10211 = vmatpush3.bf16.msra.mxu1 %v11605_v60  ;;  %v10708_v59 = vpack.c.bf16 %v3661_v58, %v3660_v57  ;;  %v3662_v60 = vld [vmem:[%s16488_s7 + $0x40] sm:$0xff] }
 0x210   :  { %10190 = vmatprep.subr.bf16.mxu0 %v11606_v61  ;;  %10212 = vmatprep.subr.bf16.mxu1 %v11607_v62  ;;  %v3663_v61 = vld [vmem:[%s16488_s7 + $0x48] sm:$0xff] }
 0x211   :  { %v10712_v62 = vpack.c.bf16 %v3663_v61, %v3662_v60  ;;  %v3184_v60 = vcombine.high %v13508_v26, %v13508_v26  ;;  %v4100_v61 = vld [vmem:[%s16489_s8 + $0x58] sm:$0xff] }
 0x213   :  { %10191 = vmatpush3.bf16.msra.mxu0 %v11608_v63  ;;  %10213 = vmatpush3.bf16.msra.mxu1 %v11609_v0  ;;  %v3664_v63 = vld [vmem:[%s16488_s7 + $0x50] sm:$0xff]  ;;  %v3665_v0 = vld [vmem:[%s16488_s7 + $0x58] sm:$0xff] }
 0x214   :  { %10192 = vmatprep.subr.bf16.mxu0 %v11610_v11  ;;  %10214 = vmatprep.subr.bf16.mxu1 %v11611_v12  ;;  %v10716_v11 = vpack.c.bf16 %v3665_v0, %v3664_v63  ;;  %v3666_v12 = vld [vmem:[%s16488_s7 + $0x60] sm:$0xff] }
 0x217   :  { %10193 = vmatpush3.bf16.msra.mxu0 %v11612_v13  ;;  %10215 = vmatpush3.bf16.msra.mxu1 %v11613_v14  ;;  %v3667_v13 = vld [vmem:[%s16488_s7 + $0x68] sm:$0xff] }
 0x218   :  { %10194 = vmatprep.subr.bf16.mxu0 %v11614_v15  ;;  %10216 = vmatprep.subr.bf16.mxu1 %v11615_v16  ;;  %v10720_v14 = vpack.c.bf16 %v3667_v13, %v3666_v12  ;;  %v3668_v15 = vld [vmem:[%s16488_s7 + $0x70] sm:$0xff]  ;;  %v3669_v16 = vld [vmem:[%s16488_s7 + $0x78] sm:$0xff]  ;;  %v5463_v12 = vld [vmem:[%s16490_s9 + $0x20] sm:$0xff] }
 0x219   :  { %v13584_v13 = vld [vmem:[%s16625_s27 + $0x30] sm:$0xff] }
 0x21b   :  { %10195 = vmatpush3.bf16.msra.mxu0 %v11616_v17  ;;  %10217 = vmatpush3.bf16.msra.mxu1 %v11617_v18  ;;  %v10724_v17 = vpack.c.bf16 %v3669_v16, %v3668_v15  ;;  %v3062_v18 = vld [vmem:[%s16625_s27] sm:$0xff] }
 0x21c   :  { %10697 = vmatprep.subr.bf16.mxu0 %v10696_v21  ;;  %10728 = vmatprep.subr.bf16.mxu1 %v16514_v20  ;;  %v3086_v48 = vcombine.high %v3062_v18, %v3062_v18 }
 0x2d1   :  { %v2479_v31 = vpop.f32.mrb[0].mxu0  ;;  %v2694_v32 = vpop.f32.mrb[0].mxu1 }
 0x2d2   :  { %v11042_v33 = vadd.f32 %v2479_v31, %v606_v29  ;;  %v11046_v34 = vadd.f32 %v2694_v32, %v614_v1  ;;  %v2481_v35 = vpop.f32.mrb[1].mxu0  ;;  %v2696_v36 = vpop.f32.mrb[1].mxu1 }
 0x2d3   :  { %v11043_v37 = vadd.f32 %v2481_v35, %v610_v6  ;;  %v11047_v2 = vadd.f32 %v2696_v36, %v618_v30  ;;  %v2483_v7 = vpop.f32.mrb[2].mxu0  ;;  %v2698_v38 = vpop.f32.mrb[2].mxu1 }
 0x2d4   :  { %v11044_v39 = vadd.f32 %v2483_v7, %v606_v29  ;;  %v11048_v40 = vadd.f32 %v2698_v38, %v614_v1  ;;  %v2485_v41 = vpop.f32.mrb[3].mxu0  ;;  %v2700_v42 = vpop.f32.mrb[3].mxu1  ;;  %v2703_v8 = vmax.f32 %v11042_v33, 0.0  ;;  %v2705_v44 = vmax.f32 %v11046_v34, 0.0  ;;  %v13513_v29 = vld [vmem:[%s16625_s27 + $0x18] sm:$0xff] }
 0x2d5   :  { %v11045_v43 = vadd.f32 %v2485_v41, %v610_v6  ;;  %v11049_v3 = vadd.f32 %v2700_v42, %v618_v30  ;;  %v2704_v9 = vmax.f32 %v11043_v37, 0.0  ;;  %v2706_v46 = vmax.f32 %v11047_v2, 0.0  ;;  %v13524_v6 = vld [vmem:[%s16625_s27 + $0x20] sm:$0xff]  ;;  %v13529_v30 = vld [vmem:[%s16625_s27 + $0x28] sm:$0x1f] }
 0x2d6   :  { %v2707_v45 = vmax.f32 %v11044_v39, 0.0  ;;  %v2709_v4 = vmax.f32 %v11048_v40, 0.0  ;;  %v13517_v1 = vpack.c.bf16 %v13513_v29, %v13508_v26  ;;  %v13533_v31 = vpack.c.bf16 %v13529_v30, %v13524_v6  ;;  %v10094_v34 = vld [vmem:[#allocation10] ss:$0 sm:$0xff] }
 0x2d7   :  { %v2708_v47 = vmax.f32 %v11045_v43, 0.0  ;;  %v2710_v5 = vmax.f32 %v11049_v3, 0.0 }
 0x2d8   :  { %v2711_v49 = vpack.c.bf16 %v2707_v45, %v2703_v8  ;;  %v2713_v50 = vpack.c.bf16 %v2709_v4, %v2705_v44  ;;  %16627 = vst [vmem:[#allocation37_spill] sm:$0xff] %v13517_v1  ;;  %16628 = vst [vmem:[#allocation38_spill] sm:$0xff] %v13533_v31 }
 0x2d9   :  { %v2712_v51 = vpack.c.bf16 %v2708_v47, %v2704_v9  ;;  %v2714_v52 = vpack.c.bf16 %v2710_v5, %v2706_v46  ;;  %v16512_v9 = vmov 0.0   ;;  %v12117_v46 = vmov 1966171168  }
 0x2da   :  { %v3088_v47 = vunpack.c.l.s4 %v12117_v46  ;;  %v13655_v46 = vld [vmem:[%s16625_s27 + $0x58] sm:$0x1f] }
 0x2db   :  { %3010 = vmatprep.mubr.bf16.mxu0 %v2712_v51  ;;  %3051 = vmatprep.mubr.bf16.mxu1 %v2714_v52 }
 0x2dc   :  { %3011 = vmatmul.mubr.bf16.vlgmr.msra.gmra.mrb[4].mxu0 %v2711_v49  ;;  %3052 = vmatmul.mubr.bf16.vlgmr.msra.gmra.mrb[4].mxu1 %v2713_v50  ;;  %v3089_v5 = vunpack.c.0.s8 %v3088_v47  ;;  %v3135_v49 = vcombine.high %v13497_v19, %v13497_v19  ;;  %v4091_v47 = vld [vmem:[%s16489_s8 + $0x10] sm:$0xff] }
 0x2dd   :  { %10699 = vmatpush3.bf16.msra.mxu0 %v10696_v21  ;;  %v13501_v21 = vpack.c.bf16 %v13497_v19, %v3062_v18  ;;  %10479 = vmatprep.mubr.msk.f32.mxu1 %vm12115_vm0, %v16512_v9  ;;  %v5464_v9 = vld [vmem:[%s16490_s9 + $0x28] sm:$0xff] }
 0x2de   :  { %10701 = vmatprep.subr.bf16.mxu0 %v10700_v53  ;;  %v13546_v10 = vsub.s32 %v3089_v5, %v13433_v23  ;;  %v4092_v5 = vld [vmem:[%s16489_s8 + $0x18] sm:$0xff]  ;;  %v13754_v24 = vpack.c.bf16 %v5464_v9, %v5463_v12  ;;  %v5465_v23 = vld [vmem:[%s16490_s9 + $0x30] sm:$0xff]  ;;  %v5467_v9 = vld [vmem:[%s16490_s9 + $0x40] sm:$0xff] }
 0x2df   :  { %16626 = vst [vmem:[#allocation36_spill] sm:$0xff] %v13501_v21  ;;  %10730 = vmatpush3.bf16.xpose.msra.mxu1 %v13501_v21  ;;  %v5468_v12 = vld [vmem:[%s16490_s9 + $0x48] sm:$0xff] }
 0x2e0   :  { %10731 = vmatprep.subr.bf16.mxu1 %v16514_v20  ;;  %v3142_v50 = vrot.slane %v13497_v19, %v13546_v10  ;;  %v3093_v51 = vrot.slane %v3062_v18, %v13546_v10  ;;  %v3149_v52 = vrot.slane %v3135_v49, %v13546_v10  ;;  %v3100_v54 = vrot.slane %v3086_v48, %v13546_v10  ;;  %v4098_v48 = vld [vmem:[%s16489_s8 + $0x48] sm:$0xff] }
 0x2e1   :  { %10703 = vmatpush3.bf16.msra.mxu0 %v10700_v53  ;;  %v13569_v63 = vrot.slane %v13508_v26, %v13546_v10  ;;  %v13573_v0 = vrot.slane %v13513_v29, %v13546_v10  ;;  %v13596_v16 = vrot.slane %v13529_v30, %v13546_v10 }
 0x2e2   :  { %10705 = vmatprep.subr.bf16.mxu0 %v10704_v56  ;;  %v3150_v53 = vcombine.high %v3142_v50, %v3142_v50  ;;  %v3101_v55 = vcombine.high %v3093_v51, %v3093_v51  ;;  %v13556_v57 = vrot.slane %v3142_v50, %v13546_v10  ;;  %v13592_v15 = vrot.slane %v3149_v52, %v13546_v10  ;;  %v4093_v50 = vld [vmem:[%s16489_s8 + $0x20] sm:$0xff] }
 0x2e4   :  { %v13559_v58 = vrot.slane %v3150_v53, %v13546_v10 }
 0x2e5   :  { %10707 = vmatpush3.bf16.msra.mxu0 %v10704_v56  ;;  %v3151_v56 = vcombine.high %v3149_v52, %v3149_v52  ;;  %v5459_v52 = vld [vmem:[%s16490_s9] sm:$0xff] }
 0x2e6   :  { %10709 = vmatprep.subr.bf16.mxu0 %v10708_v59 }
 0x2e7   :  { %10733 = vmatpush3.bf16.xpose.msra.mxu1 %v13517_v1 }
 0x2e8   :  { %10734 = vmatprep.subr.bf16.mxu1 %v16514_v20 }
 0x2e9   :  { %10711 = vmatpush3.bf16.msra.mxu0 %v10708_v59  ;;  %v3102_v59 = vcombine.high %v3100_v54, %v3100_v54 }
 0x2ea   :  { %10713 = vmatprep.subr.bf16.mxu0 %v10712_v62 }
 0x2ed   :  { %10715 = vmatpush3.bf16.msra.mxu0 %v10712_v62 }
 0x2ee   :  { %10717 = vmatprep.subr.bf16.mxu0 %v10716_v11 }
 0x2ef   :  { %10736 = vmatpush3.bf16.xpose.msra.mxu1 %v13533_v31  ;;  %v4103_v31 = vld [vmem:[%s16489_s8 + $0x70] sm:$0xff] }
 0x2f0   :  { %10737 = vmatprep.subr.bf16.mxu1 %v16514_v20  ;;  %v3199_v20 = vcombine.high %v13569_v63, %v13569_v63 }
 0x2f1   :  { %10719 = vmatpush3.bf16.msra.mxu0 %v10716_v11  ;;  %v13577_v11 = vrot.slane %v13524_v6, %v13546_v10 }
 0x2f2   :  { %10721 = vmatprep.subr.bf16.mxu0 %v10720_v14 }
 0x2f5   :  { %10723 = vmatpush3.bf16.msra.mxu0 %v10720_v14  ;;  %v13589_v14 = vld [vmem:[%s16625_s27 + $0x38] sm:$0xff] }
 0x2f6   :  { %10725 = vmatprep.subr.bf16.mxu0 %v10724_v17 }
 0x2f9   :  { %10727 = vmatpush3.bf16.msra.mxu0 %v10724_v17  ;;  %v3109_v17 = vrot.slane %v3093_v51, %v13546_v10  ;;  %v4094_v51 = vld [vmem:[%s16489_s8 + $0x28] sm:$0xff] }
 0x3af   :  { %v10196_v32 = vpop.f32.mrb[4].mxu0  ;;  %v10218_v33 = vpop.f32.mrb[4].mxu1 }
 0x3b0   :  { %v10197_v35 = vpop.f32.mrb[5].mxu0  ;;  %v10219_v36 = vpop.f32.mrb[5].mxu1 }
 0x3b1   :  { %v10198_v37 = vadd.f32 %v10197_v35, %v10196_v32  ;;  %v10220_v2 = vadd.f32 %v10219_v36, %v10218_v33  ;;  %v10199_v7 = vpop.f32.mrb[6].mxu0  ;;  %v10221_v38 = vpop.f32.mrb[6].mxu1  ;;  %v13601_v32 = vrot.slane %v3151_v56, %v13546_v10  ;;  %v13613_v35 = vld [vmem:[%s16625_s27 + $0x48] sm:$0xff]  ;;  %v3116_v36 = vrot.slane %v3100_v54, %v13546_v10 }
 0x3b2   :  { %v10200_v39 = vpop.f32.mrb[7].mxu0  ;;  %v10222_v40 = vpop.f32.mrb[7].mxu1  ;;  %v13667_v49 = vrot.slane %v13613_v35, %v13546_v10  ;;  %v5460_v56 = vld [vmem:[%s16490_s9 + $0x8] sm:$0xff] }
 0x3b3   :  { %v3013_v41 = vadd.f32 %v10198_v37, %v10094_v34  ;;  %v10201_v42 = vadd.f32 %v10200_v39, %v10199_v7  ;;  %v10223_v43 = vadd.f32 %v10222_v40, %v10221_v38  ;;  %v3130_v37 = vrot.slane %v3102_v59, %v13546_v10  ;;  %v4089_v40 = vld [vmem:[%s16489_s8] sm:$0xff]  ;;  %v4095_v59 = vld [vmem:[%s16489_s8 + $0x30] sm:$0xff] }
 0x3b4   :  { %v13623_v38 = vrot.slane %v13584_v13, %v13546_v10  ;;  %v13627_v39 = vpack.c.bf16 %v13589_v14, %v13584_v13  ;;  %v5461_v7 = vld [vmem:[%s16490_s9 + $0x10] sm:$0xff]  ;;  %v13732_v62 = vpack.c.bf16 %v5460_v56, %v5459_v52 }
 0x3b5   :  { %v3054_v3 = vadd.f32 %v10220_v2, %v3013_v41  ;;  %v3016_v8 = vadd.f32 %v10201_v42, %v10094_v34  ;;  %v13608_v34 = vld [vmem:[%s16625_s27 + $0x40] sm:$0xff]  ;;  %v4090_v41 = vld [vmem:[%s16489_s8 + $0x8] sm:$0xff]  ;;  %v13638_v42 = vld [vmem:[%s16625_s27 + $0x50] sm:$0xff]  ;;  %v4107_v25 = vcombine.low %v3116_v36, %v3130_v37  ;;  %v10128_v22 = vcombine.high %v3116_v36, %v3130_v37 }
 0x3b6   :  { %16631 = vst [vmem:[#allocation41_spill] sm:$0xff] %v13627_v39  ;;  %v4097_v36 = vld [vmem:[%s16489_s8 + $0x40] sm:$0xff]  ;;  %v13715_v37 = vpack.c.bf16 %v13655_v46, %v13638_v42 }
 0x3b7   :  { %v13537_v44 = vmax.f32 %v3054_v3, 0.0  ;;  %v3057_v45 = vadd.f32 %v10223_v43, %v3016_v8  ;;  %v13644_v3 = vrot.slane %v13589_v14, %v13546_v10  ;;  %v13698_v8 = vrot.slane %v13638_v42, %v13546_v10 }
 0x3b8   :  { %v13702_v43 = vrot.slane %v13655_v46, %v13546_v10  ;;  %16635 = vst [vmem:[#allocation45_spill] sm:$0xff] %v13715_v37  ;;  %v4129_v2 = vrot.slane %v4107_v25, %v13546_v10  ;;  %v4136_v52 = vrot.slane %v10128_v22, %v13546_v10  ;;  %v13752_v27 = vpack.c.bf16 %v4098_v48, %v4097_v36  ;;  %v5466_v22 = vld [vmem:[%s16490_s9 + $0x38] sm:$0xff]  ;;  %v4101_v25 = vld [vmem:[%s16489_s8 + $0x60] sm:$0xff] }
 0x3b9   :  { %16629 = vst [vmem:[#allocation39_spill] sm:$0xff] %v13537_v44  ;;  %v13539_v4 = vmax.f32 %v3057_v45, 0.0  ;;  %10464 = vmatprep.mubr.f32.mxu0 %v13537_v44  ;;  %v13650_v45 = vrot.slane %v13608_v34, %v13546_v10  ;;  %16633 = vst [vmem:[#allocation43_spill] sm:$0xff] %v13698_v8 }
 0x3ba   :  { %16634 = vst [vmem:[#allocation44_spill] sm:$0xff] %v13702_v43 }
 0x3bb   :  { %16630 = vst [vmem:[#allocation40_spill] sm:$0xff] %v13539_v4  ;;  %10465 = vmatmul.mubr.f32.vlgmr.msra.gmra.mrb[8].mxu0 %v13539_v4  ;;  %v3248_v4 = vcombine.high %v13573_v0, %v13573_v0 }
 0x3bc   :  { %10499 = vmatprep.mubr.f32.mxu0 %v3062_v18  ;;  %v3123_v18 = vrot.slane %v3101_v55, %v13546_v10  ;;  %v13680_v55 = vpack.c.bf16 %v13613_v35, %v13608_v34 }
 0x3be   :  { %v4105_v53 = vcombine.low %v3109_v17, %v3123_v18  ;;  %v10127_v54 = vcombine.high %v3109_v17, %v3123_v18  ;;  %16632 = vst [vmem:[#allocation42_spill] sm:$0xff] %v13680_v55  ;;  %v3198_v17 = vrot.slane %v3184_v60, %v13546_v10  ;;  %v13692_v18 = vpack.c.bf16 %v4090_v41, %v4089_v40  ;;  %v5462_v60 = vld [vmem:[%s16490_s9 + $0x18] sm:$0xff] }
 0x3bf   :  { %v13717_v40 = vpack.c.bf16 %v4092_v5, %v4091_v47  ;;  %v13719_v41 = vpack.c.bf16 %v4094_v51, %v4093_v50  ;;  %v4156_v50 = vcombine.low %v13592_v15, %v13601_v32  ;;  %v4099_v51 = vld [vmem:[%s16489_s8 + $0x50] sm:$0xff]  ;;  %v13750_v33 = vpack.c.bf16 %v5462_v60, %v5461_v7 }
 0x3c0   :  { %v4115_v47 = vrot.slane %v4105_v53, %v13546_v10  ;;  %v4122_v5 = vrot.slane %v10127_v54, %v13546_v10  ;;  %v10130_v53 = vcombine.high %v13592_v15, %v13601_v32  ;;  %v3200_v56 = vcombine.high %v3198_v17, %v3198_v17 }
 0x3c1   :  { %v13748_v54 = vpack.c.bf16 %v4096_v28, %v4095_v59  ;;  %v4102_v28 = vld [vmem:[%s16489_s8 + $0x68] sm:$0xff]  ;;  %v16636_v15 = vcombine.low %v13556_v57, %v13559_v58  ;;  %v16637_v7 = vcombine.high %v13556_v57, %v13559_v58  ;;  %v3207_v59 = vrot.slane %v13569_v63, %v13546_v10 }
 0x3c2   :  { %v3221_v60 = vrot.slane %v3199_v20, %v13546_v10  ;;  %v13785_v36 = vpack.c.bf16 %v4100_v61, %v4099_v51  ;;  %v4137_v1 = vcombine.low %v4115_v47, %v4122_v5  ;;  %v4178_v21 = vrot.slane %v4156_v50, %v13546_v10  ;;  %v5469_v20 = vld [vmem:[%s16490_s9 + $0x50] sm:$0xff]  ;;  %v5470_v61 = vld [vmem:[%s16490_s9 + $0x58] sm:$0xff] }
 0x3c3   :  { %v4164_v32 = vrot.slane %v16636_v15, %v13546_v10  ;;  %v4171_v48 = vrot.slane %v16637_v7, %v13546_v10  ;;  %v4104_v15 = vld [vmem:[%s16489_s8 + $0x78] sm:$0xff]  ;;  %v16639_v57 = vcombine.high %v13513_v29, %v13513_v29  ;;  %v4138_v63 = vcombine.low %v4129_v2, %v4136_v52 }
 0x3c4   :  { %16638 = vst [vmem:[#allocation46_spill] sm:$0xff] %v13785_v36  ;;  %v4185_v51 = vrot.slane %v10130_v53, %v13546_v10  ;;  %v3214_v47 = vrot.slane %v3198_v17, %v13546_v10  ;;  %v3228_v5 = vrot.slane %v3200_v56, %v13546_v10  ;;  %v13807_v50 = vpack.c.bf16 %v5466_v22, %v5465_v23 }
 0x3c5   :  { %v3247_v58 = vrot.slane %v16639_v57, %v13546_v10  ;;  %v13809_v7 = vpack.c.bf16 %v4102_v28, %v4101_v25  ;;  %v13811_v57 = vpack.c.bf16 %v5468_v12, %v5467_v9  ;;  %v13815_v43 = vpack.c.bf16 %v4104_v15, %v4103_v31 }
 0x3c6   :  { %v4186_v36 = vcombine.low %v4164_v32, %v4171_v48  ;;  %v4203_v8 = vcombine.low %v3207_v59, %v3221_v60  ;;  %v16640_v2 = vcombine.high %v13524_v6, %v13524_v6  ;;  %v13823_v23 = vpack.c.bf16 %v5470_v61, %v5469_v20 }
 0x3c7   :  { %v13826_v53 = vrot.slane %v4137_v1, %v13546_v10  ;;  %v10131_v56 = vcombine.high %v3207_v59, %v3221_v60  ;;  %v3249_v22 = vcombine.high %v3247_v58, %v3247_v58  ;;  %v13829_v31 = vrot.slane %v4138_v63, %v13546_v10 }
 0x3c8   :  { %v3296_v17 = vrot.slane %v16640_v2, %v13546_v10  ;;  %v4187_v28 = vcombine.low %v4178_v21, %v4185_v51  ;;  %v4205_v9 = vcombine.low %v3214_v47, %v3228_v5  ;;  %v10132_v12 = vcombine.high %v3214_v47, %v3228_v5 }
 0x3c9   :  { %v3256_v32 = vrot.slane %v13573_v0, %v13546_v10  ;;  %v3270_v48 = vrot.slane %v3248_v4, %v13546_v10  ;;  %v3297_v1 = vcombine.high %v13577_v11, %v13577_v11  ;;  %v13838_v59 = vrot.slane %v4186_v36, %v13546_v10  ;;  %v5471_v4 = vld [vmem:[%s16490_s9 + $0x60] sm:$0xff]  ;;  %v5472_v0 = vld [vmem:[%s16490_s9 + $0x68] sm:$0xff] }
 0x3ca   :  { %v4213_v21 = vrot.slane %v4203_v8, %v13546_v10  ;;  %v3298_v60 = vcombine.high %v3296_v17, %v3296_v17  ;;  %v16641_v15 = vmov 0.0|0.0   ;;  %v4220_v20 = vrot.slane %v10131_v56, %v13546_v10 }
 0x3cb   :  { %v3263_v36 = vrot.slane %v3247_v58, %v13546_v10  ;;  %v3277_v61 = vrot.slane %v3249_v22, %v13546_v10  ;;  %v16642_v8 = vmov 0.0   ;;  %v13857_v51 = vrot.slane %v4187_v28, %v13546_v10 }
 0x3cc   :  { %v4227_v47 = vrot.slane %v4205_v9, %v13546_v10  ;;  %v4234_v5 = vrot.slane %v10132_v12, %v13546_v10  ;;  %v4252_v2 = vcombine.low %v3256_v32, %v3270_v48  ;;  %v10133_v56 = vcombine.high %v3256_v32, %v3270_v48 }
 0x3cd   :  { %v3305_v58 = vrot.slane %v13577_v11, %v13546_v10  ;;  %v3319_v22 = vrot.slane %v3297_v1, %v13546_v10  ;;  %v3312_v28 = vrot.slane %v3296_v17, %v13546_v10  ;;  %v3326_v9 = vrot.slane %v3298_v60, %v13546_v10 }
 0x3ce   :  { %v4254_v12 = vcombine.low %v3263_v36, %v3277_v61  ;;  %v10134_v32 = vcombine.high %v3263_v36, %v3277_v61  ;;  %v3346_v11 = vcombine.high %v13596_v16, %v13596_v16  ;;  %v4236_v48 = vcombine.low %v4227_v47, %v4234_v5 }
 0x3cf   :  { %v16643_v1 = vcombine.high %v13529_v30, %v13529_v30  ;;  %v3393_v17 = vrot.slane %v13623_v38, %v13546_v10  ;;  %v4269_v60 = vrot.slane %v10133_v56, %v13546_v10  ;;  %v10135_v61 = vcombine.high %v3305_v58, %v3319_v22 }
 0x3d0   :  { %v4303_v47 = vcombine.low %v3312_v28, %v3326_v9  ;;  %v10136_v5 = vcombine.high %v3312_v28, %v3326_v9  ;;  %v3367_v56 = vrot.slane %v3346_v11, %v13546_v10 }
 0x3d1   :  { %v3415_v63 = vcombine.high %v3393_v17, %v3393_v17 }
 0x3d2   :  { %v4332_v11 = vrot.slane %v10136_v5, %v13546_v10  ;;  %v16645_v5 = vcombine.high %v13589_v14, %v13589_v14 }
 0x48e   :  { %v13821_v52 = vpop.f32.mrb[8].mxu0 }
 0x48f   :  { %v3736_v25 = vpop.f32.mrb[9].mxu0 }
 0x490   :  { %10480 = vmatmul.mubr.f32.vlgmr.msra.gmra.mrb[8].mxu1 %v3736_v25  ;;  %10497 = vmatprep.subr.mxu0 %v3736_v25 }
 0x491   :  { %10739 = vmatpush3.bf16.xpose.msra.mxu1 %v13627_v39  ;;  %10498 = vmatpush3.xpose.msra.mxu0 %v3736_v25  ;;  %v13867_v25 = vpack.c.bf16 %v5472_v0, %v5471_v4  ;;  %v3385_v4 = vcombine.high %v13623_v38, %v13623_v38  ;;  %v4301_v0 = vcombine.low %v3305_v58, %v3319_v22 }
 0x492   :  { %10508 = vmatprep.subr.mxu0 %v13821_v52  ;;  %10740 = vmatprep.subr.bf16.mxu1 %v16641_v15  ;;  %v4283_v38 = vrot.slane %v10134_v32, %v13546_v10  ;;  %v4325_v32 = vrot.slane %v4303_v47, %v13546_v10 }
 0x493   :  { %10494 = vmatprep.mubr.msk.f32.mxu1 %vm12115_vm0, %v16642_v8 }
 0x494   :  { %10500 = vmatmul.mubr.f32.vlgmr.msra.gmra.mrb[10].mxu0 %v13497_v19  ;;  %v4235_v19 = vcombine.low %v4213_v21, %v4220_v20  ;;  %v4262_v21 = vrot.slane %v4252_v2, %v13546_v10  ;;  %v16644_v20 = vcombine.high %v13584_v13, %v13584_v13  ;;  %v3353_v2 = vrot.slane %v13596_v16, %v13546_v10 }
 0x495   :  { %10509 = vmatpush3.xpose.msra.mxu0 %v13821_v52  ;;  %10502 = vmatprep.mubr.f32.mxu0 %v13508_v26  ;;  %v3345_v26 = vrot.slane %v16643_v1, %v13546_v10  ;;  %v4311_v16 = vrot.slane %v4301_v0, %v13546_v10  ;;  %v4334_v47 = vcombine.low %v4325_v32, %v4332_v11 }
 0x496   :  { %10747 = vmatprep.subr.bf16.mxu0 %v13692_v18  ;;  %v3384_v36 = vrot.slane %v16644_v20, %v13546_v10  ;;  %v3407_v20 = vrot.slane %v3385_v4, %v13546_v10  ;;  %v13904_v22 = vrot.slane %v4235_v19, %v13546_v10  ;;  %v4284_v28 = vcombine.low %v4262_v21, %v4269_v60 }
 0x497   :  { %v3360_v1 = vrot.slane %v3345_v26, %v13546_v10  ;;  %v4350_v4 = vcombine.low %v3353_v2, %v3367_v56  ;;  %v10137_v58 = vcombine.high %v3353_v2, %v3367_v56 }
 0x498   :  { %10503 = vmatmul.mubr.f32.gmra.mrb[12].mxu0 %v13513_v29  ;;  %v4276_v29 = vrot.slane %v4254_v12, %v13546_v10  ;;  %v3386_v9 = vcombine.high %v3384_v36, %v3384_v36  ;;  %v4318_v12 = vrot.slane %v10135_v61, %v13546_v10  ;;  %v3417_v60 = vcombine.high %v3407_v20, %v3407_v20 }
 0x499   :  { %10742 = vmatpush3.bf16.xpose.msra.mxu1 %v13680_v55  ;;  %10505 = vmatprep.mubr.f32.mxu0 %v13524_v6  ;;  %v3400_v6 = vrot.slane %v3384_v36, %v13546_v10  ;;  %v4352_v19 = vcombine.low %v3360_v1, %v3393_v17  ;;  %v4353_v55 = vcombine.low %v3407_v20, %v3415_v63  ;;  %v5473_v63 = vld [vmem:[%s16490_s9 + $0x70] sm:$0xff]  ;;  %v5474_v17 = vld [vmem:[%s16490_s9 + $0x78] sm:$0xff] }
 0x49a   :  { %10743 = vmatprep.subr.bf16.mxu1 %v16641_v15  ;;  %v4285_v26 = vcombine.low %v4276_v29, %v4283_v38  ;;  %v3414_v0 = vrot.slane %v3386_v9, %v13546_v10  ;;  %v3434_v36 = vcombine.high %v13644_v3, %v13644_v3  ;;  %v4333_v61 = vcombine.low %v4311_v16, %v4318_v12 }
 0x49b   :  { %v3416_v21 = vcombine.high %v3400_v6, %v3400_v6  ;;  %v3433_v29 = vrot.slane %v16645_v5, %v13546_v10  ;;  %v4367_v38 = vrot.slane %v10137_v58, %v13546_v10  ;;  %v4374_v2 = vrot.slane %v4352_v19, %v13546_v10 }
 0x49c   :  { %10506 = vmatmul.mubr.f32.gmra.mrb[14].mxu0 %v13529_v30  ;;  %v13912_v30 = vrot.slane %v4236_v48, %v13546_v10  ;;  %v3442_v48 = vrot.slane %v13644_v3, %v13546_v10  ;;  %v13938_v3 = vrot.slane %v4285_v26, %v13546_v10  ;;  %v4381_v56 = vrot.slane %v4353_v55, %v13546_v10 }
 0x49d   :  { %10510 = vmatprep.mubr.f32.mxu0 %v13584_v13  ;;  %v13916_v13 = vrot.slane %v4284_v28, %v13546_v10  ;;  %v4399_v1 = vcombine.low %v3417_v60, %v3400_v6  ;;  %v13946_v20 = vpack.c.bf16 %v5474_v17, %v5473_v63  ;;  %v3418_v28 = vcombine.high %v3414_v0, %v3414_v0 }
 0x49e   :  { %v3456_v9 = vrot.slane %v3434_v36, %v13546_v10  ;;  %v3464_v16 = vcombine.high %v3442_v48, %v3442_v48  ;;  %v13952_v58 = vrot.slane %v4333_v61, %v13546_v10  ;;  %v13955_v12 = vrot.slane %v4334_v47, %v13546_v10 }
 0x49f   :  { %v3435_v55 = vcombine.high %v3433_v29, %v3433_v29  ;;  %v4251_v6 = vcombine.low %v13904_v22, %v13912_v30  ;;  %v4300_v32 = vcombine.low %v13916_v13, %v13938_v3  ;;  %v13963_v26 = vcombine.low %v4374_v2, %v4381_v56 }
 0x4a0   :  { %10511 = vmatmul.mubr.f32.vlgmr.msra.gmra.mrb[16].mxu0 %v13589_v14  ;;  %v4400_v14 = vcombine.low %v3414_v0, %v3416_v21  ;;  %v16646_v21 = vcombine.high %v13608_v34, %v13608_v34  ;;  %v4401_v0 = vcombine.low %v3418_v28, %v3442_v48  ;;  %v4402_v36 = vcombine.low %v3456_v9, %v3464_v16 }
 0x4a1   :  { %10745 = vmatpush3.bf16.xpose.msra.mxu1 %v13715_v37  ;;  %10749 = vmatpush3.bf16.msra.mxu0 %v13692_v18  ;;  %v4360_v18 = vrot.slane %v4350_v4, %v13546_v10  ;;  %v4409_v4 = vrot.slane %v4399_v1, %v13546_v10  ;;  %v3466_v63 = vcombine.high %v3456_v9, %v3456_v9 }
 0x4a2   :  { %10751 = vmatprep.subr.bf16.mxu0 %v13717_v40  ;;  %10779 = vmatprep.subr.bf16.mxu1 %v13732_v62  ;;  %v4416_v19 = vrot.slane %v4400_v14, %v13546_v10  ;;  %v3482_v60 = vrot.slane %v16646_v21, %v13546_v10  ;;  %v3463_v61 = vrot.slane %v3435_v55, %v13546_v10 }
 0x4a3   :  { %10513 = vmatprep.mubr.f32.mxu0 %v13608_v34  ;;  %v4382_v11 = vcombine.low %v4360_v18, %v4367_v38  ;;  %v3483_v34 = vcombine.high %v13650_v45, %v13650_v45  ;;  %v4397_v47 = vrot.slane %v13963_v26, %v13546_v10  ;;  %v4423_v18 = vrot.slane %v4401_v0, %v13546_v10 }
 0x4a4   :  { %10514 = vmatmul.mubr.f32.gmra.mrb[18].mxu0 %v13613_v35  ;;  %v13993_v5 = vcombine.low %v4409_v4, %v4416_v19  ;;  %v4430_v38 = vrot.slane %v4402_v36, %v13546_v10  ;;  %v16649_v1 = vcombine.high %v13638_v42, %v13638_v42  ;;  %v3532_v16 = vcombine.high %v13667_v49, %v13667_v49  ;;  %v16650_v4 = vld [vmem:[#allocation43_spill] sm:$0xff]  ;;  %v16651_v36 = vld [vmem:[#allocation46_spill] sm:$0xff] }
 0x4a5   :  { %10753 = vmatpush3.bf16.msra.mxu0 %v13717_v40  ;;  %10516 = vmatprep.mubr.f32.mxu0 %v13638_v42  ;;  %v3449_v40 = vrot.slane %v3433_v29, %v13546_v10  ;;  %v3484_v29 = vcombine.high %v3482_v60, %v3482_v60  ;;  %v3540_v42 = vrot.slane %v13667_v49, %v13546_v10 }
 0x4a6   :  { %10755 = vmatprep.subr.bf16.mxu0 %v13719_v41  ;;  %v3580_v14 = vrot.slane %v16649_v1, %v13546_v10  ;;  %v14022_v55 = vcombine.low %v4423_v18, %v4430_v38  ;;  %v3581_v19 = vcombine.high %v16650_v4, %v16650_v4 }
 0x4a7   :  { %v3465_v48 = vcombine.high %v3449_v40, %v3449_v40  ;;  %v13997_v2 = vcombine.low %v3466_v63, %v3449_v40 }
 0x4a8   :  { %10495 = vmatmul.mubr.f32.vlgmr.msra.gmra.mrb[10].mxu1 %v13821_v52  ;;  %10517 = vmatmul.mubr.f32.gmra.mrb[20].mxu0 %v13655_v46  ;;  %v13983_v52 = vrot.slane %v4382_v11, %v13546_v10  ;;  %v3582_v0 = vcombine.high %v3580_v14, %v3580_v14  ;;  %v3596_v18 = vrot.slane %v3580_v14, %v13546_v10 }
 0x4a9   :  { %10757 = vmatpush3.bf16.msra.mxu0 %v13719_v41  ;;  %10781 = vmatpush3.bf16.msra.mxu1 %v13732_v62  ;;  %v3491_v41 = vrot.slane %v13650_v45, %v13546_v10  ;;  %v16647_v62 = vcombine.low %v13826_v53, %v13829_v31  ;;  %v16648_v45 = vcombine.high %v13613_v35, %v13613_v35 }
 0x4aa   :  { %10601 = vmatprep.mubr.f32.mxu1 %v13537_v44  ;;  %10759 = vmatprep.subr.bf16.mxu0 %v13748_v54  ;;  %v3467_v53 = vcombine.high %v3463_v61, %v3463_v61  ;;  %v3505_v31 = vrot.slane %v3483_v34, %v13546_v10  ;;  %v14012_v9 = vcombine.low %v3463_v61, %v3465_v48 }
 0x4ab   :  { %10783 = vmatprep.subr.bf16.mxu1 %v13750_v33  ;;  %10551 = vmatprep.mubr.f32.mxu0 %v16647_v62  ;;  %v3531_v56 = vrot.slane %v16648_v45, %v13546_v10  ;;  %v3513_v28 = vcombine.high %v3491_v41, %v3491_v41  ;;  %v3498_v35 = vrot.slane %v3482_v60, %v13546_v10  ;;  %v16652_v45 = vld [vmem:[#allocation44_spill] sm:$0xff] }
 0x4ac   :  { %v4458_v11 = vrot.slane %v13997_v2, %v13546_v10  ;;  %v4450_v21 = vcombine.low %v3467_v53, %v3491_v41  ;;  %v3515_v60 = vcombine.high %v3505_v31, %v3505_v31  ;;  %v4465_v63 = vrot.slane %v14012_v9, %v13546_v10 }
 0x4ad   :  { %10761 = vmatpush3.bf16.msra.mxu0 %v13748_v54  ;;  %10785 = vmatpush3.bf16.msra.mxu1 %v13750_v33  ;;  %v4439_v33 = vrot.slane %v13993_v5, %v13546_v10  ;;  %v3512_v54 = vrot.slane %v3484_v29, %v13546_v10  ;;  %v3533_v40 = vcombine.high %v3531_v56, %v3531_v56 }
 0x4ae   :  { %10763 = vmatprep.subr.bf16.mxu0 %v13752_v27  ;;  %10787 = vmatprep.subr.bf16.mxu1 %v13754_v24  ;;  %v4451_v49 = vcombine.low %v3505_v31, %v3513_v28  ;;  %v3514_v61 = vcombine.high %v3498_v35, %v3498_v35  ;;  %v3554_v48 = vrot.slane %v3532_v16, %v13546_v10 }
 0x4af   :  { %v3516_v34 = vcombine.high %v3512_v54, %v3512_v54  ;;  %v3562_v62 = vcombine.high %v3540_v42, %v3540_v42  ;;  %v3589_v41 = vrot.slane %v16650_v4, %v13546_v10  ;;  %v3603_v29 = vrot.slane %v3581_v19, %v13546_v10 }
 0x4b0   :  { %v3610_v38 = vrot.slane %v3582_v0, %v13546_v10  ;;  %v3630_v53 = vcombine.high %v16652_v45, %v16652_v45  ;;  %v4472_v31 = vrot.slane %v4450_v21, %v13546_v10  ;;  %v4497_v1 = vcombine.low %v3515_v60, %v3498_v35 }
 0x4b1   :  { %10765 = vmatpush3.bf16.msra.mxu0 %v13752_v27  ;;  %10789 = vmatpush3.bf16.msra.mxu1 %v13754_v24  ;;  %v3547_v27 = vrot.slane %v3531_v56, %v13546_v10  ;;  %v3561_v24 = vrot.slane %v3533_v40, %v13546_v10  ;;  %v3637_v56 = vrot.slane %v16652_v45, %v13546_v10 }
 0x4b2   :  { %10767 = vmatprep.subr.bf16.mxu0 %v16651_v36  ;;  %10791 = vmatprep.subr.bf16.mxu1 %v13807_v50  ;;  %v4498_v14 = vcombine.low %v3512_v54, %v3514_v61  ;;  %v4499_v28 = vcombine.low %v3516_v34, %v3540_v42  ;;  %v4500_v9 = vcombine.low %v3554_v48, %v3562_v62 }
 0x4b3   :  { %v3563_v16 = vcombine.high %v3547_v27, %v3547_v27  ;;  %v3565_v40 = vcombine.high %v3561_v24, %v3561_v24  ;;  %v3611_v4 = vcombine.high %v3589_v41, %v3589_v41  ;;  %v3612_v19 = vcombine.high %v3596_v18, %v3596_v18 }
 0x4b4   :  { %v3613_v0 = vcombine.high %v3603_v29, %v3603_v29  ;;  %v3651_v45 = vrot.slane %v3630_v53, %v13546_v10  ;;  %v3652_v17 = vcombine.high %v3637_v56, %v3637_v56  ;;  %v4479_v35 = vrot.slane %v4451_v49, %v13546_v10 }
 0x4b5   :  { %10769 = vmatpush3.bf16.msra.mxu0 %v16651_v36  ;;  %10793 = vmatpush3.bf16.msra.mxu1 %v13807_v50  ;;  %v3564_v50 = vcombine.high %v3554_v48, %v3554_v48  ;;  %v3614_v36 = vcombine.high %v3610_v38, %v3610_v38  ;;  %v4507_v54 = vrot.slane %v4497_v1, %v13546_v10 }
 0x4b6   :  { %10771 = vmatprep.subr.bf16.mxu0 %v13809_v7  ;;  %10795 = vmatprep.subr.bf16.mxu1 %v13811_v57  ;;  %v4514_v42 = vrot.slane %v4498_v14, %v13546_v10  ;;  %v4521_v21 = vrot.slane %v4499_v28, %v13546_v10  ;;  %v4548_v61 = vcombine.low %v3565_v40, %v3589_v41 }
 0x4b7   :  { %v4546_v60 = vcombine.low %v3564_v50, %v3547_v27  ;;  %v4549_v34 = vcombine.low %v3603_v29, %v3611_v4  ;;  %v4595_v48 = vcombine.low %v3613_v0, %v3596_v18  ;;  %v3615_v62 = vcombine.high %v13655_v46, %v13655_v46 }
 0x4b8   :  { %v4596_v49 = vcombine.low %v3610_v38, %v3612_v19  ;;  %v4597_v53 = vcombine.low %v3614_v36, %v3637_v56  ;;  %v4598_v1 = vcombine.low %v3651_v45, %v3652_v17  ;;  %v4446_v14 = vrot.slane %v14022_v55, %v13546_v10 }
 0x4b9   :  { %10773 = vmatpush3.bf16.msra.mxu0 %v13809_v7  ;;  %10797 = vmatpush3.bf16.msra.mxu1 %v13811_v57  ;;  %v4528_v7 = vrot.slane %v4500_v9, %v13546_v10  ;;  %v4547_v57 = vcombine.low %v3561_v24, %v3563_v16  ;;  %v4480_v27 = vcombine.low %v4458_v11, %v4465_v63  ;;  %v16655_v9 = vld [vmem:[#allocation40_spill] sm:$0xff] }
 0x4ba   :  { %10775 = vmatprep.subr.bf16.mxu0 %v13815_v43  ;;  %10799 = vmatprep.subr.bf16.mxu1 %v13823_v23  ;;  %v4481_v24 = vcombine.low %v4472_v31, %v4479_v35  ;;  %v4529_v46 = vcombine.low %v4507_v54, %v4514_v42  ;;  %v16653_v17 = vcombine.low %v13838_v59, %v13857_v51 }
 0x4bb   :  { %v4530_v41 = vcombine.low %v4521_v21, %v4528_v7  ;;  %v4570_v29 = vrot.slane %v4548_v61, %v13546_v10  ;;  %v4577_v55 = vrot.slane %v4549_v34, %v13546_v10  ;;  %v4605_v2 = vrot.slane %v4595_v48, %v13546_v10 }
 0x4bc   :  { %v3629_v11 = vrot.slane %v3615_v62, %v13546_v10  ;;  %v4612_v63 = vrot.slane %v4596_v49, %v13546_v10  ;;  %v4619_v18 = vrot.slane %v4597_v53, %v13546_v10  ;;  %v4626_v59 = vrot.slane %v4598_v1, %v13546_v10 }
 0x4bd   :  { %10777 = vmatpush3.bf16.msra.mxu0 %v13815_v43  ;;  %10801 = vmatpush3.bf16.msra.mxu1 %v13823_v23  ;;  %v4556_v43 = vrot.slane %v4546_v60, %v13546_v10  ;;  %v4563_v23 = vrot.slane %v4547_v57, %v13546_v10  ;;  %v4398_v51 = vcombine.low %v13983_v52, %v4397_v47 }
 0x4be   :  { %10803 = vmatprep.subr.bf16.mxu1 %v13867_v25  ;;  %10810 = vmatprep.subr.bf16.mxu0 %v16641_v15  ;;  %v4488_v22 = vrot.slane %v4480_v27, %v13546_v10  ;;  %v4495_v30 = vrot.slane %v4481_v24, %v13546_v10  ;;  %v4579_v56 = vcombine.low %v4570_v29, %v4577_v55 }
 0x4bf   :  { %v4578_v38 = vcombine.low %v4556_v43, %v4563_v23  ;;  %v3644_v26 = vrot.slane %v3629_v11, %v13546_v10  ;;  %v3653_v31 = vcombine.high %v3651_v45, %v3651_v45  ;;  %v16654_v52 = vcombine.low %v13952_v58, %v13955_v12 }
 0x4c0   :  { %10552 = vmatmul.mubr.f32.vlgmr.msra.gmra.mrb[22].mxu0 %v16653_v17  ;;  %v4544_v47 = vrot.slane %v4530_v41, %v13546_v10  ;;  %v4627_v5 = vcombine.low %v4605_v2, %v4612_v63  ;;  %v4496_v28 = vcombine.low %v4488_v22, %v4495_v30  ;;  %v4593_v3 = vrot.slane %v4579_v56, %v13546_v10 }
 0x4c1   :  { %10805 = vmatpush3.bf16.msra.mxu1 %v13867_v25  ;;  %10554 = vmatprep.mubr.f32.mxu0 %v4251_v6  ;;  %v4447_v25 = vcombine.low %v4439_v33, %v4446_v14  ;;  %v4537_v6 = vrot.slane %v4529_v46, %v13546_v10  ;;  %v4628_v33 = vcombine.low %v4619_v18, %v4626_v59 }
 0x4c2   :  { %10807 = vmatprep.subr.bf16.mxu1 %v13946_v20  ;;  %v4586_v13 = vrot.slane %v4578_v38, %v13546_v10 }
 0x4c3   :  { %v4545_v16 = vcombine.low %v4537_v6, %v4544_v47  ;;  %v4642_v58 = vrot.slane %v4628_v33, %v13546_v10 }
 0x4c4   :  { %10555 = vmatmul.mubr.f32.gmra.mrb[24].mxu0 %v4300_v32  ;;  %v4644_v32 = vcombine.low %v3653_v31, %v3644_v26  ;;  %v4594_v12 = vcombine.low %v4586_v13, %v4593_v3 }
 0x4c5   :  { %10809 = vmatpush3.bf16.msra.mxu1 %v13946_v20  ;;  %10557 = vmatprep.mubr.f32.mxu0 %v16654_v52  ;;  %v4635_v20 = vrot.slane %v4627_v5, %v13546_v10 }
 0x4c6   :  { %v4651_v50 = vrot.slane %v4644_v32, %v13546_v10 }
 0x4c7   :  { %v4643_v40 = vcombine.low %v4635_v20, %v4642_v58 }
 0x4c8   :  { %10558 = vmatmul.mubr.f32.gmra.mrb[26].mxu0 %v4398_v51  ;;  %10602 = vmatmul.mubr.f32.vlgmr.msra.gmra.mrb[12].mxu1 %v16655_v9  ;;  %v4658_v4 = vrot.slane %v4651_v50, %v13546_v10 }
 0x4c9   :  { %10560 = vmatprep.mubr.f32.mxu0 %v4447_v25 }
 0x4cc   :  { %10561 = vmatmul.mubr.f32.gmra.mrb[28].mxu0 %v4496_v28 }
 0x4cd   :  { %10563 = vmatprep.mubr.f32.mxu0 %v4545_v16 }
 0x4d0   :  { %10564 = vmatmul.mubr.f32.gmra.mrb[30].mxu0 %v4594_v12 }
 0x4d1   :  { %10566 = vmatprep.mubr.f32.mxu0 %v4643_v40 }
 0x4d4   :  { %10567 = vmatmul.mubr.f32.gmra.mrb[32].mxu0 %v4658_v4 }
 0x4d5   :  { %10638 = vmatprep.mubr.msk.f32.mxu0 %vm12115_vm0, %v16642_v8 }
 0x563   :  { %v3811_v19 = vpop.f32.mrb[8].mxu1 }
 0x564   :  { %v10481_v0 = vpop.f32.mrb[9].mxu1 }
 0x567   :  { %v10501_v36 = vpop.f32.mrb[10].mxu0 }
 0x568   :  { %v3953_v45 = vpop.f32.mrb[11].mxu0 }
 0x569   :  { %11630 = vtanh.f32 %v3953_v45 }
 0x56a   :  { %11632 = vtanh.f32 %v3811_v19 }
 0x56b   :  { %v10504_v35 = vpop.f32.mrb[12].mxu0  ;;  %11634 = vtanh.f32 %v10501_v36 }
 0x56c   :  { %v3963_v54 = vpop.f32.mrb[13].mxu0  ;;  %11636 = vtanh.f32 %v10504_v35 }
 0x56d   :  { %11638 = vtanh.f32 %v3963_v54 }
 0x56f   :  { %v10507_v42 = vpop.f32.mrb[14].mxu0 }
 0x570   :  { %v3973_v21 = vpop.f32.mrb[15].mxu0  ;;  %11640 = vtanh.f32 %v10507_v42 }
 0x571   :  { %11642 = vtanh.f32 %v3973_v21 }
 0x573   :  { %v11631_v7 = vpop.eup %11630  ;;  %v10512_v60 = vpop.f32.mrb[16].mxu0 }
 0x574   :  { %v4048_v57 = vpop.f32.mrb[17].mxu0  ;;  %10606 = vmatprep.mubr.msk.f32.mxu1 %vm5550_vm1, %v11631_v7  ;;  %11644 = vtanh.f32 %v10512_v60  ;;  %v14126_v29 = vpop.eup %11632 }
 0x575   :  { %11646 = vtanh.f32 %v4048_v57  ;;  %v11635_v63 = vpop.eup %11634 }
 0x576   :  { %v14135_v30 = vpop.eup %11636 }
 0x577   :  { %v10515_v61 = vpop.f32.mrb[18].mxu0  ;;  %v11639_v31 = vpop.eup %11638 }
 0x578   :  { %v4058_v34 = vpop.f32.mrb[19].mxu0  ;;  %11648 = vtanh.f32 %v10515_v61 }
 0x579   :  { %11650 = vtanh.f32 %v4058_v34 }
 0x57a   :  { %v14152_v28 = vpop.eup %11640 }
 0x57b   :  { %v14118_v48 = vpop.f32.mrb[10].mxu1  ;;  %v10518_v62 = vpop.f32.mrb[20].mxu0 }
 0x57c   :  { %v10496_v49 = vpop.f32.mrb[11].mxu1  ;;  %v4068_v53 = vpop.f32.mrb[21].mxu0  ;;  %11652 = vtanh.f32 %v10518_v62 }
 0x57d   :  { %11654 = vtanh.f32 %v4068_v53  ;;  %v11643_v16 = vpop.eup %11642 }
 0x57e   :  { %v14168_v19 = vpop.eup %11644  ;;  %11656 = vtanh.f32 %v14118_v48  ;;  %v16733_v48 = vld [vmem:[#allocation37_spill] sm:$0xff] }
 0x57f   :  { %v14181_v54 = vpop.eup %11646 }
 0x582   :  { %v14193_v57 = vpop.eup %11648 }
 0x593   :  { %v10553_v1 = vpop.f32.mrb[22].mxu0 }
 0x594   :  { %v4857_v14 = vcombine.high %v10553_v1, %v10553_v1  ;;  %v4864_v27 = vrot.slane %v10553_v1, %v13546_v10  ;;  %v4737_v24 = vpop.f32.mrb[23].mxu0  ;;  %v14200_v1 = vpop.eup %11650 }
 0x595   :  { %v4808_v46 = vcombine.high %v4737_v24, %v4737_v24  ;;  %v4815_v41 = vrot.slane %v4737_v24, %v13546_v10 }
 0x596   :  { %v4871_v43 = vrot.slane %v4857_v14, %v13546_v10  ;;  %v4872_v23 = vcombine.high %v4864_v27, %v4864_v27  ;;  %v14124_v17 = vrot.slane %v4864_v27, %v13546_v10 }
 0x597   :  { %v4822_v55 = vrot.slane %v4808_v46, %v13546_v10  ;;  %v4823_v2 = vcombine.high %v4815_v41, %v4815_v41  ;;  %v10556_v11 = vpop.f32.mrb[24].mxu0  ;;  %v14133_v51 = vrot.slane %v4815_v41, %v13546_v10 }
 0x598   :  { %16656 = vst [vmem:[#allocation43_spill] sm:$0xff] %v14124_v17  ;;  %v4873_v18 = vcombine.high %v4871_v43, %v4871_v43  ;;  %v14130_v59 = vrot.slane %v4872_v23, %v13546_v10  ;;  %v4955_v25 = vcombine.high %v10556_v11, %v10556_v11  ;;  %v4747_v22 = vpop.f32.mrb[25].mxu0  ;;  %v14138_v6 = vrot.slane %v4871_v43, %v13546_v10  ;;  %v14215_v43 = vpop.eup %11652 }
 0x599   :  { %16658 = vst [vmem:[#allocation44_spill] sm:$0xff] %v14133_v51  ;;  %v4824_v38 = vcombine.high %v4822_v55, %v4822_v55  ;;  %v14141_v56 = vrot.slane %v4823_v2, %v13546_v10  ;;  %v4962_v26 = vrot.slane %v10556_v11, %v13546_v10  ;;  %v14157_v20 = vrot.slane %v4822_v55, %v13546_v10 }
 0x59a   :  { %16657 = vst [vmem:[#allocation46_spill] sm:$0xff] %v14130_v59  ;;  %v14145_v52 = vrot.slane %v4873_v18, %v13546_v10  ;;  %v6676_v47 = vcombine.low %v14124_v17, %v14130_v59  ;;  %v10152_v5 = vcombine.high %v14124_v17, %v14130_v59  ;;  %v4969_v33 = vrot.slane %v4955_v25, %v13546_v10 }
 0x59b   :  { %16659 = vst [vmem:[#allocation47_spill] sm:$0xff] %v14141_v56  ;;  %v4970_v13 = vcombine.high %v4962_v26, %v4962_v26  ;;  %v10559_v3 = vpop.f32.mrb[26].mxu0  ;;  %v14154_v32 = vpop.f32.mrb[12].mxu1  ;;  %16661 = vst [vmem:[#allocation49_spill] sm:$0xff] %v14157_v20  ;;  %v14160_v58 = vrot.slane %v4824_v38, %v13546_v10  ;;  %v6627_v12 = vcombine.low %v14133_v51, %v14141_v56 }
 0x59c   :  { %16660 = vst [vmem:[#allocation48_spill] sm:$0xff] %v14154_v32  ;;  %v10150_v50 = vcombine.high %v14133_v51, %v14141_v56  ;;  %v4757_v40 = vpop.f32.mrb[27].mxu0  ;;  %v14166_v4 = vpop.f32.mrb[13].mxu1  ;;  %v14175_v45 = vrot.slane %v6676_v47, %v13546_v10  ;;  %v14178_v35 = vrot.slane %v10152_v5, %v13546_v10  ;;  %v4971_v42 = vcombine.high %v4969_v33, %v4969_v33 }
 0x59d   :  { %16662 = vst [vmem:[#allocation50_spill] sm:$0xff] %v14160_v58  ;;  %16663 = vst [vmem:[#allocation51_spill] sm:$0xff] %v14166_v4  ;;  %10604 = vmatprep.subr.mxu1 %v14166_v4  ;;  %v14184_v21 = vrot.slane %v4962_v26, %v13546_v10  ;;  %v14187_v7 = vrot.slane %v4969_v33, %v13546_v10  ;;  %v14190_v60 = vrot.slane %v4970_v13, %v13546_v10 }
 0x59e   :  { %10605 = vmatpush3.msra.mxu1 %v14166_v4  ;;  %v4906_v61 = vcombine.high %v4747_v22, %v4747_v22  ;;  %v4913_v34 = vrot.slane %v4747_v22, %v13546_v10  ;;  %v5053_v62 = vcombine.high %v10559_v3, %v10559_v3  ;;  %v5060_v49 = vrot.slane %v10559_v3, %v13546_v10 }
 0x59f   :  { %16664 = vst [vmem:[#allocation52_spill] sm:$0xff] %v14184_v21  ;;  %16665 = vst [vmem:[#allocation53_spill] sm:$0xff] %v14190_v60  ;;  %v14197_v53 = vpop.f32.mrb[28].mxu0  ;;  %10607 = vmatmul.mubr.msk.f32.vlgmr.msra.gmra.mrb[14].mxu1 %vm5550_vm1, %v11635_v63  ;;  %v14207_v24 = vrot.slane %v6627_v12, %v13546_v10  ;;  %v14210_v46 = vrot.slane %v4971_v42, %v13546_v10  ;;  %10615 = vmatprep.subr.mxu1 %v14154_v32  ;;  %v11655_v42 = vpop.eup %11654 }
 0x5a0   :  { %v14213_v41 = vpop.f32.mrb[29].mxu0  ;;  %v14218_v23 = vrot.slane %v10150_v50, %v13546_v10  ;;  %v4920_v55 = vrot.slane %v4906_v61, %v13546_v10  ;;  %v4921_v2 = vcombine.high %v4913_v34, %v4913_v34  ;;  %v5067_v11 = vrot.slane %v5053_v62, %v13546_v10  ;;  %10616 = vmatpush3.msra.mxu1 %v14154_v32 }
 0x5a1   :  { %v6774_v63 = vcombine.low %v14184_v21, %v14190_v60  ;;  %v10156_v18 = vcombine.high %v14184_v21, %v14190_v60  ;;  %v14228_v25 = vrot.slane %v4913_v34, %v13546_v10  ;;  %v5004_v22 = vcombine.high %v4757_v40, %v4757_v40  ;;  %10609 = vmatprep.mubr.msk.f32.mxu1 %vm5550_vm1, %v11639_v31 }
 0x5a2   :  { %v4922_v26 = vcombine.high %v4920_v55, %v4920_v55  ;;  %v14234_v47 = vrot.slane %v4921_v2, %v13546_v10  ;;  %v5068_v5 = vcombine.high %v5060_v49, %v5060_v49  ;;  %v14241_v13 = vrot.slane %v4920_v55, %v13546_v10  ;;  %10820 = vmatprep.subr.bf16.mxu1 %v16641_v15 }
 0x5a3   :  { %16666 = vst [vmem:[#allocation54_spill] sm:$0xff] %v14228_v25  ;;  %v14236_v33 = vpop.f32.mrb[30].mxu0  ;;  %10610 = vmatmul.mubr.msk.f32.gmra.mrb[16].mxu1 %vm5550_vm1, %v14135_v30  ;;  %v5069_v3 = vcombine.high %v5067_v11, %v5067_v11  ;;  %v14244_v12 = vrot.slane %v5060_v49, %v13546_v10  ;;  %v14247_v31 = vrot.slane %v5067_v11, %v13546_v10 }
 0x5a4   :  { %16667 = vst [vmem:[#allocation55_spill] sm:$0xff] %v14234_v47  ;;  %v14249_v50 = vpop.f32.mrb[31].mxu0  ;;  %10612 = vmatprep.mubr.msk.f32.mxu1 %vm5550_vm1, %v11643_v16  ;;  %v14255_v30 = vrot.slane %v4922_v26, %v13546_v10  ;;  %v14258_v34 = vrot.slane %v5068_v5, %v13546_v10  ;;  %v5011_v62 = vrot.slane %v4757_v40, %v13546_v10 }
 0x5a5   :  { %16668 = vst [vmem:[#allocation56_spill] sm:$0xff] %v14244_v12  ;;  %16669 = vst [vmem:[#allocation57_spill] sm:$0xff] %v14247_v31  ;;  %v14263_v49 = vrot.slane %v6774_v63, %v13546_v10  ;;  %v6725_v16 = vcombine.low %v14228_v25, %v14234_v47  ;;  %v10154_v55 = vcombine.high %v14228_v25, %v14234_v47 }
 0x5a6   :  { %16670 = vst [vmem:[#allocation58_spill] sm:$0xff] %v14258_v34  ;;  %v5018_v2 = vrot.slane %v5004_v22, %v13546_v10  ;;  %v14271_v11 = vrot.slane %v10156_v18, %v13546_v10  ;;  %v14274_v26 = vrot.slane %v5069_v3, %v13546_v10  ;;  %v14278_v40 = vcombine.high %v14247_v31, %v14247_v31 }
 0x5a7   :  { %v6894_v63 = vrot.slane %v14247_v31, %v13546_v10  ;;  %v14282_v5 = vpop.f32.mrb[32].mxu0  ;;  %10613 = vmatmul.mubr.msk.f32.gmra.mrb[18].mxu1 %vm5550_vm1, %v14152_v28  ;;  %v6872_v3 = vcombine.low %v14244_v12, %v14258_v34  ;;  %v10160_v61 = vcombine.high %v14244_v12, %v14258_v34  ;;  %v5019_v36 = vcombine.high %v5011_v62, %v5011_v62 }
 0x5a8   :  { %16671 = vst [vmem:[#allocation59_spill] sm:$0xff] %v14274_v26  ;;  %16672 = vst [vmem:[#allocation60_spill] sm:$0xff] %v14278_v40  ;;  %v14294_v38 = vpop.f32.mrb[33].mxu0  ;;  %10617 = vmatprep.mubr.msk.f32.mxu1 %vm5550_vm1, %v14181_v54  ;;  %v5020_v0 = vcombine.high %v5018_v2, %v5018_v2  ;;  %v14299_v28 = vrot.slane %v5011_v62, %v13546_v10  ;;  %v14302_v22 = vrot.slane %v5018_v2, %v13546_v10 }
 0x5a9   :  { %v14305_v18 = vrot.slane %v6725_v16, %v13546_v10  ;;  %v14308_v27 = vrot.slane %v10154_v55, %v13546_v10  ;;  %v5151_v14 = vcombine.high %v14197_v53, %v14197_v53  ;;  %v5158_v54 = vrot.slane %v14197_v53, %v13546_v10 }
 0x5aa   :  { %16673 = vst [vmem:[#allocation61_spill] sm:$0xff] %v14299_v28  ;;  %16674 = vst [vmem:[#allocation62_spill] sm:$0xff] %v14302_v22  ;;  %v14315_v9 = vrot.slane %v6872_v3, %v13546_v10  ;;  %v14318_v62 = vrot.slane %v10160_v61, %v13546_v10  ;;  %v14321_v2 = vrot.slane %v5019_v36, %v13546_v10 }
 0x5ab   :  { %v14324_v16 = vrot.slane %v5020_v0, %v13546_v10  ;;  %10618 = vmatmul.mubr.msk.f32.vlgmr.msra.gmra.mrb[20].mxu1 %vm5550_vm1, %v14168_v19  ;;  %v5165_v55 = vrot.slane %v5151_v14, %v13546_v10  ;;  %v5166_v44 = vcombine.high %v5158_v54, %v5158_v54  ;;  %v14330_v53 = vrot.slane %v5158_v54, %v13546_v10 }
 0x5ac   :  { %16675 = vst [vmem:[#allocation63_spill] sm:$0xff] %v14321_v2  ;;  %v5102_v3 = vcombine.high %v14213_v41, %v14213_v41  ;;  %10620 = vmatprep.mubr.msk.f32.mxu1 %vm5550_vm1, %v14200_v1  ;;  %v6823_v36 = vcombine.low %v14299_v28, %v14321_v2  ;;  %v10158_v0 = vcombine.high %v14299_v28, %v14321_v2 }
 0x5ad   :  { %16676 = vst [vmem:[#allocation64_spill] sm:$0xff] %v14324_v16  ;;  %v6825_v19 = vcombine.low %v14302_v22, %v14324_v16  ;;  %v10159_v14 = vcombine.high %v14302_v22, %v14324_v16  ;;  %v14345_v61 = vrot.slane %v6894_v63, %v13546_v10  ;;  %v5167_v54 = vcombine.high %v5165_v55, %v5165_v55 }
 0x5ae   :  { %v14348_v32 = vrot.slane %v5166_v44, %v13546_v10  ;;  %v14352_v1 = vcombine.high %v14330_v53, %v14330_v53  ;;  %v14355_v4 = vrot.slane %v6823_v36, %v13546_v10  ;;  %v14358_v31 = vrot.slane %v10158_v0, %v13546_v10 }
 0x5af   :  { %v14361_v2 = vrot.slane %v6825_v19, %v13546_v10  ;;  %v14364_v63 = vrot.slane %v10159_v14, %v13546_v10  ;;  %10621 = vmatmul.mubr.msk.f32.gmra.mrb[22].mxu1 %vm5550_vm1, %v14193_v57  ;;  %v6993_v44 = vcombine.low %v14274_v26, %v14278_v40  ;;  %v14371_v16 = vrot.slane %v5165_v55, %v13546_v10 }
 0x5b0   :  { %16677 = vst [vmem:[#allocation65_spill] sm:$0xff] %v14348_v32  ;;  %16678 = vst [vmem:[#allocation66_spill] sm:$0xff] %v14352_v1  ;;  %v14375_v36 = vcombine.high %v14348_v32, %v14348_v32  ;;  %v14379_v0 = vcombine.high %v14274_v26, %v14274_v26  ;;  %10623 = vmatprep.mubr.msk.f32.mxu1 %vm5550_vm1, %v11655_v42  ;;  %v14385_v57 = vrot.slane %v5167_v54, %v13546_v10 }
 0x5b1   :  { %16679 = vst [vmem:[#allocation67_spill] sm:$0xff] %v14371_v16  ;;  %v5109_v55 = vrot.slane %v14213_v41, %v13546_v10  ;;  %v5116_v14 = vrot.slane %v5102_v3, %v13546_v10  ;;  %v14396_v42 = vcombine.high %v14371_v16, %v14371_v16  ;;  %v7044_v19 = vcombine.low %v14348_v32, %v14352_v1 }
 0x5b2   :  { %16680 = vst [vmem:[#allocation68_spill] sm:$0xff] %v14375_v36  ;;  %16681 = vst [vmem:[#allocation69_spill] sm:$0xff] %v14379_v0  ;;  %v7045_v3 = vcombine.low %v14375_v36, %v14371_v16  ;;  %v14411_v26 = vrot.slane %v6993_v44, %v13546_v10  ;;  %v5249_v40 = vcombine.high %v14236_v33, %v14236_v33 }
 0x5b3   :  { %16682 = vst [vmem:[#allocation70_spill] sm:$0xff] %v14385_v57  ;;  %16683 = vst [vmem:[#allocation71_spill] sm:$0xff] %v14396_v42  ;;  %v5117_v54 = vcombine.high %v5109_v55, %v5109_v55  ;;  %v5118_v22 = vcombine.high %v5116_v14, %v5116_v14  ;;  %v14401_v28 = vrot.slane %v5109_v55, %v13546_v10  ;;  %10624 = vmatmul.mubr.msk.f32.gmra.mrb[24].mxu1 %vm5550_vm1, %v14215_v43 }
 0x5b4   :  { %v14404_v41 = vrot.slane %v5116_v14, %v13546_v10  ;;  %v5256_v1 = vrot.slane %v14236_v33, %v13546_v10  ;;  %10653 = vmatprep.mubr.msk.f32.mxu1 %vm12115_vm0, %v16642_v8  ;;  %v5263_v16 = vrot.slane %v5249_v40, %v13546_v10  ;;  %v14461_v47 = vrot.slane %v7044_v19, %v13546_v10 }
 0x5b5   :  { %16684 = vst [vmem:[#allocation72_spill] sm:$0xff] %v14401_v28  ;;  %v14420_v55 = vrot.slane %v5117_v54, %v13546_v10  ;;  %v14423_v43 = vrot.slane %v5118_v22, %v13546_v10  ;;  %v14427_v14 = vcombine.high %v14401_v28, %v14401_v28  ;;  %v6994_v33 = vcombine.low %v14379_v0, %v14401_v28 }
 0x5b6   :  { %16685 = vst [vmem:[#allocation73_spill] sm:$0xff] %v14404_v41  ;;  %v14431_v44 = vcombine.high %v14404_v41, %v14404_v41  ;;  %v5264_v36 = vcombine.high %v5256_v1, %v5256_v1  ;;  %v14437_v54 = vrot.slane %v5256_v1, %v13546_v10  ;;  %v5265_v0 = vcombine.high %v5263_v16, %v5263_v16 }
 0x5b7   :  { %16686 = vst [vmem:[#allocation74_spill] sm:$0xff] %v14420_v55  ;;  %16687 = vst [vmem:[#allocation75_spill] sm:$0xff] %v14423_v43  ;;  %v14441_v22 = vcombine.high %v14420_v55, %v14420_v55  ;;  %v14445_v32 = vcombine.high %v14423_v43, %v14423_v43  ;;  %v6995_v34 = vcombine.low %v14420_v55, %v14427_v14 }
 0x5b8   :  { %16688 = vst [vmem:[#allocation76_spill] sm:$0xff] %v14427_v14  ;;  %16689 = vst [vmem:[#allocation77_spill] sm:$0xff] %v14431_v44  ;;  %v7042_v28 = vcombine.low %v14423_v43, %v14431_v44  ;;  %v14452_v40 = vrot.slane %v6994_v33, %v13546_v10  ;;  %v14455_v1 = vrot.slane %v5263_v16, %v13546_v10 }
 0x5b9   :  { %16690 = vst [vmem:[#allocation78_spill] sm:$0xff] %v14441_v22  ;;  %v14458_v12 = vrot.slane %v5264_v36, %v13546_v10  ;;  %v14464_v25 = vrot.slane %v7045_v3, %v13546_v10  ;;  %v7091_v14 = vcombine.low %v14385_v57, %v14396_v42  ;;  %v6996_v33 = vcombine.low %v14441_v22, %v14404_v41 }
 0x5ba   :  { %16691 = vst [vmem:[#allocation79_spill] sm:$0xff] %v14455_v1  ;;  %v14471_v55 = vrot.slane %v6995_v34, %v13546_v10  ;;  %v14475_v16 = vcombine.high %v14437_v54, %v14437_v54  ;;  %v14479_v36 = vcombine.high %v14455_v1, %v14455_v1  ;;  %v14483_v19 = vcombine.high %v14385_v57, %v14385_v57 }
 0x5bb   :  { %16692 = vst [vmem:[#allocation80_spill] sm:$0xff] %v14458_v12  ;;  %v14489_v42 = vcombine.high %v14458_v12, %v14458_v12  ;;  %v5200_v34 = vcombine.high %v14249_v50, %v14249_v50  ;;  %v5207_v41 = vrot.slane %v14249_v50, %v13546_v10  ;;  %v14498_v44 = vrot.slane %v7042_v28, %v13546_v10 }
 0x5bc   :  { %16693 = vst [vmem:[#allocation81_spill] sm:$0xff] %v14475_v16  ;;  %16694 = vst [vmem:[#allocation82_spill] sm:$0xff] %v14479_v36  ;;  %v14501_v57 = vrot.slane %v5265_v0, %v13546_v10  ;;  %v5353_v3 = vrot.slane %v14282_v5, %v13546_v10  ;;  %v14506_v43 = vrot.slane %v6996_v33, %v13546_v10 }
 0x5bd   :  { %16695 = vst [vmem:[#allocation83_spill] sm:$0xff] %v14483_v19  ;;  %16696 = vst [vmem:[#allocation84_spill] sm:$0xff] %v14489_v42  ;;  %v5214_v60 = vrot.slane %v5200_v34, %v13546_v10  ;;  %v5215_v21 = vcombine.high %v5207_v41, %v5207_v41  ;;  %v14510_v50 = vrot.slane %v5207_v41, %v13546_v10 }
 0x5be   :  { %16697 = vst [vmem:[#allocation85_spill] sm:$0xff] %v14501_v57  ;;  %v7142_v22 = vcombine.low %v14458_v12, %v14475_v16  ;;  %v7189_v28 = vcombine.low %v14501_v57, %v14479_v36  ;;  %v14517_v0 = vrot.slane %v7091_v14, %v13546_v10  ;;  %v5354_v56 = vcombine.high %v5353_v3, %v5353_v3 }
 0x5bf   :  { %16698 = vst [vmem:[#allocation86_spill] sm:$0xff] %v14510_v50  ;;  %v7143_v5 = vcombine.low %v14489_v42, %v14455_v1  ;;  %v5216_v33 = vcombine.high %v5214_v60, %v5214_v60  ;;  %v14522_v34 = vrot.slane %v5214_v60, %v13546_v10  ;;  %v14525_v41 = vrot.slane %v5215_v21, %v13546_v10 }
 0x5c0   :  { %v14529_v16 = vcombine.high %v14510_v50, %v14510_v50  ;;  %v7092_v36 = vcombine.low %v14483_v19, %v14510_v50  ;;  %v14534_v14 = vrot.slane %v5354_v56, %v13546_v10  ;;  %v5298_v1 = vcombine.high %v14294_v38, %v14294_v38 }
 0x5c1   :  { %16699 = vst [vmem:[#allocation87_spill] sm:$0xff] %v14522_v34  ;;  %16700 = vst [vmem:[#allocation88_spill] sm:$0xff] %v14525_v41  ;;  %v14539_v42 = vrot.slane %v5216_v33, %v13546_v10  ;;  %v14543_v21 = vcombine.high %v14522_v34, %v14522_v34  ;;  %v14547_v60 = vcombine.high %v14525_v41, %v14525_v41 }
 0x5c2   :  { %16701 = vst [vmem:[#allocation89_spill] sm:$0xff] %v14529_v16  ;;  %v5305_v50 = vrot.slane %v14294_v38, %v13546_v10  ;;  %v14552_v56 = vrot.slane %v7142_v22, %v13546_v10  ;;  %v7093_v19 = vcombine.low %v14525_v41, %v14529_v16  ;;  %v14557_v33 = vrot.slane %v7092_v36, %v13546_v10 }
 0x5c3   :  { %16702 = vst [vmem:[#allocation90_spill] sm:$0xff] %v14539_v42  ;;  %16703 = vst [vmem:[#allocation91_spill] sm:$0xff] %v14543_v21  ;;  %v5312_v12 = vrot.slane %v5298_v1, %v13546_v10  ;;  %v14561_v51 = vrot.slane %v7143_v5, %v13546_v10  ;;  %v14564_v59 = vrot.slane %v5353_v3, %v13546_v10 }
 0x5c4   :  { %16704 = vst [vmem:[#allocation92_spill] sm:$0xff] %v14547_v60  ;;  %v14568_v38 = vcombine.high %v14501_v57, %v14501_v57  ;;  %v5313_v22 = vcombine.high %v5305_v50, %v5305_v50  ;;  %v14572_v17 = vcombine.high %v14539_v42, %v14539_v42  ;;  %v7094_v36 = vcombine.low %v14547_v60, %v14522_v34 }
 0x5c5   :  { %16705 = vst [vmem:[#allocation93_spill] sm:$0xff] %v14564_v59  ;;  %v5314_v5 = vcombine.high %v5312_v12, %v5312_v12  ;;  %v14579_v16 = vrot.slane %v7093_v19, %v13546_v10  ;;  %v7140_v57 = vcombine.low %v14539_v42, %v14543_v21  ;;  %v14586_v41 = vrot.slane %v5305_v50, %v13546_v10 }
 0x5c6   :  { %16706 = vst [vmem:[#allocation94_spill] sm:$0xff] %v14568_v38  ;;  %v14589_v37 = vrot.slane %v5312_v12, %v13546_v10  ;;  %v14592_v34 = vrot.slane %v5313_v22, %v13546_v10  ;;  %v14598_v19 = vrot.slane %v7189_v28, %v13546_v10  ;;  %v16711_v12 = vcombine.low %v14157_v20, %v14160_v58 }
 0x5c7   :  { %16707 = vst [vmem:[#allocation95_spill] sm:$0xff] %v14586_v41  ;;  %v14595_v1 = vrot.slane %v5314_v5, %v13546_v10  ;;  %v14602_v3 = vcombine.high %v14586_v41, %v14586_v41  ;;  %v7190_v50 = vcombine.low %v14568_v38, %v14586_v41  ;;  %v16712_v22 = vcombine.high %v14157_v20, %v14160_v58 }
 0x5c8   :  { %16708 = vst [vmem:[#allocation96_spill] sm:$0xff] %v14589_v37  ;;  %16709 = vst [vmem:[#allocation97_spill] sm:$0xff] %v14592_v34  ;;  %v6651_v60 = vrot.slane %v16711_v12, %v13546_v10  ;;  %v14616_v28 = vcombine.high %v14589_v37, %v14589_v37  ;;  %v14620_v21 = vcombine.high %v14592_v34, %v14592_v34 }
 0x5c9   :  { %16710 = vst [vmem:[#allocation98_spill] sm:$0xff] %v14602_v3  ;;  %v6658_v5 = vrot.slane %v16712_v22, %v13546_v10  ;;  %v14624_v41 = vcombine.high %v14595_v1, %v14595_v1  ;;  %v6659_v12 = vcombine.low %v14207_v24, %v14218_v23  ;;  %v7191_v38 = vcombine.low %v14592_v34, %v14602_v3 }
 0x5ca   :  { %16713 = vst [vmem:[#allocation99_spill] sm:$0xff] %v14616_v28  ;;  %16714 = vst [vmem:[#allocation100_spill] sm:$0xff] %v14620_v21  ;;  %v14631_v22 = vrot.slane %v7190_v50, %v13546_v10  ;;  %v16716_v58 = vcombine.low %v14138_v6, %v14145_v52  ;;  %v7192_v39 = vcombine.low %v14620_v21, %v14589_v37 }
 0x5cb   :  { %16715 = vst [vmem:[#allocation101_spill] sm:$0xff] %v14624_v41  ;;  %v6660_v42 = vcombine.low %v6651_v60, %v6658_v5  ;;  %v7238_v8 = vcombine.low %v14595_v1, %v14616_v28  ;;  %v7239_v24 = vcombine.low %v14624_v41, %v14564_v59  ;;  %v6667_v23 = vrot.slane %v6659_v12, %v13546_v10 }
 0x5cc   :  { %v6700_v20 = vrot.slane %v16716_v58, %v13546_v10  ;;  %v7122_v50 = vrot.slane %v7094_v36, %v13546_v10  ;;  %v7141_v60 = vcombine.low %v14572_v17, %v14437_v54  ;;  %v16717_v58 = vcombine.high %v14138_v6, %v14145_v52 }
 0x5cd   :  { %v6674_v5 = vrot.slane %v6660_v42, %v13546_v10  ;;  %v14653_v21 = vrot.slane %v7140_v57, %v13546_v10  ;;  %v7213_v3 = vrot.slane %v7191_v38, %v13546_v10  ;;  %v7221_v12 = vcombine.low %v14598_v19, %v14631_v22 }
 0x5ce   :  { %v6707_v37 = vrot.slane %v16717_v58, %v13546_v10  ;;  %v6708_v36 = vcombine.low %v14175_v45, %v14178_v35  ;;  %v7220_v34 = vrot.slane %v7192_v39, %v13546_v10  ;;  %v7246_v42 = vrot.slane %v7238_v8, %v13546_v10 }
 0x5cf   :  { %v16718_v58 = vcombine.low %v14241_v13, %v14255_v30  ;;  %v7253_v57 = vrot.slane %v7239_v24, %v13546_v10  ;;  %v6675_v28 = vcombine.low %v6667_v23, %v6674_v5  ;;  %v16719_v19 = vcombine.high %v14241_v13, %v14255_v30 }
 0x5d0   :  { %v6709_v59 = vcombine.low %v6700_v20, %v6707_v37  ;;  %v6716_v38 = vrot.slane %v6708_v36, %v13546_v10  ;;  %v6757_v37 = vcombine.low %v14305_v18, %v14308_v27  ;;  %v16720_v8 = vcombine.low %v14187_v7, %v14210_v46 }
 0x5d1   :  { %v6749_v41 = vrot.slane %v16718_v58, %v13546_v10  ;;  %v6756_v45 = vrot.slane %v16719_v19, %v13546_v10  ;;  %v16721_v35 = vcombine.high %v14187_v7, %v14210_v46  ;;  %v6806_v23 = vcombine.low %v14263_v49, %v14271_v11 }
 0x5d2   :  { %v6723_v39 = vrot.slane %v6709_v59, %v13546_v10  ;;  %v6798_v20 = vrot.slane %v16720_v8, %v13546_v10  ;;  %v16722_v59 = vcombine.low %v14355_v4, %v14358_v31  ;;  %v16723_v18 = vcombine.low %v14361_v2, %v14364_v63 }
 0x5d3   :  { %v6805_v22 = vrot.slane %v16721_v35, %v13546_v10  ;;  %v6758_v24 = vcombine.low %v6749_v41, %v6756_v45  ;;  %v6765_v58 = vrot.slane %v6757_v37, %v13546_v10  ;;  %v16724_v41 = vcombine.low %v14315_v9, %v14318_v62 }
 0x5d4   :  { %v6863_v27 = vrot.slane %v16722_v59, %v13546_v10  ;;  %v6870_v5 = vrot.slane %v16723_v18, %v13546_v10  ;;  %v6724_v36 = vcombine.low %v6716_v38, %v6723_v39  ;;  %v7222_v49 = vcombine.low %v7213_v3, %v7220_v34 }
 0x5d5   :  { %v6807_v19 = vcombine.low %v6798_v20, %v6805_v22  ;;  %v6902_v45 = vrot.slane %v16724_v41, %v13546_v10  ;;  %v6772_v11 = vrot.slane %v6758_v24, %v13546_v10  ;;  %v6814_v4 = vrot.slane %v6806_v23, %v13546_v10 }
 0x5d6   :  { %v7026_v31 = vcombine.low %v14471_v55, %v14506_v43  ;;  %v7261_v8 = vcombine.low %v7246_v42, %v7253_v57  ;;  %v10811_v2 = vpack.c.bf16 %v6724_v36, %v6675_v28  ;;  %v16725_v38 = vcombine.low %v14411_v26, %v14452_v40 }
 0x5d7   :  { %v6821_v63 = vrot.slane %v6807_v19, %v13546_v10  ;;  %v6773_v37 = vcombine.low %v6765_v58, %v6772_v11  ;;  %v16726_v62 = vcombine.low %v14445_v32, %v14330_v53  ;;  %v7075_v55 = vcombine.low %v14461_v47, %v14464_v25  ;;  %v16731_v19 = vld [vmem:[#allocation36_spill] sm:$0xff]  ;;  %v16735_v11 = vld [vmem:[#allocation41_spill] sm:$0xff] }
 0x5d8   :  { %v7033_v39 = vrot.slane %v16725_v38, %v13546_v10  ;;  %v7040_v9 = vrot.slane %v7026_v31, %v13546_v10  ;;  %10812 = vmatpush3.bf16.msra.mxu0 %v10811_v2  ;;  %v6871_v3 = vcombine.low %v6863_v27, %v6870_v5  ;;  %v6910_v28 = vcombine.low %v6902_v45, %v14345_v61  ;;  %v16737_v31 = vld [vmem:[#allocation45_spill] sm:$0xff] }
 0x5d9   :  { %v7059_v34 = vrot.slane %v16726_v62, %v13546_v10  ;;  %v6822_v43 = vcombine.low %v6814_v4, %v6821_v63  ;;  %v7124_v42 = vcombine.low %v14579_v16, %v7122_v50  ;;  %10813 = vmatprep.subr.bf16.mxu0 %v16641_v15  ;;  %v7089_v40 = vrot.slane %v7075_v55, %v13546_v10  ;;  %v16736_v4 = vld [vmem:[#allocation42_spill] sm:$0xff]  ;;  %v16740_v55 = vld [vmem:[#allocation44_spill] sm:$0xff] }
 0x5da   :  { %v16727_v57 = vcombine.low %v14517_v0, %v14557_v33  ;;  %v7157_v25 = vrot.slane %v7141_v60, %v13546_v10  ;;  %v7173_v61 = vcombine.low %v14552_v56, %v14561_v51  ;;  %v16728_v16 = vrot.slane %v14534_v14, %v13546_v10  ;;  %v16739_v62 = vld [vmem:[#allocation46_spill] sm:$0xff] }
 0x5db   :  { %v7074_v26 = vcombine.low %v14498_v44, %v7059_v34  ;;  %v10814_v47 = vpack.c.bf16 %v6822_v43, %v6773_v37  ;;  %v7138_v35 = vrot.slane %v7124_v42, %v13546_v10  ;;  %v7041_v50 = vcombine.low %v7033_v39, %v7040_v9  ;;  %v16738_v39 = vld [vmem:[#allocation43_spill] sm:$0xff] }
 0x5dc   :  { %v7131_v20 = vrot.slane %v16727_v57, %v13546_v10  ;;  %v7275_v44 = vrot.slane %v16728_v16, %v13546_v10  ;;  %v7172_v24 = vcombine.low %v14653_v21, %v7157_v25  ;;  %v7229_v0 = vrot.slane %v7221_v12, %v13546_v10  ;;  %v16743_v57 = vld [vmem:[#allocation50_spill] sm:$0xff]  ;;  %v16745_v16 = vld [vmem:[#allocation53_spill] sm:$0xff] }
 0x5dd   :  { %v7082_v22 = vrot.slane %v7074_v26, %v13546_v10  ;;  %10815 = vmatpush3.bf16.msra.mxu0 %v10814_v47  ;;  %v10817_v33 = vpack.c.bf16 %v6910_v28, %v6871_v3  ;;  %v7187_v60 = vrot.slane %v7173_v61, %v13546_v10  ;;  %v7236_v23 = vrot.slane %v7222_v49, %v13546_v10  ;;  %v16734_v49 = vld [vmem:[#allocation38_spill] sm:$0xff]  ;;  %v16741_v28 = vld [vmem:[#allocation49_spill] sm:$0xff]  ;;  %v16742_v26 = vld [vmem:[#allocation47_spill] sm:$0xff] }
 0x5de   :  { %10816 = vmatprep.subr.bf16.mxu0 %v16641_v15  ;;  %v7139_v59 = vcombine.low %v7131_v20, %v7138_v35  ;;  %v7180_v21 = vrot.slane %v7172_v24, %v13546_v10  ;;  %v7268_v12 = vrot.slane %v7261_v8, %v13546_v10  ;;  %v16732_v41 = vmov 0.0   ;;  %v10165_v8 = vld [vmem:[#allocation12] ss:$0 sm:$0xff]  ;;  %v16744_v47 = vld [vmem:[#allocation52_spill] sm:$0xff] }
 0x5df   :  { %v7090_v56 = vcombine.low %v7082_v22, %v7089_v40  ;;  %v7237_v36 = vcombine.low %v7229_v0, %v7236_v23  ;;  %v7368_v2 = vcombine.high %v10165_v8, %v10165_v8  ;;  %v7375_v63 = vrot.slane %v10165_v8, %v13546_v10  ;;  %v16746_v22 = vld [vmem:[#allocation54_spill] sm:$0xff]  ;;  %v16747_v23 = vld [vmem:[#allocation55_spill] sm:$0xff]  ;;  %v16753_v8 = vld [vmem:[#allocation64_spill] sm:$0xff] }
 0x5e0   :  { %v7188_v18 = vcombine.low %v7180_v21, %v7187_v60  ;;  %v7276_v58 = vcombine.low %v7268_v12, %v7275_v44  ;;  %v4902_v37 = vcombine.high %v16738_v39, %v16738_v39  ;;  %v4903_v9 = vcombine.high %v14138_v6, %v14138_v6 }
 0x5e1   :  { %v10821_v27 = vpack.c.bf16 %v7090_v56, %v7041_v50  ;;  %10819 = vmatpush3.bf16.msk.msra.mxu0 %vm14738_vm4, %v10817_v33  ;;  %v7382_v38 = vrot.slane %v7368_v2, %v13546_v10  ;;  %v4904_v34 = vcombine.high %v16739_v62, %v16739_v62  ;;  %v7383_v3 = vcombine.high %v7375_v63, %v7375_v63 }
 0x5e2   :  { %v10824_v5 = vpack.c.bf16 %v7188_v18, %v7139_v59  ;;  %10830 = vmatprep.subr.bf16.mxu0 %v16641_v15  ;;  %v10827_v45 = vpack.c.bf16 %v7276_v58, %v7237_v36  ;;  %v14806_v33 = vrot.slane %v7375_v63, %v13546_v10  ;;  %v16748_v59 = vld [vmem:[#allocation56_spill] sm:$0xff]  ;;  %v16749_v18 = vld [vmem:[#allocation58_spill] sm:$0xff]  ;;  %v16750_v36 = vld [vmem:[#allocation61_spill] sm:$0xff] }
 0x5e3   :  { %10822 = vmatpush3.bf16.msra.mxu1 %v10821_v27  ;;  %v7384_v25 = vcombine.high %v7382_v38, %v7382_v38  ;;  %v14809_v60 = vrot.slane %v7382_v38, %v13546_v10  ;;  %v14818_v12 = vrot.slane %v7383_v3, %v13546_v10 }
 0x5e4   :  { %10823 = vmatprep.subr.bf16.mxu1 %v16641_v15  ;;  %10639 = vmatmul.mubr.msk.f32.vlgmr.msra.gmra.mrb[34].mxu0 %vm6916_vm5, %v14126_v29  ;;  %v11657_v29 = vpop.eup %11656  ;;  %v14837_v3 = vcombine.high %v14806_v33, %v14806_v33 }
 0x5e5   :  { %10832 = vmatpush3.bf16.msra.mxu0 %v16731_v19  ;;  %10668 = vmatprep.mubr.msk.f32.mxu0 %vm12115_vm0, %v16732_v41  ;;  %v16751_v19 = vld [vmem:[#allocation62_spill] sm:$0xff] }
 0x5e6   :  { %10833 = vmatprep.subr.bf16.mxu0 %v16641_v15 }
 0x5e7   :  { %10825 = vmatpush3.bf16.msra.mxu1 %v10824_v5 }
 0x5e8   :  { %10826 = vmatprep.subr.bf16.mxu1 %v16641_v15 }
 0x5e9   :  { %10835 = vmatpush3.bf16.msra.mxu0 %v16733_v48  ;;  %v14827_v48 = vrot.slane %v7384_v25, %v13546_v10  ;;  %v14841_v25 = vcombine.high %v14809_v60, %v14809_v60 }
 0x5ea   :  { %10836 = vmatprep.subr.bf16.mxu0 %v16641_v15 }
 0x5eb   :  { %10829 = vmatpush3.bf16.msk.msra.mxu1 %vm14738_vm4, %v10827_v45  ;;  %v14853_v56 = vcombine.high %v14827_v48, %v14827_v48 }
 0x5ec   :  { %10840 = vmatprep.subr.bf16.mxu1 %v16641_v15 }
 0x5ed   :  { %10839 = vmatpush3.bf16.msk.msra.mxu0 %vm14738_vm4, %v16734_v49 }
 0x5ee   :  { %10654 = vmatmul.mubr.msk.f32.vlgmr.msra.gmra.mrb[26].mxu1 %vm6916_vm5, %v11657_v29  ;;  %10686 = vmatprep.subr.mxu0 %v16732_v41 }
 0x5ef   :  { %10842 = vmatpush3.bf16.msra.mxu1 %v16735_v11  ;;  %10683 = vmatprep.mubr.msk.f32.mxu1 %vm12115_vm0, %v16732_v41 }
 0x5f0   :  { %10843 = vmatprep.subr.bf16.mxu1 %v16641_v15 }
 0x5f3   :  { %10845 = vmatpush3.bf16.msra.mxu1 %v16736_v4  ;;  %v16752_v4 = vld [vmem:[#allocation63_spill] sm:$0xff] }
 0x5f4   :  { %10846 = vmatprep.subr.bf16.mxu1 %v16641_v15  ;;  %v4905_v15 = vcombine.high %v14145_v52, %v14145_v52 }
 0x5f7   :  { %10849 = vmatpush3.bf16.msk.msra.mxu1 %vm14738_vm4, %v16737_v31  ;;  %v14847_v31 = vcombine.high %v14818_v12, %v14818_v12 }
 0x672   :  { %v10608_v27 = vpop.f32.mrb[14].mxu1 }
 0x673   :  { %v5838_v29 = vcombine.high %v10608_v27, %v10608_v27  ;;  %v5845_v49 = vrot.slane %v10608_v27, %v13546_v10  ;;  %v5635_v11 = vpop.f32.mrb[15].mxu1 }
 0x674   :  { %v5789_v63 = vcombine.high %v5635_v11, %v5635_v11  ;;  %v5796_v38 = vrot.slane %v5635_v11, %v13546_v10 }
 0x675   :  { %v5852_v27 = vrot.slane %v5838_v29, %v13546_v10  ;;  %v5853_v45 = vcombine.high %v5845_v49, %v5845_v49  ;;  %v5861_v58 = vrot.slane %v5845_v49, %v13546_v10 }
 0x676   :  { %v5803_v2 = vrot.slane %v5789_v63, %v13546_v10  ;;  %v5804_v11 = vcombine.high %v5796_v38, %v5796_v38  ;;  %v5812_v5 = vrot.slane %v5796_v38, %v13546_v10  ;;  %v10611_v21 = vpop.f32.mrb[16].mxu1 }
 0x677   :  { %v5854_v0 = vcombine.high %v5852_v27, %v5852_v27  ;;  %v5868_v29 = vrot.slane %v5852_v27, %v13546_v10  ;;  %v5875_v51 = vrot.slane %v5853_v45, %v13546_v10  ;;  %v5883_v49 = vcombine.high %v5861_v58, %v5861_v58  ;;  %v5645_v24 = vpop.f32.mrb[17].mxu1 }
 0x678   :  { %v6455_v50 = vadd.f32 %v5861_v58, %v16738_v39  ;;  %v5805_v61 = vcombine.high %v5803_v2, %v5803_v2  ;;  %v5819_v63 = vrot.slane %v5803_v2, %v13546_v10  ;;  %v5826_v44 = vrot.slane %v5804_v11, %v13546_v10 }
 0x679   :  { %v5882_v38 = vrot.slane %v5854_v0, %v13546_v10  ;;  %v5884_v35 = vcombine.high %v5868_v29, %v5868_v29  ;;  %v5885_v20 = vcombine.high %v5875_v51, %v5875_v51  ;;  %v6456_v42 = vadd.f32 %v5875_v51, %v16739_v62 }
 0x67a   :  { %v6457_v40 = vadd.f32 %v5883_v49, %v4902_v37  ;;  %v6459_v27 = vadd.f32 %v5868_v29, %v14138_v6  ;;  %11658 = vtanh.f32 %v6455_v50  ;;  %v5833_v45 = vrot.slane %v5805_v61, %v13546_v10  ;;  %v14864_v43 = vpop.f32.mrb[18].mxu1 }
 0x67b   :  { %v5886_v39 = vcombine.high %v5882_v38, %v5882_v38  ;;  %v6458_v58 = vadd.f32 %v5885_v20, %v4904_v34  ;;  %v6460_v2 = vadd.f32 %v5882_v38, %v14145_v52  ;;  %v6461_v0 = vadd.f32 %v5884_v35, %v4903_v9  ;;  %v14870_v11 = vpop.f32.mrb[19].mxu1 }
 0x67c   :  { %11660 = vtanh.f32 %v6456_v42  ;;  %v5834_v62 = vcombine.high %v5812_v5, %v5812_v5  ;;  %v5835_v37 = vcombine.high %v5819_v63, %v5819_v63  ;;  %v5836_v51 = vcombine.high %v5826_v44, %v5826_v44 }
 0x67d   :  { %v6462_v61 = vadd.f32 %v5886_v39, %v4905_v15  ;;  %11662 = vtanh.f32 %v6457_v40  ;;  %v5837_v50 = vcombine.high %v5833_v45, %v5833_v45  ;;  %v6447_v34 = vadd.f32 %v5812_v5, %v16740_v55 }
 0x67e   :  { %11664 = vtanh.f32 %v6458_v58  ;;  %v6448_v20 = vadd.f32 %v5826_v44, %v16742_v26  ;;  %v16754_v6 = vcombine.high %v16740_v55, %v16740_v55  ;;  %v16755_v42 = vcombine.high %v16742_v26, %v16742_v26  ;;  %v14883_v29 = vpop.f32.mrb[20].mxu1 }
 0x67f   :  { %11666 = vtanh.f32 %v6459_v27  ;;  %v6451_v52 = vadd.f32 %v5819_v63, %v16741_v28  ;;  %v6452_v15 = vadd.f32 %v5833_v45, %v16743_v57  ;;  %v16756_v40 = vcombine.high %v16741_v28, %v16741_v28  ;;  %v14890_v44 = vpop.f32.mrb[21].mxu1 }
 0x680   :  { %v6449_v9 = vadd.f32 %v5834_v62, %v16754_v6  ;;  %v6450_v35 = vadd.f32 %v5836_v51, %v16755_v42  ;;  %11668 = vtanh.f32 %v6460_v2  ;;  %v16757_v55 = vcombine.high %v16743_v57, %v16743_v57 }
 0x681   :  { %v6453_v5 = vadd.f32 %v5835_v37, %v16756_v40  ;;  %v5936_v26 = vcombine.high %v10611_v21, %v10611_v21  ;;  %v5943_v38 = vrot.slane %v10611_v21, %v13546_v10  ;;  %11670 = vtanh.f32 %v6461_v0 }
 0x682   :  { %v6454_v49 = vadd.f32 %v5837_v50, %v16757_v55  ;;  %v5887_v27 = vcombine.high %v5645_v24, %v5645_v24  ;;  %v5894_v63 = vrot.slane %v5645_v24, %v13546_v10  ;;  %11672 = vtanh.f32 %v6462_v61  ;;  %v14901_v2 = vpop.f32.mrb[22].mxu1 }
 0x683   :  { %v5950_v28 = vrot.slane %v5936_v26, %v13546_v10  ;;  %v5951_v39 = vcombine.high %v5943_v38, %v5943_v38  ;;  %v5959_v58 = vrot.slane %v5943_v38, %v13546_v10  ;;  %11674 = vtanh.f32 %v6447_v34  ;;  %v14905_v0 = vpop.f32.mrb[23].mxu1 }
 0x684   :  { %v5901_v57 = vrot.slane %v5887_v27, %v13546_v10  ;;  %v5902_v62 = vcombine.high %v5894_v63, %v5894_v63  ;;  %v5910_v21 = vrot.slane %v5894_v63, %v13546_v10  ;;  %v14907_v24 = vpop.eup %11658  ;;  %11676 = vtanh.f32 %v6448_v20 }
 0x685   :  { %v5952_v37 = vcombine.high %v5950_v28, %v5950_v28  ;;  %v5966_v51 = vrot.slane %v5950_v28, %v13546_v10  ;;  %v5973_v61 = vrot.slane %v5951_v39, %v13546_v10  ;;  %11678 = vtanh.f32 %v6449_v9 }
 0x686   :  { %v5981_v50 = vcombine.high %v5959_v58, %v5959_v58  ;;  %v6471_v6 = vadd.f32 %v5959_v58, %v16744_v47  ;;  %v5903_v34 = vcombine.high %v5901_v57, %v5901_v57  ;;  %v14912_v42 = vpop.eup %11660  ;;  %11680 = vtanh.f32 %v6450_v35  ;;  %v14915_v38 = vpop.f32.mrb[24].mxu1 }
 0x687   :  { %v5980_v40 = vrot.slane %v5952_v37, %v13546_v10  ;;  %v5982_v55 = vcombine.high %v5966_v51, %v5966_v51  ;;  %v5983_v26 = vcombine.high %v5973_v61, %v5973_v61  ;;  %v14917_v20 = vpop.eup %11662  ;;  %11682 = vtanh.f32 %v6451_v52  ;;  %v14924_v39 = vpop.f32.mrb[25].mxu1 }
 0x688   :  { %v6472_v27 = vadd.f32 %v5973_v61, %v16745_v16  ;;  %v16758_v9 = vcombine.high %v16744_v47, %v16744_v47  ;;  %v6475_v28 = vadd.f32 %v5966_v51, %v14187_v7  ;;  %v14926_v35 = vpop.eup %11664  ;;  %11684 = vtanh.f32 %v6452_v15 }
 0x689   :  { %v5984_v58 = vcombine.high %v5980_v40, %v5980_v40  ;;  %v16759_v37 = vcombine.high %v16745_v16, %v16745_v16  ;;  %v6476_v52 = vadd.f32 %v5980_v40, %v14210_v46  ;;  %v14932_v41 = vpop.eup %11666  ;;  %11686 = vtanh.f32 %v6453_v5 }
 0x68a   :  { %v6473_v63 = vadd.f32 %v5981_v50, %v16758_v9  ;;  %v16760_v47 = vcombine.high %v14187_v7, %v14187_v7  ;;  %v5917_v51 = vrot.slane %v5901_v57, %v13546_v10  ;;  %v5924_v50 = vrot.slane %v5902_v62, %v13546_v10  ;;  %v14939_v9 = vpop.eup %11668 }
 0x68b   :  { %v6474_v45 = vadd.f32 %v5983_v26, %v16759_v37  ;;  %11688 = vtanh.f32 %v6454_v49  ;;  %v16761_v16 = vcombine.high %v14210_v46, %v14210_v46  ;;  %v5931_v40 = vrot.slane %v5903_v34, %v13546_v10  ;;  %v14945_v37 = vpop.eup %11670 }
 0x68c   :  { %v6477_v61 = vadd.f32 %v5982_v55, %v16760_v47  ;;  %v5932_v26 = vcombine.high %v5910_v21, %v5910_v21  ;;  %11690 = vtanh.f32 %v6471_v6  ;;  %v5933_v5 = vcombine.high %v5917_v51, %v5917_v51  ;;  %v14948_v57 = vpop.eup %11672 }
 0x68d   :  { %v6478_v15 = vadd.f32 %v5984_v58, %v16761_v16  ;;  %v5934_v7 = vcombine.high %v5924_v50, %v5924_v50  ;;  %v6463_v55 = vadd.f32 %v5910_v21, %v16746_v22  ;;  %16762 = vst [vmem:[#allocation36_spill] sm:$0xff] %v14948_v57  ;;  %11692 = vtanh.f32 %v6472_v27  ;;  %v14954_v47 = vpop.eup %11674 }
 0x68e   :  { %v5935_v62 = vcombine.high %v5931_v40, %v5931_v40  ;;  %v6464_v49 = vadd.f32 %v5924_v50, %v16747_v23  ;;  %v16763_v46 = vcombine.high %v16746_v22, %v16746_v22  ;;  %11694 = vtanh.f32 %v6473_v63  ;;  %v14961_v57 = vpop.eup %11676 }
 0x68f   :  { %v16764_v6 = vcombine.high %v16747_v23, %v16747_v23  ;;  %v6467_v16 = vadd.f32 %v5917_v51, %v14241_v13  ;;  %v6468_v21 = vadd.f32 %v5931_v40, %v14255_v30  ;;  %11696 = vtanh.f32 %v6474_v45  ;;  %v14971_v23 = vpop.eup %11678 }
 0x690   :  { %v6465_v58 = vadd.f32 %v5932_v26, %v16763_v46  ;;  %v16765_v27 = vcombine.high %v14241_v13, %v14241_v13  ;;  %v16766_v22 = vcombine.high %v14255_v30, %v14255_v30  ;;  %v6041_v63 = vrot.slane %v14864_v43, %v13546_v10  ;;  %16767 = vst [vmem:[#allocation37_spill] sm:$0xff] %v14971_v23 }
 0x691   :  { %v6466_v34 = vadd.f32 %v5934_v7, %v16764_v6  ;;  %11698 = vtanh.f32 %v6475_v28  ;;  %v16768_v51 = vcombine.high %v14864_v43, %v14864_v43  ;;  %v5985_v45 = vcombine.high %v14870_v11, %v14870_v11 }
 0x692   :  { %v6469_v50 = vadd.f32 %v5933_v5, %v16765_v27  ;;  %v6470_v26 = vadd.f32 %v5935_v62, %v16766_v22  ;;  %v5992_v13 = vrot.slane %v14870_v11, %v13546_v10  ;;  %v14981_v5 = vpop.eup %11680  ;;  %11700 = vtanh.f32 %v6476_v52 }
 0x693   :  { %v6048_v40 = vrot.slane %v16768_v51, %v13546_v10  ;;  %16769 = vst [vmem:[#allocation38_spill] sm:$0xff] %v14981_v5  ;;  %v6049_v30 = vcombine.high %v6041_v63, %v6041_v63  ;;  %v6056_v7 = vrot.slane %v6041_v63, %v13546_v10  ;;  %v6122_v28 = vcombine.high %v14883_v29, %v14883_v29  ;;  %v14986_v62 = vpop.eup %11682  ;;  %v16772_v51 = vld [vmem:[#allocation57_spill] sm:$0xff] }
 0x694   :  { %16770 = vst [vmem:[#allocation41_spill] sm:$0xff] %v14986_v62  ;;  %11702 = vtanh.f32 %v6477_v61  ;;  %v5999_v46 = vrot.slane %v5985_v45, %v13546_v10  ;;  %v6000_v6 = vcombine.high %v5992_v13, %v5992_v13  ;;  %v14990_v27 = vpop.eup %11684  ;;  %v6008_v61 = vrot.slane %v5992_v13, %v13546_v10 }
 0x695   :  { %v6063_v43 = vrot.slane %v6048_v40, %v13546_v10  ;;  %16771 = vst [vmem:[#allocation42_spill] sm:$0xff] %v14990_v27  ;;  %11704 = vtanh.f32 %v6478_v15  ;;  %v6070_v11 = vrot.slane %v6049_v30, %v13546_v10  ;;  %v6071_v52 = vcombine.high %v6056_v7, %v6056_v7  ;;  %v14994_v63 = vpop.eup %11686 }
 0x696   :  { %v6487_v22 = vadd.f32 %v6056_v7, %v16748_v59  ;;  %11706 = vtanh.f32 %v6463_v55  ;;  %v6001_v62 = vcombine.high %v5999_v46, %v5999_v46  ;;  %v14998_v40 = vpop.eup %11688  ;;  %v16773_v15 = vcombine.high %v16748_v59, %v16748_v59 }
 0x697   :  { %v6491_v5 = vadd.f32 %v6063_v43, %v16772_v51  ;;  %11708 = vtanh.f32 %v6464_v49  ;;  %v6072_v45 = vcombine.high %v6070_v11, %v6070_v11  ;;  %v6488_v27 = vadd.f32 %v6070_v11, %v16749_v18  ;;  %v15004_v23 = vpop.eup %11690 }
 0x698   :  { %v6489_v30 = vadd.f32 %v6071_v52, %v16773_v15  ;;  %16774 = vst [vmem:[#allocation45_spill] sm:$0xff] %v15004_v23  ;;  %11710 = vtanh.f32 %v6465_v58  ;;  %v6015_v55 = vrot.slane %v5999_v46, %v13546_v10  ;;  %v6022_v7 = vrot.slane %v6000_v6, %v13546_v10  ;;  %v15009_v13 = vpop.eup %11692 }
 0x699   :  { %v6029_v43 = vrot.slane %v6001_v62, %v13546_v10  ;;  %16775 = vst [vmem:[#allocation43_spill] sm:$0xff] %v15009_v13  ;;  %11712 = vtanh.f32 %v6466_v34  ;;  %v16776_v49 = vcombine.high %v16749_v18, %v16749_v18  ;;  %v6030_v51 = vcombine.high %v6008_v61, %v6008_v61  ;;  %v15015_v52 = vpop.eup %11694 }
 0x69a   :  { %v6479_v59 = vadd.f32 %v6008_v61, %v16750_v36  ;;  %16777 = vst [vmem:[#allocation46_spill] sm:$0xff] %v15015_v52  ;;  %11714 = vtanh.f32 %v6467_v16  ;;  %v6031_v58 = vcombine.high %v6015_v55, %v6015_v55  ;;  %v6032_v15 = vcombine.high %v6022_v7, %v6022_v7  ;;  %v15017_v23 = vpop.eup %11696 }
 0x69b   :  { %v6490_v11 = vadd.f32 %v6072_v45, %v16776_v49  ;;  %v6033_v46 = vcombine.high %v6029_v43, %v6029_v43  ;;  %16778 = vst [vmem:[#allocation44_spill] sm:$0xff] %v15017_v23  ;;  %11716 = vtanh.f32 %v6468_v21  ;;  %v6480_v62 = vadd.f32 %v6022_v7, %v16752_v4  ;;  %v15024_v45 = vpop.eup %11698 }
 0x69c   :  { %v16779_v34 = vcombine.high %v16750_v36, %v16750_v36  ;;  %v6483_v18 = vadd.f32 %v6015_v55, %v16751_v19  ;;  %16780 = vst [vmem:[#allocation49_spill] sm:$0xff] %v15024_v45  ;;  %11718 = vtanh.f32 %v6469_v50  ;;  %v16781_v16 = vcombine.high %v16752_v4, %v16752_v4  ;;  %v15033_v7 = vpop.eup %11700 }
 0x69d   :  { %v6484_v49 = vadd.f32 %v6029_v43, %v16753_v8  ;;  %v16782_v21 = vcombine.high %v16751_v19, %v16751_v19  ;;  %16783 = vst [vmem:[#allocation47_spill] sm:$0xff] %v15033_v7  ;;  %11720 = vtanh.f32 %v6470_v26  ;;  %v16784_v36 = vcombine.high %v16753_v8, %v16753_v8 }
 0x69e   :  { %v6481_v6 = vadd.f32 %v6030_v51, %v16779_v34  ;;  %v6482_v61 = vadd.f32 %v6032_v15, %v16781_v16  ;;  %v6129_v50 = vrot.slane %v14883_v29, %v13546_v10  ;;  %v6136_v4 = vrot.slane %v6122_v28, %v13546_v10  ;;  %v15043_v51 = vpop.eup %11702 }
 0x69f   :  { %v6485_v23 = vadd.f32 %v6031_v58, %v16782_v21  ;;  %v15038_v55 = vadd.f32 %v6033_v46, %v16784_v36  ;;  %16785 = vst [vmem:[#allocation50_spill] sm:$0xff] %v15043_v51  ;;  %11722 = vtanh.f32 %v6487_v22  ;;  %v6073_v19 = vcombine.high %v14890_v44, %v14890_v44  ;;  %v15051_v8 = vpop.eup %11704 }
 0x6a0   :  { %v6080_v43 = vrot.slane %v14890_v44, %v13546_v10  ;;  %v6220_v26 = vcombine.high %v14901_v2, %v14901_v2  ;;  %16786 = vst [vmem:[#allocation52_spill] sm:$0xff] %v15051_v8  ;;  %11724 = vtanh.f32 %v6488_v27  ;;  %v6137_v58 = vcombine.high %v6129_v50, %v6129_v50  ;;  %v15054_v28 = vpop.eup %11706  ;;  %v16790_v8 = vld [vmem:[#allocation75_spill] sm:$0xff] }
 0x6a1   :  { %v6138_v15 = vcombine.high %v6136_v4, %v6136_v4  ;;  %v6145_v29 = vrot.slane %v6129_v50, %v13546_v10  ;;  %16787 = vst [vmem:[#allocation53_spill] sm:$0xff] %v15054_v28  ;;  %11726 = vtanh.f32 %v6489_v30  ;;  %v6152_v22 = vrot.slane %v6136_v4, %v13546_v10  ;;  %v15058_v16 = vpop.eup %11708  ;;  %v16791_v30 = vld [vmem:[#allocation65_spill] sm:$0xff] }
 0x6a2   :  { %v6087_v46 = vrot.slane %v6073_v19, %v13546_v10  ;;  %v6088_v34 = vcombine.high %v6080_v43, %v6080_v43  ;;  %16788 = vst [vmem:[#allocation54_spill] sm:$0xff] %v15058_v16  ;;  %11728 = vtanh.f32 %v6490_v11  ;;  %v6159_v44 = vrot.slane %v6137_v58, %v13546_v10  ;;  %v15062_v36 = vpop.eup %11710  ;;  %v16792_v16 = vld [vmem:[#allocation77_spill] sm:$0xff] }
 0x6a3   :  { %v6166_v21 = vrot.slane %v6138_v15, %v13546_v10  ;;  %v6167_v27 = vcombine.high %v6145_v29, %v6145_v29  ;;  %16789 = vst [vmem:[#allocation55_spill] sm:$0xff] %v15062_v36  ;;  %11730 = vtanh.f32 %v6491_v5  ;;  %v6168_v50 = vcombine.high %v6152_v22, %v6152_v22  ;;  %v15066_v4 = vpop.eup %11712  ;;  %v16793_v15 = vld [vmem:[#allocation66_spill] sm:$0xff]  ;;  %v16794_v5 = vld [vmem:[#allocation68_spill] sm:$0xff] }
 0x6a4   :  { %v6500_v28 = vadd.f32 %v6145_v29, %v16790_v8  ;;  %v6504_v51 = vadd.f32 %v6152_v22, %v16791_v30  ;;  %11732 = vtanh.f32 %v6479_v59  ;;  %v6169_v19 = vcombine.high %v6159_v44, %v6159_v44  ;;  %v15069_v45 = vpop.eup %11714  ;;  %v16795_v29 = vld [vmem:[#allocation67_spill] sm:$0xff] }
 0x6a5   :  { %v6170_v7 = vcombine.high %v6166_v21, %v6166_v21  ;;  %v6501_v11 = vadd.f32 %v6159_v44, %v16792_v16  ;;  %11734 = vtanh.f32 %v6480_v62  ;;  %v6502_v58 = vadd.f32 %v6167_v27, %v14445_v32  ;;  %v15074_v13 = vpop.eup %11716 }
 0x6a6   :  { %v6505_v36 = vadd.f32 %v6166_v21, %v16793_v15  ;;  %v6506_v52 = vadd.f32 %v6168_v50, %v16794_v5  ;;  %11736 = vtanh.f32 %v6481_v6  ;;  %v6503_v8 = vadd.f32 %v6169_v19, %v14330_v53  ;;  %v15078_v30 = vpop.eup %11718 }
 0x6a7   :  { %v6507_v59 = vadd.f32 %v6170_v7, %v16795_v29  ;;  %v6089_v22 = vcombine.high %v6087_v46, %v6087_v46  ;;  %16796 = vst [vmem:[#allocation56_spill] sm:$0xff] %v15078_v30  ;;  %11738 = vtanh.f32 %v6482_v61  ;;  %v6096_v16 = vrot.slane %v6080_v43, %v13546_v10  ;;  %v15083_v44 = vpop.eup %11720  ;;  %v16804_v29 = vld [vmem:[#allocation72_spill] sm:$0xff]  ;;  %v16808_v30 = vld [vmem:[#allocation78_spill] sm:$0xff] }
 0x6a8   :  { %v6103_v62 = vrot.slane %v6087_v46, %v13546_v10  ;;  %v6110_v32 = vrot.slane %v6088_v34, %v13546_v10  ;;  %16797 = vst [vmem:[#allocation58_spill] sm:$0xff] %v15083_v44  ;;  %11740 = vtanh.f32 %v6483_v18  ;;  %v6227_v53 = vrot.slane %v14901_v2, %v13546_v10  ;;  %v16800_v34 = vld [vmem:[#allocation59_spill] sm:$0xff]  ;;  %v16801_v18 = vld [vmem:[#allocation60_spill] sm:$0xff]  ;;  %v16803_v2 = vld [vmem:[#allocation69_spill] sm:$0xff] }
 0x6a9   :  { %v6117_v21 = vrot.slane %v6089_v22, %v13546_v10  ;;  %v6234_v6 = vrot.slane %v6220_v26, %v13546_v10  ;;  %v15089_v7 = vpop.eup %11722  ;;  %11742 = vtanh.f32 %v6484_v49  ;;  %v6118_v61 = vcombine.high %v6096_v16, %v6096_v16  ;;  %v16805_v49 = vld [vmem:[#allocation74_spill] sm:$0xff] }
 0x6aa   :  { %16798 = vst [vmem:[#allocation61_spill] sm:$0xff] %v15089_v7  ;;  %v6119_v27 = vcombine.high %v6103_v62, %v6103_v62  ;;  %v6120_v43 = vcombine.high %v6110_v32, %v6110_v32  ;;  %v15091_v50 = vpop.eup %11724  ;;  %11744 = vtanh.f32 %v6485_v23  ;;  %v6492_v19 = vadd.f32 %v6096_v16, %v16800_v34 }
 0x6ab   :  { %16799 = vst [vmem:[#allocation62_spill] sm:$0xff] %v15091_v50  ;;  %v6121_v46 = vcombine.high %v6117_v21, %v6117_v21  ;;  %v6493_v15 = vadd.f32 %v6110_v32, %v16801_v18  ;;  %v15095_v5 = vpop.eup %11726  ;;  %11746 = vtanh.f32 %v15038_v55  ;;  %v6494_v26 = vadd.f32 %v6118_v61, %v16803_v2  ;;  %v16807_v50 = vld [vmem:[#allocation76_spill] sm:$0xff]  ;;  %v16809_v32 = vld [vmem:[#allocation73_spill] sm:$0xff]  ;;  %v16814_v2 = vld [vmem:[#allocation90_spill] sm:$0xff] }
 0x6ac   :  { %16802 = vst [vmem:[#allocation63_spill] sm:$0xff] %v15095_v5  ;;  %v6495_v22 = vadd.f32 %v6120_v43, %v16804_v29  ;;  %v6496_v7 = vadd.f32 %v6103_v62, %v16805_v49  ;;  %v15101_v44 = vpop.eup %11728  ;;  %11748 = vtanh.f32 %v6500_v28  ;;  %v15104_v23 = vadd.f32 %v6117_v21, %v16807_v50  ;;  %v16815_v29 = vld [vmem:[#allocation80_spill] sm:$0xff]  ;;  %v16819_v5 = vld [vmem:[#allocation81_spill] sm:$0xff] }
 0x6ad   :  { %16806 = vst [vmem:[#allocation64_spill] sm:$0xff] %v15101_v44  ;;  %v15107_v16 = vadd.f32 %v6119_v27, %v16808_v30  ;;  %v15110_v34 = vadd.f32 %v6121_v46, %v16809_v32  ;;  %v15112_v18 = vpop.eup %11730  ;;  %11750 = vtanh.f32 %v6501_v11  ;;  %v6235_v55 = vcombine.high %v6227_v53, %v6227_v53 }
 0x6ae   :  { %16810 = vst [vmem:[#allocation57_spill] sm:$0xff] %v15112_v18  ;;  %v6236_v61 = vcombine.high %v6234_v6, %v6234_v6  ;;  %v6243_v43 = vrot.slane %v6227_v53, %v13546_v10  ;;  %v15115_v62 = vpop.eup %11732  ;;  %11752 = vtanh.f32 %v6502_v58  ;;  %v6250_v28 = vrot.slane %v6234_v6, %v13546_v10 }
 0x6af   :  { %16811 = vst [vmem:[#allocation75_spill] sm:$0xff] %v15115_v62  ;;  %v6171_v21 = vcombine.high %v14905_v0, %v14905_v0  ;;  %v6178_v30 = vrot.slane %v14905_v0, %v13546_v10  ;;  %v15122_v27 = vpop.eup %11734  ;;  %11754 = vtanh.f32 %v6503_v8  ;;  %v6257_v11 = vrot.slane %v6235_v55, %v13546_v10  ;;  %v16817_v8 = vld [vmem:[#allocation91_spill] sm:$0xff] }
 0x6b0   :  { %16812 = vst [vmem:[#allocation65_spill] sm:$0xff] %v15122_v27  ;;  %v6264_v50 = vrot.slane %v6236_v61, %v13546_v10  ;;  %v6265_v46 = vcombine.high %v6243_v43, %v6243_v43  ;;  %v15126_v53 = vpop.eup %11736  ;;  %11756 = vtanh.f32 %v6504_v51  ;;  %v6266_v58 = vcombine.high %v6250_v28, %v6250_v28  ;;  %v16836_v27 = vld [vmem:[#allocation99_spill] sm:$0xff] }
 0x6b1   :  { %16813 = vst [vmem:[#allocation77_spill] sm:$0xff] %v15126_v53  ;;  %v6516_v6 = vadd.f32 %v6243_v43, %v16814_v2  ;;  %v15130_v49 = vadd.f32 %v6250_v28, %v16815_v29  ;;  %v15132_v32 = vpop.eup %11738  ;;  %11758 = vtanh.f32 %v6505_v36  ;;  %v6267_v0 = vcombine.high %v6257_v11, %v6257_v11  ;;  %v16820_v53 = vld [vmem:[#allocation84_spill] sm:$0xff]  ;;  %v16822_v2 = vld [vmem:[#allocation79_spill] sm:$0xff] }
 0x6b2   :  { %16816 = vst [vmem:[#allocation66_spill] sm:$0xff] %v15132_v32  ;;  %v6268_v18 = vcombine.high %v6264_v50, %v6264_v50  ;;  %v6517_v44 = vadd.f32 %v6257_v11, %v16817_v8  ;;  %v15135_v55 = vpop.eup %11740  ;;  %11760 = vtanh.f32 %v6506_v52  ;;  %v6518_v61 = vadd.f32 %v6265_v46, %v14572_v17 }
 0x6b3   :  { %16818 = vst [vmem:[#allocation68_spill] sm:$0xff] %v15135_v55  ;;  %v15139_v51 = vadd.f32 %v6264_v50, %v16819_v5  ;;  %v15142_v43 = vadd.f32 %v6266_v58, %v16820_v53  ;;  %v15144_v28 = vpop.eup %11742  ;;  %11762 = vtanh.f32 %v6507_v59  ;;  %v6519_v36 = vadd.f32 %v6267_v0, %v14437_v54  ;;  %v16825_v53 = vld [vmem:[#allocation70_spill] sm:$0xff] }
 0x6b4   :  { %16821 = vst [vmem:[#allocation67_spill] sm:$0xff] %v15144_v28  ;;  %v15148_v29 = vadd.f32 %v6268_v18, %v16822_v2  ;;  %v6185_v11 = vrot.slane %v6171_v21, %v13546_v10  ;;  %v15151_v8 = vpop.eup %11744  ;;  %11764 = vtanh.f32 %v6492_v19  ;;  %v6186_v17 = vcombine.high %v6178_v30, %v6178_v30  ;;  %v16826_v2 = vld [vmem:[#allocation88_spill] sm:$0xff]  ;;  %v16828_v28 = vld [vmem:[#allocation83_spill] sm:$0xff] }
 0x6b5   :  { %16823 = vst [vmem:[#allocation59_spill] sm:$0xff] %v15151_v8  ;;  %v6194_v52 = vrot.slane %v6178_v30, %v13546_v10  ;;  %v6318_v5 = vcombine.high %v14915_v38, %v14915_v38  ;;  %v15156_v50 = vpop.eup %11746  ;;  %11766 = vtanh.f32 %v6493_v15  ;;  %v6325_v18 = vrot.slane %v14915_v38, %v13546_v10  ;;  %v16827_v8 = vld [vmem:[#allocation71_spill] sm:$0xff] }
 0x6b6   :  { %16824 = vst [vmem:[#allocation60_spill] sm:$0xff] %v15156_v50  ;;  %v6187_v59 = vcombine.high %v6185_v11, %v6185_v11  ;;  %v6201_v54 = vrot.slane %v6185_v11, %v13546_v10  ;;  %v15161_v46 = vpop.eup %11748  ;;  %11768 = vtanh.f32 %v6494_v26  ;;  %v6208_v19 = vrot.slane %v6186_v17, %v13546_v10 }
 0x6b7   :  { %v6216_v21 = vcombine.high %v6194_v52, %v6194_v52  ;;  %v15165_v30 = vadd.f32 %v6194_v52, %v16825_v53  ;;  %v15167_v58 = vpop.eup %11750  ;;  %11770 = vtanh.f32 %v6495_v22  ;;  %v6989_v50 = vpop.f32.mrb[34].mxu0 }
 0x6b8   :  { %v6215_v15 = vrot.slane %v6187_v59, %v13546_v10  ;;  %v6217_v0 = vcombine.high %v6201_v54, %v6201_v54  ;;  %v15171_v11 = vadd.f32 %v6201_v54, %v16826_v2  ;;  %v15173_v38 = vpop.eup %11752  ;;  %11772 = vtanh.f32 %v6496_v7  ;;  %v10640_v53 = vpop.f32.mrb[35].mxu0  ;;  %v16829_v59 = vld [vmem:[#allocation89_spill] sm:$0xff]  ;;  %v16830_v2 = vld [vmem:[#allocation92_spill] sm:$0xff] }
 0x6b9   :  { %v6218_v26 = vcombine.high %v6208_v19, %v6208_v19  ;;  %v15176_v17 = vadd.f32 %v6208_v19, %v16827_v8  ;;  %v15179_v52 = vadd.f32 %v6216_v21, %v16828_v28  ;;  %v15181_v55 = vpop.eup %11754  ;;  %11774 = vtanh.f32 %v15104_v23  ;;  %v16831_v8 = vld [vmem:[#allocation86_spill] sm:$0xff]  ;;  %v16832_v23 = vld [vmem:[#allocation87_spill] sm:$0xff] }
 0x6ba   :  { %v6219_v22 = vcombine.high %v6215_v15, %v6215_v15  ;;  %v15185_v54 = vadd.f32 %v6215_v15, %v16829_v59  ;;  %v15188_v32 = vadd.f32 %v6217_v0, %v16830_v2  ;;  %v15190_v7 = vpop.eup %11756  ;;  %11776 = vtanh.f32 %v15107_v16 }
 0x6bb   :  { %v15194_v19 = vadd.f32 %v6218_v26, %v16831_v8  ;;  %v6332_v28 = vrot.slane %v6318_v5, %v13546_v10  ;;  %v6333_v21 = vcombine.high %v6325_v18, %v6325_v18  ;;  %v15197_v53 = vpop.eup %11758  ;;  %11778 = vtanh.f32 %v15110_v34 }
 0x6bc   :  { %v15201_v15 = vadd.f32 %v6219_v22, %v16832_v23  ;;  %v6340_v0 = vrot.slane %v6325_v18, %v13546_v10  ;;  %v6269_v59 = vcombine.high %v14924_v39, %v14924_v39  ;;  %v15206_v2 = vpop.eup %11760  ;;  %11780 = vtanh.f32 %v6516_v6 }
 0x6bd   :  { %16833 = vst [vmem:[#allocation69_spill] sm:$0xff] %v15206_v2  ;;  %v6347_v16 = vrot.slane %v6332_v28, %v13546_v10  ;;  %v6354_v5 = vrot.slane %v6333_v21, %v13546_v10  ;;  %v6276_v26 = vrot.slane %v14924_v39, %v13546_v10  ;;  %v15212_v8 = vpop.eup %11762  ;;  %11782 = vtanh.f32 %v6517_v44  ;;  %v16838_v44 = vld [vmem:[#allocation101_spill] sm:$0xff] }
 0x6be   :  { %16834 = vst [vmem:[#allocation72_spill] sm:$0xff] %v15212_v8  ;;  %v6355_v34 = vcombine.high %v6340_v0, %v6340_v0  ;;  %v15215_v22 = vadd.f32 %v6340_v0, %v14595_v1  ;;  %v6283_v18 = vrot.slane %v6269_v59, %v13546_v10  ;;  %v15218_v23 = vpop.eup %11764  ;;  %11784 = vtanh.f32 %v6518_v61  ;;  %v16840_v61 = vld [vmem:[#allocation93_spill] sm:$0xff] }
 0x6bf   :  { %16835 = vst [vmem:[#allocation74_spill] sm:$0xff] %v15218_v23  ;;  %v6356_v6 = vcombine.high %v6354_v5, %v6354_v5  ;;  %v15221_v28 = vadd.f32 %v6354_v5, %v16836_v27  ;;  %v15224_v21 = vadd.f32 %v6347_v16, %v14534_v14  ;;  %v15226_v39 = vpop.eup %11766  ;;  %11786 = vtanh.f32 %v6519_v36 }
 0x6c0   :  { %16837 = vst [vmem:[#allocation76_spill] sm:$0xff] %v15226_v39  ;;  %v15229_v62 = vadd.f32 %v6355_v34, %v16838_v44  ;;  %v6284_v1 = vcombine.high %v6276_v26, %v6276_v26  ;;  %v6285_v0 = vcombine.high %v6283_v18, %v6283_v18  ;;  %v15231_v8 = vpop.eup %11768  ;;  %11788 = vtanh.f32 %v15130_v49  ;;  %v16842_v44 = vld [vmem:[#allocation51_spill] sm:$0xff] }
 0x6c1   :  { %16839 = vst [vmem:[#allocation78_spill] sm:$0xff] %v15231_v8  ;;  %v15235_v59 = vadd.f32 %v6356_v6, %v16840_v61  ;;  %v6292_v27 = vrot.slane %v6276_v26, %v13546_v10  ;;  %v6299_v14 = vrot.slane %v6283_v18, %v13546_v10  ;;  %v7353_v16 = vpop.f32.mrb[26].mxu1  ;;  %v15239_v5 = vpop.eup %11770  ;;  %11790 = vtanh.f32 %v15139_v51  ;;  %v16844_v18 = vld [vmem:[#allocation85_spill] sm:$0xff] }
 0x6c2   :  { %16841 = vst [vmem:[#allocation73_spill] sm:$0xff] %v15239_v5  ;;  %v6306_v36 = vrot.slane %v6284_v1, %v13546_v10  ;;  %v6313_v34 = vrot.slane %v6285_v0, %v13546_v10  ;;  %v15245_v8 = vadd.f32 %v6989_v50, %v16842_v44  ;;  %v10655_v49 = vpop.f32.mrb[27].mxu1  ;;  %v15247_v39 = vpop.eup %11772  ;;  %11792 = vtanh.f32 %v15142_v43  ;;  %v16846_v0 = vld [vmem:[#allocation82_spill] sm:$0xff] }
 0x6c3   :  { %16843 = vst [vmem:[#allocation90_spill] sm:$0xff] %v15247_v39  ;;  %v6314_v26 = vcombine.high %v6292_v27, %v6292_v27  ;;  %v6315_v6 = vcombine.high %v6299_v14, %v6299_v14  ;;  %v15251_v61 = vadd.f32 %v6292_v27, %v16844_v18  ;;  %v15253_v5 = vpop.eup %11774  ;;  %11794 = vtanh.f32 %v15148_v29  ;;  %v16848_v44 = vld [vmem:[#allocation94_spill] sm:$0xff]  ;;  %v16849_v49 = vld [vmem:[#allocation97_spill] sm:$0xff]  ;;  %v16851_v29 = vld [vmem:[#allocation95_spill] sm:$0xff] }
 0x6c4   :  { %16845 = vst [vmem:[#allocation80_spill] sm:$0xff] %v15253_v5  ;;  %v6316_v51 = vcombine.high %v6306_v36, %v6306_v36  ;;  %v6317_v1 = vcombine.high %v6313_v34, %v6313_v34  ;;  %v15257_v23 = vadd.f32 %v6306_v36, %v16846_v0  ;;  %v15259_v50 = vpop.eup %11776  ;;  %11796 = vtanh.f32 %v15165_v30  ;;  %v16850_v27 = vld [vmem:[#allocation98_spill] sm:$0xff]  ;;  %v16852_v0 = vld [vmem:[#allocation100_spill] sm:$0xff] }
 0x6c5   :  { %16847 = vst [vmem:[#allocation91_spill] sm:$0xff] %v15259_v50  ;;  %v15263_v43 = vadd.f32 %v6314_v26, %v16848_v44  ;;  %v15266_v39 = vadd.f32 %v6299_v14, %v16849_v49  ;;  %v15269_v18 = vadd.f32 %v6313_v34, %v16850_v27  ;;  %v15271_v5 = vpop.eup %11778  ;;  %11798 = vtanh.f32 %v15176_v17  ;;  %v16853_v30 = vld [vmem:[#allocation96_spill] sm:$0xff] }
 0x6c6   :  { %v15275_v36 = vadd.f32 %v6316_v51, %v16851_v29  ;;  %v15278_v50 = vadd.f32 %v6315_v6, %v16852_v0  ;;  %v15281_v2 = vadd.f32 %v6317_v1, %v16853_v30  ;;  %v15283_v26 = vpop.eup %11780  ;;  %11800 = vtanh.f32 %v15179_v52  ;;  %v16854_v14 = vld [vmem:[#allocation48_spill] sm:$0xff] }
 0x6c7   :  { %v15287_v34 = vadd.f32 %v16854_v14, %v7353_v16  ;;  %v7433_v44 = vmul.f32 %v14907_v24, %v14806_v33  ;;  %v7434_v17 = vmul.f32 %v14912_v42, %v14818_v12  ;;  %v15293_v51 = vpop.eup %11782  ;;  %11802 = vtanh.f32 %v15194_v19  ;;  %v16855_v19 = vld [vmem:[#allocation36_spill] sm:$0xff]  ;;  %v16856_v14 = vld [vmem:[#allocation37_spill] sm:$0xff] }
 0x6c8   :  { %v7435_v6 = vmul.f32 %v14917_v20, %v14837_v3  ;;  %v7436_v1 = vmul.f32 %v14926_v35, %v14847_v31  ;;  %v7437_v52 = vmul.f32 %v14932_v41, %v14809_v60  ;;  %v15302_v16 = vpop.eup %11784  ;;  %11804 = vtanh.f32 %v15171_v11 }
 0x6c9   :  { %v7438_v24 = vmul.f32 %v14939_v9, %v14827_v48  ;;  %v7439_v42 = vmul.f32 %v14945_v37, %v14841_v25  ;;  %v7440_v49 = vmul.f32 %v16855_v19, %v14853_v56  ;;  %v15311_v20 = vpop.eup %11786  ;;  %11806 = vtanh.f32 %v15185_v54 }
 0x6ca   :  { %v7654_v35 = vcombine.low %v7433_v44, %v7434_v17  ;;  %v7655_v27 = vcombine.low %v7435_v6, %v7436_v1  ;;  %v7425_v41 = vmul.f32 %v14954_v47, %v14806_v33  ;;  %v15316_v11 = vpop.eup %11788  ;;  %11808 = vtanh.f32 %v15188_v32 }
 0x6cb   :  { %v7656_v9 = vcombine.low %v7437_v52, %v7438_v24  ;;  %v7657_v29 = vcombine.low %v7439_v42, %v7440_v49  ;;  %v7426_v37 = vmul.f32 %v14961_v57, %v14818_v12  ;;  %v15321_v0 = vpop.eup %11790  ;;  %11810 = vtanh.f32 %v15201_v15  ;;  %v16857_v57 = vld [vmem:[#allocation38_spill] sm:$0xff]  ;;  %v16858_v52 = vld [vmem:[#allocation41_spill] sm:$0xff] }
 0x6cc   :  { %v7664_v54 = vrot.slane %v7654_v35, %v13546_v10  ;;  %v7671_v30 = vrot.slane %v7655_v27, %v13546_v10  ;;  %v7427_v47 = vmul.f32 %v16856_v14, %v14837_v3  ;;  %v15328_v44 = vpop.eup %11792  ;;  %11812 = vtanh.f32 %v15215_v22  ;;  %v16859_v42 = vld [vmem:[#allocation42_spill] sm:$0xff] }
 0x6cd   :  { %v7678_v32 = vrot.slane %v7656_v9, %v13546_v10  ;;  %v7685_v17 = vrot.slane %v7657_v29, %v13546_v10  ;;  %v7428_v6 = vmul.f32 %v16857_v57, %v14847_v31  ;;  %v15335_v1 = vpop.eup %11794  ;;  %11814 = vtanh.f32 %v15221_v28 }
 0x6ce   :  { %v7686_v15 = vcombine.low %v7664_v54, %v7671_v30  ;;  %v7429_v24 = vmul.f32 %v16858_v52, %v14809_v60  ;;  %v7430_v19 = vmul.f32 %v16859_v42, %v14827_v48  ;;  %v15342_v49 = vpop.eup %11796  ;;  %11816 = vtanh.f32 %v15229_v62 }
 0x6cf   :  { %v7687_v22 = vcombine.low %v7678_v32, %v7685_v17  ;;  %v7431_v35 = vmul.f32 %v14994_v63, %v14841_v25  ;;  %v7432_v27 = vmul.f32 %v14998_v40, %v14853_v56  ;;  %v15349_v9 = vpop.eup %11798  ;;  %11818 = vtanh.f32 %v15235_v59  ;;  %v16860_v17 = vld [vmem:[#allocation45_spill] sm:$0xff] }
 0x6d0   :  { %v7694_v28 = vrot.slane %v7686_v15, %v13546_v10  ;;  %v7605_v29 = vcombine.low %v7425_v41, %v7426_v37  ;;  %v7606_v54 = vcombine.low %v7427_v47, %v7428_v6  ;;  %v15353_v30 = vpop.eup %11800  ;;  %11820 = vtanh.f32 %v15224_v21  ;;  %v16861_v15 = vld [vmem:[#allocation43_spill] sm:$0xff] }
 0x6d1   :  { %v7701_v62 = vrot.slane %v7687_v22, %v13546_v10  ;;  %v7607_v14 = vcombine.low %v7429_v24, %v7430_v19  ;;  %v7608_v32 = vcombine.low %v7431_v35, %v7432_v27  ;;  %v15357_v63 = vpop.eup %11802  ;;  %11822 = vtanh.f32 %v15251_v61  ;;  %v16862_v24 = vld [vmem:[#allocation46_spill] sm:$0xff]  ;;  %v16863_v35 = vld [vmem:[#allocation44_spill] sm:$0xff] }
 0x6d2   :  { %v7615_v40 = vrot.slane %v7605_v29, %v13546_v10  ;;  %v7622_v59 = vrot.slane %v7606_v54, %v13546_v10  ;;  %v7449_v41 = vmul.f32 %v16860_v17, %v14806_v33  ;;  %v15364_v37 = vpop.eup %11804  ;;  %11824 = vtanh.f32 %v15257_v23  ;;  %v16864_v29 = vld [vmem:[#allocation49_spill] sm:$0xff] }
 0x6d3   :  { %v7702_v21 = vcombine.low %v7694_v28, %v7701_v62  ;;  %v7629_v47 = vrot.slane %v7607_v14, %v13546_v10  ;;  %v7636_v57 = vrot.slane %v7608_v32, %v13546_v10  ;;  %v15369_v6 = vpop.eup %11806  ;;  %11826 = vtanh.f32 %v15263_v43  ;;  %v16865_v62 = vld [vmem:[#allocation47_spill] sm:$0xff] }
 0x6d4   :  { %v7637_v61 = vcombine.low %v7615_v40, %v7622_v59  ;;  %v7450_v52 = vmul.f32 %v16861_v15, %v14818_v12  ;;  %v7451_v42 = vmul.f32 %v16862_v24, %v14837_v3  ;;  %v15376_v19 = vpop.eup %11808  ;;  %11828 = vtanh.f32 %v15275_v36  ;;  %v16866_v40 = vld [vmem:[#allocation50_spill] sm:$0xff] }
 0x6d5   :  { %v8189_v23 = vsel %vm8185_vm6, %v7702_v21, 0.0  ;;  %v7638_v22 = vcombine.low %v7629_v47, %v7636_v57  ;;  %v7452_v27 = vmul.f32 %v16863_v35, %v14847_v31  ;;  %v15382_v28 = vpop.eup %11810  ;;  %11830 = vtanh.f32 %v15266_v39  ;;  %v16867_v39 = vld [vmem:[#allocation52_spill] sm:$0xff] }
 0x6d6   :  { %8190 = vadd.xlane.f32.xlu0 %v8189_v23  ;;  %v7645_v43 = vrot.slane %v7637_v61, %v13546_v10  ;;  %v7453_v54 = vmul.f32 %v16864_v29, %v14809_v60  ;;  %v7454_v14 = vmul.f32 %v16865_v62, %v14827_v48  ;;  %v15390_v36 = vpop.eup %11812  ;;  %11832 = vtanh.f32 %v15269_v18  ;;  %v16868_v23 = vld [vmem:[#allocation53_spill] sm:$0xff]  ;;  %v16870_v62 = vld [vmem:[#allocation55_spill] sm:$0xff] }
 0x6d7   :  { %v7652_v32 = vrot.slane %v7638_v22, %v13546_v10  ;;  %v7455_v59 = vmul.f32 %v16866_v40, %v14841_v25  ;;  %v7456_v17 = vmul.f32 %v16867_v39, %v14853_v56  ;;  %v15398_v21 = vpop.eup %11814  ;;  %11834 = vtanh.f32 %v15278_v50 }
 0x6d8   :  { %v7752_v47 = vcombine.low %v7449_v41, %v7450_v52  ;;  %v7753_v57 = vcombine.low %v7451_v42, %v7452_v27  ;;  %v7754_v61 = vcombine.low %v7453_v54, %v7454_v14  ;;  %v15401_v15 = vpop.eup %11816  ;;  %11836 = vtanh.f32 %v15281_v2  ;;  %v16869_v27 = vld [vmem:[#allocation54_spill] sm:$0xff] }
 0x6d9   :  { %v7653_v18 = vcombine.low %v7645_v43, %v7652_v32  ;;  %v7755_v24 = vcombine.low %v7455_v59, %v7456_v17  ;;  %v7441_v22 = vmul.f32 %v16868_v23, %v14806_v33  ;;  %v15406_v35 = vpop.eup %11818  ;;  %11838 = vtanh.f32 %v15245_v8  ;;  %v16871_v17 = vld [vmem:[#allocation56_spill] sm:$0xff] }
 0x6da   :  { %v7762_v29 = vrot.slane %v7752_v47, %v13546_v10  ;;  %v7769_v50 = vrot.slane %v7753_v57, %v13546_v10  ;;  %v7776_v41 = vrot.slane %v7754_v61, %v13546_v10  ;;  %v15412_v52 = vpop.eup %11820  ;;  %11840 = vtanh.f32 %v15287_v34  ;;  %v16872_v57 = vld [vmem:[#allocation58_spill] sm:$0xff] }
 0x6db   :  { %v8186_v2 = vsel %vm8185_vm6, %v7653_v18, 0.0  ;;  %v7783_v42 = vrot.slane %v7755_v24, %v13546_v10  ;;  %v7442_v43 = vmul.f32 %v16869_v27, %v14818_v12  ;;  %v15419_v54 = vpop.eup %11822  ;;  %v7443_v14 = vmul.f32 %v16870_v62, %v14837_v3 }
 0x6dc   :  { %8187 = vadd.xlane.f32.xlu0 %v8186_v2  ;;  %v7784_v8 = vcombine.low %v7762_v29, %v7769_v50  ;;  %v7444_v32 = vmul.f32 %v15066_v4, %v14847_v31  ;;  %v7445_v34 = vmul.f32 %v15069_v45, %v14809_v60  ;;  %v15427_v40 = vpop.eup %11824  ;;  %v7446_v39 = vmul.f32 %v15074_v13, %v14827_v48 }
 0x6dd   :  { %v7785_v59 = vcombine.low %v7776_v41, %v7783_v42  ;;  %v7447_v47 = vmul.f32 %v16871_v17, %v14841_v25  ;;  %v7448_v61 = vmul.f32 %v16872_v57, %v14853_v56  ;;  %v15435_v18 = vpop.eup %11826  ;;  %v7703_v4 = vcombine.low %v7441_v22, %v7442_v43 }
 0x6de   :  { %v7792_v24 = vrot.slane %v7784_v8, %v13546_v10  ;;  %v7704_v23 = vcombine.low %v7443_v14, %v7444_v32  ;;  %v7478_v45 = vmul.f32 %v15161_v46, %v14806_v33  ;;  %v15440_v29 = vpop.eup %11828  ;;  %v7705_v13 = vcombine.low %v7445_v34, %v7446_v39 }
 0x6df   :  { %v7799_v50 = vrot.slane %v7785_v59, %v13546_v10  ;;  %v7706_v41 = vcombine.low %v7447_v47, %v7448_v61  ;;  %v7479_v2 = vmul.f32 %v15167_v58, %v14818_v12  ;;  %v15445_v42 = vpop.eup %11830  ;;  %v7713_v27 = vrot.slane %v7703_v4, %v13546_v10 }
 0x6e0   :  { %v7720_v8 = vrot.slane %v7704_v23, %v13546_v10  ;;  %v7480_v22 = vmul.f32 %v15173_v38, %v14837_v3  ;;  %v7481_v46 = vmul.f32 %v15181_v55, %v14847_v31  ;;  %v15453_v43 = vpop.eup %11832  ;;  %v7727_v14 = vrot.slane %v7705_v13, %v13546_v10  ;;  %v16873_v38 = vld [vmem:[#allocation69_spill] sm:$0xff]  ;;  %v16874_v55 = vld [vmem:[#allocation72_spill] sm:$0xff] }
 0x6e1   :  { %v7800_v62 = vcombine.low %v7792_v24, %v7799_v50  ;;  %v7734_v32 = vrot.slane %v7706_v41, %v13546_v10  ;;  %v7482_v58 = vmul.f32 %v15190_v7, %v14809_v60  ;;  %v15459_v34 = vpop.eup %11834  ;;  %v7483_v39 = vmul.f32 %v15197_v53, %v14827_v48  ;;  %v16875_v41 = vld [vmem:[#allocation75_spill] sm:$0xff] }
 0x6e2   :  { %v7735_v59 = vcombine.low %v7713_v27, %v7720_v8  ;;  %v7484_v17 = vmul.f32 %v16873_v38, %v14841_v25  ;;  %v7485_v47 = vmul.f32 %v16874_v55, %v14853_v56  ;;  %v15467_v57 = vpop.eup %11836  ;;  %v7938_v4 = vcombine.low %v7478_v45, %v7479_v2  ;;  %v16877_v45 = vld [vmem:[#allocation65_spill] sm:$0xff] }
 0x6e3   :  { %v8195_v61 = vsel %vm8185_vm6, %v7800_v62, 0.0  ;;  %v7736_v24 = vcombine.low %v7727_v14, %v7734_v32  ;;  %v7939_v23 = vcombine.low %v7480_v22, %v7481_v46  ;;  %v15470_v7 = vpop.eup %11838  ;;  %v7940_v13 = vcombine.low %v7482_v58, %v7483_v39  ;;  %v16878_v14 = vld [vmem:[#allocation77_spill] sm:$0xff]  ;;  %v16879_v58 = vld [vmem:[#allocation66_spill] sm:$0xff] }
 0x6e4   :  { %8196 = vadd.xlane.f32.xlu0 %v8195_v61  ;;  %v7743_v50 = vrot.slane %v7735_v59, %v13546_v10  ;;  %v7941_v53 = vcombine.low %v7484_v17, %v7485_v47  ;;  %v7457_v27 = vmul.f32 %v16875_v41, %v14806_v33  ;;  %v15475_v8 = vpop.eup %11840  ;;  %v7948_v55 = vrot.slane %v7938_v4, %v13546_v10  ;;  %v16880_v47 = vld [vmem:[#allocation68_spill] sm:$0xff]  ;;  %v16882_v41 = vld [vmem:[#allocation59_spill] sm:$0xff] }
 0x6e5   :  { %16876 = vst [vmem:[#allocation81_spill] sm:$0xff] %v15475_v8  ;;  %v7750_v38 = vrot.slane %v7736_v24, %v13546_v10  ;;  %v7955_v62 = vrot.slane %v7939_v23, %v13546_v10  ;;  %v7458_v2 = vmul.f32 %v16877_v45, %v14818_v12  ;;  %v7962_v22 = vrot.slane %v7940_v13, %v13546_v10  ;;  %v16881_v24 = vld [vmem:[#allocation67_spill] sm:$0xff] }
 0x6e6   :  { %v7969_v46 = vrot.slane %v7941_v53, %v13546_v10  ;;  %v7459_v32 = vmul.f32 %v16878_v14, %v14837_v3  ;;  %v7460_v59 = vmul.f32 %v16879_v58, %v14847_v31  ;;  %v7461_v61 = vmul.f32 %v16880_v47, %v14809_v60  ;;  %v16883_v53 = vld [vmem:[#allocation60_spill] sm:$0xff] }
 0x6e7   :  { %v7751_v39 = vcombine.low %v7743_v50, %v7750_v38  ;;  %v7970_v17 = vcombine.low %v7948_v55, %v7955_v62  ;;  %v7462_v4 = vmul.f32 %v16881_v24, %v14827_v48  ;;  %v7463_v13 = vmul.f32 %v16882_v41, %v14841_v25 }
 0x6e8   :  { %v7971_v23 = vcombine.low %v7962_v22, %v7969_v46  ;;  %v7464_v45 = vmul.f32 %v16883_v53, %v14853_v56  ;;  %v7801_v8 = vcombine.low %v7457_v27, %v7458_v2  ;;  %v7802_v50 = vcombine.low %v7459_v32, %v7460_v59  ;;  %v16884_v22 = vld [vmem:[#allocation74_spill] sm:$0xff]  ;;  %v16885_v27 = vld [vmem:[#allocation76_spill] sm:$0xff] }
 0x6e9   :  { %v8192_v14 = vsel %vm8185_vm6, %v7751_v39, 0.0  ;;  %v7978_v58 = vrot.slane %v7970_v17, %v13546_v10  ;;  %v7803_v38 = vcombine.low %v7461_v61, %v7462_v4  ;;  %v7470_v46 = vmul.f32 %v16884_v22, %v14806_v33  ;;  %v16886_v39 = vld [vmem:[#allocation78_spill] sm:$0xff]  ;;  %v16887_v61 = vld [vmem:[#allocation73_spill] sm:$0xff]  ;;  %v16889_v53 = vld [vmem:[#allocation80_spill] sm:$0xff] }
 0x6ea   :  { %8193 = vadd.xlane.f32.xlu0 %v8192_v14  ;;  %v7985_v55 = vrot.slane %v7971_v23, %v13546_v10  ;;  %v7804_v62 = vcombine.low %v7463_v13, %v7464_v45  ;;  %v7811_v47 = vrot.slane %v7801_v8, %v13546_v10  ;;  %v7818_v24 = vrot.slane %v7802_v50, %v13546_v10  ;;  %v16888_v8 = vld [vmem:[#allocation90_spill] sm:$0xff]  ;;  %v16890_v14 = vld [vmem:[#allocation91_spill] sm:$0xff] }
 0x6eb   :  { %v7825_v41 = vrot.slane %v7803_v38, %v13546_v10  ;;  %v7471_v2 = vmul.f32 %v16885_v27, %v14818_v12  ;;  %v7472_v32 = vmul.f32 %v16886_v39, %v14837_v3  ;;  %v7473_v4 = vmul.f32 %v16887_v61, %v14847_v31 }
 0x6ec   :  { %v7986_v59 = vcombine.low %v7978_v58, %v7985_v55  ;;  %v7832_v17 = vrot.slane %v7804_v62, %v13546_v10  ;;  %v7474_v23 = vmul.f32 %v16888_v8, %v14809_v60  ;;  %v7833_v13 = vcombine.low %v7811_v47, %v7818_v24  ;;  %v16891_v47 = vld [vmem:[#allocation61_spill] sm:$0xff] }
 0x6ed   :  { %v7475_v45 = vmul.f32 %v16889_v53, %v14827_v48  ;;  %v7476_v50 = vmul.f32 %v16890_v14, %v14841_v25  ;;  %v7477_v38 = vmul.f32 %v15271_v5, %v14853_v56  ;;  %v7889_v62 = vcombine.low %v7470_v46, %v7471_v2  ;;  %v16892_v5 = vld [vmem:[#allocation62_spill] sm:$0xff]  ;;  %v16893_v2 = vld [vmem:[#allocation63_spill] sm:$0xff] }
 0x6ee   :  { %v8208_v58 = vsel %vm8185_vm6, %v7986_v59, 0.0  ;;  %v7834_v55 = vcombine.low %v7825_v41, %v7832_v17  ;;  %v7890_v22 = vcombine.low %v7472_v32, %v7473_v4  ;;  %v7841_v27 = vrot.slane %v7833_v13, %v13546_v10  ;;  %v16894_v17 = vld [vmem:[#allocation64_spill] sm:$0xff] }
 0x6ef   :  { %8209 = vadd.xlane.f32.xlu1 %v8208_v58  ;;  %v7891_v39 = vcombine.low %v7474_v23, %v7475_v45  ;;  %v7892_v61 = vcombine.low %v7476_v50, %v7477_v38  ;;  %v7465_v24 = vmul.f32 %v16891_v47, %v14806_v33  ;;  %v7899_v53 = vrot.slane %v7889_v62, %v13546_v10  ;;  %v16895_v45 = vld [vmem:[#allocation57_spill] sm:$0xff] }
 0x6f0   :  { %v7848_v8 = vrot.slane %v7834_v55, %v13546_v10  ;;  %v7906_v14 = vrot.slane %v7890_v22, %v13546_v10  ;;  %v7466_v59 = vmul.f32 %v16892_v5, %v14818_v12  ;;  %v7467_v32 = vmul.f32 %v16893_v2, %v14837_v3 }
 0x6f1   :  { %v7913_v46 = vrot.slane %v7891_v39, %v13546_v10  ;;  %v7920_v41 = vrot.slane %v7892_v61, %v13546_v10  ;;  %v7468_v4 = vmul.f32 %v16894_v17, %v14847_v31  ;;  %v7469_v50 = vmul.f32 %v16895_v45, %v14809_v60 }
 0x6f2   :  { %v7849_v23 = vcombine.low %v7841_v27, %v7848_v8  ;;  %v7921_v13 = vcombine.low %v7899_v53, %v7906_v14  ;;  %v7850_v38 = vcombine.low %v7465_v24, %v7466_v59  ;;  %v7494_v62 = vmul.f32 %v15283_v26, %v14806_v33 }
 0x6f3   :  { %v7922_v58 = vcombine.low %v7913_v46, %v7920_v41  ;;  %v7851_v55 = vcombine.low %v7467_v32, %v7468_v4  ;;  %v7495_v22 = vmul.f32 %v15293_v51, %v14818_v12  ;;  %v7872_v47 = vrot.slane %v7469_v50, %v13546_v10  ;;  %v15550_v51 = vld [vmem:[#allocation13] ss:$0 sm:$0xff] }
 0x6f4   :  { %v8198_v39 = vsel %vm8185_vm6, %v7849_v23, 0.0  ;;  %v7929_v61 = vrot.slane %v7921_v13, %v13546_v10  ;;  %v7858_v27 = vrot.slane %v7850_v38, %v13546_v10  ;;  %v7496_v53 = vmul.f32 %v15302_v16, %v14837_v3 }
 0x6f5   :  { %8199 = vadd.xlane.f32.xlu0 %v8198_v39  ;;  %v7936_v24 = vrot.slane %v7922_v58, %v13546_v10  ;;  %v7865_v8 = vrot.slane %v7851_v55, %v13546_v10  ;;  %v7497_v26 = vmul.f32 %v15311_v20, %v14847_v31  ;;  %v7887_v14 = vrot.slane %v7872_v47, %v13546_v10 }
 0x6f6   :  { %v7498_v5 = vmul.f32 %v15316_v11, %v14809_v60  ;;  %v7499_v59 = vmul.f32 %v15321_v0, %v14827_v48  ;;  %v7500_v46 = vmul.f32 %v15328_v44, %v14841_v25  ;;  %v7501_v16 = vmul.f32 %v15335_v1, %v14853_v56 }
 0x6f7   :  { %v7937_v41 = vcombine.low %v7929_v61, %v7936_v24  ;;  %v7873_v2 = vcombine.low %v7858_v27, %v7865_v8  ;;  %v8036_v32 = vcombine.low %v7494_v62, %v7495_v22  ;;  %v8037_v20 = vcombine.low %v7496_v53, %v7497_v26 }
 0x6f8   :  { %v8038_v17 = vcombine.low %v7498_v5, %v7499_v59  ;;  %v8229_v4 = vmul.f32 %v15470_v7, %v15550_v51  ;;  %v7486_v11 = vmul.f32 %v15342_v49, %v14806_v33  ;;  %v8039_v13 = vcombine.low %v7500_v46, %v7501_v16 }
 0x6f9   :  { %v8205_v23 = vsel %vm8185_vm6, %v7937_v41, 0.0  ;;  %v7880_v0 = vrot.slane %v7873_v2, %v13546_v10  ;;  %v8046_v44 = vrot.slane %v8036_v32, %v13546_v10  ;;  %v8053_v45 = vrot.slane %v8037_v20, %v13546_v10 }
 0x6fa   :  { %8206 = vadd.xlane.f32.xlu1 %v8205_v23  ;;  %v8060_v1 = vrot.slane %v8038_v17, %v13546_v10  ;;  %v8231_v50 = vsel %vm8185_vm6, %v8229_v4, 0.0  ;;  %v7487_v7 = vmul.f32 %v15349_v9, %v14818_v12  ;;  %v8067_v49 = vrot.slane %v8039_v13, %v13546_v10 }
 0x6fb   :  { %v7888_v38 = vcombine.low %v7880_v0, %v7887_v14  ;;  %v7488_v58 = vmul.f32 %v15353_v30, %v14837_v3  ;;  %v7489_v55 = vmul.f32 %v15357_v63, %v14847_v31  ;;  %v8068_v62 = vcombine.low %v8046_v44, %v8053_v45 }
 0x6fc   :  { %v7490_v22 = vmul.f32 %v15364_v37, %v14809_v60  ;;  %v7491_v39 = vmul.f32 %v15369_v6, %v14827_v48  ;;  %v7492_v61 = vmul.f32 %v15376_v19, %v14841_v25  ;;  %v8069_v27 = vcombine.low %v8060_v1, %v8067_v49  ;;  %v16896_v1 = vld [vmem:[#allocation81_spill] sm:$0xff] }
 0x6fd   :  { %v8202_v9 = vsel %vm8201_vm7, %v7888_v38, 0.0  ;;  %v7493_v47 = vmul.f32 %v15382_v28, %v14853_v56  ;;  %v7987_v30 = vcombine.low %v7486_v11, %v7487_v7  ;;  %v8076_v63 = vrot.slane %v8068_v62, %v13546_v10 }
 0x6fe   :  { %8203 = vadd.xlane.f32.xlu0 %v8202_v9  ;;  %v7988_v24 = vcombine.low %v7488_v58, %v7489_v55  ;;  %v7989_v8 = vcombine.low %v7490_v22, %v7491_v39  ;;  %v7502_v37 = vmul.f32 %v15419_v54, %v14806_v33  ;;  %v8083_v6 = vrot.slane %v8069_v27, %v13546_v10 }
 0x6ff   :  { %v7990_v53 = vcombine.low %v7492_v61, %v7493_v47  ;;  %v7997_v19 = vrot.slane %v7987_v30, %v13546_v10  ;;  %v7503_v26 = vmul.f32 %v15427_v40, %v14818_v12  ;;  %v7504_v5 = vmul.f32 %v15435_v18, %v14837_v3 }
 0x700   :  { %v8004_v14 = vrot.slane %v7988_v24, %v13546_v10  ;;  %v8011_v28 = vrot.slane %v7989_v8, %v13546_v10  ;;  %v7505_v59 = vmul.f32 %v15440_v29, %v14847_v31  ;;  %v8084_v46 = vcombine.low %v8076_v63, %v8083_v6  ;;  %v16898_v6 = vld [vmem:[#allocation33_spill] sm:$0xff] }
 0x701   :  { %v8018_v54 = vrot.slane %v7990_v53, %v13546_v10  ;;  %v7506_v41 = vmul.f32 %v15445_v42, %v14809_v60  ;;  %v7507_v2 = vmul.f32 %v15453_v43, %v14827_v48  ;;  %v7508_v16 = vmul.f32 %v15459_v34, %v14841_v25 }
 0x702   :  { %8232 = vadd.xlane.f32.xlu0 %v8231_v50  ;;  %v8019_v40 = vcombine.low %v7997_v19, %v8004_v14  ;;  %v7509_v18 = vmul.f32 %v15467_v57, %v14853_v56  ;;  %v8085_v32 = vcombine.low %v7502_v37, %v7503_v26  ;;  %v8214_v29 = vsel %vm8185_vm6, %v8084_v46, 0.0 }
 0x703   :  { %v8020_v20 = vcombine.low %v8011_v28, %v8018_v54  ;;  %v8086_v17 = vcombine.low %v7504_v5, %v7505_v59  ;;  %v8087_v4 = vcombine.low %v7506_v41, %v7507_v2  ;;  %8215 = vadd.xlane.f32.xlu1 %v8214_v29  ;;  %v7510_v43 = vmul.f32 %v15390_v36, %v14806_v33 }
 0x704   :  { %v8027_v42 = vrot.slane %v8019_v40, %v13546_v10  ;;  %v8088_v11 = vcombine.low %v7508_v16, %v7509_v18  ;;  %v8095_v48 = vrot.slane %v8085_v32, %v13546_v10  ;;  %v7511_v57 = vmul.f32 %v15398_v21, %v14818_v12 }
 0x705   :  { %v8034_v25 = vrot.slane %v8020_v20, %v13546_v10  ;;  %v8102_v34 = vrot.slane %v8086_v17, %v13546_v10  ;;  %v8109_v56 = vrot.slane %v8087_v4, %v13546_v10  ;;  %v7512_v0 = vmul.f32 %v15401_v15, %v14837_v3 }
 0x706   :  { %v8116_v23 = vrot.slane %v8088_v11, %v13546_v10  ;;  %v7513_v13 = vmul.f32 %v15406_v35, %v14847_v31  ;;  %v7514_v33 = vmul.f32 %v15412_v52, %v14809_v60  ;;  %v8134_v45 = vcombine.low %v7510_v43, %v7511_v57 }
 0x707   :  { %v8035_v36 = vcombine.low %v8027_v42, %v8034_v25  ;;  %v8117_v44 = vcombine.low %v8095_v48, %v8102_v34  ;;  %v8230_v50 = vmul.f32 %v16896_v1, %v15550_v51  ;;  %v16897_v30 = vlaneseq }
 0x708   :  { %v8118_v7 = vcombine.low %v8109_v56, %v8116_v23  ;;  %v8135_v38 = vcombine.low %v7512_v0, %v7513_v13  ;;  %v8156_v21 = vrot.slane %v7514_v33, %v13546_v10  ;;  %v8142_v60 = vrot.slane %v8134_v45, %v13546_v10 }
 0x709   :  { %v8211_v12 = vsel %vm8185_vm6, %v8035_v36, 0.0  ;;  %v8234_v3 = vsel %vm8185_vm6, %v8230_v50, 0.0  ;;  %v8125_v31 = vrot.slane %v8117_v44, %v13546_v10  ;;  %v8250_v63 = vand.u32 127, %v16897_v30 }
 0x70a   :  { %8212 = vadd.xlane.f32.xlu1 %v8211_v12  ;;  %v8132_v15 = vrot.slane %v8118_v7, %v13546_v10  ;;  %v8149_v35 = vrot.slane %v8135_v38, %v13546_v10  ;;  %v8171_v55 = vrot.slane %v8156_v21, %v13546_v10 }
 0x70b   :  { %v8262_v8 = vadd.s32 4294967280, %v8250_v63  ;;  %v8255_v37 = vadd.s32 4294967288, %v8250_v63  ;;  %v15655_v53 = vsub.s32 %v8250_v63, %v16898_v6  ;;  %v8276_v26 = vadd.s32 4294967264, %v8250_v63 }
 0x70c   :  { %v8133_v52 = vcombine.low %v8125_v31, %v8132_v15  ;;  %v8157_v49 = vcombine.low %v8142_v60, %v8149_v35  ;;  %v8269_v5 = vadd.s32 4294967272, %v8250_v63  ;;  %v8283_v59 = vadd.s32 4294967256, %v8250_v63 }
 0x70d   :  { %v15658_v19 = vsub.s32 %v8262_v8, %v16898_v6  ;;  %v15663_v28 = vsub.s32 %v8255_v37, %v16898_v6  ;;  %v15674_v40 = vsub.s32 %v8276_v26, %v16898_v6  ;;  %v12119_v35 = vmov 0  }
 0x70e   :  { %v8217_v51 = vsel %vm8185_vm6, %v8133_v52, 0.0  ;;  %v8164_v58 = vrot.slane %v8157_v49, %v13546_v10  ;;  %v15681_v32 = vsub.s32 %v8269_v5, %v16898_v6  ;;  %v15686_v20 = vsub.s32 %v8283_v59, %v16898_v6  ;;  %11105 = vset.pattern.permute.xlu1 %v12119_v35  ;;  %11104 = vset.pattern.permute.xlu0 %v12119_v35  ;;  %v16899_v49 = vld [vmem:[#allocation34_spill] sm:$0xff] }
 0x70f   :  { %8218 = vadd.xlane.f32.xlu1 %v8217_v51 }
 0x710   :  { %v8172_v62 = vcombine.low %v8164_v58, %v8171_v55  ;;  %v16900_v58 = vld [vmem:[#allocation35_spill] sm:$0xff] }
 0x712   :  { %v8220_v22 = vsel %vm8201_vm7, %v8172_v62, 0.0 }
 0x713   :  { %8221 = vadd.xlane.f32.xlu1 %v8220_v22 }
 0x717   :  { %8235 = vadd.xlane.f32.xlu1 %v8234_v3 }
 0x763   :  { %v15639_v39 = vpop.xlane.xlu0 %8190 }
 0x764   :  { %v8259_v18 = vrot.slane %v15639_v39, %v15663_v28 }
 0x769   :  { %v15641_v61 = vpop.xlane.xlu0 %8187 }
 0x76a   :  { %v8254_v54 = vrot.slane %v15641_v61, %v15655_v53 }
 0x76c   :  { %v8261_v42 = vsel %vm8260_vm8, %v8259_v18, %v8254_v54 }
 0x771   :  { %v15645_v27 = vpop.xlane.xlu0 %8196 }
 0x772   :  { %v8273_v56 = vrot.slane %v15645_v27, %v15681_v32 }
 0x777   :  { %v15650_v24 = vpop.xlane.xlu0 %8193 }
 0x778   :  { %v8266_v2 = vrot.slane %v15650_v24, %v15658_v19 }
 0x77a   :  { %v8268_v48 = vsel %vm8267_vm9, %v8266_v2, %v8261_v42 }
 0x77b   :  { %v8275_v33 = vsel %vm8274_vm10, %v8273_v56, %v8268_v48 }
 0x77c   :  { %v15643_v9 = vpop.xlane.xlu1 %8209 }
 0x77d   :  { %v8297_v29 = vrot.slane %v15643_v9, %v15663_v28 }
 0x782   :  { %v15660_v14 = vpop.xlane.xlu0 %8199 }
 0x783   :  { %v8280_v43 = vrot.slane %v15660_v14, %v15674_v40 }
 0x785   :  { %v8282_v45 = vsel %vm8281_vm11, %v8280_v43, %v8275_v33 }
 0x787   :  { %v15647_v47 = vpop.xlane.xlu1 %8206 }
 0x788   :  { %v8293_v41 = vrot.slane %v15647_v47, %v15655_v53 }
 0x78a   :  { %v8298_v11 = vsel %vm8260_vm8, %v8297_v29, %v8293_v41 }
 0x78b   :  { %v15688_v17 = vpop.xlane.xlu0 %8203 }
 0x78c   :  { %v8287_v57 = vrot.slane %v15688_v17, %v15686_v20 }
 0x78e   :  { %v8289_v50 = vsel %vm8288_vm12, %v8287_v57, %v8282_v45 }
 0x78f   :  { %v15706_v44 = vpop.xlane.xlu0 %8232 }
 0x790   :  { %v15652_v10 = vpop.xlane.xlu1 %8215  ;;  %v8514_v21 = vrot.slane %v15706_v44, %v15655_v53 }
 0x791   :  { %v8307_v23 = vrot.slane %v15652_v10, %v15681_v32 }
 0x797   :  { %v15665_v46 = vpop.xlane.xlu1 %8212 }
 0x798   :  { %v8302_v16 = vrot.slane %v15665_v46, %v15658_v19 }
 0x79a   :  { %v8303_v25 = vsel %vm8267_vm9, %v8302_v16, %v8298_v11 }
 0x79b   :  { %v8308_v36 = vsel %vm8274_vm10, %v8307_v23, %v8303_v25 }
 0x79c   :  { %v8219_v4 = vpop.xlane.xlu1 %8218 }
 0x79d   :  { %v8312_v34 = vrot.slane %v8219_v4, %v15674_v40 }
 0x79f   :  { %v8313_v1 = vsel %vm8281_vm11, %v8312_v34, %v8308_v36 }
 0x7a0   :  { %v8222_v0 = vpop.xlane.xlu1 %8221 }
 0x7a1   :  { %v8317_v13 = vrot.slane %v8222_v0, %v15686_v20 }
 0x7a3   :  { %v8318_v7 = vsel %vm8288_vm12, %v8317_v13, %v8313_v1 }
 0x7a4   :  { %v8236_v38 = vpop.xlane.xlu1 %8235  ;;  %v8320_v12 = vsel %vm8319_vm13, %v8318_v7, %v8289_v50 }
 0x7a5   :  { %v8518_v3 = vrot.slane %v8236_v38, %v15655_v53  ;;  %v8323_v31 = vsel %vm8322_vm14, %v8320_v12, -inf }
 0x7a6   :  { %8324 = vmax.xlane.f32.xlu0 %v8323_v31 }
 0x7a7   :  { %v8519_v15 = vsel %vm8319_vm13, %v8518_v3, %v8514_v21 }
 0x7a8   :  { %v8522_v60 = vsel %vm8521_vm15, %v8519_v15, -inf }
 0x7a9   :  { %8523 = vmax.xlane.f32.xlu1 %v8522_v60 }
 0x833   :  { %v8325_v52 = vpop.xlane.xlu0 %8324 }
 0x834   :  { %v8330_v51 = vrot.slane %v8325_v52, %v16899_v49  ;;  %v8334_v55 = vrot.slane %v8325_v52, %v16900_v58 }
 0x836   :  { %v8337_v62 = vsub.f32 %v15641_v61, %v8330_v51  ;;  %v8338_v22 = vsub.f32 %v15639_v39, %v8330_v51  ;;  %v8343_v30 = vsub.f32 %v15647_v47, %v8334_v55  ;;  %v8344_v37 = vsub.f32 %v15643_v9, %v8334_v55  ;;  %v8524_v59 = vpop.xlane.xlu1 %8523 }
 0x837   :  { %v8347_v26 = vsub.f32 %v8219_v4, %v8334_v55  ;;  %v8339_v54 = vsub.f32 %v15650_v24, %v8330_v51  ;;  %v8348_v2 = vsub.f32 %v8222_v0, %v8334_v55  ;;  %v8533_v61 = vrot.slane %v8524_v59, %v16900_v58 }
 0x838   :  { %v8349_v63 = vmul.f32 1.442695, %v8337_v62  ;;  %v8351_v8 = vmul.f32 1.442695, %v8338_v22  ;;  %v8361_v5 = vmul.f32 1.442695, %v8343_v30  ;;  %v8345_v39 = vsub.f32 %v15665_v46, %v8334_v55 }
 0x839   :  { %v8363_v41 = vmul.f32 1.442695, %v8344_v37  ;;  %v8369_v16 = vmul.f32 1.442695, %v8347_v26  ;;  %v8353_v47 = vmul.f32 1.442695, %v8339_v54  ;;  %v8537_v29 = vsub.f32 %v8236_v38, %v8533_v61 }
 0x83a   :  { %11842 = vpow2.f32 %v8349_v63  ;;  %v8371_v9 = vmul.f32 1.442695, %v8348_v2  ;;  %v8365_v24 = vmul.f32 1.442695, %v8345_v39  ;;  %v8340_v42 = vsub.f32 %v15645_v27, %v8330_v51 }
 0x83b   :  { %11844 = vpow2.f32 %v8351_v8  ;;  %v8540_v11 = vmul.f32 1.442695, %v8537_v29  ;;  %v8346_v48 = vsub.f32 %v15652_v10, %v8334_v55  ;;  %v8341_v27 = vsub.f32 %v15660_v14, %v8330_v51 }
 0x83c   :  { %11846 = vpow2.f32 %v8361_v5  ;;  %v8355_v43 = vmul.f32 1.442695, %v8340_v42  ;;  %v8342_v10 = vsub.f32 %v15688_v17, %v8330_v51  ;;  %v8529_v13 = vrot.slane %v8524_v59, %v16899_v49 }
 0x83d   :  { %11848 = vpow2.f32 %v8363_v41  ;;  %v8367_v56 = vmul.f32 1.442695, %v8346_v48  ;;  %v8357_v0 = vmul.f32 1.442695, %v8341_v27 }
 0x83e   :  { %11850 = vpow2.f32 %v8369_v16  ;;  %v8359_v14 = vmul.f32 1.442695, %v8342_v10  ;;  %v8536_v45 = vsub.f32 %v15706_v44, %v8529_v13 }
 0x83f   :  { %11852 = vpow2.f32 %v8353_v47 }
 0x840   :  { %11854 = vpow2.f32 %v8371_v9  ;;  %v8538_v17 = vmul.f32 1.442695, %v8536_v45 }
 0x841   :  { %11856 = vpow2.f32 %v8365_v24 }
 0x842   :  { %11858 = vpow2.f32 %v8540_v11 }
 0x843   :  { %11860 = vpow2.f32 %v8355_v43 }
 0x844   :  { %v15728_v18 = vpop.eup %11842  ;;  %11862 = vpow2.f32 %v8367_v56 }
 0x845   :  { %v15730_v4 = vpop.eup %11844  ;;  %8386 = vperm.xlu0 %11104, %v15728_v18   ;;  %11864 = vpow2.f32 %v8357_v0 }
 0x846   :  { %8389 = vperm.xlu1 %11105, %v15730_v4   ;;  %v15735_v46 = vpop.eup %11846  ;;  %11866 = vpow2.f32 %v8359_v14 }
 0x847   :  { %v15739_v25 = vpop.eup %11848  ;;  %11868 = vpow2.f32 %v8538_v17 }
 0x848   :  { %v15741_v34 = vpop.eup %11850 }
 0x849   :  { %8416 = vperm.xlu0 %11104, %v15741_v34   ;;  %v15746_v57 = vpop.eup %11852 }
 0x84a   :  { %8404 = vperm.xlu1 %11105, %v15735_v46   ;;  %v15748_v23 = vpop.eup %11854 }
 0x84b   :  { %v15754_v33 = vpop.eup %11856 }
 0x84c   :  { %v15756_v36 = vpop.eup %11858 }
 0x84d   :  { %8419 = vperm.xlu0 %11104, %v15748_v23   ;;  %v15761_v1 = vpop.eup %11860 }
 0x84e   :  { %8407 = vperm.xlu1 %11105, %v15739_v25   ;;  %v15764_v50 = vpop.eup %11862 }
 0x84f   :  { %v15767_v7 = vpop.eup %11864 }
 0x850   :  { %v15770_v38 = vpop.eup %11866 }
 0x851   :  { %8548 = vperm.xlu0 %11104, %v15756_v36   ;;  %v15773_v44 = vpop.eup %11868 }
 0x852   :  { %8392 = vperm.xlu1 %11105, %v15746_v57  }
 0x856   :  { %8410 = vperm.xlu1 %11105, %v15754_v33  }
 0x85a   :  { %8395 = vperm.xlu1 %11105, %v15761_v1  }
 0x85e   :  { %8413 = vperm.xlu1 %11105, %v15764_v50  }
 0x862   :  { %8398 = vperm.xlu1 %11105, %v15767_v7  }
 0x866   :  { %8401 = vperm.xlu1 %11105, %v15770_v38  }
 0x86a   :  { %8545 = vperm.xlu1 %11105, %v15773_v44  }
 0x8c4   :  { %v8387_v15 = vpop.permute.xlu0 %8386 }
 0x8c5   :  { %v8390_v12 = vpop.permute.xlu1 %8389  ;;  %v8424_v63 = vrot.slane %v8387_v15, %v15655_v53 }
 0x8c6   :  { %v8428_v8 = vrot.slane %v8390_v12, %v15663_v28 }
 0x8c8   :  { %v8417_v52 = vpop.permute.xlu0 %8416  ;;  %v8429_v39 = vsel %vm8260_vm8, %v8428_v8, %v8424_v63 }
 0x8c9   :  { %v8405_v21 = vpop.permute.xlu1 %8404  ;;  %v8472_v16 = vrot.slane %v8417_v52, %v15674_v40 }
 0x8ca   :  { %v8453_v22 = vrot.slane %v8405_v21, %v15655_v53 }
 0x8cc   :  { %v8420_v26 = vpop.permute.xlu0 %8419 }
 0x8cd   :  { %v8408_v3 = vpop.permute.xlu1 %8407  ;;  %v8477_v24 = vrot.slane %v8420_v26, %v15686_v20 }
 0x8ce   :  { %v8457_v51 = vrot.slane %v8408_v3, %v15663_v28 }
 0x8d0   :  { %v8458_v37 = vsel %vm8260_vm8, %v8457_v51, %v8453_v22  ;;  %v8549_v48 = vpop.permute.xlu0 %8548 }
 0x8d1   :  { %v8393_v31 = vpop.permute.xlu1 %8392  ;;  %v8557_v13 = vrot.slane %v8549_v48, %v15655_v53 }
 0x8d2   :  { %v8433_v5 = vrot.slane %v8393_v31, %v15658_v19 }
 0x8d4   :  { %v8434_v47 = vsel %vm8267_vm9, %v8433_v5, %v8429_v39 }
 0x8d5   :  { %v8411_v60 = vpop.permute.xlu1 %8410 }
 0x8d6   :  { %v8462_v55 = vrot.slane %v8411_v60, %v15658_v19 }
 0x8d8   :  { %v8463_v59 = vsel %vm8267_vm9, %v8462_v55, %v8458_v37 }
 0x8d9   :  { %v8396_v35 = vpop.permute.xlu1 %8395 }
 0x8da   :  { %v8438_v41 = vrot.slane %v8396_v35, %v15681_v32 }
 0x8dc   :  { %v8439_v42 = vsel %vm8274_vm10, %v8438_v41, %v8434_v47 }
 0x8dd   :  { %v8414_v62 = vpop.permute.xlu1 %8413 }
 0x8de   :  { %v8467_v30 = vrot.slane %v8414_v62, %v15681_v32 }
 0x8e0   :  { %v8468_v2 = vsel %vm8274_vm10, %v8467_v30, %v8463_v59 }
 0x8e1   :  { %v8399_v54 = vpop.permute.xlu1 %8398  ;;  %v8473_v29 = vsel %vm8281_vm11, %v8472_v16, %v8468_v2 }
 0x8e2   :  { %v8443_v61 = vrot.slane %v8399_v54, %v15674_v40  ;;  %v8478_v56 = vsel %vm8288_vm12, %v8477_v24, %v8473_v29 }
 0x8e4   :  { %v8444_v43 = vsel %vm8281_vm11, %v8443_v61, %v8439_v42 }
 0x8e5   :  { %v8402_v9 = vpop.permute.xlu1 %8401 }
 0x8e6   :  { %v8448_v11 = vrot.slane %v8402_v9, %v15686_v20 }
 0x8e8   :  { %v8449_v27 = vsel %vm8288_vm12, %v8448_v11, %v8444_v43 }
 0x8e9   :  { %v8546_v10 = vpop.permute.xlu1 %8545  ;;  %v8479_v0 = vsel %vm8319_vm13, %v8478_v56, %v8449_v27  ;;  %v9059_v27 = vld [vmem:[%s16494_s13 + $0x18] sm:$0xff] }
 0x8ea   :  { %v8553_v14 = vrot.slane %v8546_v10, %v15655_v53  ;;  %v8481_v45 = vsel %vm8322_vm14, %v8479_v0, 0.0  ;;  %v9063_v56 = vld [vmem:[%s16494_s13 + $0x38] sm:$0xff] }
 0x8eb   :  { %8482 = vadd.xlane.f32.xlu1 %v8481_v45  ;;  %v10882_v45 = vpack.c.bf16 %v9063_v56, %v9059_v27  ;;  %v9081_v56 = vld [vmem:[%s16494_s13 + $0xc8] sm:$0xff] }
 0x8ec   :  { %v8558_v17 = vsel %vm8319_vm13, %v8557_v13, %v8553_v14  ;;  %v16901_v13 = vld [vmem:[#allocation39_spill] sm:$0xff]  ;;  %v16902_v14 = vmov 0.0  }
 0x8ed   :  { %v8560_v12 = vsel %vm8521_vm15, %v8558_v17, 0.0  ;;  %v9058_v17 = vld [vmem:[%s16494_s13 + $0x10] sm:$0xff] }
 0x8ee   :  { %8561 = vadd.xlane.f32.xlu0 %v8560_v12  ;;  %v9062_v12 = vld [vmem:[%s16494_s13 + $0x30] sm:$0xff] }
 0x978   :  { %v8483_v21 = vpop.xlane.xlu1 %8482 }
 0x979   :  { %v8488_v3 = vrot.slane %v8483_v21, %v16899_v49  ;;  %v8492_v52 = vrot.slane %v8483_v21, %v16900_v58 }
 0x97b   :  { %11870 = vrcp.f32 %v8488_v3  ;;  %v8562_v31 = vpop.xlane.xlu0 %8561 }
 0x97c   :  { %v8567_v15 = vrot.slane %v8562_v31, %v16899_v49  ;;  %v8571_v60 = vrot.slane %v8562_v31, %v16900_v58  ;;  %v9067_v31 = vld [vmem:[%s16494_s13 + $0x58] sm:$0xff] }
 0x97e   :  { %11872 = vrcp.f32 %v8567_v15  ;;  %v9071_v15 = vld [vmem:[%s16494_s13 + $0x78] sm:$0xff] }
 0x97f   :  { %11874 = vrcp.f32 %v8571_v60 }
 0x980   :  { %11876 = vrcp.f32 %v8492_v52  ;;  %v16903_v52 = vld [vmem:[#allocation40_spill] sm:$0xff] }
 0x985   :  { %v11871_v35 = vpop.eup %11870 }
 0x986   :  { %v8497_v51 = vmul.f32 %v11871_v35, %v15730_v4  ;;  %v8496_v55 = vmul.f32 %v11871_v35, %v15728_v18  ;;  %v8498_v62 = vmul.f32 %v11871_v35, %v15746_v57  ;;  %v8499_v22 = vmul.f32 %v11871_v35, %v15761_v1 }
 0x987   :  { %v8500_v63 = vmul.f32 %v11871_v35, %v15767_v7  ;;  %v8501_v8 = vmul.f32 %v11871_v35, %v15770_v38 }
 0x988   :  { %8588 = vperm.xlu1 %11105, %v8497_v51   ;;  %8585 = vperm.xlu0 %11104, %v8496_v55   ;;  %v11873_v30 = vpop.eup %11872  ;;  %v10884_v51 = vpack.c.bf16 %v9062_v12, %v9058_v17  ;;  %v10886_v55 = vpack.c.bf16 %v9071_v15, %v9067_v31  ;;  %v9099_v17 = vld [vmem:[%s16494_s13 + $0x158] sm:$0xff]  ;;  %v9080_v15 = vld [vmem:[%s16494_s13 + $0xc0] sm:$0xff] }
 0x989   :  { %v11875_v37 = vpop.eup %11874  ;;  %v8575_v4 = vmul.f32 %v11873_v30, %v15773_v44  ;;  %v9103_v12 = vld [vmem:[%s16494_s13 + $0x178] sm:$0xff] }
 0x98a   :  { %v8577_v18 = vmul.f32 %v11875_v37, %v15756_v36  ;;  %v11877_v26 = vpop.eup %11876 }
 0x98b   :  { %v8503_v57 = vmul.f32 %v11877_v26, %v15735_v46  ;;  %v8504_v1 = vmul.f32 %v11877_v26, %v15739_v25  ;;  %v8505_v7 = vmul.f32 %v11877_v26, %v15754_v33  ;;  %v8506_v38 = vmul.f32 %v11877_v26, %v15764_v50  ;;  %v9057_v46 = vld [vmem:[%s16494_s13 + $0x8] sm:$0xff] }
 0x98c   :  { %8591 = vperm.xlu1 %11105, %v8498_v62   ;;  %8594 = vperm.xlu0 %11104, %v8499_v22   ;;  %v8507_v5 = vmul.f32 %v11877_v26, %v15741_v34  ;;  %v8508_v44 = vmul.f32 %v11877_v26, %v15748_v23  ;;  %v9061_v25 = vld [vmem:[%s16494_s13 + $0x28] sm:$0xff]  ;;  %v9066_v62 = vld [vmem:[%s16494_s13 + $0x50] sm:$0xff]  ;;  %v9060_v26 = vld [vmem:[%s16494_s13 + $0x20] sm:$0xff] }
 0x98d   :  { %v10850_v36 = vpack.c.bf16 %v9061_v25, %v9057_v46  ;;  %v9070_v22 = vld [vmem:[%s16494_s13 + $0x70] sm:$0xff]  ;;  %v9069_v46 = vld [vmem:[%s16494_s13 + $0x68] sm:$0xff]  ;;  %v9083_v25 = vld [vmem:[%s16494_s13 + $0xd8] sm:$0xff] }
 0x98f   :  { %10851 = vmatprep.subr.bf16.mxu1 %v10850_v36  ;;  %v9087_v36 = vld [vmem:[%s16494_s13 + $0xf8] sm:$0xff] }
 0x990   :  { %8597 = vperm.xlu1 %11105, %v8500_v63   ;;  %8600 = vperm.xlu0 %11104, %v8501_v8   ;;  %v9079_v63 = vld [vmem:[%s16494_s13 + $0xb8] sm:$0xff] }
 0x994   :  { %8834 = vperm.xlu1 %11105, %v8575_v4   ;;  %8914 = vperm.xlu0 %11104, %v8577_v18   ;;  %v9056_v18 = vld [vmem:[%s16494_s13] sm:$0xff] }
 0x998   :  { %8712 = vperm.xlu1 %11105, %v8503_v57   ;;  %8715 = vperm.xlu0 %11104, %v8504_v1   ;;  %v10888_v57 = vpack.c.bf16 %v9070_v22, %v9066_v62  ;;  %v9065_v1 = vld [vmem:[%s16494_s13 + $0x48] sm:$0xff]  ;;  %v9088_v22 = vld [vmem:[%s16494_s13 + $0x100] sm:$0xff] }
 0x99c   :  { %8718 = vperm.xlu1 %11105, %v8505_v7   ;;  %8721 = vperm.xlu0 %11104, %v8506_v38   ;;  %v9074_v7 = vld [vmem:[%s16494_s13 + $0x90] sm:$0xff] }
 0x99d   :  { %v9078_v38 = vld [vmem:[%s16494_s13 + $0xb0] sm:$0xff] }
 0x9a0   :  { %8724 = vperm.xlu1 %11105, %v8507_v5   ;;  %8727 = vperm.xlu0 %11104, %v8508_v44  }
 0xa07   :  { %v8589_v33 = vpop.permute.xlu1 %8588  ;;  %v8586_v50 = vpop.permute.xlu0 %8585 }
 0xa08   :  { %v8609_v59 = vrot.slane %v8589_v33, %v15663_v28  ;;  %v8605_v34 = vrot.slane %v8586_v50, %v15655_v53 }
 0xa0a   :  { %v8610_v2 = vsel %vm8260_vm8, %v8609_v59, %v8605_v34  ;;  %v10852_v34 = vpack.c.bf16 %v9060_v26, %v9056_v18  ;;  %v9098_v18 = vld [vmem:[%s16494_s13 + $0x150] sm:$0xff] }
 0xa0b   :  { %v8592_v54 = vpop.permute.xlu1 %8591  ;;  %v8595_v23 = vpop.permute.xlu0 %8594 }
 0xa0c   :  { %v8614_v41 = vrot.slane %v8592_v54, %v15658_v19  ;;  %v8619_v16 = vrot.slane %v8595_v23, %v15681_v32  ;;  %v9064_v54 = vld [vmem:[%s16494_s13 + $0x40] sm:$0xff] }
 0xa0d   :  { %v9068_v23 = vld [vmem:[%s16494_s13 + $0x60] sm:$0xff] }
 0xa0e   :  { %v8615_v61 = vsel %vm8267_vm9, %v8614_v41, %v8610_v2  ;;  %v10892_v41 = vpack.c.bf16 %v9078_v38, %v9074_v7  ;;  %v9107_v38 = vld [vmem:[%s16494_s13 + $0x198] sm:$0xff] }
 0xa0f   :  { %v8598_v39 = vpop.permute.xlu1 %8597  ;;  %v8601_v47 = vpop.permute.xlu0 %8600  ;;  %v8620_v24 = vsel %vm8274_vm10, %v8619_v16, %v8615_v61  ;;  %v10854_v16 = vpack.c.bf16 %v9069_v46, %v9065_v1  ;;  %v9082_v61 = vld [vmem:[%s16494_s13 + $0xd0] sm:$0xff]  ;;  %v9109_v1 = vld [vmem:[%s16494_s13 + $0x1a8] sm:$0xff]  ;;  %v9104_v46 = vld [vmem:[%s16494_s13 + $0x180] sm:$0xff] }
 0xa10   :  { %v8624_v9 = vrot.slane %v8598_v39, %v15674_v40  ;;  %v8629_v29 = vrot.slane %v8601_v47, %v15686_v20  ;;  %v9086_v39 = vld [vmem:[%s16494_s13 + $0xf0] sm:$0xff] }
 0xa12   :  { %v8625_v42 = vsel %vm8281_vm11, %v8624_v9, %v8620_v24  ;;  %v9077_v9 = vld [vmem:[%s16494_s13 + $0xa8] sm:$0xff]  ;;  %v9095_v24 = vld [vmem:[%s16494_s13 + $0x138] sm:$0xff] }
 0xa13   :  { %v8630_v11 = vsel %vm8288_vm12, %v8629_v29, %v8625_v42  ;;  %v8835_v48 = vpop.permute.xlu1 %8834  ;;  %v8915_v43 = vpop.permute.xlu0 %8914  ;;  %v9091_v29 = vld [vmem:[%s16494_s13 + $0x118] sm:$0xff]  ;;  %v10856_v42 = vpack.c.bf16 %v9068_v23, %v9064_v54 }
 0xa14   :  { %9681 = vst.msk [vmem:[#allocation19] sm:$0x1] %vm9680_vm2, %v8630_v11  ;;  %v8839_v10 = vrot.slane %v8835_v48, %v15655_v53  ;;  %v8919_v0 = vrot.slane %v8915_v43, %v15655_v53  ;;  %10669 = vmatmul.mubr.msk.f32.vlgmr.msra.gmra.mrb[36].mxu0 %vm6916_vm5, %v8630_v11  ;;  %v9072_v11 = vld [vmem:[%s16494_s13 + $0x80] sm:$0xff]  ;;  %v10896_v43 = vpack.c.bf16 %v9086_v39, %v9082_v61  ;;  %v9114_v61 = vld [vmem:[%s16494_s13 + $0x1d0] sm:$0xff] }
 0xa15   :  { %10687 = vmatpush3.msra.mxu0 %v16901_v13  ;;  %10688 = vmatprep.mubr.msk.f32.mxu0 %vm12115_vm0, %v16902_v14  ;;  %v9076_v48 = vld [vmem:[%s16494_s13 + $0xa0] sm:$0xff]  ;;  %v9094_v13 = vld [vmem:[%s16494_s13 + $0x130] sm:$0xff] }
 0xa16   :  { %9686 = vst.msk [vmem:[#allocation20] sm:$0x1] %vm9685_vm3, %v8839_v10  ;;  %9687 = vst.msk [vmem:[#allocation20 + $0x1] sm:$0x1] %vm9685_vm3, %v8919_v0  ;;  %10691 = vmatprep.subr.mxu0 %v16902_v14 }
 0xa17   :  { %v8713_v21 = vpop.permute.xlu1 %8712  ;;  %v8716_v3 = vpop.permute.xlu0 %8715 }
 0xa18   :  { %10689 = vmatmul.mubr.msk.f32.vlgmr.msra.gmra.mrb[38].mxu0 %vm5550_vm1, %v8839_v10  ;;  %v8732_v60 = vrot.slane %v8713_v21, %v15655_v53  ;;  %v8736_v35 = vrot.slane %v8716_v3, %v15663_v28  ;;  %v9075_v28 = vld [vmem:[%s16494_s13 + $0x98] sm:$0xff]  ;;  %v10898_v10 = vpack.c.bf16 %v9095_v24, %v9091_v29  ;;  %v10860_v21 = vpack.c.bf16 %v9076_v48, %v9072_v11  ;;  %v8997_v29 = vld [vmem:[%s16493_s12 + $0x28] sm:$0xff] }
 0xa19   :  { %10692 = vmatpush3.msra.mxu0 %v16903_v52  ;;  %10693 = vmatprep.mubr.msk.f32.mxu0 %vm12115_vm0, %v16902_v14  ;;  %v9089_v52 = vld [vmem:[%s16494_s13 + $0x108] sm:$0xff]  ;;  %v8995_v11 = vld [vmem:[%s16493_s12 + $0x18] sm:$0xff]  ;;  %vm9664_vm0 = vcmask 1041408  }
 0xa1a   :  { %10883 = vmatprep.subr.bf16.mxu0 %v10882_v45  ;;  %v8737_v37 = vsel %vm8260_vm8, %v8736_v35, %v8732_v60  ;;  %v9085_v45 = vld [vmem:[%s16494_s13 + $0xe8] sm:$0xff]  ;;  %v9084_v60 = vld [vmem:[%s16494_s13 + $0xe0] sm:$0xff]  ;;  %v10902_v35 = vpack.c.bf16 %v9103_v12, %v9099_v17  ;;  %v8999_v48 = vld [vmem:[%s16493_s12 + $0x38] sm:$0xff] }
 0xa1b   :  { %v8719_v30 = vpop.permute.xlu1 %8718  ;;  %v8722_v53 = vpop.permute.xlu0 %8721  ;;  %v10862_v31 = vpack.c.bf16 %v9085_v45, %v9081_v56  ;;  %v8996_v45 = vld [vmem:[%s16493_s12 + $0x20] sm:$0xff]  ;;  %v8994_v17 = vld [vmem:[%s16493_s12 + $0x10] sm:$0xff] }
 0xa1c   :  { %v8741_v8 = vrot.slane %v8719_v30, %v15658_v19  ;;  %10694 = vmatmul.mubr.msk.f32.vlgmr.msra.gmra.mrb[40].mxu0 %vm5550_vm1, %v8919_v0  ;;  %v8746_v4 = vrot.slane %v8722_v53, %v15681_v32  ;;  %v10890_v32 = vpack.c.bf16 %v9079_v63, %v9075_v28  ;;  %v9090_v0 = vld [vmem:[%s16494_s13 + $0x110] sm:$0xff]  ;;  %v9092_v30 = vld [vmem:[%s16494_s13 + $0x120] sm:$0xff]  ;;  %v9097_v53 = vld [vmem:[%s16494_s13 + $0x148] sm:$0xff] }
 0xa1d   :  { %10885 = vmatpush1.bf16.msra.mxu0 %v10884_v51  ;;  %9260 = vmatprep.mubr.f32.mxu0 %v16902_v14  ;;  %v10900_v3 = vpack.c.bf16 %v9094_v13, %v9090_v0  ;;  %v9093_v51 = vld [vmem:[%s16494_s13 + $0x128] sm:$0xff]  ;;  %v10868_v63 = vpack.c.bf16 %v9092_v30, %v9088_v22  ;;  %v8992_v13 = vld [vmem:[%s16493_s12] sm:$0xff]  ;;  %v8998_v12 = vld [vmem:[%s16493_s12 + $0x30] sm:$0xff] }
 0xa1e   :  { %v8742_v19 = vsel %vm8267_vm9, %v8741_v8, %v8737_v37  ;;  %10887 = vmatprep.subr.bf16.mxu0 %v10886_v55  ;;  %v10864_v55 = vpack.c.bf16 %v9084_v60, %v9080_v15  ;;  %v10866_v62 = vpack.c.bf16 %v9093_v51, %v9089_v52  ;;  %v9101_v28 = vld [vmem:[%s16494_s13 + $0x168] sm:$0xff]  ;;  %v9096_v37 = vld [vmem:[%s16494_s13 + $0x140] sm:$0xff]  ;;  %v9007_v15 = vld [vmem:[%s16493_s12 + $0x78] sm:$0xff]  ;;  %v10916_v51 = vpack.c.bf16 %v8996_v45, %v8992_v13 }
 0xa1f   :  { %v8725_v5 = vpop.permute.xlu1 %8724  ;;  %v8728_v44 = vpop.permute.xlu0 %8727  ;;  %v8747_v59 = vsel %vm8274_vm10, %v8746_v4, %v8742_v19  ;;  %v10870_v8 = vpack.c.bf16 %v9101_v28, %v9097_v53  ;;  %v9100_v4 = vld [vmem:[%s16494_s13 + $0x160] sm:$0xff]  ;;  %v9105_v19 = vld [vmem:[%s16494_s13 + $0x188] sm:$0xff]  ;;  %v9002_v28 = vld [vmem:[%s16493_s12 + $0x50] sm:$0xff] }
 0xa20   :  { %v8751_v33 = vrot.slane %v8725_v5, %v15674_v40  ;;  %v8756_v50 = vrot.slane %v8728_v44, %v15686_v20  ;;  %v9073_v40 = vld [vmem:[%s16494_s13 + $0x88] sm:$0xff]  ;;  %v10894_v20 = vpack.c.bf16 %v9087_v36, %v9083_v25  ;;  %v10872_v26 = vpack.c.bf16 %v9100_v4, %v9096_v37  ;;  %v9111_v5 = vld [vmem:[%s16494_s13 + $0x1b8] sm:$0xff]  ;;  %v9108_v25 = vld [vmem:[%s16494_s13 + $0x1a0] sm:$0xff] }
 0xa21   :  { %10889 = vmatpush1.bf16.msra.mxu0 %v10888_v57  ;;  %v10858_v27 = vpack.c.bf16 %v9077_v9, %v9073_v40  ;;  %v9102_v57 = vld [vmem:[%s16494_s13 + $0x170] sm:$0xff]  ;;  %v10874_v7 = vpack.c.bf16 %v9109_v1, %v9105_v19  ;;  %v10906_v44 = vpack.c.bf16 %v9111_v5, %v9107_v38  ;;  %v9112_v40 = vld [vmem:[%s16494_s13 + $0x1c0] sm:$0xff]  ;;  %v8993_v9 = vld [vmem:[%s16493_s12 + $0x8] sm:$0xff] }
 0xa22   :  { %v8752_v2 = vsel %vm8281_vm11, %v8751_v33, %v8747_v59  ;;  %10891 = vmatprep.subr.bf16.mxu0 %v10890_v32  ;;  %v10904_v32 = vpack.c.bf16 %v9102_v57, %v9098_v18  ;;  %v9106_v36 = vld [vmem:[%s16494_s13 + $0x190] sm:$0xff]  ;;  %v10876_v33 = vpack.c.bf16 %v9108_v25, %v9104_v46  ;;  %v9113_v59 = vld [vmem:[%s16494_s13 + $0x1c8] sm:$0xff]  ;;  %v9004_v22 = vld [vmem:[%s16493_s12 + $0x60] sm:$0xff] }
 0xa23   :  { %v8757_v47 = vsel %vm8288_vm12, %v8756_v50, %v8752_v2  ;;  %v9110_v50 = vld [vmem:[%s16494_s13 + $0x1b0] sm:$0xff]  ;;  %v9119_v2 = vld [vmem:[%s16494_s13 + $0x1f8] sm:$0xff]  ;;  %v9013_v4 = vld [vmem:[%s16493_s12 + $0xa8] sm:$0xff] }
 0xa24   :  { %9682 = vst.msk [vmem:[#allocation19 + $0x1] sm:$0x1] %vm9680_vm2, %v8757_v47  ;;  %10684 = vmatmul.mubr.msk.f32.vlgmr.msra.gmra.mrb[28].mxu1 %vm6916_vm5, %v8757_v47  ;;  %v10908_v54 = vpack.c.bf16 %v9110_v50, %v9106_v36  ;;  %v9118_v47 = vld [vmem:[%s16494_s13 + $0x1f0] sm:$0xff]  ;;  %v9011_v18 = vld [vmem:[%s16493_s12 + $0x98] sm:$0xff]  ;;  %v9008_v1 = vld [vmem:[%s16493_s12 + $0x80] sm:$0xff] }
 0xa25   :  { %10853 = vmatpush1.bf16.msra.mxu1 %v10852_v34  ;;  %10893 = vmatpush1.bf16.msra.mxu0 %v10892_v41  ;;  %v9117_v34 = vld [vmem:[%s16494_s13 + $0x1e8] sm:$0xff]  ;;  %v9115_v41 = vld [vmem:[%s16494_s13 + $0x1d8] sm:$0xff]  ;;  %v10912_v24 = vpack.c.bf16 %v9118_v47, %v9114_v61  ;;  %v9010_v5 = vld [vmem:[%s16493_s12 + $0x90] sm:$0xff] }
 0xa26   :  { %10855 = vmatprep.subr.bf16.mxu1 %v10854_v16  ;;  %10895 = vmatprep.subr.bf16.mxu0 %v10894_v20  ;;  %v10878_v23 = vpack.c.bf16 %v9117_v34, %v9113_v59  ;;  %v10910_v16 = vpack.c.bf16 %v9119_v2, %v9115_v41  ;;  %v9116_v20 = vld [vmem:[%s16494_s13 + $0x1e0] sm:$0xff]  ;;  %v9017_v46 = vld [vmem:[%s16493_s12 + $0xc8] sm:$0xff]  ;;  %v9019_v36 = vld [vmem:[%s16493_s12 + $0xd8] sm:$0xff] }
 0xa27   :  { %9189 = vmatprep.mubr.f32.mxu1 %v16902_v14  ;;  %v10880_v39 = vpack.c.bf16 %v9116_v20, %v9112_v40  ;;  %v9021_v25 = vld [vmem:[%s16493_s12 + $0xe8] sm:$0xff]  ;;  %v9016_v41 = vld [vmem:[%s16493_s12 + $0xc0] sm:$0xff]  ;;  %v9022_v20 = vld [vmem:[%s16493_s12 + $0xf0] sm:$0xff] }
 0xa28   :  { %v9020_v2 = vld [vmem:[%s16493_s12 + $0xe0] sm:$0xff]  ;;  %v9025_v61 = vld [vmem:[%s16493_s12 + $0x108] sm:$0xff]  ;;  %v9027_v47 = vld [vmem:[%s16493_s12 + $0x118] sm:$0xff] }
 0xa29   :  { %10857 = vmatpush1.bf16.msra.mxu1 %v10856_v42  ;;  %10897 = vmatpush1.bf16.msra.mxu0 %v10896_v43  ;;  %v10914_v42 = vpack.c.bf16 %v8997_v29, %v8993_v9  ;;  %v10946_v43 = vpack.c.bf16 %v8999_v48, %v8995_v11  ;;  %v9031_v9 = vld [vmem:[%s16493_s12 + $0x138] sm:$0xff]  ;;  %v9024_v11 = vld [vmem:[%s16493_s12 + $0x100] sm:$0xff]  ;;  %v9037_v13 = vld [vmem:[%s16493_s12 + $0x168] sm:$0xff] }
 0xa2a   :  { %10859 = vmatprep.subr.bf16.mxu1 %v10858_v27  ;;  %10899 = vmatprep.subr.bf16.mxu0 %v10898_v10  ;;  %v9028_v48 = vld [vmem:[%s16493_s12 + $0x120] sm:$0xff]  ;;  %v9035_v45 = vld [vmem:[%s16493_s12 + $0x158] sm:$0xff] }
 0xa2d   :  { %10861 = vmatpush1.bf16.msra.mxu1 %v10860_v21  ;;  %10901 = vmatpush1.bf16.msra.mxu0 %v10900_v3  ;;  %v9001_v21 = vld [vmem:[%s16493_s12 + $0x48] sm:$0xff] }
 0xa2e   :  { %10863 = vmatprep.subr.bf16.mxu1 %v10862_v31  ;;  %10903 = vmatprep.subr.bf16.mxu0 %v10902_v35  ;;  %v9005_v3 = vld [vmem:[%s16493_s12 + $0x68] sm:$0xff]  ;;  %v9003_v31 = vld [vmem:[%s16493_s12 + $0x58] sm:$0xff] }
 0xa2f   :  { %v10918_v30 = vpack.c.bf16 %v9005_v3, %v9001_v21  ;;  %v10950_v53 = vpack.c.bf16 %v9007_v15, %v9003_v31  ;;  %v9032_v3 = vld [vmem:[%s16493_s12 + $0x140] sm:$0xff] }
 0xa30   :  { %v9036_v31 = vld [vmem:[%s16493_s12 + $0x160] sm:$0xff] }
 0xa31   :  { %10865 = vmatpush1.bf16.msra.mxu1 %v10864_v55  ;;  %10905 = vmatpush1.bf16.msra.mxu0 %v10904_v32  ;;  %v10948_v55 = vpack.c.bf16 %v8998_v12, %v8994_v17  ;;  %v9012_v32 = vld [vmem:[%s16493_s12 + $0xa0] sm:$0xff]  ;;  %v9039_v17 = vld [vmem:[%s16493_s12 + $0x178] sm:$0xff]  ;;  %v10932_v12 = vpack.c.bf16 %v9028_v48, %v9024_v11  ;;  %v9446_v11 = vld [vmem:[%s16904_s17 + $0x10] sm:$0xff] }
 0xa32   :  { %10867 = vmatprep.subr.bf16.mxu1 %v10866_v62  ;;  %10907 = vmatprep.subr.bf16.mxu0 %v10906_v44  ;;  %v9000_v62 = vld [vmem:[%s16493_s12 + $0x40] sm:$0xff]  ;;  %v9014_v44 = vld [vmem:[%s16493_s12 + $0xb0] sm:$0xff]  ;;  %v9447_v48 = vld [vmem:[%s16904_s17 + $0x18] sm:$0xff] }
 0xa33   :  { %v10920_v57 = vpack.c.bf16 %v9004_v22, %v9000_v62  ;;  %v9043_v62 = vld [vmem:[%s16493_s12 + $0x198] sm:$0xff] }
 0xa34   :  { %v9047_v22 = vld [vmem:[%s16493_s12 + $0x1b8] sm:$0xff] }
 0xa35   :  { %10869 = vmatpush1.bf16.msra.mxu1 %v10868_v63  ;;  %10909 = vmatpush1.bf16.msra.mxu0 %v10908_v54  ;;  %v9006_v63 = vld [vmem:[%s16493_s12 + $0x70] sm:$0xff]  ;;  %v10924_v54 = vpack.c.bf16 %v9012_v32, %v9008_v1  ;;  %v9055_v1 = vld [vmem:[%s16493_s12 + $0x1f8] sm:$0xff] }
 0xa36   :  { %10871 = vmatprep.subr.bf16.mxu1 %v10870_v8  ;;  %10911 = vmatprep.subr.bf16.mxu0 %v10910_v16  ;;  %v9009_v8 = vld [vmem:[%s16493_s12 + $0x88] sm:$0xff]  ;;  %v10952_v19 = vpack.c.bf16 %v9006_v63, %v9002_v28  ;;  %v10926_v16 = vpack.c.bf16 %v9021_v25, %v9017_v46  ;;  %v9040_v28 = vld [vmem:[%s16493_s12 + $0x180] sm:$0xff]  ;;  %v9050_v25 = vld [vmem:[%s16493_s12 + $0x1d0] sm:$0xff] }
 0xa37   :  { %v9044_v63 = vld [vmem:[%s16493_s12 + $0x1a0] sm:$0xff] }
 0xa38   :  { %v10940_v32 = vpack.c.bf16 %v9044_v63, %v9040_v28  ;;  %v9451_v28 = vld [vmem:[%s16904_s17 + $0x38] sm:$0xff] }
 0xa39   :  { %10873 = vmatpush1.bf16.msra.mxu1 %v10872_v26  ;;  %10913 = vmatpush1.bf16.msra.mxu0 %v10912_v24  ;;  %v9015_v26 = vld [vmem:[%s16493_s12 + $0xb8] sm:$0xff]  ;;  %v10928_v24 = vpack.c.bf16 %v9020_v2, %v9016_v41  ;;  %v9444_v41 = vld [vmem:[%s16904_s17] sm:$0xff]  ;;  %v9445_v2 = vld [vmem:[%s16904_s17 + $0x8] sm:$0xff] }
 0xa3a   :  { %10875 = vmatprep.subr.bf16.mxu1 %v10874_v7  ;;  %10947 = vmatprep.subr.bf16.mxu0 %v10946_v43  ;;  %v10922_v7 = vpack.c.bf16 %v9013_v4, %v9009_v8  ;;  %v10954_v38 = vpack.c.bf16 %v9015_v26, %v9011_v18  ;;  %v9042_v4 = vld [vmem:[%s16493_s12 + $0x190] sm:$0xff]  ;;  %v9049_v26 = vld [vmem:[%s16493_s12 + $0x1c8] sm:$0xff] }
 0xa3b   :  { %v9046_v18 = vld [vmem:[%s16493_s12 + $0x1b0] sm:$0xff] }
 0xa3d   :  { %10877 = vmatpush1.bf16.msra.mxu1 %v10876_v33  ;;  %v9023_v33 = vld [vmem:[%s16493_s12 + $0xf8] sm:$0xff] }
 0xa3e   :  { %10879 = vmatprep.subr.bf16.mxu1 %v10878_v23  ;;  %v10956_v23 = vpack.c.bf16 %v9014_v44, %v9010_v5  ;;  %v10958_v40 = vpack.c.bf16 %v9023_v33, %v9019_v36  ;;  %v9052_v5 = vld [vmem:[%s16493_s12 + $0x1e0] sm:$0xff]  ;;  %v9054_v36 = vld [vmem:[%s16493_s12 + $0x1f0] sm:$0xff] }
 0xa3f   :  { %v9460_v33 = vld [vmem:[%s16904_s17 + $0x80] sm:$0xff] }
 0xa41   :  { %10881 = vmatpush1.bf16.msra.mxu1 %v10880_v39  ;;  %v9029_v39 = vld [vmem:[%s16493_s12 + $0x128] sm:$0xff] }
 0xa42   :  { %10915 = vmatprep.subr.bf16.mxu1 %v10914_v42  ;;  %v10930_v43 = vpack.c.bf16 %v9029_v39, %v9025_v61  ;;  %v9462_v61 = vld [vmem:[%s16904_s17 + $0x90] sm:$0xff]  ;;  %v9463_v39 = vld [vmem:[%s16904_s17 + $0x98] sm:$0xff] }
 0xae7   :  { %v16065_v27 = vpop.f32.mrb[36].mxu0 }
 0xae8   :  { %v10670_v56 = vpop.f32.mrb[37].mxu0 }
 0xae9   :  { %v10962_v56 = vpack.c.bf16 %v9031_v9, %v9027_v47  ;;  %v9494_v47 = vld [vmem:[%s16904_s17 + $0x190] sm:$0xff]  ;;  %v9495_v9 = vld [vmem:[%s16904_s17 + $0x198] sm:$0xff] }
 0xaeb   :  { %v8908_v10 = vpop.f32.mrb[38].mxu0 }
 0xaec   :  { %v10690_v0 = vpop.f32.mrb[39].mxu0 }
 0xaed   :  { %v9033_v0 = vld [vmem:[%s16493_s12 + $0x148] sm:$0xff] }
 0xaee   :  { %v10934_v15 = vpack.c.bf16 %v9037_v13, %v9033_v0  ;;  %v9464_v0 = vld [vmem:[%s16904_s17 + $0xa0] sm:$0xff]  ;;  %v9465_v13 = vld [vmem:[%s16904_s17 + $0xa8] sm:$0xff] }
 0xaef   :  { %v8988_v60 = vpop.f32.mrb[40].mxu0 }
 0xaf0   :  { %v9122_v35 = vrot.slane %v8988_v60, 7  ;;  %v10695_v52 = vpop.f32.mrb[41].mxu0  ;;  %v10966_v60 = vpack.c.bf16 %v9039_v17, %v9035_v45  ;;  %v9496_v45 = vld [vmem:[%s16904_s17 + $0x1a0] sm:$0xff]  ;;  %v9497_v17 = vld [vmem:[%s16904_s17 + $0x1a8] sm:$0xff] }
 0xaf1   :  { %v9038_v52 = vld [vmem:[%s16493_s12 + $0x170] sm:$0xff] }
 0xaf2   :  { %v9123_v37 = vsel %vm8319_vm13, %v9122_v35, %v8908_v10  ;;  %v9030_v10 = vld [vmem:[%s16493_s12 + $0x130] sm:$0xff] }
 0xaf3   :  { %9190 = vmatmul.mubr.f32.vlgmr.msra.gmra.mrb[30].mxu1 %v9123_v37  ;;  %9261 = vmatmul.mubr.f32.vlgmr.msra.gmra.mrb[42].mxu0 %v9123_v37  ;;  %v9034_v35 = vld [vmem:[%s16493_s12 + $0x150] sm:$0xff]  ;;  %v10970_v37 = vpack.c.bf16 %v9047_v22, %v9043_v62  ;;  %v9499_v62 = vld [vmem:[%s16904_s17 + $0x1b8] sm:$0xff] }
 0xaf4   :  { %10917 = vmatpush1.bf16.msra.mxu1 %v10916_v51  ;;  %10949 = vmatpush1.bf16.msra.mxu0 %v10948_v55  ;;  %v9041_v51 = vld [vmem:[%s16493_s12 + $0x188] sm:$0xff] }
 0xaf5   :  { %10919 = vmatprep.subr.bf16.mxu1 %v10918_v30  ;;  %10951 = vmatprep.subr.bf16.mxu0 %v10950_v53  ;;  %v9045_v55 = vld [vmem:[%s16493_s12 + $0x1a8] sm:$0xff]  ;;  %v10936_v30 = vpack.c.bf16 %v9036_v31, %v9032_v3  ;;  %v10968_v53 = vpack.c.bf16 %v9038_v52, %v9034_v35  ;;  %v9448_v3 = vld [vmem:[%s16904_s17 + $0x20] sm:$0xff]  ;;  %v9466_v52 = vld [vmem:[%s16904_s17 + $0xb0] sm:$0xff] }
 0xaf6   :  { %9336 = vmatprep.mubr.f32.mxu1 %v16902_v14  ;;  %9407 = vmatprep.mubr.f32.mxu0 %v16902_v14  ;;  %v9018_v14 = vld [vmem:[%s16493_s12 + $0xd0] sm:$0xff]  ;;  %v10938_v8 = vpack.c.bf16 %v9045_v55, %v9041_v51  ;;  %v9449_v31 = vld [vmem:[%s16904_s17 + $0x28] sm:$0xff]  ;;  %v9467_v51 = vld [vmem:[%s16904_s17 + $0xb8] sm:$0xff] }
 0xaf7   :  { %v8828_v50 = vpop.f32.mrb[28].mxu1  ;;  %v10960_v42 = vpack.c.bf16 %v9022_v20, %v9018_v14  ;;  %v9476_v14 = vld [vmem:[%s16904_s17 + $0x100] sm:$0xff]  ;;  %v9477_v20 = vld [vmem:[%s16904_s17 + $0x108] sm:$0xff]  ;;  %v9498_v55 = vld [vmem:[%s16904_s17 + $0x1b0] sm:$0xff]  ;;  %v10988_v22 = vpack.c.bf16 %v9449_v31, %v9448_v3  ;;  %v10990_v63 = vpack.c.bf16 %v9467_v51, %v9466_v52 }
 0xaf8   :  { %v9269_v59 = vrot.slane %v8828_v50, 7  ;;  %10921 = vmatpush1.bf16.msra.mxu1 %v10920_v57  ;;  %10953 = vmatpush1.bf16.msra.mxu0 %v10952_v19  ;;  %v10685_v34 = vpop.f32.mrb[29].mxu1  ;;  %v9053_v57 = vld [vmem:[%s16493_s12 + $0x1e8] sm:$0xff]  ;;  %v9051_v19 = vld [vmem:[%s16493_s12 + $0x1d8] sm:$0xff]  ;;  %v9458_v3 = vld [vmem:[%s16904_s17 + $0x70] sm:$0xff] }
 0xaf9   :  { %10923 = vmatprep.subr.bf16.mxu1 %v10922_v7  ;;  %10955 = vmatprep.subr.bf16.mxu0 %v10954_v38  ;;  %v10972_v7 = vpack.c.bf16 %v9046_v18, %v9042_v4  ;;  %v9048_v38 = vld [vmem:[%s16493_s12 + $0x1c0] sm:$0xff]  ;;  %v10942_v44 = vpack.c.bf16 %v9053_v57, %v9049_v26  ;;  %v10974_v46 = vpack.c.bf16 %v9055_v1, %v9051_v19  ;;  %v9461_v50 = vld [vmem:[%s16904_s17 + $0x88] sm:$0xff]  ;;  %v9483_v4 = vld [vmem:[%s16904_s17 + $0x138] sm:$0xff] }
 0xafa   :  { %v16168_v29 = vsel %vm8319_vm13, %v9269_v59, %v16065_v27  ;;  %v9026_v27 = vld [vmem:[%s16493_s12 + $0x110] sm:$0xff]  ;;  %v9492_v59 = vld [vmem:[%s16904_s17 + $0x180] sm:$0xff]  ;;  %v9493_v34 = vld [vmem:[%s16904_s17 + $0x188] sm:$0xff] }
 0xafb   :  { %v10964_v21 = vpack.c.bf16 %v9030_v10, %v9026_v27  ;;  %v9478_v27 = vld [vmem:[%s16904_s17 + $0x110] sm:$0xff]  ;;  %v9479_v10 = vld [vmem:[%s16904_s17 + $0x118] sm:$0xff]  ;;  %v9481_v35 = vld [vmem:[%s16904_s17 + $0x128] sm:$0xff] }
 0xafc   :  { %10925 = vmatpush1.bf16.msra.mxu1 %v10924_v54  ;;  %10957 = vmatpush1.bf16.msra.mxu0 %v10956_v23  ;;  %v10944_v54 = vpack.c.bf16 %v9052_v5, %v9048_v38  ;;  %v10976_v23 = vpack.c.bf16 %v9054_v36, %v9050_v25  ;;  %v9468_v18 = vld [vmem:[%s16904_s17 + $0xc0] sm:$0xff]  ;;  %v9469_v26 = vld [vmem:[%s16904_s17 + $0xc8] sm:$0xff]  ;;  %v9470_v36 = vld [vmem:[%s16904_s17 + $0xd0] sm:$0xff] }
 0xafd   :  { %10927 = vmatprep.subr.bf16.mxu1 %v10926_v16  ;;  %10959 = vmatprep.subr.bf16.mxu0 %v10958_v40  ;;  %v10978_v16 = vpack.c.bf16 %v9461_v50, %v9460_v33  ;;  %v11010_v40 = vpack.c.bf16 %v9493_v34, %v9492_v59  ;;  %v9500_v57 = vld [vmem:[%s16904_s17 + $0x1c0] sm:$0xff]  ;;  %v9501_v19 = vld [vmem:[%s16904_s17 + $0x1c8] sm:$0xff]  ;;  %v10994_v5 = vpack.c.bf16 %v9469_v26, %v9468_v18  ;;  %v9471_v33 = vld [vmem:[%s16904_s17 + $0xd8] sm:$0xff] }
 0xafe   :  { %v9453_v38 = vld [vmem:[%s16904_s17 + $0x48] sm:$0xff]  ;;  %v9502_v50 = vld [vmem:[%s16904_s17 + $0x1d0] sm:$0xff]  ;;  %v9503_v59 = vld [vmem:[%s16904_s17 + $0x1d8] sm:$0xff] }
 0xaff   :  { %v9485_v25 = vld [vmem:[%s16904_s17 + $0x148] sm:$0xff] }
 0xb00   :  { %10929 = vmatpush1.bf16.msra.mxu1 %v10928_v24  ;;  %10961 = vmatpush1.bf16.msra.mxu0 %v10960_v42  ;;  %v10980_v24 = vpack.c.bf16 %v9445_v2, %v9444_v41  ;;  %v11012_v42 = vpack.c.bf16 %v9477_v20, %v9476_v14  ;;  %v9455_v41 = vld [vmem:[%s16904_s17 + $0x58] sm:$0xff]  ;;  %v10998_v2 = vpack.c.bf16 %v9471_v33, %v9470_v36  ;;  %v9472_v20 = vld [vmem:[%s16904_s17 + $0xe0] sm:$0xff]  ;;  %v9414_v51 = vld [vmem:[#allocation15] sm:$0xf] }
 0xb01   :  { %10931 = vmatprep.subr.bf16.mxu1 %v10930_v43  ;;  %10963 = vmatprep.subr.bf16.mxu0 %v10962_v56  ;;  %v10982_v43 = vpack.c.bf16 %v9463_v39, %v9462_v61  ;;  %v11014_v56 = vpack.c.bf16 %v9495_v9, %v9494_v47  ;;  %v9487_v14 = vld [vmem:[%s16904_s17 + $0x158] sm:$0xff]  ;;  %v9473_v61 = vld [vmem:[%s16904_s17 + $0xe8] sm:$0xff]  ;;  %v9504_v39 = vld [vmem:[%s16904_s17 + $0x1e0] sm:$0xff] }
 0xb02   :  { %v9505_v47 = vld [vmem:[%s16904_s17 + $0x1e8] sm:$0xff] }
 0xb04   :  { %10933 = vmatpush1.bf16.msra.mxu1 %v10932_v12  ;;  %10965 = vmatpush1.bf16.msra.mxu0 %v10964_v21  ;;  %v10984_v12 = vpack.c.bf16 %v9447_v48, %v9446_v11  ;;  %v11016_v21 = vpack.c.bf16 %v9479_v10, %v9478_v27  ;;  %v11034_v11 = vpack.c.bf16 %v9505_v47, %v9504_v39  ;;  %v9456_v48 = vld [vmem:[%s16904_s17 + $0x60] sm:$0xff]  ;;  %v9489_v10 = vld [vmem:[%s16904_s17 + $0x168] sm:$0xff] }
 0xb05   :  { %10935 = vmatprep.subr.bf16.mxu1 %v10934_v15  ;;  %10967 = vmatprep.subr.bf16.mxu0 %v10966_v60  ;;  %v10986_v15 = vpack.c.bf16 %v9465_v13, %v9464_v0  ;;  %v11018_v60 = vpack.c.bf16 %v9497_v17, %v9496_v45  ;;  %v9474_v0 = vld [vmem:[%s16904_s17 + $0xf0] sm:$0xff]  ;;  %v9475_v13 = vld [vmem:[%s16904_s17 + $0xf8] sm:$0xff] }
 0xb06   :  { %v11006_v17 = vpack.c.bf16 %v9475_v13, %v9474_v0 }
 0xb08   :  { %10937 = vmatpush1.bf16.msra.mxu1 %v10936_v30  ;;  %10969 = vmatpush1.bf16.msra.mxu0 %v10968_v53  ;;  %v9450_v53 = vld [vmem:[%s16904_s17 + $0x30] sm:$0xff] }
 0xb09   :  { %10939 = vmatprep.subr.bf16.mxu1 %v10938_v8  ;;  %10971 = vmatprep.subr.bf16.mxu0 %v10970_v37  ;;  %v11022_v8 = vpack.c.bf16 %v9499_v62, %v9498_v55  ;;  %v9482_v37 = vld [vmem:[%s16904_s17 + $0x130] sm:$0xff]  ;;  %v10992_v1 = vpack.c.bf16 %v9451_v28, %v9450_v53  ;;  %v9419_v55 = vrot.slane %v9414_v51, %v16899_v49  ;;  %v16905_v62 = vsub.s32 2, %v16898_v6 }
 0xb0a   :  { %v16906_v53 = vsub.s32 3, %v16898_v6  ;;  %v10173_v6 = vld [vmem:[#allocation16] ss:$0 sm:$0xff] }
 0xb0c   :  { %10941 = vmatpush1.bf16.msra.mxu1 %v10940_v32  ;;  %10973 = vmatpush1.bf16.msra.mxu0 %v10972_v7  ;;  %v11024_v32 = vpack.c.bf16 %v9483_v4, %v9482_v37  ;;  %v9452_v7 = vld [vmem:[%s16904_s17 + $0x40] sm:$0xff]  ;;  %v9431_v28 = vrot.slane %v9414_v51, %v16906_v53 }
 0xb0d   :  { %10943 = vmatprep.subr.bf16.mxu1 %v10942_v44  ;;  %10975 = vmatprep.subr.bf16.mxu0 %v10974_v46  ;;  %v11026_v44 = vpack.c.bf16 %v9501_v19, %v9500_v57  ;;  %v9484_v46 = vld [vmem:[%s16904_s17 + $0x140] sm:$0xff]  ;;  %v10996_v34 = vpack.c.bf16 %v9453_v38, %v9452_v7 }
 0xb10   :  { %10945 = vmatpush1.bf16.msra.mxu1 %v10944_v54  ;;  %10977 = vmatpush1.bf16.msra.mxu0 %v10976_v23  ;;  %v11028_v54 = vpack.c.bf16 %v9485_v25, %v9484_v46  ;;  %v9454_v23 = vld [vmem:[%s16904_s17 + $0x50] sm:$0xff] }
 0xb11   :  { %10979 = vmatprep.subr.bf16.mxu1 %v10978_v16  ;;  %11011 = vmatprep.subr.bf16.mxu0 %v11010_v40  ;;  %v11030_v16 = vpack.c.bf16 %v9503_v59, %v9502_v50  ;;  %v9486_v40 = vld [vmem:[%s16904_s17 + $0x150] sm:$0xff]  ;;  %v11000_v9 = vpack.c.bf16 %v9455_v41, %v9454_v23 }
 0xb12   :  { %v10174_v50 = vld [vmem:[#allocation18] ss:$0 sm:$0xff] }
 0xb13   :  { %9337 = vmatmul.mubr.f32.vlgmr.msra.gmra.mrb[30].mxu1 %v16168_v29  ;;  %9408 = vmatmul.mubr.f32.vlgmr.msra.gmra.mrb[42].mxu0 %v16168_v29  ;;  %v9480_v29 = vld [vmem:[%s16904_s17 + $0x120] sm:$0xff] }
 0xb14   :  { %10981 = vmatpush3.bf16.msra.mxu1 %v10980_v24  ;;  %11013 = vmatpush3.bf16.msra.mxu0 %v11012_v42  ;;  %v11020_v30 = vpack.c.bf16 %v9481_v35, %v9480_v29  ;;  %v11032_v24 = vpack.c.bf16 %v9487_v14, %v9486_v40  ;;  %v11002_v42 = vpack.c.bf16 %v9473_v61, %v9472_v20  ;;  %v9491_v29 = vld [vmem:[%s16904_s17 + $0x178] sm:$0xff] }
 0xb15   :  { %10983 = vmatprep.subr.bf16.mxu1 %v10982_v43  ;;  %11015 = vmatprep.subr.bf16.mxu0 %v11014_v56  ;;  %v9457_v43 = vld [vmem:[%s16904_s17 + $0x68] sm:$0xff]  ;;  %v9488_v56 = vld [vmem:[%s16904_s17 + $0x160] sm:$0xff] }
 0xb16   :  { %v11004_v27 = vpack.c.bf16 %v9457_v43, %v9456_v48  ;;  %v11036_v45 = vpack.c.bf16 %v9489_v10, %v9488_v56 }
 0xb18   :  { %10985 = vmatpush3.bf16.msra.mxu1 %v10984_v12  ;;  %11017 = vmatpush3.bf16.msra.mxu0 %v11016_v21  ;;  %v9506_v12 = vld [vmem:[%s16904_s17 + $0x1f0] sm:$0xff]  ;;  %v9507_v21 = vld [vmem:[%s16904_s17 + $0x1f8] sm:$0xff] }
 0xb19   :  { %10987 = vmatprep.subr.bf16.mxu1 %v10986_v15  ;;  %11019 = vmatprep.subr.bf16.mxu0 %v11018_v60  ;;  %v11038_v31 = vpack.c.bf16 %v9507_v21, %v9506_v12  ;;  %v9459_v15 = vld [vmem:[%s16904_s17 + $0x78] sm:$0xff]  ;;  %v9490_v60 = vld [vmem:[%s16904_s17 + $0x170] sm:$0xff]  ;;  %s12120_s17 = smov [#allocation19]  }
 0xb1a   :  { %v11008_v35 = vpack.c.bf16 %v9459_v15, %v9458_v3  ;;  %v11040_v52 = vpack.c.bf16 %v9491_v29, %v9490_v60  ;;  %s9695_s5 = sshll.u32 %s12120_s17, 4  ;;  %s9696_s5 = int_to_ptr.vmem [resolvable:$true] %s9695_s5 }
 0xb1b   :  { %s12044_s3 = scalar_lea.vmem %s9696_s5, 32  ;;  %p12049_p6 = scmp.lt.s32.totalorder %s9696_s5, %s9696_s5 }
 0xb1c   :  { %10989 = vmatpush3.bf16.msra.mxu1 %v10988_v22  ;;  %11021 = vmatpush3.bf16.msra.mxu0 %v11020_v30  ;;  %v9427_v22 = vrot.slane %v9414_v51, %v16905_v62  ;;  %v9423_v30 = vrot.slane %v9414_v51, %v16900_v58  ;;  %p12045_p5 = scmp.ne.s32.totalorder %s9696_s5, %s12044_s3  ;;  %p12050_p7 = scmp.lt.s32.totalorder %s12044_s3, %s12044_s3 }
 0xb1d   :  { %10991 = vmatprep.subr.bf16.mxu1 %v10990_v63  ;;  %11023 = vmatprep.subr.bf16.mxu0 %v11022_v8 }
 0xb1e   :  { %p12051_p8 = por %p12050_p7, %p12049_p6 }
 0xb20   :  { %10993 = vmatpush3.bf16.msra.mxu1 %v10992_v1  ;;  %11025 = vmatpush3.bf16.msra.mxu0 %v11024_v32  ;;  %p12052_p9 = pnand %p12051_p8, %p12045_p5 }
 0xb21   :  { %10995 = vmatprep.subr.bf16.mxu1 %v10994_v5  ;;  %11027 = vmatprep.subr.bf16.mxu0 %v11026_v44 }
 0xb24   :  { %10997 = vmatpush3.bf16.msra.mxu1 %v10996_v34  ;;  %11029 = vmatpush3.bf16.msra.mxu0 %v11028_v54 }
 0xb25   :  { %10999 = vmatprep.subr.bf16.mxu1 %v10998_v2  ;;  %11031 = vmatprep.subr.bf16.mxu0 %v11030_v16 }
 0xb28   :  { %11001 = vmatpush3.bf16.msra.mxu1 %v11000_v9  ;;  %11033 = vmatpush3.bf16.msra.mxu0 %v11032_v24 }
 0xb29   :  { %11003 = vmatprep.subr.bf16.mxu1 %v11002_v42  ;;  %11035 = vmatprep.subr.bf16.mxu0 %v11034_v11 }
 0xb2c   :  { %11005 = vmatpush3.bf16.msra.mxu1 %v11004_v27  ;;  %11037 = vmatpush3.bf16.msra.mxu0 %v11036_v45 }
 0xb2d   :  { %11007 = vmatprep.subr.bf16.mxu1 %v11006_v17  ;;  %11039 = vmatprep.subr.bf16.mxu0 %v11038_v31 }
 0xb30   :  { %11009 = vmatpush3.bf16.msra.mxu1 %v11008_v35  ;;  %11041 = vmatpush3.bf16.msra.mxu0 %v11040_v52 }
 0xbe6   :  { %v9338_v63 = vpop.f32.mrb[30].mxu1  ;;  %v9409_v8 = vpop.f32.mrb[42].mxu0 }
 0xbe7   :  { %v9436_v37 = vadd.f32 %v9419_v55, %v9338_v63  ;;  %v9438_v4 = vadd.f32 %v9427_v22, %v9409_v8  ;;  %v9340_v18 = vpop.f32.mrb[31].mxu1  ;;  %v9411_v26 = vpop.f32.mrb[43].mxu0 }
 0xbe8   :  { %v9437_v57 = vadd.f32 %v9423_v30, %v9340_v18  ;;  %v9439_v19 = vadd.f32 %v9431_v28, %v9411_v26 }
 0xbe9   :  { %v9440_v7 = vmax.f32 %v9436_v37, 0.0  ;;  %v9442_v49 = vmax.f32 %v9438_v4, 0.0 }
 0xbea   :  { %v9441_v1 = vmax.f32 %v9437_v57, 0.0  ;;  %v9443_v32 = vmax.f32 %v9439_v19, 0.0 }
 0xbec   :  { %9579 = vmatprep.mubr.f32.mxu1 %v9441_v1  ;;  %9649 = vmatprep.mubr.f32.mxu0 %v9443_v32 }
 0xbed   :  { %9580 = vmatmul.mubr.f32.vlgmr.msra.gmra.mrb[32].mxu1 %v9440_v7  ;;  %9650 = vmatmul.mubr.f32.vlgmr.msra.gmra.mrb[44].mxu0 %v9442_v49 }
 0xcc0   :  { %v10394_v58 = vpop.f32.mrb[32].mxu1  ;;  %v10429_v38 = vpop.f32.mrb[44].mxu0 }
 0xcc1   :  { %v10395_v5 = vpop.f32.mrb[33].mxu1  ;;  %v10430_v44 = vpop.f32.mrb[45].mxu0 }
 0xcc2   :  { %v10396_v46 = vadd.f32 %v10395_v5, %v10394_v58  ;;  %v10431_v25 = vadd.f32 %v10430_v44, %v10429_v38 }
 0xcc4   :  { %v9582_v36 = vadd.f32 %v10396_v46, %v10173_v6 }
 0xcc6   :  { %v9652_v33 = vadd.f32 %v10431_v25, %v9582_v36 }
 0xcc8   :  { %v9655_v59 = vmax.f32 %v9652_v33, 0.0 }
 0xcca   :  { %v9663_v34 = vmul.f32 %v10174_v50, %v9655_v59 }
 0xccc   :  { %v9665_v54 = vsel %vm9664_vm0, %v9663_v34, 0.0 }
 0xccd   :  { %9666 = vadd.xlane.f32.xlu1 %v9665_v54 }
 0xcce   :  { %12055 = shalt.err (!%p12052_p9)
}
 0xccf   :  { %s12056_s16 = scalar_lea.hbm %s16500_s20, 32 }
 0xcd0   :  { %p12057_p10 = scmp.ne.s32.totalorder %s16500_s20, %s12056_s16  ;;  %p12060_p11 = scmp.lt.u32.totalorder %s12056_s16, %s16500_s20 }
 0xcd2   :  { %p12062_p12 = pnand %p12060_p11, %p12057_p10 }
 0xcd4   :  { %12065 = shalt.err (!%p12062_p12)
}
 0xcd5   :  { %s12121_s11 = smov 16   ;;  %s12122_s27 = smov 1  }
 0xcd6   :  { %9701 = dma.vmem_to_hbm [thread:$0]  %s9696_s5, 32, %s16500_s20, [#allocation9], %s12121_s11, %s12121_s11, %s12122_s27  }
 0xcd7   :  { %s12123_s30 = smov [#allocation20]  }
 0xcd8   :  { %s9707_s22 = sshll.u32 %s12123_s30, 4  ;;  %s9708_s22 = int_to_ptr.vmem [resolvable:$true] %s9707_s22 }
 0xcd9   :  { %s12066_s12 = scalar_lea.vmem %s9708_s22, 32  ;;  %p12071_p0 = scmp.lt.s32.totalorder %s9708_s22, %s9708_s22 }
 0xcda   :  { %p12067_p13 = scmp.ne.s32.totalorder %s9708_s22, %s12066_s12  ;;  %p12072_p1 = scmp.lt.s32.totalorder %s12066_s12, %s12066_s12 }
 0xcdc   :  { %p12073_p2 = por %p12072_p1, %p12071_p0 }
 0xcde   :  { %p12074_p3 = pnand %p12073_p2, %p12067_p13 }
 0xce0   :  { %12077 = shalt.err (!%p12074_p3)
}
 0xce1   :  { %s12078_s1 = scalar_lea.hbm %s16501_s21, 32 }
 0xce2   :  { %p12079_p4 = scmp.ne.s32.totalorder %s16501_s21, %s12078_s1  ;;  %p12082_p5 = scmp.lt.u32.totalorder %s12078_s1, %s16501_s21 }
 0xce4   :  { %p12084_p6 = pnand %p12082_p5, %p12079_p4 }
 0xce6   :  { %12087 = shalt.err (!%p12084_p6)
}
 0xce7   :  { %9713 = dma.vmem_to_hbm [thread:$0]  %s9708_s22, 32, %s16501_s21, [#allocation21], %s12121_s11, %s12121_s11, %s12122_s27   ;;  %v10175_v23 = vld [vmem:[#allocation6] ss:$0 sm:$0xff]  ;;  %vm9676_vm1 = vcmask 1024  }
 0xd5a   :  { %v9667_v41 = vpop.xlane.xlu1 %9666 }
 0xd5b   :  { %v9675_v2 = vadd.f32 %v10175_v23, %v9667_v41 }
 0xd5d   :  { %9677 = vst.msk [vmem:[%s16499_s19] sm:$0x3] %vm9676_vm1, %v9675_v2 }
 0xd5e   :  { %12102 = dma.done.wait [#allocation9], 32  }
 0xd5f   :  { %12103 = vsyncadd [#allocation9], 4294967264 }
 0xd60   :  { %12104 = dma.done.wait [#allocation21], 32  }
 0xd61   :  { %12105 = vsyncadd [#allocation21], 4294967264 }
 0xd62   :  { %9722 = vsyncpa [#allocation8], 1 }
 0xd63   :  { %9723 = vsyncpa [#allocation11], 1 }
 0xd64   :  { %9724 = vsyncpa [#allocation14], 1 }
 0xd65   :  { %9725 = vsyncpa [#allocation17], 1 }
 0xd66   :  { %9726 = vsyncpa [#allocation9], 1 }
 0xd67   :  { %9727 = vsyncpa [#allocation21], 1 }
 0xd68   :  { %9728 = vsyncmov [#allocation3] }
 0xd6b   :  { %s9729_s21 = vpop.sfrf %9728 }
 0xd6c   :  { %p10176_p7 = scmp.ne.s32.totalorder %s9729_s21, 0 }
 0xd6e   :  { %9733 = shalt.err (%p10176_p7)  }
 0xd6f   :  { %9735 = vsyncmov [#allocation3 + $0x1] }
 0xd72   :  { %s9736_s15 = vpop.sfrf %9735 }
 0xd73   :  { %p10177_p8 = scmp.ne.s32.totalorder %s9736_s15, 0 }
 0xd75   :  { %9740 = shalt.err (%p10177_p8)  }

</bundles_post_ra>
